<compile_context>
chip_gen: v5e
topology: v5e:2x2
jax: 0.10.0
libtpu: 0.0.40
codegen_flags: <defaults>
</compile_context>

<pallas_src>
import math

import jax
import jax.numpy as jnp
from jax.experimental import pallas as pl
from jax.experimental.pallas import tpu as pltpu

# Small, module-consistent sizes (d_model divisible by num_heads).
D_MODEL = 32
NUM_HEADS = 4
HEAD_DIM = D_MODEL // NUM_HEADS
LN_EPS = 1e-5


def mhsa_kernel(x_ref, w_ref, v_ref, o_ref):
    """One grid step: a (Bt, C, T) slab of batch elements; params are full blocks.

    w_ref: (4C, C) bf16  = [Wq*scale ; Wk ; Wv ; Wo]        (y = x @ W^T convention)
    v_ref: (6C, 1) f32   = [gamma ; beta ; bq*scale ; bk ; bv ; bo] as column vectors
    """
    Bt, C, T = x_ref.shape
    H, Dh = NUM_HEADS, HEAD_DIM

    x = x_ref[...].astype(jnp.float32)                 # (Bt, C, T)
    w_all = w_ref[...]                                 # (4C, C) bf16
    v_all = v_ref[...]                                 # (6C, 1) f32

    gamma = v_all[0:C]                                 # (C, 1)
    beta = v_all[C:2 * C]                              # (C, 1)
    b_in = v_all[2 * C:5 * C]                          # (3C, 1)  (q bias pre-scaled)
    b_o = v_all[5 * C:6 * C]                           # (C, 1)
    w_in = w_all[0:3 * C]                              # (3C, C) bf16 (q rows pre-scaled)
    w_o = w_all[3 * C:4 * C]                           # (C, C)  bf16

    # ---- LayerNorm over d_model (sublane axis); stays (C, T)-major, f32 math ----
    mean = jnp.mean(x, axis=1, keepdims=True)                         # (Bt, 1, T)
    var = jnp.mean(jnp.square(x - mean), axis=1, keepdims=True)
    ln = (x - mean) * jax.lax.rsqrt(var + LN_EPS)
    ln = ln * gamma + beta                                            # (Bt, C, T)

    # ---- fused QKV projection: one (3C,C)@(C,T) matmul per folded batch ----
    ln_b = ln.astype(jnp.bfloat16)
    w_in_b = jnp.broadcast_to(w_in[None], (Bt, 3 * C, C))             # 24 KiB, hoisted
    qkv = jnp.einsum('boc,bct->bot', w_in_b, ln_b,
                     preferred_element_type=jnp.float32) + b_in       # (Bt, 3C, T) f32

    # ---- per-head attention (heads = static sublane slices; unrolled at trace) ----
    ctx_heads = []
    for h in range(H):
        q_h = qkv[:, h * Dh:(h + 1) * Dh]                             # (Bt, Dh, T)
        k_h = qkv[:, C + h * Dh:C + (h + 1) * Dh]                     # (Bt, Dh, T)
        v_h = qkv[:, 2 * C + h * Dh:2 * C + (h + 1) * Dh]             # (Bt, Dh, T)

        q_ht = jnp.transpose(q_h, (0, 2, 1)).astype(jnp.bfloat16)     # (Bt, T, Dh)
        k_hb = k_h.astype(jnp.bfloat16)
        v_hb = v_h.astype(jnp.bfloat16)

        s = jnp.einsum('bqd,bdk->bqk', q_ht, k_hb,
                       preferred_element_type=jnp.float32)            # (Bt, T, T) f32
        s = s - jnp.max(s, axis=-1, keepdims=True)
        p = jnp.exp(s)
        p = p * pl.reciprocal(jnp.sum(p, axis=-1, keepdims=True), approx=True)

        # ctx as V @ P^T -> (Dh, T)-major: lane-dense output, full K=T contraction.
        ctx_heads.append(
            jnp.einsum('bdk,bqk->bdq', v_hb, p.astype(jnp.bfloat16),
                       preferred_element_type=jnp.float32))           # (Bt, Dh, T)

    # ---- fused output projection + head merge, directly (C, T)-major ----
    ctx = jnp.concatenate(ctx_heads, axis=1)                          # (Bt, C, T), c = h*Dh+d
    ctx_b = ctx.astype(jnp.bfloat16)
    w_o_b = jnp.broadcast_to(w_o[None], (Bt, C, C))
    out = jnp.einsum('boc,bct->bot', w_o_b, ctx_b,
                     preferred_element_type=jnp.float32) + b_o        # (Bt, C, T)

    # TODO(synk): Dropout(p=0.1) after out_proj is identity in eval mode; not applied.
    o_ref[...] = out.astype(o_ref.dtype)


def mhsa_forward(x, params, *, block_b=4):
    """x: (B, C, T) float32 -> (B, C, T) float32. No wrapper-side transposes."""
    B, C, T = x.shape
    assert C == D_MODEL
    assert B % block_b == 0, "batch must be divisible by block_b"
    w_all, v_all = params

    return pl.pallas_call(
        mhsa_kernel,
        out_shape=jax.ShapeDtypeStruct((B, C, T), x.dtype),
        grid=(B // block_b,),                      # keep even (>=2) for v7x's 2 TCs
        in_specs=[
            pl.BlockSpec((block_b, C, T), lambda g: (g, 0, 0)),       # activations
            pl.BlockSpec(w_all.shape, lambda g: (0, 0)),              # packed weights (bf16)
            pl.BlockSpec(v_all.shape, lambda g: (0, 0)),              # packed LN/bias columns
        ],
        out_specs=pl.BlockSpec((block_b, C, T), lambda g: (g, 0, 0)),
        compiler_params=pltpu.CompilerParams(
            dimension_semantics=("parallel",),
            vmem_limit_bytes=32 * 1024 * 1024,     # v7x scoped ceiling; fine on v5e/v6e
        ),
    )(x, w_all, v_all)


# ---------------------------------------------------------------------------
# Parameters (PyTorch storage convention) and kernel-friendly preparation.
# ---------------------------------------------------------------------------
def make_params(key):
    """Synthetic params in the PyTorch convention (in_proj packed as (3C, C))."""
    C = D_MODEL
    ks = jax.random.split(key, 6)
    ln_w = 1.0 + 0.1 * jax.random.normal(ks[0], (C,), jnp.float32)
    ln_b = 0.1 * jax.random.normal(ks[1], (C,), jnp.float32)
    in_proj_w = 0.1 * jax.random.normal(ks[2], (3 * C, C), jnp.float32)
    in_proj_b = 0.05 * jax.random.normal(ks[3], (3 * C,), jnp.float32)
    out_proj_w = 0.1 * jax.random.normal(ks[4], (C, C), jnp.float32)
    out_proj_b = 0.05 * jax.random.normal(ks[5], (C,), jnp.float32)
    return (ln_w, ln_b, in_proj_w, in_proj_b, out_proj_w, out_proj_b)


def prepare_params(raw):
    """Pack everything into 2 kernel inputs:
       w_all (4C, C) bf16 = [Wq*scale ; Wk ; Wv ; Wo]   (y = x @ W^T convention)
       v_all (6C, 1) f32  = [gamma ; beta ; bq*scale ; bk ; bv ; bo]
    The 1/sqrt(head_dim) attention scale is folded into the Q projection."""
    ln_w, ln_b, in_w, in_b, out_w, out_b = raw
    C, Dh = D_MODEL, HEAD_DIM
    scale = 1.0 / math.sqrt(Dh)
    w_q, b_q = in_w[:C] * scale, in_b[:C] * scale
    w_all = jnp.concatenate([w_q, in_w[C:2 * C], in_w[2 * C:], out_w],
                            axis=0).astype(jnp.bfloat16)              # (4C, C)
    v_all = jnp.concatenate([ln_w, ln_b, b_q, in_b[C:2 * C], in_b[2 * C:], out_b],
                            axis=0).reshape(6 * C, 1).astype(jnp.float32)
    return (w_all, v_all)


def mhsa_reference(x, raw):
    """Pure-JAX f32 reference mirroring the PyTorch module in eval mode."""
    ln_w, ln_b, in_w, in_b, out_w, out_b = raw
    C, H, Dh = D_MODEL, NUM_HEADS, HEAD_DIM
    xt = jnp.transpose(x, (0, 2, 1))                          # (B, T, C)
    mean = xt.mean(-1, keepdims=True)
    var = jnp.square(xt - mean).mean(-1, keepdims=True)
    ln = (xt - mean) / jnp.sqrt(var + LN_EPS) * ln_w + ln_b
    qkv = ln @ in_w.T + in_b
    q, k, v = qkv[..., :C], qkv[..., C:2 * C], qkv[..., 2 * C:]
    B, T, _ = q.shape

    def split(t):
        return t.reshape(B, T, H, Dh).transpose(0, 2, 1, 3)   # (B, H, T, Dh)

    qh, kh, vh = split(q), split(k), split(v)
    s = (qh @ kh.transpose(0, 1, 3, 2)) / math.sqrt(Dh)
    p = jax.nn.softmax(s, axis=-1)
    ctx = (p @ vh).transpose(0, 2, 1, 3).reshape(B, T, C)
    out = ctx @ out_w.T + out_b
    return jnp.transpose(out, (0, 2, 1))                      # (B, C, T)


if __name__ == "__main__":
    B, C, T = 8, D_MODEL, 128                                 # (B, num_channels, T)
    key = jax.random.PRNGKey(0)
    kx, kp = jax.random.split(key)
    x = jax.random.normal(kx, (B, C, T), jnp.float32)
    raw = make_params(kp)
    params = prepare_params(raw)

    out = jax.block_until_ready(mhsa_forward(x, params, block_b=4))
    ref = jax.block_until_ready(mhsa_reference(x, raw))

    assert out.shape == (B, C, T)
    max_err = float(jnp.max(jnp.abs(out - ref)))
    # bf16 MXU operands + approx softmax reciprocal => looser parity than pure f32.
    assert max_err < 1e-2, f"mismatch vs reference: max abs err {max_err}"
    print("KERNEL_OK")
</pallas_src>

<mosaic_0001>
module attributes {stable_mosaic.version = 11 : i64} {
  func.func @mhsa_kernel(%arg0: i32, %arg1: memref<4x32x128xf32, #tpu.memory_space<vmem>>, %arg2: memref<128x32xbf16, #tpu.memory_space<vmem>>, %arg3: memref<192x1xf32, #tpu.memory_space<vmem>>, %arg4: memref<4x32x128xf32, #tpu.memory_space<vmem>>) attributes {dimension_semantics = [#tpu.dimension_semantics<parallel>], iteration_bounds = array<i64: 2>, scalar_prefetch = 0 : i64, scratch_operands = 0 : i64, tpu.core_type = #tpu.core_type<tc>, window_params = [{transform_indices = @transform_0, window_bounds = array<i64: 4, 32, 128>}, {pipeline_mode = #tpu.pipeline_mode<synchronous>, transform_indices = @transform_1, window_bounds = array<i64: 128, 32>}, {pipeline_mode = #tpu.pipeline_mode<synchronous>, transform_indices = @transform_2, window_bounds = array<i64: 192, 1>}, {transform_indices = @transform_3, window_bounds = array<i64: 4, 32, 128>}]} {
    %c0 = arith.constant 0 : index
    %c0_0 = arith.constant 0 : index
    %c0_1 = arith.constant 0 : index
    %0 = vector.load %arg1[%c0, %c0_0, %c0_1] : memref<4x32x128xf32, #tpu.memory_space<vmem>>, vector<4x32x128xf32>
    %c0_2 = arith.constant 0 : index
    %c0_3 = arith.constant 0 : index
    %1 = vector.load %arg2[%c0_2, %c0_3] : memref<128x32xbf16, #tpu.memory_space<vmem>>, vector<128x32xbf16>
    %c0_4 = arith.constant 0 : index
    %c0_5 = arith.constant 0 : index
    %2 = vector.load %arg3[%c0_4, %c0_5] : memref<192x1xf32, #tpu.memory_space<vmem>>, vector<192x1xf32>
    %3 = vector.extract_strided_slice %2 {offsets = [0, 0], sizes = [32, 1], strides = [1, 1]} : vector<192x1xf32> to vector<32x1xf32>
    %4 = vector.extract_strided_slice %2 {offsets = [32, 0], sizes = [32, 1], strides = [1, 1]} : vector<192x1xf32> to vector<32x1xf32>
    %5 = vector.extract_strided_slice %2 {offsets = [64, 0], sizes = [96, 1], strides = [1, 1]} : vector<192x1xf32> to vector<96x1xf32>
    %6 = vector.extract_strided_slice %2 {offsets = [160, 0], sizes = [32, 1], strides = [1, 1]} : vector<192x1xf32> to vector<32x1xf32>
    %7 = vector.extract_strided_slice %1 {offsets = [0, 0], sizes = [96, 32], strides = [1, 1]} : vector<128x32xbf16> to vector<96x32xbf16>
    %8 = vector.extract_strided_slice %1 {offsets = [96, 0], sizes = [32, 32], strides = [1, 1]} : vector<128x32xbf16> to vector<32x32xbf16>
    %cst = arith.constant dense<0.000000e+00> : vector<4x128xf32>
    %9 = vector.multi_reduction <add>, %0, %cst [1] : vector<4x32x128xf32> to vector<4x128xf32>
    %10 = vector.shape_cast %9 : vector<4x128xf32> to vector<4x1x128xf32>
    %cst_6 = arith.constant 3.200000e+01 : f32
    %11 = vector.broadcast %cst_6 : f32 to vector<4x1x128xf32>
    %12 = arith.divf %10, %11 : vector<4x1x128xf32>
    %13 = vector.broadcast %12 : vector<4x1x128xf32> to vector<4x32x128xf32>
    %14 = arith.subf %0, %13 : vector<4x32x128xf32>
    %15 = arith.mulf %14, %14 : vector<4x32x128xf32>
    %cst_7 = arith.constant dense<0.000000e+00> : vector<4x128xf32>
    %16 = vector.multi_reduction <add>, %15, %cst_7 [1] : vector<4x32x128xf32> to vector<4x128xf32>
    %17 = vector.shape_cast %16 : vector<4x128xf32> to vector<4x1x128xf32>
    %cst_8 = arith.constant 3.200000e+01 : f32
    %18 = vector.broadcast %cst_8 : f32 to vector<4x1x128xf32>
    %19 = arith.divf %17, %18 : vector<4x1x128xf32>
    %20 = vector.broadcast %12 : vector<4x1x128xf32> to vector<4x32x128xf32>
    %21 = arith.subf %0, %20 : vector<4x32x128xf32>
    %cst_9 = arith.constant 9.99999974E-6 : f32
    %22 = vector.broadcast %cst_9 : f32 to vector<4x1x128xf32>
    %23 = arith.addf %19, %22 : vector<4x1x128xf32>
    %24 = math.rsqrt %23 : vector<4x1x128xf32>
    %25 = vector.broadcast %24 : vector<4x1x128xf32> to vector<4x32x128xf32>
    %26 = arith.mulf %21, %25 : vector<4x32x128xf32>
    %27 = vector.shape_cast %3 : vector<32x1xf32> to vector<1x32x1xf32>
    %28 = vector.broadcast %27 : vector<1x32x1xf32> to vector<4x32x128xf32>
    %29 = arith.mulf %26, %28 : vector<4x32x128xf32>
    %30 = vector.shape_cast %4 : vector<32x1xf32> to vector<1x32x1xf32>
    %31 = vector.broadcast %30 : vector<1x32x1xf32> to vector<4x32x128xf32>
    %32 = arith.addf %29, %31 : vector<4x32x128xf32>
    %33 = arith.truncf %32 : vector<4x32x128xf32> to vector<4x32x128xbf16>
    %34 = vector.shape_cast %7 : vector<96x32xbf16> to vector<1x96x32xbf16>
    %35 = vector.shape_cast %34 : vector<1x96x32xbf16> to vector<1x96x32xbf16>
    %36 = vector.broadcast %35 : vector<1x96x32xbf16> to vector<4x96x32xbf16>
    "tpu.trace_start"() <{level = 10 : i32, message = "boc,bct->bot"}> : () -> ()
    %cst_10 = arith.constant dense<0.000000e+00> : vector<4x96x128xf32>
    %37 = tpu.matmul %36, %33, %cst_10 {dimension_numbers = #tpu.dot_dimension_numbers<[2], [1], [1], [2], [0, 0, 0, 1, 1, 2], [0], [0]>} : vector<4x96x32xbf16>, vector<4x32x128xbf16>, vector<4x96x128xf32> -> vector<4x96x128xf32>
    "tpu.trace_stop"() : () -> ()
    %38 = vector.shape_cast %5 : vector<96x1xf32> to vector<1x96x1xf32>
    %39 = vector.broadcast %38 : vector<1x96x1xf32> to vector<4x96x128xf32>
    %40 = arith.addf %37, %39 : vector<4x96x128xf32>
    %41 = vector.extract_strided_slice %40 {offsets = [0, 0, 0], sizes = [4, 8, 128], strides = [1, 1, 1]} : vector<4x96x128xf32> to vector<4x8x128xf32>
    %42 = vector.extract_strided_slice %40 {offsets = [0, 32, 0], sizes = [4, 8, 128], strides = [1, 1, 1]} : vector<4x96x128xf32> to vector<4x8x128xf32>
    %43 = vector.extract_strided_slice %40 {offsets = [0, 64, 0], sizes = [4, 8, 128], strides = [1, 1, 1]} : vector<4x96x128xf32> to vector<4x8x128xf32>
    %44 = tpu.transpose %41, [0, 2, 1] : vector<4x8x128xf32> -> vector<4x128x8xf32>
    %45 = arith.truncf %44 : vector<4x128x8xf32> to vector<4x128x8xbf16>
    %46 = arith.truncf %42 : vector<4x8x128xf32> to vector<4x8x128xbf16>
    %47 = arith.truncf %43 : vector<4x8x128xf32> to vector<4x8x128xbf16>
    "tpu.trace_start"() <{level = 10 : i32, message = "bqd,bdk->bqk"}> : () -> ()
    %cst_11 = arith.constant dense<0.000000e+00> : vector<4x128x128xf32>
    %48 = tpu.matmul %45, %46, %cst_11 {dimension_numbers = #tpu.dot_dimension_numbers<[2], [1], [1], [2], [0, 0, 0, 1, 1, 2], [0], [0]>} : vector<4x128x8xbf16>, vector<4x8x128xbf16>, vector<4x128x128xf32> -> vector<4x128x128xf32>
    "tpu.trace_stop"() : () -> ()
    %cst_12 = arith.constant dense<0xFF800000> : vector<4x128xf32>
    %49 = vector.multi_reduction <maximumf>, %48, %cst_12 [2] : vector<4x128x128xf32> to vector<4x128xf32>
    %50 = vector.shape_cast %49 : vector<4x128xf32> to vector<4x128x1xf32>
    %51 = vector.broadcast %50 : vector<4x128x1xf32> to vector<4x128x128xf32>
    %52 = arith.subf %48, %51 : vector<4x128x128xf32>
    %53 = math.exp %52 : vector<4x128x128xf32>
    %cst_13 = arith.constant dense<0.000000e+00> : vector<4x128xf32>
    %54 = vector.multi_reduction <add>, %53, %cst_13 [2] : vector<4x128x128xf32> to vector<4x128xf32>
    %55 = vector.shape_cast %54 : vector<4x128xf32> to vector<4x128x1xf32>
    %56 = tpu.reciprocal %55 {approx = true} : vector<4x128x1xf32> -> vector<4x128x1xf32>
    %57 = vector.broadcast %56 : vector<4x128x1xf32> to vector<4x128x128xf32>
    %58 = arith.mulf %53, %57 : vector<4x128x128xf32>
    %59 = arith.truncf %58 : vector<4x128x128xf32> to vector<4x128x128xbf16>
    "tpu.trace_start"() <{level = 10 : i32, message = "bdk,bqk->bdq"}> : () -> ()
    %cst_14 = arith.constant dense<0.000000e+00> : vector<4x8x128xf32>
    %60 = tpu.matmul %47, %59, %cst_14 {dimension_numbers = #tpu.dot_dimension_numbers<[2], [2], [1], [1], [0, 0, 0, 1, 1, 1], [0], [0]>} : vector<4x8x128xbf16>, vector<4x128x128xbf16>, vector<4x8x128xf32> -> vector<4x8x128xf32>
    "tpu.trace_stop"() : () -> ()
    %61 = vector.extract_strided_slice %40 {offsets = [0, 8, 0], sizes = [4, 8, 128], strides = [1, 1, 1]} : vector<4x96x128xf32> to vector<4x8x128xf32>
    %62 = vector.extract_strided_slice %40 {offsets = [0, 40, 0], sizes = [4, 8, 128], strides = [1, 1, 1]} : vector<4x96x128xf32> to vector<4x8x128xf32>
    %63 = vector.extract_strided_slice %40 {offsets = [0, 72, 0], sizes = [4, 8, 128], strides = [1, 1, 1]} : vector<4x96x128xf32> to vector<4x8x128xf32>
    %64 = tpu.transpose %61, [0, 2, 1] : vector<4x8x128xf32> -> vector<4x128x8xf32>
    %65 = arith.truncf %64 : vector<4x128x8xf32> to vector<4x128x8xbf16>
    %66 = arith.truncf %62 : vector<4x8x128xf32> to vector<4x8x128xbf16>
    %67 = arith.truncf %63 : vector<4x8x128xf32> to vector<4x8x128xbf16>
    "tpu.trace_start"() <{level = 10 : i32, message = "bqd,bdk->bqk"}> : () -> ()
    %cst_15 = arith.constant dense<0.000000e+00> : vector<4x128x128xf32>
    %68 = tpu.matmul %65, %66, %cst_15 {dimension_numbers = #tpu.dot_dimension_numbers<[2], [1], [1], [2], [0, 0, 0, 1, 1, 2], [0], [0]>} : vector<4x128x8xbf16>, vector<4x8x128xbf16>, vector<4x128x128xf32> -> vector<4x128x128xf32>
    "tpu.trace_stop"() : () -> ()
    %cst_16 = arith.constant dense<0xFF800000> : vector<4x128xf32>
    %69 = vector.multi_reduction <maximumf>, %68, %cst_16 [2] : vector<4x128x128xf32> to vector<4x128xf32>
    %70 = vector.shape_cast %69 : vector<4x128xf32> to vector<4x128x1xf32>
    %71 = vector.broadcast %70 : vector<4x128x1xf32> to vector<4x128x128xf32>
    %72 = arith.subf %68, %71 : vector<4x128x128xf32>
    %73 = math.exp %72 : vector<4x128x128xf32>
    %cst_17 = arith.constant dense<0.000000e+00> : vector<4x128xf32>
    %74 = vector.multi_reduction <add>, %73, %cst_17 [2] : vector<4x128x128xf32> to vector<4x128xf32>
    %75 = vector.shape_cast %74 : vector<4x128xf32> to vector<4x128x1xf32>
    %76 = tpu.reciprocal %75 {approx = true} : vector<4x128x1xf32> -> vector<4x128x1xf32>
    %77 = vector.broadcast %76 : vector<4x128x1xf32> to vector<4x128x128xf32>
    %78 = arith.mulf %73, %77 : vector<4x128x128xf32>
    %79 = arith.truncf %78 : vector<4x128x128xf32> to vector<4x128x128xbf16>
    "tpu.trace_start"() <{level = 10 : i32, message = "bdk,bqk->bdq"}> : () -> ()
    %cst_18 = arith.constant dense<0.000000e+00> : vector<4x8x128xf32>
    %80 = tpu.matmul %67, %79, %cst_18 {dimension_numbers = #tpu.dot_dimension_numbers<[2], [2], [1], [1], [0, 0, 0, 1, 1, 1], [0], [0]>} : vector<4x8x128xbf16>, vector<4x128x128xbf16>, vector<4x8x128xf32> -> vector<4x8x128xf32>
    "tpu.trace_stop"() : () -> ()
    %81 = vector.extract_strided_slice %40 {offsets = [0, 16, 0], sizes = [4, 8, 128], strides = [1, 1, 1]} : vector<4x96x128xf32> to vector<4x8x128xf32>
    %82 = vector.extract_strided_slice %40 {offsets = [0, 48, 0], sizes = [4, 8, 128], strides = [1, 1, 1]} : vector<4x96x128xf32> to vector<4x8x128xf32>
    %83 = vector.extract_strided_slice %40 {offsets = [0, 80, 0], sizes = [4, 8, 128], strides = [1, 1, 1]} : vector<4x96x128xf32> to vector<4x8x128xf32>
    %84 = tpu.transpose %81, [0, 2, 1] : vector<4x8x128xf32> -> vector<4x128x8xf32>
    %85 = arith.truncf %84 : vector<4x128x8xf32> to vector<4x128x8xbf16>
    %86 = arith.truncf %82 : vector<4x8x128xf32> to vector<4x8x128xbf16>
    %87 = arith.truncf %83 : vector<4x8x128xf32> to vector<4x8x128xbf16>
    "tpu.trace_start"() <{level = 10 : i32, message = "bqd,bdk->bqk"}> : () -> ()
    %cst_19 = arith.constant dense<0.000000e+00> : vector<4x128x128xf32>
    %88 = tpu.matmul %85, %86, %cst_19 {dimension_numbers = #tpu.dot_dimension_numbers<[2], [1], [1], [2], [0, 0, 0, 1, 1, 2], [0], [0]>} : vector<4x128x8xbf16>, vector<4x8x128xbf16>, vector<4x128x128xf32> -> vector<4x128x128xf32>
    "tpu.trace_stop"() : () -> ()
    %cst_20 = arith.constant dense<0xFF800000> : vector<4x128xf32>
    %89 = vector.multi_reduction <maximumf>, %88, %cst_20 [2] : vector<4x128x128xf32> to vector<4x128xf32>
    %90 = vector.shape_cast %89 : vector<4x128xf32> to vector<4x128x1xf32>
    %91 = vector.broadcast %90 : vector<4x128x1xf32> to vector<4x128x128xf32>
    %92 = arith.subf %88, %91 : vector<4x128x128xf32>
    %93 = math.exp %92 : vector<4x128x128xf32>
    %cst_21 = arith.constant dense<0.000000e+00> : vector<4x128xf32>
    %94 = vector.multi_reduction <add>, %93, %cst_21 [2] : vector<4x128x128xf32> to vector<4x128xf32>
    %95 = vector.shape_cast %94 : vector<4x128xf32> to vector<4x128x1xf32>
    %96 = tpu.reciprocal %95 {approx = true} : vector<4x128x1xf32> -> vector<4x128x1xf32>
    %97 = vector.broadcast %96 : vector<4x128x1xf32> to vector<4x128x128xf32>
    %98 = arith.mulf %93, %97 : vector<4x128x128xf32>
    %99 = arith.truncf %98 : vector<4x128x128xf32> to vector<4x128x128xbf16>
    "tpu.trace_start"() <{level = 10 : i32, message = "bdk,bqk->bdq"}> : () -> ()
    %cst_22 = arith.constant dense<0.000000e+00> : vector<4x8x128xf32>
    %100 = tpu.matmul %87, %99, %cst_22 {dimension_numbers = #tpu.dot_dimension_numbers<[2], [2], [1], [1], [0, 0, 0, 1, 1, 1], [0], [0]>} : vector<4x8x128xbf16>, vector<4x128x128xbf16>, vector<4x8x128xf32> -> vector<4x8x128xf32>
    "tpu.trace_stop"() : () -> ()
    %101 = vector.extract_strided_slice %40 {offsets = [0, 24, 0], sizes = [4, 8, 128], strides = [1, 1, 1]} : vector<4x96x128xf32> to vector<4x8x128xf32>
    %102 = vector.extract_strided_slice %40 {offsets = [0, 56, 0], sizes = [4, 8, 128], strides = [1, 1, 1]} : vector<4x96x128xf32> to vector<4x8x128xf32>
    %103 = vector.extract_strided_slice %40 {offsets = [0, 88, 0], sizes = [4, 8, 128], strides = [1, 1, 1]} : vector<4x96x128xf32> to vector<4x8x128xf32>
    %104 = tpu.transpose %101, [0, 2, 1] : vector<4x8x128xf32> -> vector<4x128x8xf32>
    %105 = arith.truncf %104 : vector<4x128x8xf32> to vector<4x128x8xbf16>
    %106 = arith.truncf %102 : vector<4x8x128xf32> to vector<4x8x128xbf16>
    %107 = arith.truncf %103 : vector<4x8x128xf32> to vector<4x8x128xbf16>
    "tpu.trace_start"() <{level = 10 : i32, message = "bqd,bdk->bqk"}> : () -> ()
    %cst_23 = arith.constant dense<0.000000e+00> : vector<4x128x128xf32>
    %108 = tpu.matmul %105, %106, %cst_23 {dimension_numbers = #tpu.dot_dimension_numbers<[2], [1], [1], [2], [0, 0, 0, 1, 1, 2], [0], [0]>} : vector<4x128x8xbf16>, vector<4x8x128xbf16>, vector<4x128x128xf32> -> vector<4x128x128xf32>
    "tpu.trace_stop"() : () -> ()
    %cst_24 = arith.constant dense<0xFF800000> : vector<4x128xf32>
    %109 = vector.multi_reduction <maximumf>, %108, %cst_24 [2] : vector<4x128x128xf32> to vector<4x128xf32>
    %110 = vector.shape_cast %109 : vector<4x128xf32> to vector<4x128x1xf32>
    %111 = vector.broadcast %110 : vector<4x128x1xf32> to vector<4x128x128xf32>
    %112 = arith.subf %108, %111 : vector<4x128x128xf32>
    %113 = math.exp %112 : vector<4x128x128xf32>
    %cst_25 = arith.constant dense<0.000000e+00> : vector<4x128xf32>
    %114 = vector.multi_reduction <add>, %113, %cst_25 [2] : vector<4x128x128xf32> to vector<4x128xf32>
    %115 = vector.shape_cast %114 : vector<4x128xf32> to vector<4x128x1xf32>
    %116 = tpu.reciprocal %115 {approx = true} : vector<4x128x1xf32> -> vector<4x128x1xf32>
    %117 = vector.broadcast %116 : vector<4x128x1xf32> to vector<4x128x128xf32>
    %118 = arith.mulf %113, %117 : vector<4x128x128xf32>
    %119 = arith.truncf %118 : vector<4x128x128xf32> to vector<4x128x128xbf16>
    "tpu.trace_start"() <{level = 10 : i32, message = "bdk,bqk->bdq"}> : () -> ()
    %cst_26 = arith.constant dense<0.000000e+00> : vector<4x8x128xf32>
    %120 = tpu.matmul %107, %119, %cst_26 {dimension_numbers = #tpu.dot_dimension_numbers<[2], [2], [1], [1], [0, 0, 0, 1, 1, 1], [0], [0]>} : vector<4x8x128xbf16>, vector<4x128x128xbf16>, vector<4x8x128xf32> -> vector<4x8x128xf32>
    "tpu.trace_stop"() : () -> ()
    %121 = tpu.concatenate %60, %80, %100, %120 in 1 : vector<4x8x128xf32>, vector<4x8x128xf32>, vector<4x8x128xf32>, vector<4x8x128xf32> -> vector<4x32x128xf32>
    %122 = arith.truncf %121 : vector<4x32x128xf32> to vector<4x32x128xbf16>
    %123 = vector.shape_cast %8 : vector<32x32xbf16> to vector<1x32x32xbf16>
    %124 = vector.shape_cast %123 : vector<1x32x32xbf16> to vector<1x32x32xbf16>
    %125 = vector.broadcast %124 : vector<1x32x32xbf16> to vector<4x32x32xbf16>
    "tpu.trace_start"() <{level = 10 : i32, message = "boc,bct->bot"}> : () -> ()
    %cst_27 = arith.constant dense<0.000000e+00> : vector<4x32x128xf32>
    %126 = tpu.matmul %125, %122, %cst_27 {dimension_numbers = #tpu.dot_dimension_numbers<[2], [1], [1], [2], [0, 0, 0, 1, 1, 2], [0], [0]>} : vector<4x32x32xbf16>, vector<4x32x128xbf16>, vector<4x32x128xf32> -> vector<4x32x128xf32>
    "tpu.trace_stop"() : () -> ()
    %127 = vector.shape_cast %6 : vector<32x1xf32> to vector<1x32x1xf32>
    %128 = vector.broadcast %127 : vector<1x32x1xf32> to vector<4x32x128xf32>
    %129 = arith.addf %126, %128 : vector<4x32x128xf32>
    %c0_28 = arith.constant 0 : index
    %c0_29 = arith.constant 0 : index
    %c0_30 = arith.constant 0 : index
    %130 = vector.load %arg4[%c0_28, %c0_29, %c0_30] : memref<4x32x128xf32, #tpu.memory_space<vmem>>, vector<4x32x128xf32>
    tpu.vector_store %arg4[%c0_28, %c0_29, %c0_30], %129 {strides = array<i32>} : memref<4x32x128xf32, #tpu.memory_space<vmem>>, vector<4x32x128xf32>,
    return
  }
  func.func @transform_0(%arg0: i32) -> (i32, i32, i32) {
    %c0_i32 = arith.constant 0 : i32
    %c0_i32_0 = arith.constant 0 : i32
    %c0_i32_1 = arith.constant 0 : i32
    return %arg0, %c0_i32, %c0_i32_0 : i32, i32, i32
  }
  func.func @transform_1(%arg0: i32) -> (i32, i32) {
    %c0_i32 = arith.constant 0 : i32
    %c0_i32_0 = arith.constant 0 : i32
    %c0_i32_1 = arith.constant 0 : i32
    return %c0_i32, %c0_i32_0 : i32, i32
  }
  func.func @transform_2(%arg0: i32) -> (i32, i32) {
    %c0_i32 = arith.constant 0 : i32
    %c0_i32_0 = arith.constant 0 : i32
    %c0_i32_1 = arith.constant 0 : i32
    return %c0_i32, %c0_i32_0 : i32, i32
  }
  func.func @transform_3(%arg0: i32) -> (i32, i32, i32) {
    %c0_i32 = arith.constant 0 : i32
    %c0_i32_0 = arith.constant 0 : i32
    %c0_i32_1 = arith.constant 0 : i32
    return %arg0, %c0_i32, %c0_i32_0 : i32, i32, i32
  }
}

</mosaic_0001>

<bundles_post_ra>
// kernel: tpu_custom_call.1
= control target key start
LH: loop header
LB: loop body
LE: loop exit
PB: predicated region body
PF: predicated region fallthrough
CT: control target
= control target key end

     0   :  { %8 = vsyncpa [#allocation3], 0  ;;  %s13267_s0 = inlined_call_operand.vmem [shape: f32[8,32,128], index: 0, kind: input, shape index: {}]   ;;  %s13268_s1 = inlined_call_operand.vmem [shape: bf16[128,32], index: 1, kind: input, shape index: {}]   ;;  %s13269_s2 = inlined_call_operand.vmem [shape: f32[192,1], index: 2, kind: input, shape index: {}]   ;;  %s13270_s3 = inlined_call_operand.hbm [shape: f32[8,32,128], index: 3, kind: output, shape index: {}]  }
   0x1   :  { %10 = vsyncpa [#allocation3 + $0x1], 0  ;;  %s9319_s12 = smov 0   ;;  %s9321_s13 = smov 0  }
   0x2   :  { %s9323_s14 = smov 0   ;;  %s9325_s15 = smov 0  }
   0x3 LB: > { %s9340_s16 = sadd.s32 4294967295, %s9293_s15   ;;  %s7277_s17 = sadd.s32 4294967294, %s9293_s15   ;;  %s9293_s15 = sphi %s9325_s15, %s14168_s15   ;;  %s9289_s14 = sphi %s9323_s14, %s14167_s14   ;;  %s9285_s13 = sphi %s9321_s13, %s14166_s13   ;;  %s9281_s12 = sphi %s9319_s12, %s14165_s12  }
   0x4   : > { %s9344_s18 = sadd.s32 1, %s9293_s15   ;;  %s91_s19 = sadd.s32 1, %s9289_s14 }
   0x5   : > { %s88_s20 = ssub.s32 %s9293_s15, %s9344_s18  ;;  %p101_p0 = scmp.ne.s32.totalorder %s9289_s14, %s9285_s13 }
   0x6   : > { %p89_p1 = scmp.eq.s32.totalorder %s88_s20, 0  ;;  %p102_p2 = scmp.eq.s32.totalorder %s9340_s16, 1 }
   0x7   : > { %p107_p3 = scmp.ne.s32.totalorder %s9285_s13, %s9281_s12  ;;  %p108_p4 = scmp.eq.s32.totalorder %s7277_s17, 1 }
   0x8   : > { %s9355_s21 = scalar_select %p89_p1, %s9289_s14, %s91_s19  }
   0x9   : > { %p9357_p5 = por %p102_p2, %p101_p0  ;;  %p9361_p6 = por %p108_p4, %p107_p3 }
   0xa   : > { %p7280_p7 = scmp.ge.s32.totalorder %s9293_s15, 1  ;;  %p142_p8 = scmp.lt.s32.totalorder %s9293_s15, 3 }
   0xc   : > { %p143_p9 = pnand %p7280_p7, %p142_p8 }
   0xe   : > { %146 = sbr.rel (%p143_p9) target bundleno = 4054 (0xfd6), region = 32 }
  0x13   : > { %v212_v0 = vld [vmem:[%s13269_s2 + $0x20] sm:$0xff]  ;;  %v210_v1 = vld [vmem:[%s13269_s2 + $0x10] sm:$0xff]  ;;  %v9295_v3 = vmov 0   ;;  %s7282_s30 = sshll.u32 %s9340_s16, 2  ;;  %v213_v4 = vld [vmem:[%s13269_s2 + $0x28] sm:$0xff]  ;;  %v9296_v24 = vmov 32.0  }
  0x14   : > { %v208_v2 = vld [vmem:[%s13269_s2] sm:$0xff]  ;;  %7540 = vset.pattern.permute.xlu2 %v9295_v3  ;;  %7539 = vset.pattern.permute.xlu1 %v9295_v3  ;;  %p168_p10 = scmp.lt.s32.totalorder %s7282_s30, 7  ;;  %v211_v5 = vld [vmem:[%s13269_s2 + $0x18] sm:$0xff]  ;;  %v209_v6 = vld [vmem:[%s13269_s2 + $0x8] sm:$0xff]  ;;  %8197 = vrcp.f32 %v9296_v24  ;;  %vm601_vm13 = vcmask 261120   ;;  %vm1077_vm14 = vcmask 1043456  }
  0x15   : > { %7538 = vset.pattern.permute.xlu0 %v9295_v3  ;;  %449 = vperm.xlu2 %7540, %v212_v0   ;;  %v216_v7 = vld [vmem:[%s13269_s2 + $0x40] sm:$0xff]  ;;  %v215_v8 = vld [vmem:[%s13269_s2 + $0x38] sm:$0xff]  ;;  %v214_v9 = vld [vmem:[%s13269_s2 + $0x30] sm:$0xff]  ;;  %vm1052_vm15 = vcmask 64512   ;;  %s164_s17 = sand.u32 1, %s9285_s13   ;;  %s7493_s24 = sshll.u32 %s9340_s16, 7 }
  0x16   : > { %423 = vperm.xlu1 %7539, %v210_v1   ;;  %413 = vperm.xlu0 %7538, %v208_v2   ;;  %s14170_s30 = smov (!%p168_p10, %s7282_s30), 7  ;;  %v219_v17 = vld [vmem:[%s13269_s2 + $0x58] sm:$0xff]  ;;  %v217_v34 = vld [vmem:[%s13269_s2 + $0x48] sm:$0xff]  ;;  %v222_v51 = vld [vmem:[%s13269_s2 + $0x70] sm:$0xff]  ;;  %s7281_s19 = sshll.u32 %s164_s17, 7 }
  0x17   : > { %s7483_s10 = sshll.u32 %s14170_s30, 5  ;;  %v220_v56 = vld [vmem:[%s13269_s2 + $0x60] sm:$0xff]  ;;  %s13215_s20 = scalar_lea.vmem [#allocation2], %s7281_s19 }
  0x18   : > { %s9398_s28 = scalar_lea.vmem %s13267_s0, %s7483_s10  ;;  %s7211_s27 = scalar_lea.hbm %s13270_s3, %s7493_s24 }
  0x19   : > { %v9401_v10 = vld [vmem:[%s9398_s28] sm:$0xff]  ;;  %v9404_v11 = vld [vmem:[%s9398_s28 + $0x8] sm:$0xff]  ;;  %v9424_v18 = vld [vmem:[%s9398_s28 + $0x10] sm:$0xff]  ;;  %s7214_s29 = sshll.u32 %s7211_s27, 4  ;;  %s7199_s16 = scalar_lea.sflag [#allocation3], %s164_s17  ;;  %s7215_s29 = int_to_ptr.hbm [resolvable:$true] %s7214_s29 }
  0x1a   : > { %v9407_v12 = vld [vmem:[%s9398_s28 + $0x20] sm:$0xff]  ;;  %v232_v13 = vadd.f32 %v9404_v11, %v9401_v10  ;;  %v9412_v14 = vld [vmem:[%s9398_s28 + $0x28] sm:$0xff]  ;;  %v9427_v19 = vld [vmem:[%s9398_s28 + $0x30] sm:$0xff]  ;;  %v8198_v44 = vpop.eup %8197  ;;  %s9245_s30 = sshra.s32 %s7215_s29, 4  ;;  %s9251_s7 = scalar_lea.hbm %s13270_s3, 256  ;;  %s9246_s30 = int_to_ptr.hbm [resolvable:$true] %s9245_s30 }
  0x1b   : > { %v9415_v15 = vld [vmem:[%s9398_s28 + $0x40] sm:$0xff]  ;;  %v9418_v16 = vld [vmem:[%s9398_s28 + $0x48] sm:$0xff]  ;;  %v241_v20 = vadd.f32 %v9412_v14, %v9407_v12  ;;  %v9432_v21 = vld [vmem:[%s9398_s28 + $0x50] sm:$0xff]  ;;  %v269_v46 = vmul.f32 32.0, %v8198_v44  ;;  %vm273_vm0 = vweird.f32 %v8198_v44  ;;  %s9247_s4 = scalar_lea.hbm %s9246_s30, 128  ;;  %p9252_p0 = scmp.lt.s32.totalorder %s9246_s30, %s13270_s3 }
  0x1c   : > { %v250_v22 = vadd.f32 %v9418_v16, %v9415_v15  ;;  %v233_v23 = vadd.f32 %v232_v13, %v9424_v18  ;;  %v9438_v25 = vld [vmem:[%s9398_s28 + $0x60] sm:$0xff]  ;;  %v9441_v26 = vld [vmem:[%s9398_s28 + $0x68] sm:$0xff]  ;;  %v9444_v27 = vld [vmem:[%s9398_s28 + $0x70] sm:$0xff]  ;;  %p9248_p11 = scmp.ne.s32.totalorder %s9246_s30, %s9247_s4  ;;  %p9253_p1 = scmp.lt.s32.totalorder %s9251_s7, %s9247_s4 }
  0x1d   : > { %454 = vperm.xlu2 %7540, %v213_v4   ;;  %v9447_v28 = vld [vmem:[%s9398_s28 + $0x18] sm:$0xff]  ;;  %v242_v30 = vadd.f32 %v241_v20, %v9427_v19  ;;  %v259_v33 = vadd.f32 %v9441_v26, %v9438_v25  ;;  %v270_v52 = vsub.f32 1.0, %v269_v46 }
  0x1e   : > { %428 = vperm.xlu1 %7539, %v211_v5   ;;  %418 = vperm.xlu0 %7538, %v209_v6   ;;  %v9450_v29 = vld [vmem:[%s9398_s28 + $0x38] sm:$0xff]  ;;  %v251_v32 = vadd.f32 %v250_v22, %v9432_v21  ;;  %v234_v35 = vadd.f32 %v233_v23, %v9447_v28  ;;  %p9249_p12 = pnand %p9248_p11, %p9357_p5  ;;  %p9254_p2 = por %p9253_p1, %p9252_p0 }
  0x1f   : > { %v9454_v31 = vld [vmem:[%s9398_s28 + $0x58] sm:$0xff]  ;;  %v243_v37 = vadd.f32 %v242_v30, %v9450_v29  ;;  %v260_v39 = vadd.f32 %v259_v33, %v9444_v27  ;;  %v271_v58 = vmul.f32 %v8198_v44, %v270_v52 }
  0x20   : > { %v9464_v36 = vld [vmem:[%s9398_s28 + $0x78] sm:$0xff]  ;;  %v252_v38 = vadd.f32 %v251_v32, %v9454_v31  ;;  %v235_v40 = vrot.slane %v234_v35, 4  ;;  %s7212_s28 = sshll.u32 %s13215_s20, 4  ;;  %p9250_p13 = pneg %p9249_p12  ;;  %s7213_s28 = int_to_ptr.vmem [resolvable:$true] %s7212_s28 }
  0x21   : > { %v244_v41 = vrot.slane %v243_v37, 4  ;;  %v261_v43 = vadd.f32 %v260_v39, %v9464_v36  ;;  %v272_v63 = vadd.f32 %v8198_v44, %v271_v58 }
  0x22   : > { %v253_v42 = vrot.slane %v252_v38, 4  ;;  %v236_v45 = vadd.f32 %v235_v40, %v234_v35  ;;  %p9255_p3 = pnand %p9254_p2, %p9250_p13 }
  0x23   : > { %v245_v47 = vadd.f32 %v244_v41, %v243_v37  ;;  %v262_v49 = vrot.slane %v261_v43, 4  ;;  %v9476_v4 = vsel %vm273_vm0, %v8198_v44, %v272_v63 }
  0x24   : > { %v254_v48 = vadd.f32 %v253_v42, %v252_v38  ;;  %v237_v50 = vrot.slane %v236_v45, 2 }
  0x25   : > { %501 = vperm.xlu2 %7540, %v216_v7   ;;  %v246_v53 = vrot.slane %v245_v47, 2  ;;  %v263_v55 = vadd.f32 %v262_v49, %v261_v43 }
  0x26   : > { %464 = vperm.xlu1 %7539, %v215_v8   ;;  %459 = vperm.xlu0 %7538, %v214_v9   ;;  %v255_v54 = vrot.slane %v254_v48, 2  ;;  %v238_v57 = vadd.f32 %v237_v50, %v236_v45  ;;  %v225_v9 = vld [vmem:[%s13269_s2 + $0x88] sm:$0xff] }
  0x27   : > { %v247_v59 = vadd.f32 %v246_v53, %v245_v47  ;;  %v264_v61 = vrot.slane %v263_v55, 2 }
  0x28   : > { %v256_v60 = vadd.f32 %v255_v54, %v254_v48  ;;  %v239_v62 = vrot.slane %v238_v57, 1 }
  0x29   : > { %v248_v0 = vrot.slane %v247_v59, 1  ;;  %v265_v2 = vadd.f32 %v264_v61, %v263_v55 }
  0x2a   : > { %v257_v1 = vrot.slane %v256_v60, 1  ;;  %v240_v3 = vadd.f32 %v239_v62, %v238_v57 }
  0x2b   : > { %v249_v5 = vadd.f32 %v248_v0, %v247_v59  ;;  %v266_v7 = vrot.slane %v265_v2, 1 }
  0x2c   : > { %v258_v6 = vadd.f32 %v257_v1, %v256_v60  ;;  %v275_v8 = vmul.f32 %v9476_v4, %v240_v3 }
  0x2d   : > { %516 = vperm.xlu2 %7540, %v219_v17   ;;  %v276_v13 = vmul.f32 %v9476_v4, %v249_v5  ;;  %v267_v23 = vadd.f32 %v266_v7, %v265_v2 }
  0x2e   : > { %506 = vperm.xlu0 %7538, %v217_v34   ;;  %v277_v17 = vmul.f32 %v9476_v4, %v258_v6  ;;  %v9485_v20 = vsub.f32 %v9401_v10, %v275_v8  ;;  %v9488_v22 = vsub.f32 %v9404_v11, %v275_v8  ;;  %v9503_v10 = vsub.f32 %v9424_v18, %v275_v8 }
  0x2f   : > { %v9491_v24 = vsub.f32 %v9407_v12, %v276_v13  ;;  %v9494_v30 = vsub.f32 %v9412_v14, %v276_v13  ;;  %v9510_v34 = vsub.f32 %v9427_v19, %v276_v13  ;;  %v9522_v35 = vsub.f32 %v9447_v28, %v275_v8 }
  0x30   : > { %v9497_v32 = vsub.f32 %v9415_v15, %v277_v17  ;;  %v9500_v33 = vsub.f32 %v9418_v16, %v277_v17  ;;  %v295_v11 = vmul.f32 %v9485_v20, %v9485_v20  ;;  %v296_v12 = vmul.f32 %v9488_v22, %v9488_v22 }
  0x31   : > { %v299_v14 = vmul.f32 %v9491_v24, %v9491_v24  ;;  %v300_v15 = vmul.f32 %v9494_v30, %v9494_v30  ;;  %v9517_v16 = vsub.f32 %v9432_v21, %v277_v17  ;;  %v297_v37 = vmul.f32 %v9503_v10, %v9503_v10 }
  0x32   : > { %v303_v18 = vmul.f32 %v9497_v32, %v9497_v32  ;;  %v311_v19 = vadd.f32 %v296_v12, %v295_v11  ;;  %v9527_v38 = vsub.f32 %v9450_v29, %v276_v13  ;;  %v301_v39 = vmul.f32 %v9510_v34, %v9510_v34 }
  0x33   : > { %v320_v40 = vadd.f32 %v300_v15, %v299_v14  ;;  %v9532_v21 = vsub.f32 %v9454_v31, %v277_v17  ;;  %v304_v41 = vmul.f32 %v9500_v33, %v9500_v33  ;;  %v298_v28 = vmul.f32 %v9522_v35, %v9522_v35 }
  0x34   : > { %v312_v42 = vadd.f32 %v311_v19, %v297_v37  ;;  %v302_v43 = vmul.f32 %v9527_v38, %v9527_v38  ;;  %v305_v29 = vmul.f32 %v9517_v16, %v9517_v16  ;;  %v278_v31 = vmul.f32 %v9476_v4, %v267_v23 }
  0x35   : > { %531 = vperm.xlu2 %7540, %v222_v51   ;;  %v321_v44 = vadd.f32 %v320_v40, %v301_v39  ;;  %v306_v45 = vmul.f32 %v9532_v21, %v9532_v21  ;;  %v329_v46 = vadd.f32 %v304_v41, %v303_v18 }
  0x36   : > { %521 = vperm.xlu0 %7538, %v220_v56   ;;  %v313_v47 = vadd.f32 %v312_v42, %v298_v28  ;;  %v9546_v50 = vsub.f32 %v9438_v25, %v278_v31  ;;  %v9549_v51 = vsub.f32 %v9441_v26, %v278_v31  ;;  %v9552_v52 = vsub.f32 %v9444_v27, %v278_v31 }
  0x37   : > { %v322_v48 = vadd.f32 %v321_v44, %v302_v43  ;;  %v330_v49 = vadd.f32 %v329_v46, %v305_v29  ;;  %v9555_v53 = vsub.f32 %v9464_v36, %v278_v31 }
  0x38   : > { %v314_v54 = vrot.slane %v313_v47, 4  ;;  %v307_v56 = vmul.f32 %v9546_v50, %v9546_v50  ;;  %v308_v57 = vmul.f32 %v9549_v51, %v9549_v51  ;;  %v309_v25 = vmul.f32 %v9552_v52, %v9552_v52 }
  0x39   : > { %v331_v55 = vadd.f32 %v330_v49, %v306_v45  ;;  %v323_v58 = vrot.slane %v322_v48, 4  ;;  %v310_v27 = vmul.f32 %v9555_v53, %v9555_v53 }
  0x3a   : > { %v338_v59 = vadd.f32 %v308_v57, %v307_v56  ;;  %v315_v60 = vadd.f32 %v314_v54, %v313_v47 }
  0x3b   : > { %v332_v26 = vrot.slane %v331_v55, 4  ;;  %v324_v61 = vadd.f32 %v323_v58, %v322_v48 }
  0x3c   : > { %v339_v36 = vadd.f32 %v338_v59, %v309_v25  ;;  %v316_v0 = vrot.slane %v315_v60, 2 }
  0x3d   : > { %546 = vperm.xlu2 %7540, %v225_v9   ;;  %v333_v62 = vadd.f32 %v332_v26, %v331_v55  ;;  %v325_v2 = vrot.slane %v324_v61, 2 }
  0x3e   : > { %v340_v63 = vadd.f32 %v339_v36, %v310_v27  ;;  %v317_v6 = vadd.f32 %v316_v0, %v315_v60 }
  0x3f   : > { %v334_v3 = vrot.slane %v333_v62, 2  ;;  %v326_v8 = vadd.f32 %v325_v2, %v324_v61 }
  0x40   : > { %v341_v1 = vrot.slane %v340_v63, 4  ;;  %v318_v17 = vrot.slane %v317_v6, 1 }
  0x41   : > { %v335_v9 = vadd.f32 %v334_v3, %v333_v62  ;;  %v327_v23 = vrot.slane %v326_v8, 1 }
  0x42   : > { %v342_v5 = vadd.f32 %v341_v1, %v340_v63  ;;  %v319_v14 = vadd.f32 %v318_v17, %v317_v6 }
  0x43   : > { %v336_v11 = vrot.slane %v335_v9, 1  ;;  %v328_v15 = vadd.f32 %v327_v23, %v326_v8 }
  0x44   : > { %v343_v7 = vrot.slane %v342_v5, 2  ;;  %v347_v19 = vmul.f32 %v319_v14, %v9476_v4 }
  0x45   : > { %v337_v18 = vadd.f32 %v336_v11, %v335_v9  ;;  %v348_v39 = vmul.f32 %v328_v15, %v9476_v4 }
  0x46   : > { %v344_v13 = vadd.f32 %v343_v7, %v342_v5  ;;  %v351_v28 = vadd.f32 1e-05, %v347_v19 }
  0x47   : > { %v349_v40 = vmul.f32 %v337_v18, %v9476_v4  ;;  %v352_v42 = vadd.f32 1e-05, %v348_v39 }
  0x48   : > { %v345_v12 = vrot.slane %v344_v13, 1  ;;  %8199 = vrsqrt.f32 %v351_v28  ;;  %vm361_vm1 = vweird.f32 %v351_v28 }
  0x49   : > { %v353_v43 = vadd.f32 1e-05, %v349_v40  ;;  %8201 = vrsqrt.f32 %v352_v42  ;;  %vm371_vm3 = vweird.f32 %v352_v42 }
  0x4a   : > { %v346_v37 = vadd.f32 %v345_v12, %v344_v13 }
  0x4b   : > { %8203 = vrsqrt.f32 %v353_v43  ;;  %vm381_vm5 = vweird.f32 %v353_v43 }
  0x4c   : > { %v350_v41 = vmul.f32 %v346_v37, %v9476_v4 }
  0x4e   : > { %v354_v29 = vadd.f32 1e-05, %v350_v41  ;;  %v8200_v44 = vpop.eup %8199 }
  0x4f   : > { %v8202_v45 = vpop.eup %8201  ;;  %v356_v47 = vmul.f32 %v8200_v44, %v351_v28  ;;  %vm362_vm2 = vweird.f32 %v8200_v44 }
  0x50   : > { %8205 = vrsqrt.f32 %v354_v29  ;;  %v366_v48 = vmul.f32 %v8202_v45, %v352_v42  ;;  %vm372_vm4 = vweird.f32 %v8202_v45  ;;  %vm363_vm7 = vmor %vm361_vm1, %vm362_vm2  ;;  %vm391_vm8 = vweird.f32 %v354_v29 }
  0x51   : > { %v8204_v46 = vpop.eup %8203  ;;  %v357_v55 = vmul.f32 %v8200_v44, %v356_v47  ;;  %vm373_vm10 = vmor %vm371_vm3, %vm372_vm4 }
  0x52   : > { %v376_v49 = vmul.f32 %v8204_v46, %v353_v43  ;;  %v367_v56 = vmul.f32 %v8202_v45, %v366_v48  ;;  %vm382_vm6 = vweird.f32 %v8204_v46 }
  0x53   : > { %v358_v58 = vmul.f32 0.5, %v357_v55  ;;  %vm383_vm11 = vmor %vm381_vm5, %vm382_vm6 }
  0x54   : > { %v377_v57 = vmul.f32 %v8204_v46, %v376_v49  ;;  %v368_v25 = vmul.f32 0.5, %v367_v56 }
  0x55   : > { %v359_v59 = vsub.f32 1.5, %v358_v58 }
  0x56   : > { %v8206_v31 = vpop.eup %8205  ;;  %v378_v26 = vmul.f32 0.5, %v377_v57  ;;  %v369_v60 = vsub.f32 1.5, %v368_v25 }
  0x57   : > { %v386_v54 = vmul.f32 %v8206_v31, %v354_v29  ;;  %vm392_vm9 = vweird.f32 %v8206_v31  ;;  %v360_v62 = vmul.f32 %v8200_v44, %v359_v59 }
  0x58   : > { %v379_v36 = vsub.f32 1.5, %v378_v26  ;;  %v370_v63 = vmul.f32 %v8202_v45, %v369_v60  ;;  %vm393_vm12 = vmor %vm391_vm8, %vm392_vm9 }
  0x59   : > { %v387_v4 = vmul.f32 %v8206_v31, %v386_v54  ;;  %v364_v2 = vsel %vm363_vm7, %v8200_v44, %v360_v62 }
  0x5a   : > { %v380_v0 = vmul.f32 %v8204_v46, %v379_v36  ;;  %v374_v3 = vsel %vm373_vm10, %v8202_v45, %v370_v63  ;;  %v395_v13 = vmul.f32 %v364_v2, %v9485_v20  ;;  %v396_v37 = vmul.f32 %v364_v2, %v9488_v22 }
  0x5b   : > { %v388_v27 = vmul.f32 0.5, %v387_v4  ;;  %v399_v17 = vmul.f32 %v374_v3, %v9491_v24  ;;  %v400_v19 = vmul.f32 %v374_v3, %v9494_v30  ;;  %v397_v24 = vmul.f32 %v364_v2, %v9503_v10 }
  0x5c   : > { %v384_v5 = vsel %vm383_vm11, %v8204_v46, %v380_v0  ;;  %v398_v10 = vmul.f32 %v364_v2, %v9522_v35 }
  0x5d   : > { %v389_v61 = vsub.f32 1.5, %v388_v27  ;;  %v403_v23 = vmul.f32 %v384_v5, %v9497_v32  ;;  %v404_v39 = vmul.f32 %v384_v5, %v9500_v33  ;;  %v401_v32 = vmul.f32 %v374_v3, %v9510_v34 }
  0x5e   : > { %v402_v34 = vmul.f32 %v374_v3, %v9527_v38 }
  0x5f   : > { %v390_v1 = vmul.f32 %v8206_v31, %v389_v61 }
  0x61   : > { %v394_v6 = vsel %vm393_vm12, %v8206_v31, %v390_v1 }
  0x62   : > { %v407_v11 = vmul.f32 %v394_v6, %v9546_v50  ;;  %v408_v40 = vmul.f32 %v394_v6, %v9549_v51  ;;  %v405_v50 = vmul.f32 %v384_v5, %v9517_v16  ;;  %v409_v28 = vmul.f32 %v394_v6, %v9552_v52 }
  0x63   : > { %v406_v16 = vmul.f32 %v384_v5, %v9532_v21  ;;  %v410_v52 = vmul.f32 %v394_v6, %v9555_v53 }
  0x6f   : > { %v450_v9 = vpop.permute.xlu2 %449 }
  0x77   : > { %v455_v45 = vpop.permute.xlu2 %454 }
  0x88   : > { %v424_v7 = vpop.permute.xlu1 %423  ;;  %v414_v8 = vpop.permute.xlu0 %413 }
  0x89   : > { %v431_v12 = vmul.f32 %v414_v8, %v395_v13  ;;  %v435_v14 = vmul.f32 %v414_v8, %v399_v17  ;;  %v439_v15 = vmul.f32 %v414_v8, %v403_v23  ;;  %v443_v18 = vmul.f32 %v414_v8, %v407_v11 }
  0x8a   : > { %v433_v49 = vmul.f32 %v424_v7, %v397_v24  ;;  %v437_v54 = vmul.f32 %v424_v7, %v401_v32  ;;  %v441_v55 = vmul.f32 %v424_v7, %v405_v50  ;;  %v445_v56 = vmul.f32 %v424_v7, %v409_v28 }
  0x8b   : > { %v9581_v42 = vadd.f32 %v450_v9, %v431_v12  ;;  %v9583_v43 = vadd.f32 %v450_v9, %v435_v14  ;;  %v9585_v22 = vadd.f32 %v450_v9, %v439_v15  ;;  %v9587_v30 = vadd.f32 %v450_v9, %v443_v18 }
  0x8d   : > { %v483_v57 = vpack.c.bf16 %v9581_v42, %v9581_v42  ;;  %v487_v35 = vpack.c.bf16 %v9583_v43, %v9583_v43  ;;  %v491_v38 = vpack.c.bf16 %v9585_v22, %v9585_v22  ;;  %v495_v21 = vpack.c.bf16 %v9587_v30, %v9587_v30 }
  0x8f   : > { %v593_v30 = vunpack.c.l.b16 %v483_v57 }
  0x90   : > { %v429_v41 = vpop.permute.xlu1 %428  ;;  %v419_v20 = vpop.permute.xlu0 %418 }
  0x91   : > { %v432_v33 = vmul.f32 %v419_v20, %v396_v37  ;;  %v436_v51 = vmul.f32 %v419_v20, %v400_v19  ;;  %v440_v29 = vmul.f32 %v419_v20, %v404_v39  ;;  %v444_v44 = vmul.f32 %v419_v20, %v408_v40 }
  0x92   : > { %v434_v53 = vmul.f32 %v429_v41, %v398_v10  ;;  %v438_v4 = vmul.f32 %v429_v41, %v402_v34  ;;  %v442_v58 = vmul.f32 %v429_v41, %v406_v16  ;;  %v446_v25 = vmul.f32 %v429_v41, %v410_v52  ;;  %v7484_v16 = vld [vmem:[%s13268_s1] sm:$0xff]  ;;  %v7485_v52 = vld [vmem:[%s13268_s1 + $0x8] sm:$0xff] }
  0x93   : > { %v468_v46 = vadd.f32 %v455_v45, %v432_v33  ;;  %v472_v31 = vadd.f32 %v455_v45, %v436_v51  ;;  %v476_v47 = vadd.f32 %v455_v45, %v440_v29  ;;  %v480_v48 = vadd.f32 %v455_v45, %v444_v44 }
  0x94   : > { %v663_v33 = vunpack.c.l.b16 %v487_v35  ;;  %v714_v51 = vunpack.c.l.b16 %v491_v38  ;;  %v765_v29 = vunpack.c.l.b16 %v495_v21 }
  0x95   : > { %v484_v59 = vpack.c.bf16 %v468_v46, %v468_v46  ;;  %v488_v60 = vpack.c.bf16 %v472_v31, %v472_v31  ;;  %v492_v36 = vpack.c.bf16 %v476_v47, %v476_v47  ;;  %v496_v61 = vpack.c.bf16 %v480_v48, %v480_v48  ;;  %v7486_v46 = vld [vmem:[%s13268_s1 + $0x10] sm:$0xff]  ;;  %v7487_v31 = vld [vmem:[%s13268_s1 + $0x18] sm:$0xff]  ;;  %v7488_v47 = vld [vmem:[%s13268_s1 + $0x20] sm:$0xff]  ;;  %v502_v48 = vpop.permute.xlu2 %501 }
  0x97   : > { %v594_v32 = vunpack.c.l.b16 %v484_v59  ;;  %v664_v50 = vunpack.c.l.b16 %v488_v60  ;;  %v715_v43 = vunpack.c.l.b16 %v492_v36  ;;  %v766_v22 = vunpack.c.l.b16 %v496_v61 }
  0x98   : > { %v465_v26 = vpop.permute.xlu1 %464  ;;  %v460_v27 = vpop.permute.xlu0 %459 }
  0x99   : > { %v469_v62 = vadd.f32 %v460_v27, %v433_v49  ;;  %v470_v63 = vadd.f32 %v465_v26, %v434_v53  ;;  %v473_v0 = vadd.f32 %v460_v27, %v437_v54  ;;  %v474_v1 = vadd.f32 %v465_v26, %v438_v4 }
  0x9a   : > { %v477_v2 = vadd.f32 %v460_v27, %v441_v55  ;;  %v478_v3 = vadd.f32 %v465_v26, %v442_v58  ;;  %v481_v5 = vadd.f32 %v460_v27, %v445_v56  ;;  %v482_v6 = vadd.f32 %v465_v26, %v446_v25 }
  0x9b   : > { %v485_v7 = vpack.c.bf16 %v469_v62, %v469_v62  ;;  %v486_v8 = vpack.c.bf16 %v470_v63, %v470_v63  ;;  %v489_v9 = vpack.c.bf16 %v473_v0, %v473_v0  ;;  %v490_v13 = vpack.c.bf16 %v474_v1, %v474_v1 }
  0x9c   : > { %v493_v17 = vpack.c.bf16 %v477_v2, %v477_v2  ;;  %v494_v23 = vpack.c.bf16 %v478_v3, %v478_v3  ;;  %v497_v11 = vpack.c.bf16 %v481_v5, %v481_v5  ;;  %v498_v12 = vpack.c.bf16 %v482_v6, %v482_v6 }
  0x9d   : > { %v595_v14 = vunpack.c.l.b16 %v485_v7  ;;  %v596_v15 = vunpack.c.l.b16 %v486_v8  ;;  %v665_v18 = vunpack.c.l.b16 %v489_v9  ;;  %v666_v37 = vunpack.c.l.b16 %v490_v13 }
  0x9e   : > { %v716_v19 = vunpack.c.l.b16 %v493_v17  ;;  %v717_v39 = vunpack.c.l.b16 %v494_v23  ;;  %v767_v40 = vunpack.c.l.b16 %v497_v11  ;;  %v768_v41 = vunpack.c.l.b16 %v498_v12 }
  0x9f   : > { %v598_v20 = vpack.c.b16 %v596_v15, %v595_v14  ;;  %v668_v24 = vpack.c.b16 %v666_v37, %v665_v18  ;;  %v597_v44 = vpack.c.b16 %v594_v32, %v593_v30  ;;  %v667_v45 = vpack.c.b16 %v664_v50, %v663_v33  ;;  %v9671_v32 = vpop.permute.xlu2 %516 }
  0xa0   : > { %v719_v28 = vpack.c.b16 %v717_v39, %v716_v19  ;;  %v770_v42 = vpack.c.b16 %v768_v41, %v767_v40  ;;  %v718_v10 = vpack.c.b16 %v715_v43, %v714_v51  ;;  %v769_v34 = vpack.c.b16 %v766_v22, %v765_v29  ;;  %v9636_v35 = vpop.permute.xlu0 %506  ;;  %13484 = vst [vmem:[#allocation16_spill] sm:$0xff] %v9671_v32 }
  0xa1   : > { %626 = vmatpush.bf16.msra.mxu0 %v598_v20  ;;  %677 = vmatpush.bf16.msra.mxu1 %v668_v24  ;;  %13473 = vst [vmem:[#allocation5_spill] sm:$0xff] %v9636_v35  ;;  %v7489_v24 = vld [vmem:[%s13268_s1 + $0x28] sm:$0xff] }
  0xa2   : > { %728 = vmatpush.bf16.msra.mxu2 %v719_v28  ;;  %779 = vmatpush.bf16.msra.mxu3 %v770_v42 }
  0xa5   : > { %627 = vmatpush.bf16.msra.mxu0 %v597_v44  ;;  %678 = vmatpush.bf16.msra.mxu1 %v667_v45 }
  0xa6   : > { %729 = vmatpush.bf16.msra.mxu2 %v718_v10  ;;  %780 = vmatpush.bf16.msra.mxu3 %v769_v34 }
  0xa7   : > { %v9673_v50 = vpop.permute.xlu2 %531 }
  0xa8   : > { %7309 = vmatmul.msk.bf16.vlgmr.msra.gmra.mxu0 %vm601_vm13, %v7484_v16  ;;  %7315 = vmatmul.msk.bf16.vlgmr.msra.gmra.mxu1 %vm601_vm13, %v7484_v16  ;;  %v522_v5 = vpop.permute.xlu0 %521  ;;  %13485 = vst [vmem:[#allocation17_spill] sm:$0xff] %v9673_v50 }
  0xa9   : > { %7321 = vmatmul.msk.bf16.vlgmr.msra.gmra.mxu2 %vm601_vm13, %v7484_v16  ;;  %7327 = vmatmul.msk.bf16.vlgmr.msra.gmra.mxu3 %vm601_vm13, %v7484_v16 }
  0xaf   : > { %v9675_v28 = vpop.permute.xlu2 %546 }
  0xb0   : > { %13486 = vst [vmem:[#allocation18_spill] sm:$0xff] %v9675_v28 }
  0xb8   : > { %7310 = vmatmul.msk.bf16.gmra.mxu0 %vm601_vm13, %v7485_v52  ;;  %7316 = vmatmul.msk.bf16.gmra.mxu1 %vm601_vm13, %v7485_v52 }
  0xb9   : > { %7322 = vmatmul.msk.bf16.gmra.mxu2 %vm601_vm13, %v7485_v52  ;;  %7328 = vmatmul.msk.bf16.gmra.mxu3 %vm601_vm13, %v7485_v52 }
  0xc8   : > { %7311 = vmatmul.msk.bf16.gmra.mxu0 %vm601_vm13, %v7486_v46  ;;  %7317 = vmatmul.msk.bf16.gmra.mxu1 %vm601_vm13, %v7486_v46 }
  0xc9   : > { %7323 = vmatmul.msk.bf16.gmra.mxu2 %vm601_vm13, %v7486_v46  ;;  %7329 = vmatmul.msk.bf16.gmra.mxu3 %vm601_vm13, %v7486_v46 }
  0xd8   : > { %7312 = vmatmul.msk.bf16.gmra.mxu0 %vm601_vm13, %v7487_v31  ;;  %7318 = vmatmul.msk.bf16.gmra.mxu1 %vm601_vm13, %v7487_v31 }
  0xd9   : > { %7324 = vmatmul.msk.bf16.gmra.mxu2 %vm601_vm13, %v7487_v31  ;;  %7330 = vmatmul.msk.bf16.gmra.mxu3 %vm601_vm13, %v7487_v31 }
  0xe8   : > { %7313 = vmatmul.msk.bf16.gmra.mxu0 %vm601_vm13, %v7488_v47  ;;  %7319 = vmatmul.msk.bf16.gmra.mxu1 %vm601_vm13, %v7488_v47 }
  0xe9   : > { %7325 = vmatmul.msk.bf16.gmra.mxu2 %vm601_vm13, %v7488_v47  ;;  %7331 = vmatmul.msk.bf16.gmra.mxu3 %vm601_vm13, %v7488_v47 }
  0xf8   : > { %7314 = vmatmul.msk.bf16.gmra.mxu0 %vm601_vm13, %v7489_v24  ;;  %7320 = vmatmul.msk.bf16.gmra.mxu1 %vm601_vm13, %v7489_v24 }
  0xf9   : > { %7326 = vmatmul.msk.bf16.gmra.mxu2 %vm601_vm13, %v7489_v24  ;;  %7332 = vmatmul.msk.bf16.gmra.mxu3 %vm601_vm13, %v7489_v24 }
 0x125   : > { %v629_v49 = vpop.f32.mrf.mxu0  ;;  %v680_v54 = vpop.f32.mrf.mxu1 }
 0x126   : > { %v630_v55 = vadd.f32 %v629_v49, %v502_v48  ;;  %v681_v56 = vadd.f32 %v680_v54, %v502_v48 }
 0x128   : > { %v7541_v57 = vpack.i.bf16 %v681_v56, %v630_v55 }
 0x12a   : > { %7542 = vxpose.xlu2.b32.start.end [1/1] (short) %v7541_v57, 128 }
 0x12c   : > { %v731_v38 = vpop.f32.mrf.mxu2  ;;  %v782_v21 = vpop.f32.mrf.mxu3 }
 0x12d   : > { %v732_v53 = vadd.f32 %v731_v38, %v502_v48  ;;  %v783_v4 = vadd.f32 %v782_v21, %v502_v48  ;;  %v631_v58 = vpop.f32.mrf.mxu0  ;;  %v682_v25 = vpop.f32.mrf.mxu1 }
 0x12e   : > { %v632_v26 = vadd.f32 %v631_v58, %v9636_v35  ;;  %v683_v27 = vadd.f32 %v682_v25, %v9636_v35 }
 0x12f   : > { %v7623_v59 = vpack.i.bf16 %v783_v4, %v732_v53 }
 0x130   : > { %v7705_v60 = vpack.i.bf16 %v683_v27, %v632_v26 }
 0x131   : > { %7624 = vxpose.xlu0.b32.start.end [1/1] (short) %v7623_v59, 128 }
 0x132   : > { %7706 = vxpose.xlu1.b32.start.end [1/1] (short) %v7705_v60, 128 }
 0x134   : > { %v9640_v36 = vpop.f32.mrf.mxu2  ;;  %v9642_v61 = vpop.f32.mrf.mxu3 }
 0x135   : > { %13474 = vst [vmem:[#allocation6_spill] sm:$0xff] %v9640_v36  ;;  %v9644_v62 = vpop.f32.mrf.mxu0  ;;  %v9646_v63 = vpop.f32.mrf.mxu1 }
 0x136   : > { %13475 = vst [vmem:[#allocation7_spill] sm:$0xff] %v9642_v61 }
 0x137   : > { %13476 = vst [vmem:[#allocation8_spill] sm:$0xff] %v9644_v62 }
 0x138   : > { %13477 = vst [vmem:[#allocation9_spill] sm:$0xff] %v9646_v63 }
 0x13c   : > { %v9648_v0 = vpop.f32.mrf.mxu2  ;;  %v9650_v1 = vpop.f32.mrf.mxu3 }
 0x13d   : > { %13478 = vst [vmem:[#allocation10_spill] sm:$0xff] %v9648_v0  ;;  %v9652_v2 = vpop.f32.mrf.mxu0  ;;  %v9654_v3 = vpop.f32.mrf.mxu1 }
 0x13e   : > { %13479 = vst [vmem:[#allocation11_spill] sm:$0xff] %v9650_v1 }
 0x13f   : > { %13480 = vst [vmem:[#allocation12_spill] sm:$0xff] %v9652_v2 }
 0x140   : > { %13481 = vst [vmem:[#allocation13_spill] sm:$0xff] %v9654_v3 }
 0x144   : > { %v9656_v6 = vpop.f32.mrf.mxu2  ;;  %v9658_v7 = vpop.f32.mrf.mxu3 }
 0x145   : > { %13482 = vst [vmem:[#allocation14_spill] sm:$0xff] %v9656_v6  ;;  %v639_v8 = vpop.f32.mrf.mxu0  ;;  %v690_v9 = vpop.f32.mrf.mxu1 }
 0x146   : > { %13483 = vst [vmem:[#allocation15_spill] sm:$0xff] %v9658_v7  ;;  %v640_v13 = vadd.f32 %v639_v8, %v522_v5  ;;  %v691_v17 = vadd.f32 %v690_v9, %v522_v5 }
 0x148   : > { %v1004_v23 = vpack.c.bf16 %v640_v13, %v640_v13  ;;  %v1005_v11 = vpack.c.bf16 %v691_v17, %v691_v17 }
 0x14a   : > { %v1079_v12 = vsel %vm1077_vm14, %v1004_v23, 0  ;;  %v1195_v14 = vsel %vm1077_vm14, %v1005_v11, 0 }
 0x14b   : > { %1088 = vmatpush.bf16.msrb.mxu0 %v1079_v12  ;;  %1204 = vmatpush.bf16.msrb.mxu1 %v1195_v14 }
 0x14c   : > { %v741_v15 = vpop.f32.mrf.mxu2  ;;  %v792_v18 = vpop.f32.mrf.mxu3 }
 0x14d   : > { %v742_v37 = vadd.f32 %v741_v15, %v522_v5  ;;  %v793_v19 = vadd.f32 %v792_v18, %v522_v5 }
 0x14f   : > { %v1006_v39 = vpack.c.bf16 %v742_v37, %v742_v37  ;;  %v1007_v40 = vpack.c.bf16 %v793_v19, %v793_v19 }
 0x151   : > { %v1311_v41 = vsel %vm1077_vm14, %v1006_v39, 0  ;;  %v1427_v20 = vsel %vm1077_vm14, %v1007_v40, 0 }
 0x152   : > { %1320 = vmatpush.bf16.msrb.mxu2 %v1311_v41  ;;  %1436 = vmatpush.bf16.msrb.mxu3 %v1427_v20 }
 0x1c3   : > { %v7543_v42 = vpop.trf.xlu2 }
 0x1c4   : > { %v7547_v43 = vunpack.i.h.bf16 %v7543_v42  ;;  %v7544_v22 = vunpack.i.l.bf16 %v7543_v42 }
 0x1c6   : > { %v956_v30 = vpack.c.bf16 %v7547_v43, %v7547_v43  ;;  %v940_v33 = vpack.c.bf16 %v7544_v22, %v7544_v22 }
 0x1c8   : > { %v1028_v34 = vunpack.c.l.b16 %v940_v33  ;;  %v1146_v52 = vunpack.c.l.b16 %v956_v30 }
 0x1cb   : > { %v7548_v51 = vpop.trf.xlu2 }
 0x1cc   : > { %v7552_v29 = vunpack.i.h.bf16 %v7548_v51  ;;  %v7549_v44 = vunpack.i.l.bf16 %v7548_v51 }
 0x1ce   : > { %v957_v45 = vpack.c.bf16 %v7552_v29, %v7552_v29  ;;  %v941_v10 = vpack.c.bf16 %v7549_v44, %v7549_v44 }
 0x1d0   : > { %v1029_v16 = vunpack.c.l.b16 %v941_v10  ;;  %v1147_v46 = vunpack.c.l.b16 %v957_v45 }
 0x1d2   : > { %v1044_v31 = vpack.c.b16 %v1029_v16, %v1028_v34  ;;  %v1162_v47 = vpack.c.b16 %v1147_v46, %v1146_v52 }
 0x1d3   : > { %v7553_v48 = vpop.trf.xlu2 }
 0x1d4   : > { %7333 = vmatmul.msk.bf16.vlgmr.msrb.gmra.mxu0 %vm1052_vm15, %v1044_v31  ;;  %7341 = vmatmul.msk.bf16.vlgmr.msrb.gmra.mxu1 %vm1052_vm15, %v1162_v47  ;;  %v7554_v54 = vunpack.i.l.bf16 %v7553_v48  ;;  %v7557_v55 = vunpack.i.h.bf16 %v7553_v48 }
 0x1d5   : > { %v7625_v49 = vpop.trf.xlu0 }
 0x1d6   : > { %v7629_v56 = vunpack.i.h.bf16 %v7625_v49  ;;  %v7626_v57 = vunpack.i.l.bf16 %v7625_v49  ;;  %v942_v21 = vpack.c.bf16 %v7554_v54, %v7554_v54  ;;  %v958_v53 = vpack.c.bf16 %v7557_v55, %v7557_v55 }
 0x1d8   : > { %v988_v25 = vpack.c.bf16 %v7629_v56, %v7629_v56  ;;  %v972_v26 = vpack.c.bf16 %v7626_v57, %v7626_v57  ;;  %v1030_v8 = vunpack.c.l.b16 %v942_v21  ;;  %v1148_v13 = vunpack.c.l.b16 %v958_v53 }
 0x1da   : > { %v1378_v14 = vunpack.c.l.b16 %v988_v25  ;;  %v1262_v15 = vunpack.c.l.b16 %v972_v26 }
 0x1db   : > { %v7558_v38 = vpop.trf.xlu2 }
 0x1dc   : > { %v7559_v4 = vunpack.i.l.bf16 %v7558_v38  ;;  %v7562_v58 = vunpack.i.h.bf16 %v7558_v38 }
 0x1dd   : > { %v7630_v27 = vpop.trf.xlu0 }
 0x1de   : > { %v7634_v59 = vunpack.i.h.bf16 %v7630_v27  ;;  %v7631_v60 = vunpack.i.l.bf16 %v7630_v27  ;;  %v943_v5 = vpack.c.bf16 %v7559_v4, %v7559_v4  ;;  %v959_v9 = vpack.c.bf16 %v7562_v58, %v7562_v58 }
 0x1e0   : > { %v989_v17 = vpack.c.bf16 %v7634_v59, %v7634_v59  ;;  %v973_v23 = vpack.c.bf16 %v7631_v60, %v7631_v60  ;;  %v1031_v11 = vunpack.c.l.b16 %v943_v5  ;;  %v1149_v12 = vunpack.c.l.b16 %v959_v9 }
 0x1e2   : > { %v1379_v18 = vunpack.c.l.b16 %v989_v17  ;;  %v1263_v37 = vunpack.c.l.b16 %v973_v23  ;;  %v1045_v19 = vpack.c.b16 %v1031_v11, %v1030_v8  ;;  %v1163_v39 = vpack.c.b16 %v1149_v12, %v1148_v13 }
 0x1e3   : > { %v7563_v40 = vpop.trf.xlu2 }
 0x1e4   : > { %v1278_v41 = vpack.c.b16 %v1263_v37, %v1262_v15  ;;  %v1394_v20 = vpack.c.b16 %v1379_v18, %v1378_v14  ;;  %7334 = vmatmul.msk.bf16.gmra.mxu0 %vm1052_vm15, %v1045_v19  ;;  %7342 = vmatmul.msk.bf16.gmra.mxu1 %vm1052_vm15, %v1163_v39  ;;  %v7567_v22 = vunpack.i.h.bf16 %v7563_v40  ;;  %v7564_v30 = vunpack.i.l.bf16 %v7563_v40 }
 0x1e5   : > { %v7635_v24 = vpop.trf.xlu0 }
 0x1e6   : > { %7349 = vmatmul.msk.bf16.vlgmr.msrb.gmra.mxu2 %vm1052_vm15, %v1278_v41  ;;  %7357 = vmatmul.msk.bf16.vlgmr.msrb.gmra.mxu3 %vm1052_vm15, %v1394_v20  ;;  %v7639_v42 = vunpack.i.h.bf16 %v7635_v24  ;;  %v7636_v43 = vunpack.i.l.bf16 %v7635_v24  ;;  %v960_v44 = vpack.c.bf16 %v7567_v22, %v7567_v22  ;;  %v944_v45 = vpack.c.bf16 %v7564_v30, %v7564_v30 }
 0x1e8   : > { %v990_v33 = vpack.c.bf16 %v7639_v42, %v7639_v42  ;;  %v974_v51 = vpack.c.bf16 %v7636_v43, %v7636_v43  ;;  %v1150_v47 = vunpack.c.l.b16 %v960_v44  ;;  %v1032_v49 = vunpack.c.l.b16 %v944_v45 }
 0x1ea   : > { %v1264_v56 = vunpack.c.l.b16 %v974_v51  ;;  %v1380_v57 = vunpack.c.l.b16 %v990_v33 }
 0x1eb   : > { %v7568_v29 = vpop.trf.xlu2 }
 0x1ec   : > { %v7572_v10 = vunpack.i.h.bf16 %v7568_v29  ;;  %v7569_v34 = vunpack.i.l.bf16 %v7568_v29 }
 0x1ed   : > { %v7640_v16 = vpop.trf.xlu0 }
 0x1ee   : > { %v7644_v52 = vunpack.i.h.bf16 %v7640_v16  ;;  %v7641_v46 = vunpack.i.l.bf16 %v7640_v16  ;;  %v961_v31 = vpack.c.bf16 %v7572_v10, %v7572_v10  ;;  %v945_v48 = vpack.c.bf16 %v7569_v34, %v7569_v34 }
 0x1f0   : > { %v991_v54 = vpack.c.bf16 %v7644_v52, %v7644_v52  ;;  %v975_v55 = vpack.c.bf16 %v7641_v46, %v7641_v46  ;;  %v1151_v38 = vunpack.c.l.b16 %v961_v31  ;;  %v1033_v21 = vunpack.c.l.b16 %v945_v48 }
 0x1f2   : > { %v1265_v53 = vunpack.c.l.b16 %v975_v55  ;;  %v1381_v4 = vunpack.c.l.b16 %v991_v54  ;;  %v1164_v25 = vpack.c.b16 %v1151_v38, %v1150_v47  ;;  %v1046_v26 = vpack.c.b16 %v1033_v21, %v1032_v49  ;;  %v9696_v49 = vpop.f32.mrf.mxu1  ;;  %v9698_v21 = vpop.f32.mrf.mxu0 }
 0x1f3   : > { %v7573_v58 = vpop.trf.xlu2  ;;  %13487 = vst [vmem:[#allocation19_spill] sm:$0xff] %v9696_v49 }
 0x1f4   : > { %v1279_v27 = vpack.c.b16 %v1265_v53, %v1264_v56  ;;  %v1395_v59 = vpack.c.b16 %v1381_v4, %v1380_v57  ;;  %7343 = vmatmul.msk.bf16.gmra.mxu1 %vm1052_vm15, %v1164_v25  ;;  %7335 = vmatmul.msk.bf16.gmra.mxu0 %vm1052_vm15, %v1046_v26  ;;  %v7577_v8 = vunpack.i.h.bf16 %v7573_v58  ;;  %v7574_v31 = vunpack.i.l.bf16 %v7573_v58  ;;  %13488 = vst [vmem:[#allocation20_spill] sm:$0xff] %v9698_v21 }
 0x1f5   : > { %v7645_v60 = vpop.trf.xlu0 }
 0x1f6   : > { %7350 = vmatmul.msk.bf16.gmra.mxu2 %vm1052_vm15, %v1279_v27  ;;  %7358 = vmatmul.msk.bf16.gmra.mxu3 %vm1052_vm15, %v1395_v59  ;;  %v7649_v5 = vunpack.i.h.bf16 %v7645_v60  ;;  %v7646_v9 = vunpack.i.l.bf16 %v7645_v60  ;;  %v962_v23 = vpack.c.bf16 %v7577_v8, %v7577_v8  ;;  %v946_v56 = vpack.c.bf16 %v7574_v31, %v7574_v31 }
 0x1f8   : > { %v992_v13 = vpack.c.bf16 %v7649_v5, %v7649_v5  ;;  %v976_v11 = vpack.c.bf16 %v7646_v9, %v7646_v9  ;;  %v1152_v19 = vunpack.c.l.b16 %v962_v23  ;;  %v1034_v26 = vunpack.c.l.b16 %v946_v56 }
 0x1fa   : > { %v1266_v41 = vunpack.c.l.b16 %v976_v11  ;;  %v1382_v20 = vunpack.c.l.b16 %v992_v13 }
 0x1fb   : > { %v7578_v17 = vpop.trf.xlu2 }
 0x1fc   : > { %v7582_v12 = vunpack.i.h.bf16 %v7578_v17  ;;  %v7579_v46 = vunpack.i.l.bf16 %v7578_v17 }
 0x1fd   : > { %v7650_v14 = vpop.trf.xlu0 }
 0x1fe   : > { %v7654_v15 = vunpack.i.h.bf16 %v7650_v14  ;;  %v7651_v18 = vunpack.i.l.bf16 %v7650_v14  ;;  %v963_v37 = vpack.c.bf16 %v7582_v12, %v7582_v12  ;;  %v947_v55 = vpack.c.bf16 %v7579_v46, %v7579_v46 }
 0x200   : > { %v993_v39 = vpack.c.bf16 %v7654_v15, %v7654_v15  ;;  %v977_v40 = vpack.c.bf16 %v7651_v18, %v7651_v18  ;;  %v1153_v24 = vunpack.c.l.b16 %v963_v37  ;;  %v1035_v25 = vunpack.c.l.b16 %v947_v55  ;;  %v9706_v15 = vpop.f32.mrf.mxu1 }
 0x201   : > { %13489 = vst [vmem:[#allocation21_spill] sm:$0xff] %v9706_v15 }
 0x202   : > { %v1267_v42 = vunpack.c.l.b16 %v977_v40  ;;  %v1383_v43 = vunpack.c.l.b16 %v993_v39  ;;  %v1165_v30 = vpack.c.b16 %v1153_v24, %v1152_v19  ;;  %v1047_v8 = vpack.c.b16 %v1035_v25, %v1034_v26  ;;  %v9709_v39 = vpop.f32.mrf.mxu0  ;;  %v9727_v25 = vpop.f32.mrf.mxu2 }
 0x203   : > { %v9687_v22 = vpop.trf.xlu2  ;;  %13490 = vst [vmem:[#allocation22_spill] sm:$0xff] %v9709_v39 }
 0x204   : > { %v1280_v33 = vpack.c.b16 %v1267_v42, %v1266_v41  ;;  %v1396_v51 = vpack.c.b16 %v1383_v43, %v1382_v20  ;;  %7344 = vmatmul.msk.bf16.gmra.mxu1 %vm1052_vm15, %v1165_v30  ;;  %v7587_v45 = vunpack.i.h.bf16 %v9687_v22  ;;  %7336 = vmatmul.msk.bf16.gmra.mxu0 %vm1052_vm15, %v1047_v8  ;;  %13495 = vst [vmem:[#allocation27_spill] sm:$0xff] %v9727_v25 }
 0x205   : > { %v7655_v29 = vpop.trf.xlu0 }
 0x206   : > { %7351 = vmatmul.msk.bf16.gmra.mxu2 %vm1052_vm15, %v1280_v33  ;;  %7359 = vmatmul.msk.bf16.gmra.mxu3 %vm1052_vm15, %v1396_v51  ;;  %v7659_v44 = vunpack.i.h.bf16 %v7655_v29  ;;  %v7656_v10 = vunpack.i.l.bf16 %v7655_v29  ;;  %v964_v52 = vpack.c.bf16 %v7587_v45, %v7587_v45 }
 0x208   : > { %v994_v34 = vpack.c.bf16 %v7659_v44, %v7659_v44  ;;  %v978_v47 = vpack.c.bf16 %v7656_v10, %v7656_v10  ;;  %v1154_v4 = vunpack.c.l.b16 %v964_v52  ;;  %v9714_v52 = vpop.f32.mrf.mxu1 }
 0x209   : > { %13491 = vst [vmem:[#allocation23_spill] sm:$0xff] %v9714_v52 }
 0x20a   : > { %v1268_v60 = vunpack.c.l.b16 %v978_v47  ;;  %v1384_v58 = vunpack.c.l.b16 %v994_v34 }
 0x20b   : > { %v9693_v16 = vpop.trf.xlu2 }
 0x20c   : > { %v7592_v48 = vunpack.i.h.bf16 %v9693_v16 }
 0x20d   : > { %v7660_v54 = vpop.trf.xlu0 }
 0x20e   : > { %v7664_v57 = vunpack.i.h.bf16 %v7660_v54  ;;  %v7661_v38 = vunpack.i.l.bf16 %v7660_v54  ;;  %v965_v53 = vpack.c.bf16 %v7592_v48, %v7592_v48  ;;  %v9716_v48 = vpop.trf.xlu1  ;;  %v9718_v54 = vpop.f32.mrf.mxu0 }
 0x20f   : > { %13492 = vst [vmem:[#allocation24_spill] sm:$0xff] %v9716_v48 }
 0x210   : > { %v995_v27 = vpack.c.bf16 %v7664_v57, %v7664_v57  ;;  %v979_v59 = vpack.c.bf16 %v7661_v38, %v7661_v38  ;;  %v1155_v5 = vunpack.c.l.b16 %v965_v53  ;;  %13493 = vst [vmem:[#allocation25_spill] sm:$0xff] %v9718_v54  ;;  %v9722_v53 = vpop.f32.mrf.mxu3 }
 0x211   : > { %13494 = vst [vmem:[#allocation26_spill] sm:$0xff] %v9722_v53 }
 0x212   : > { %v1269_v9 = vunpack.c.l.b16 %v979_v59  ;;  %v1385_v13 = vunpack.c.l.b16 %v995_v27  ;;  %v1166_v23 = vpack.c.b16 %v1155_v5, %v1154_v4 }
 0x213   : > { %v9700_v17 = vpop.trf.xlu2 }
 0x214   : > { %v1281_v11 = vpack.c.b16 %v1269_v9, %v1268_v60  ;;  %v1397_v12 = vpack.c.b16 %v1385_v13, %v1384_v58  ;;  %7345 = vmatmul.msk.bf16.gmra.mxu1 %vm1052_vm15, %v1166_v23  ;;  %v7597_v37 = vunpack.i.h.bf16 %v9700_v17  ;;  %v9732_v58 = vpop.f32.mrf.mxu1 }
 0x215   : > { %v7665_v14 = vpop.trf.xlu0  ;;  %13497 = vst [vmem:[#allocation29_spill] sm:$0xff] %v9732_v58 }
 0x216   : > { %7352 = vmatmul.msk.bf16.gmra.mxu2 %vm1052_vm15, %v1281_v11  ;;  %7360 = vmatmul.msk.bf16.gmra.mxu3 %vm1052_vm15, %v1397_v12  ;;  %v7669_v18 = vunpack.i.h.bf16 %v7665_v14  ;;  %v7666_v19 = vunpack.i.l.bf16 %v7665_v14  ;;  %v966_v20 = vpack.c.bf16 %v7597_v37, %v7597_v37  ;;  %v9730_v60 = vpop.trf.xlu1  ;;  %v9737_v11 = vpop.f32.mrf.mxu0 }
 0x217   : > { %13496 = vst [vmem:[#allocation28_spill] sm:$0xff] %v9730_v60 }
 0x218   : > { %v996_v40 = vpack.c.bf16 %v7669_v18, %v7669_v18  ;;  %v980_v24 = vpack.c.bf16 %v7666_v19, %v7666_v19  ;;  %v1156_v29 = vunpack.c.l.b16 %v966_v20  ;;  %13498 = vst [vmem:[#allocation30_spill] sm:$0xff] %v9737_v11  ;;  %v9739_v37 = vpop.f32.mrf.mxu3 }
 0x219   : > { %13499 = vst [vmem:[#allocation31_spill] sm:$0xff] %v9739_v37 }
 0x21a   : > { %v1270_v10 = vunpack.c.l.b16 %v980_v24  ;;  %v1386_v34 = vunpack.c.l.b16 %v996_v40 }
 0x21b   : > { %v9711_v41 = vpop.trf.xlu2 }
 0x21c   : > { %v7602_v42 = vunpack.i.h.bf16 %v9711_v41 }
 0x21d   : > { %v7670_v43 = vpop.trf.xlu0 }
 0x21e   : > { %v7674_v30 = vunpack.i.h.bf16 %v7670_v43  ;;  %v7671_v33 = vunpack.i.l.bf16 %v7670_v43  ;;  %v967_v51 = vpack.c.bf16 %v7602_v42, %v7602_v42 }
 0x220   : > { %v997_v44 = vpack.c.bf16 %v7674_v30, %v7674_v30  ;;  %v981_v45 = vpack.c.bf16 %v7671_v33, %v7671_v33  ;;  %v1157_v46 = vunpack.c.l.b16 %v967_v51  ;;  %v9741_v30 = vpop.f32.mrf.mxu2 }
 0x221   : > { %13500 = vst [vmem:[#allocation32_spill] sm:$0xff] %v9741_v30 }
 0x222   : > { %v1271_v31 = vunpack.c.l.b16 %v981_v45  ;;  %v1387_v47 = vunpack.c.l.b16 %v997_v44  ;;  %v1167_v56 = vpack.c.b16 %v1157_v46, %v1156_v29  ;;  %v9743_v44 = vpop.trf.xlu1 }
 0x223   : > { %v9720_v55 = vpop.trf.xlu2  ;;  %13501 = vst [vmem:[#allocation33_spill] sm:$0xff] %v9743_v44 }
 0x224   : > { %v1282_v57 = vpack.c.b16 %v1271_v31, %v1270_v10  ;;  %v1398_v38 = vpack.c.b16 %v1387_v47, %v1386_v34  ;;  %7346 = vmatmul.msk.bf16.gmra.mxu1 %vm1052_vm15, %v1167_v56  ;;  %v7607_v27 = vunpack.i.h.bf16 %v9720_v55  ;;  %v9747_v31 = vpop.f32.mrf.mxu1  ;;  %v9752_v56 = vpop.f32.mrf.mxu0  ;;  %v7604_v6 = vunpack.i.l.bf16 %v9720_v55 }
 0x225   : > { %v7675_v4 = vpop.trf.xlu0  ;;  %13502 = vst [vmem:[#allocation34_spill] sm:$0xff] %v9747_v31 }
 0x226   : > { %7353 = vmatmul.msk.bf16.gmra.mxu2 %vm1052_vm15, %v1282_v57  ;;  %7361 = vmatmul.msk.bf16.gmra.mxu3 %vm1052_vm15, %v1398_v38  ;;  %v7679_v26 = vunpack.i.h.bf16 %v7675_v4  ;;  %v7676_v59 = vunpack.i.l.bf16 %v7675_v4  ;;  %v968_v8 = vpack.c.bf16 %v7607_v27, %v7607_v27  ;;  %13503 = vst [vmem:[#allocation35_spill] sm:$0xff] %v9752_v56  ;;  %v952_v32 = vpack.c.bf16 %v7604_v6, %v7604_v6 }
 0x228   : > { %v998_v5 = vpack.c.bf16 %v7679_v26, %v7679_v26  ;;  %v982_v13 = vpack.c.bf16 %v7676_v59, %v7676_v59  ;;  %v1158_v40 = vunpack.c.l.b16 %v968_v8  ;;  %v9755_v26 = vpop.f32.mrf.mxu3  ;;  %v7589_v59 = vunpack.i.l.bf16 %v9693_v16  ;;  %v9761_v8 = vpop.f32.mrf.mxu2 }
 0x229   : > { %13504 = vst [vmem:[#allocation36_spill] sm:$0xff] %v9755_v26 }
 0x22a   : > { %v1388_v42 = vunpack.c.l.b16 %v998_v5  ;;  %v1272_v43 = vunpack.c.l.b16 %v982_v13  ;;  %v9757_v27 = vpop.trf.xlu1  ;;  %v7584_v5 = vunpack.i.l.bf16 %v9687_v22  ;;  %13506 = vst [vmem:[#allocation38_spill] sm:$0xff] %v9761_v8 }
 0x22b   : > { %v9734_v9 = vpop.trf.xlu2  ;;  %13505 = vst [vmem:[#allocation37_spill] sm:$0xff] %v9757_v27 }
 0x22c   : > { %v7612_v23 = vunpack.i.h.bf16 %v9734_v9  ;;  %v7609_v3 = vunpack.i.l.bf16 %v9734_v9  ;;  %v1040_v9 = vunpack.c.l.b16 %v952_v32 }
 0x22d   : > { %v7680_v12 = vpop.trf.xlu0 }
 0x22e   : > { %v7684_v14 = vunpack.i.h.bf16 %v7680_v12  ;;  %v7681_v18 = vunpack.i.l.bf16 %v7680_v12  ;;  %v969_v19 = vpack.c.bf16 %v7612_v23, %v7612_v23 }
 0x230   : > { %v999_v20 = vpack.c.bf16 %v7684_v14, %v7684_v14  ;;  %v983_v24 = vpack.c.bf16 %v7681_v18, %v7681_v18  ;;  %v1159_v33 = vunpack.c.l.b16 %v969_v19 }
 0x232   : > { %v1389_v51 = vunpack.c.l.b16 %v999_v20  ;;  %v1273_v29 = vunpack.c.l.b16 %v983_v24  ;;  %v1168_v10 = vpack.c.b16 %v1159_v33, %v1158_v40  ;;  %v9766_v40 = vpop.f32.mrf.mxu1  ;;  %v949_v20 = vpack.c.bf16 %v7589_v59, %v7589_v59  ;;  %v9768_v33 = vpop.f32.mrf.mxu0 }
 0x233   : > { %v9745_v45 = vpop.trf.xlu2  ;;  %13507 = vst [vmem:[#allocation39_spill] sm:$0xff] %v9766_v40  ;;  %v948_v24 = vpack.c.bf16 %v7584_v5, %v7584_v5  ;;  %v9770_v52 = vpop.trf.xlu1 }
 0x234   : > { %v1399_v34 = vpack.c.b16 %v1389_v51, %v1388_v42  ;;  %v1283_v46 = vpack.c.b16 %v1273_v29, %v1272_v43  ;;  %7347 = vmatmul.msk.bf16.gmra.mxu1 %vm1052_vm15, %v1168_v10  ;;  %v7617_v38 = vunpack.i.h.bf16 %v9745_v45  ;;  %13508 = vst [vmem:[#allocation40_spill] sm:$0xff] %v9768_v33  ;;  %v1037_v51 = vunpack.c.l.b16 %v949_v20  ;;  %v9772_v59 = vpop.f32.mrf.mxu3 }
 0x235   : > { %v7685_v47 = vpop.trf.xlu0  ;;  %v1036_v29 = vunpack.c.l.b16 %v948_v24  ;;  %13509 = vst [vmem:[#allocation41_spill] sm:$0xff] %v9770_v52 }
 0x236   : > { %7362 = vmatmul.msk.bf16.gmra.mxu3 %vm1052_vm15, %v1399_v34  ;;  %7354 = vmatmul.msk.bf16.gmra.mxu2 %vm1052_vm15, %v1283_v46  ;;  %v7689_v57 = vunpack.i.h.bf16 %v7685_v47  ;;  %v7686_v4 = vunpack.i.l.bf16 %v7685_v47  ;;  %v970_v23 = vpack.c.bf16 %v7617_v38, %v7617_v38  ;;  %13510 = vst [vmem:[#allocation42_spill] sm:$0xff] %v9772_v59 }
 0x237   : > { %v1048_v38 = vpack.c.b16 %v1037_v51, %v1036_v29 }
 0x238   : > { %v1000_v13 = vpack.c.bf16 %v7689_v57, %v7689_v57  ;;  %v984_v14 = vpack.c.bf16 %v7686_v4, %v7686_v4  ;;  %v1160_v22 = vunpack.c.l.b16 %v970_v23  ;;  %v9775_v23 = vpop.f32.mrf.mxu2 }
 0x239   : > { %7337 = vmatmul.msk.bf16.gmra.mxu0 %vm1052_vm15, %v1048_v38  ;;  %13511 = vst [vmem:[#allocation43_spill] sm:$0xff] %v9775_v23 }
 0x23a   : > { %v1390_v10 = vunpack.c.l.b16 %v1000_v13  ;;  %v1274_v34 = vunpack.c.l.b16 %v984_v14  ;;  %v9780_v13 = vpop.f32.mrf.mxu1 }
 0x23b   : > { %v9763_v12 = vpop.trf.xlu2  ;;  %13512 = vst [vmem:[#allocation44_spill] sm:$0xff] %v9780_v13 }
 0x23c   : > { %v7622_v18 = vunpack.i.h.bf16 %v9763_v12 }
 0x23d   : > { %v7690_v19 = vpop.trf.xlu0 }
 0x23e   : > { %v7694_v42 = vunpack.i.h.bf16 %v7690_v19  ;;  %v7691_v43 = vunpack.i.l.bf16 %v7690_v19  ;;  %v971_v16 = vpack.c.bf16 %v7622_v18, %v7622_v18 }
 0x240   : > { %v1001_v46 = vpack.c.bf16 %v7694_v42, %v7694_v42  ;;  %v985_v47 = vpack.c.bf16 %v7691_v43, %v7691_v43  ;;  %v1161_v57 = vunpack.c.l.b16 %v971_v16  ;;  %v9782_v42 = vpop.f32.mrf.mxu0  ;;  %v9784_v43 = vpop.trf.xlu1 }
 0x241   : > { %13513 = vst [vmem:[#allocation45_spill] sm:$0xff] %v9782_v42 }
 0x242   : > { %v1391_v4 = vunpack.c.l.b16 %v1001_v46  ;;  %v1275_v26 = vunpack.c.l.b16 %v985_v47  ;;  %v1169_v5 = vpack.c.b16 %v1161_v57, %v1160_v22  ;;  %13514 = vst [vmem:[#allocation46_spill] sm:$0xff] %v9784_v43 }
 0x244   : > { %v1400_v19 = vpack.c.b16 %v1391_v4, %v1390_v10  ;;  %v1284_v18 = vpack.c.b16 %v1275_v26, %v1274_v34  ;;  %7348 = vmatmul.msk.bf16.gmra.mxu1 %vm1052_vm15, %v1169_v5  ;;  %v9786_v26 = vpop.f32.mrf.mxu3  ;;  %v9788_v34 = vpop.f32.mrf.mxu2 }
 0x245   : > { %v7695_v20 = vpop.trf.xlu0  ;;  %13515 = vst [vmem:[#allocation47_spill] sm:$0xff] %v9786_v26  ;;  %v953_v26 = vpack.c.bf16 %v7609_v3, %v7609_v3 }
 0x246   : > { %7363 = vmatmul.msk.bf16.gmra.mxu3 %vm1052_vm15, %v1400_v19  ;;  %7355 = vmatmul.msk.bf16.gmra.mxu2 %vm1052_vm15, %v1284_v18  ;;  %v7699_v14 = vunpack.i.h.bf16 %v7695_v20  ;;  %v7696_v24 = vunpack.i.l.bf16 %v7695_v20  ;;  %13516 = vst [vmem:[#allocation48_spill] sm:$0xff] %v9788_v34 }
 0x247   : > { %v1041_v30 = vunpack.c.l.b16 %v953_v26 }
 0x248   : > { %v1002_v16 = vpack.c.bf16 %v7699_v14, %v7699_v14  ;;  %v986_v22 = vpack.c.bf16 %v7696_v24, %v7696_v24  ;;  %v9795_v20 = vpop.trf.xlu1 }
 0x249   : > { %13517 = vst [vmem:[#allocation49_spill] sm:$0xff] %v9795_v20  ;;  %v1050_v15 = vpack.c.b16 %v1041_v30, %v1040_v9 }
 0x24a   : > { %v1392_v46 = vunpack.c.l.b16 %v1002_v16  ;;  %v1276_v47 = vunpack.c.l.b16 %v986_v22 }
 0x24c   : > { %v9797_v13 = vpop.f32.mrf.mxu3  ;;  %v9801_v16 = vpop.f32.mrf.mxu2 }
 0x24d   : > { %v7700_v51 = vpop.trf.xlu0  ;;  %13518 = vst [vmem:[#allocation50_spill] sm:$0xff] %v9797_v13 }
 0x24e   : > { %v7704_v29 = vunpack.i.h.bf16 %v7700_v51  ;;  %v7701_v10 = vunpack.i.l.bf16 %v7700_v51  ;;  %13519 = vst [vmem:[#allocation51_spill] sm:$0xff] %v9801_v16 }
 0x250   : > { %v1003_v57 = vpack.c.bf16 %v7704_v29, %v7704_v29  ;;  %v987_v38 = vpack.c.bf16 %v7701_v10, %v7701_v10  ;;  %v9809_v29 = vpop.trf.xlu1 }
 0x251   : > { %v9790_v4 = vpop.f32.mrf.mxu0  ;;  %v9792_v5 = vpop.f32.mrf.mxu1  ;;  %13520 = vst [vmem:[#allocation52_spill] sm:$0xff] %v9809_v29 }
 0x252   : > { %1478 = vmax.xlane.f32.xlu1 %v9790_v4  ;;  %v1393_v19 = vunpack.c.l.b16 %v1003_v57  ;;  %v1277_v18 = vunpack.c.l.b16 %v987_v38  ;;  %v7599_v38 = vunpack.i.l.bf16 %v9711_v41 }
 0x254   : > { %v1401_v14 = vpack.c.b16 %v1393_v19, %v1392_v46  ;;  %v1285_v24 = vpack.c.b16 %v1277_v18, %v1276_v47  ;;  %v9811_v10 = vpop.f32.mrf.mxu3  ;;  %v9813_v46 = vpop.f32.mrf.mxu2  ;;  %v7594_v19 = vunpack.i.l.bf16 %v9700_v17  ;;  %v951_v18 = vpack.c.bf16 %v7599_v38, %v7599_v38 }
 0x255   : > { %13521 = vst [vmem:[#allocation53_spill] sm:$0xff] %v9811_v10 }
 0x256   : > { %7364 = vmatmul.msk.bf16.gmra.mxu3 %vm1052_vm15, %v1401_v14  ;;  %7356 = vmatmul.msk.bf16.gmra.mxu2 %vm1052_vm15, %v1285_v24  ;;  %13522 = vst [vmem:[#allocation54_spill] sm:$0xff] %v9813_v46  ;;  %v950_v14 = vpack.c.bf16 %v7594_v19, %v7594_v19  ;;  %v1039_v24 = vunpack.c.l.b16 %v951_v18 }
 0x258   : > { %v9818_v57 = vpop.trf.xlu1  ;;  %v1038_v42 = vunpack.c.l.b16 %v950_v14 }
 0x259   : > { %v9803_v22 = vpop.f32.mrf.mxu0  ;;  %v9805_v51 = vpop.f32.mrf.mxu1  ;;  %13523 = vst [vmem:[#allocation55_spill] sm:$0xff] %v9818_v57 }
 0x25a   : > { %1510 = vmax.xlane.f32.xlu1 %v9792_v5  ;;  %1480 = vmax.xlane.f32.xlu2 %v9803_v22  ;;  %v1049_v10 = vpack.c.b16 %v1039_v24, %v1038_v42 }
 0x25c   : > { %7338 = vmatmul.msk.bf16.gmra.mxu0 %vm1052_vm15, %v1049_v10 }
 0x260   : > { %v9831_v41 = vpop.trf.xlu1 }
 0x261   : > { %v9815_v47 = vpop.f32.mrf.mxu1  ;;  %13524 = vst [vmem:[#allocation56_spill] sm:$0xff] %v9831_v41  ;;  %v9833_v17 = vpop.f32.mrf.mxu0 }
 0x262   : > { %1512 = vmax.xlane.f32.xlu1 %v9805_v51 }
 0x268   : > { %v9844_v18 = vpop.trf.xlu1 }
 0x269   : > { %v9822_v13 = vpop.f32.mrf.mxu2  ;;  %v9824_v40 = vpop.f32.mrf.mxu3  ;;  %13525 = vst [vmem:[#allocation57_spill] sm:$0xff] %v9844_v18 }
 0x26a   : > { %1574 = vmax.xlane.f32.xlu0 %v9824_v40  ;;  %v9827_v46 = vpop.f32.mrf.mxu1  ;;  %1542 = vmax.xlane.f32.xlu1 %v9822_v13  ;;  %v9850_v24 = vpop.f32.mrf.mxu0 }
 0x26c   : > { %7339 = vmatmul.msk.bf16.gmra.mxu0 %vm1052_vm15, %v1050_v15 }
 0x270   : > { %v9857_v16 = vpop.trf.xlu1 }
 0x271   : > { %v9835_v38 = vpop.f32.mrf.mxu2  ;;  %v9837_v19 = vpop.f32.mrf.mxu3  ;;  %13526 = vst [vmem:[#allocation58_spill] sm:$0xff] %v9857_v16  ;;  %v7619_v16 = vunpack.i.l.bf16 %v9763_v12 }
 0x272   : > { %1576 = vmax.xlane.f32.xlu2 %v9837_v19  ;;  %1482 = vmax.xlane.f32.xlu0 %v9833_v17  ;;  %v9841_v42 = vpop.f32.mrf.mxu1  ;;  %v9887_v56 = vpop.f32.mrf.mxu0 }
 0x273   : > { %1514 = vmax.xlane.f32.xlu1 %v9815_v47  ;;  %v955_v43 = vpack.c.bf16 %v7619_v16, %v7619_v16 }
 0x278   : > { %v9869_v2 = vpop.trf.xlu1 }
 0x279   : > { %v9846_v14 = vpop.f32.mrf.mxu2  ;;  %v9848_v10 = vpop.f32.mrf.mxu3  ;;  %13527 = vst [vmem:[#allocation59_spill] sm:$0xff] %v9869_v2  ;;  %v7614_v2 = vunpack.i.l.bf16 %v9745_v45  ;;  %v1043_v45 = vunpack.c.l.b16 %v955_v43 }
 0x27a   : > { %1546 = vmax.xlane.f32.xlu2 %v9846_v14  ;;  %1544 = vmax.xlane.f32.xlu0 %v9835_v38  ;;  %v9854_v33 = vpop.f32.mrf.mxu1  ;;  %v9918_v0 = vpop.f32.mrf.mxu0 }
 0x27b   : > { %1484 = vmax.xlane.f32.xlu1 %v9850_v24  ;;  %v954_v20 = vpack.c.bf16 %v7614_v2, %v7614_v2 }
 0x27d   : > { %v1042_v52 = vunpack.c.l.b16 %v954_v20 }
 0x27f   : > { %v1051_v25 = vpack.c.b16 %v1043_v45, %v1042_v52 }
 0x280   : > { %v9880_v55 = vpop.trf.xlu1 }
 0x281   : > { %v9859_v54 = vpop.f32.mrf.mxu2  ;;  %v9861_v8 = vpop.f32.mrf.mxu3  ;;  %13528 = vst [vmem:[#allocation60_spill] sm:$0xff] %v9880_v55  ;;  %7340 = vmatmul.msk.bf16.gmra.mxu0 %vm1052_vm15, %v1051_v25 }
 0x282   : > { %1580 = vmax.xlane.f32.xlu0 %v9861_v8  ;;  %v9864_v7 = vpop.f32.mrf.mxu1  ;;  %v9938_v29 = vpop.f32.mrf.mxu0 }
 0x283   : > { %1516 = vmax.xlane.f32.xlu1 %v9827_v46 }
 0x288   : > { %v9893_v39 = vpop.trf.xlu1 }
 0x289   : > { %v9871_v37 = vpop.f32.mrf.mxu2  ;;  %v9873_v34 = vpop.f32.mrf.mxu3  ;;  %13529 = vst [vmem:[#allocation61_spill] sm:$0xff] %v9893_v39 }
 0x28a   : > { %1582 = vmax.xlane.f32.xlu2 %v9873_v34  ;;  %1550 = vmax.xlane.f32.xlu0 %v9871_v37  ;;  %v9877_v31 = vpop.f32.mrf.mxu1  ;;  %v9966_v44 = vpop.f32.mrf.mxu0 }
 0x28b   : > { %1578 = vmax.xlane.f32.xlu1 %v9848_v10 }
 0x290   : > { %v9903_v30 = vpop.trf.xlu1 }
 0x291   : > { %v9883_v3 = vpop.f32.mrf.mxu2  ;;  %v9885_v6 = vpop.f32.mrf.mxu3  ;;  %13530 = vst [vmem:[#allocation62_spill] sm:$0xff] %v9903_v30 }
 0x292   : > { %1552 = vmax.xlane.f32.xlu2 %v9883_v3  ;;  %v9890_v28 = vpop.f32.mrf.mxu1 }
 0x293   : > { %1486 = vmax.xlane.f32.xlu1 %v9887_v56 }
 0x299   : > { %v9895_v50 = vpop.f32.mrf.mxu2  ;;  %v9897_v32 = vpop.f32.mrf.mxu3 }
 0x29a   : > { %1586 = vmax.xlane.f32.xlu0 %v9897_v32  ;;  %v9900_v15 = vpop.f32.mrf.mxu1 }
 0x29b   : > { %1518 = vmax.xlane.f32.xlu1 %v9841_v42 }
 0x2a1   : > { %v9905_v26 = vpop.f32.mrf.mxu2  ;;  %v9907_v9 = vpop.f32.mrf.mxu3 }
 0x2a2   : > { %1588 = vmax.xlane.f32.xlu2 %v9907_v9  ;;  %1556 = vmax.xlane.f32.xlu0 %v9905_v26  ;;  %v9912_v63 = vpop.f32.mrf.mxu1 }
 0x2a3   : > { %1548 = vmax.xlane.f32.xlu1 %v9859_v54 }
 0x2a9   : > { %v9914_v62 = vpop.f32.mrf.mxu2  ;;  %v9916_v1 = vpop.f32.mrf.mxu3 }
 0x2aa   : > { %1558 = vmax.xlane.f32.xlu2 %v9914_v62  ;;  %v9922_v30 = vpop.f32.mrf.mxu1 }
 0x2ab   : > { %1488 = vmax.xlane.f32.xlu1 %v9918_v0 }
 0x2b1   : > { %v9924_v39 = vpop.f32.mrf.mxu3  ;;  %v9926_v55 = vpop.f32.mrf.mxu2 }
 0x2b2   : > { %1592 = vmax.xlane.f32.xlu0 %v9924_v39  ;;  %v9932_v18 = vpop.f32.mrf.mxu1 }
 0x2b3   : > { %1520 = vmax.xlane.f32.xlu1 %v9854_v33 }
 0x2b9   : > { %v9934_v41 = vpop.f32.mrf.mxu3  ;;  %v9936_v57 = vpop.f32.mrf.mxu2 }
 0x2ba   : > { %1594 = vmax.xlane.f32.xlu2 %v9934_v41  ;;  %1562 = vmax.xlane.f32.xlu0 %v9936_v57  ;;  %v9949_v58 = vpop.f32.mrf.mxu1 }
 0x2bb   : > { %1490 = vmax.xlane.f32.xlu1 %v9938_v29 }
 0x2c1   : > { %v9943_v23 = vpop.f32.mrf.mxu3  ;;  %v9945_v12 = vpop.f32.mrf.mxu2 }
 0x2c2   : > { %1564 = vmax.xlane.f32.xlu2 %v9945_v12  ;;  %v9960_v52 = vpop.f32.mrf.mxu1 }
 0x2c3   : > { %1522 = vmax.xlane.f32.xlu1 %v9864_v7 }
 0x2c5   : > { %v1479_v27 = vpop.xlane.xlu1 %1478 }
 0x2c6   : > { %v1606_v60 = vsub.f32 %v9790_v4, %v1479_v27 }
 0x2c8   : > { %v1670_v21 = vmul.f32 1.442695, %v1606_v60 }
 0x2c9   : > { %v9952_v2 = vpop.f32.mrf.mxu3  ;;  %v9954_v16 = vpop.f32.mrf.mxu2 }
 0x2ca   : > { %1598 = vmax.xlane.f32.xlu0 %v9952_v2  ;;  %v9971_v49 = vpop.f32.mrf.mxu1  ;;  %8207 = vpow2.f32 %v1670_v21  ;;  %v9992_v21 = vpop.f32.mrf.mxu0 }
 0x2cb   : > { %1584 = vmax.xlane.f32.xlu1 %v9885_v6  ;;  %13532 = vst [vmem:[#allocation64_spill] sm:$0xff] %v9971_v49 }
 0x2cd   : > { %v9958_v43 = vpop.xlane.xlu1 %1510 }
 0x2d1   : > { %v9962_v20 = vpop.f32.mrf.mxu3  ;;  %v9964_v45 = vpop.f32.mrf.mxu2 }
 0x2d2   : > { %13531 = vst [vmem:[#allocation63_spill] sm:$0xff] %v9962_v20  ;;  %1600 = vmax.xlane.f32.xlu2 %v9962_v20  ;;  %1568 = vmax.xlane.f32.xlu0 %v9964_v45 }
 0x2d3   : > { %1492 = vmax.xlane.f32.xlu1 %v9966_v44 }
 0x2d5   : > { %v1513_v25 = vpop.xlane.xlu1 %1512 }
 0x2d6   : > { %v1623_v48 = vsub.f32 %v9805_v51, %v1513_v25  ;;  %v9988_v25 = vpop.eup %8207 }
 0x2d8   : > { %v1704_v61 = vmul.f32 1.442695, %v1623_v48 }
 0x2d9   : > { %v9973_v59 = vpop.f32.mrf.mxu3  ;;  %v9979_v36 = vpop.f32.mrf.mxu2 }
 0x2da   : > { %1540 = vmax.xlane.f32.xlu2 %v9971_v49  ;;  %13533 = vst [vmem:[#allocation65_spill] sm:$0xff] %v9979_v36  ;;  %8209 = vpow2.f32 %v1704_v61 }
 0x2db   : > { %1524 = vmax.xlane.f32.xlu1 %v9877_v31 }
 0x2dd   : > { %v1575_v53 = vpop.xlane.xlu0 %1574  ;;  %v1543_v11 = vpop.xlane.xlu1 %1542 }
 0x2de   : > { %v1654_v20 = vsub.f32 %v9824_v40, %v1575_v53  ;;  %v1638_v27 = vsub.f32 %v9822_v13, %v1543_v11 }
 0x2e0   : > { %v1766_v4 = vmul.f32 1.442695, %v1654_v20  ;;  %v1734_v48 = vmul.f32 1.442695, %v1638_v27  ;;  %v9990_v49 = vpop.eup %8209 }
 0x2e1   : > { %v9981_v35 = vpop.f32.mrf.mxu3  ;;  %13534 = vst [vmem:[#allocation66_spill] sm:$0xff] %v9990_v49 }
 0x2e2   : > { %1570 = vmax.xlane.f32.xlu2 %v9979_v36  ;;  %1604 = vmax.xlane.f32.xlu0 %v9981_v35  ;;  %8211 = vpow2.f32 %v1766_v4 }
 0x2e3   : > { %1554 = vmax.xlane.f32.xlu1 %v9895_v50  ;;  %8213 = vpow2.f32 %v1734_v48  ;;  %v10013_v48 = vpop.f32.mrf.mxu0 }
 0x2e5   : > { %v1483_v51 = vpop.xlane.xlu0 %1482 }
 0x2e6   : > { %v1515_v60 = vpop.xlane.xlu1 %1514  ;;  %v1608_v53 = vsub.f32 %v9833_v17, %v1483_v51 }
 0x2e7   : > { %v1624_v61 = vsub.f32 %v9815_v47, %v1515_v60 }
 0x2e8   : > { %v1674_v11 = vmul.f32 1.442695, %v1608_v53  ;;  %v9999_v20 = vpop.eup %8211 }
 0x2e9   : > { %v1706_v13 = vmul.f32 1.442695, %v1624_v61  ;;  %13535 = vst [vmem:[#allocation67_spill] sm:$0xff] %v9999_v20  ;;  %v10001_v36 = vpop.eup %8213 }
 0x2ea   : > { %1798 = vadd.xlane.f32.xlu2 %v9988_v25  ;;  %1832 = vadd.xlane.f32.xlu0 %v9990_v49  ;;  %13536 = vst [vmem:[#allocation68_spill] sm:$0xff] %v10001_v36  ;;  %8215 = vpow2.f32 %v1674_v11 }
 0x2eb   : > { %1494 = vmax.xlane.f32.xlu1 %v9992_v21  ;;  %8217 = vpow2.f32 %v1706_v13 }
 0x2ed   : > { %v1545_v27 = vpop.xlane.xlu0 %1544 }
 0x2ee   : > { %v1485_v40 = vpop.xlane.xlu1 %1484  ;;  %v1639_v17 = vsub.f32 %v9835_v38, %v1545_v27 }
 0x2ef   : > { %v1609_v53 = vsub.f32 %v9850_v24, %v1485_v40 }
 0x2f0   : > { %v1736_v4 = vmul.f32 1.442695, %v1639_v17  ;;  %v10009_v51 = vpop.eup %8215 }
 0x2f1   : > { %13537 = vst [vmem:[#allocation69_spill] sm:$0xff] %v10009_v51  ;;  %v10011_v60 = vpop.eup %8217  ;;  %v1676_v61 = vmul.f32 1.442695, %v1609_v53 }
 0x2f2   : > { %1894 = vadd.xlane.f32.xlu2 %v9999_v20  ;;  %1862 = vadd.xlane.f32.xlu0 %v10001_v36  ;;  %13538 = vst [vmem:[#allocation70_spill] sm:$0xff] %v10011_v60  ;;  %8219 = vpow2.f32 %v1736_v4 }
 0x2f3   : > { %1526 = vmax.xlane.f32.xlu1 %v9890_v28  ;;  %8221 = vpow2.f32 %v1676_v61 }
 0x2f5   : > { %v1581_v13 = vpop.xlane.xlu0 %1580 }
 0x2f6   : > { %v10007_v47 = vpop.xlane.xlu1 %1516  ;;  %v1657_v36 = vsub.f32 %v9861_v8, %v1581_v13 }
 0x2f8   : > { %v10020_v27 = vpop.eup %8219  ;;  %v1772_v24 = vmul.f32 1.442695, %v1657_v36 }
 0x2f9   : > { %13539 = vst [vmem:[#allocation71_spill] sm:$0xff] %v10020_v27  ;;  %v10027_v40 = vpop.eup %8221 }
 0x2fa   : > { %1834 = vadd.xlane.f32.xlu2 %v10011_v60  ;;  %1802 = vadd.xlane.f32.xlu0 %v10009_v51 }
 0x2fb   : > { %1496 = vmax.xlane.f32.xlu1 %v10013_v48 }
 0x2fe   : > { %v1579_v38 = vpop.xlane.xlu1 %1578 }
 0x2ff   : > { %v1656_v11 = vsub.f32 %v9848_v10, %v1579_v38 }
 0x301   : > { %v1770_v17 = vmul.f32 1.442695, %v1656_v11  ;;  %v10037_v11 = vpop.f32.mrf.mxu0 }
 0x302   : > { %1864 = vadd.xlane.f32.xlu2 %v10020_v27 }
 0x303   : > { %1528 = vmax.xlane.f32.xlu1 %v9900_v15  ;;  %8223 = vpow2.f32 %v1770_v17 }
 0x304   : > { %8225 = vpow2.f32 %v1772_v24 }
 0x306   : > { %v10025_v4 = vpop.xlane.xlu1 %1486 }
 0x309   : > { %v10029_v53 = vpop.eup %8223  ;;  %v10054_v60 = vpop.f32.mrf.mxu0 }
 0x30a   : > { %13540 = vst [vmem:[#allocation72_spill] sm:$0xff] %v10029_v53  ;;  %1804 = vadd.xlane.f32.xlu2 %v10027_v40  ;;  %1898 = vadd.xlane.f32.xlu0 %v10029_v53  ;;  %v10035_v38 = vpop.eup %8225 }
 0x30b   : > { %1590 = vmax.xlane.f32.xlu1 %v9916_v1  ;;  %13541 = vst [vmem:[#allocation73_spill] sm:$0xff] %v10035_v38 }
 0x30e   : > { %v1519_v10 = vpop.xlane.xlu1 %1518 }
 0x30f   : > { %v1626_v8 = vsub.f32 %v9841_v42, %v1519_v10 }
 0x311   : > { %v1710_v61 = vmul.f32 1.442695, %v1626_v8 }
 0x312   : > { %1900 = vadd.xlane.f32.xlu2 %v10035_v38 }
 0x313   : > { %8227 = vpow2.f32 %v1710_v61  ;;  %1498 = vmax.xlane.f32.xlu1 %v10037_v11 }
 0x316   : > { %v1549_v36 = vpop.xlane.xlu1 %1548 }
 0x317   : > { %v1641_v13 = vsub.f32 %v9859_v54, %v1549_v36  ;;  %v1551_v36 = vpop.xlane.xlu0 %1550 }
 0x319   : > { %v10042_v17 = vpop.eup %8227  ;;  %v1740_v24 = vmul.f32 1.442695, %v1641_v13 }
 0x31a   : > { %13542 = vst [vmem:[#allocation74_spill] sm:$0xff] %v10042_v17  ;;  %1838 = vadd.xlane.f32.xlu0 %v10042_v17 }
 0x31b   : > { %1530 = vmax.xlane.f32.xlu1 %v9912_v63  ;;  %8229 = vpow2.f32 %v1740_v24  ;;  %v1642_v24 = vsub.f32 %v9871_v37, %v1551_v36  ;;  %v10069_v36 = vpop.f32.mrf.mxu0 }
 0x31e   : > { %v1489_v42 = vpop.xlane.xlu1 %1488 }
 0x31f   : > { %v1611_v10 = vsub.f32 %v9918_v0, %v1489_v42  ;;  %v1742_v42 = vmul.f32 1.442695, %v1642_v24 }
 0x321   : > { %v1680_v8 = vmul.f32 1.442695, %v1611_v10  ;;  %v10047_v27 = vpop.eup %8229 }
 0x322   : > { %13543 = vst [vmem:[#allocation75_spill] sm:$0xff] %v10047_v27  ;;  %1868 = vadd.xlane.f32.xlu0 %v10047_v27 }
 0x323   : > { %8231 = vpow2.f32 %v1680_v8  ;;  %1560 = vmax.xlane.f32.xlu1 %v9926_v55 }
 0x326   : > { %v1521_v54 = vpop.xlane.xlu1 %1520 }
 0x327   : > { %v1627_v61 = vsub.f32 %v9854_v33, %v1521_v54  ;;  %v1587_v54 = vpop.xlane.xlu0 %1586 }
 0x329   : > { %v10052_v13 = vpop.eup %8231  ;;  %v1712_v49 = vmul.f32 1.442695, %v1627_v61  ;;  %v1660_v61 = vsub.f32 %v9897_v32, %v1587_v54 }
 0x32a   : > { %13544 = vst [vmem:[#allocation76_spill] sm:$0xff] %v10052_v13  ;;  %1808 = vadd.xlane.f32.xlu0 %v10052_v13 }
 0x32b   : > { %8233 = vpow2.f32 %v1712_v49  ;;  %1500 = vmax.xlane.f32.xlu1 %v10054_v60  ;;  %v1778_v24 = vmul.f32 1.442695, %v1660_v61 }
 0x32c   : > { %8235 = vpow2.f32 %v1742_v42 }
 0x32e   : > { %v1491_v0 = vpop.xlane.xlu1 %1490 }
 0x32f   : > { %v1612_v33 = vsub.f32 %v9938_v29, %v1491_v0  ;;  %v1557_v53 = vpop.xlane.xlu0 %1556 }
 0x331   : > { %v10059_v10 = vpop.eup %8233  ;;  %v1682_v37 = vmul.f32 1.442695, %v1612_v33 }
 0x332   : > { %13545 = vst [vmem:[#allocation77_spill] sm:$0xff] %v10059_v10  ;;  %1840 = vadd.xlane.f32.xlu2 %v10059_v10  ;;  %v10066_v49 = vpop.eup %8235 }
 0x333   : > { %1532 = vmax.xlane.f32.xlu1 %v9922_v30  ;;  %13546 = vst [vmem:[#allocation78_spill] sm:$0xff] %v10066_v49  ;;  %8237 = vpow2.f32 %v1682_v37 }
 0x334   : > { %8239 = vpow2.f32 %v1778_v24  ;;  %v10090_v24 = vpop.f32.mrf.mxu0 }
 0x336   : > { %v10064_v8 = vpop.xlane.xlu1 %1522 }
 0x339   : > { %v10074_v0 = vpop.eup %8237 }
 0x33a   : > { %1870 = vadd.xlane.f32.xlu2 %v10066_v49  ;;  %v10080_v33 = vpop.eup %8239 }
 0x33b   : > { %1502 = vmax.xlane.f32.xlu1 %v10069_v36  ;;  %13547 = vst [vmem:[#allocation79_spill] sm:$0xff] %v10080_v33 }
 0x33c   : > { %v10112_v38 = vpop.f32.mrf.mxu0 }
 0x33e   : > { %v1585_v42 = vpop.xlane.xlu1 %1584 }
 0x33f   : > { %v1659_v29 = vsub.f32 %v9885_v6, %v1585_v42  ;;  %v10086_v6 = vpop.xlane.xlu2 %1480 }
 0x341   : > { %v1776_v27 = vmul.f32 1.442695, %v1659_v29 }
 0x342   : > { %1810 = vadd.xlane.f32.xlu2 %v10074_v0 }
 0x343   : > { %8241 = vpow2.f32 %v1776_v27  ;;  %1534 = vmax.xlane.f32.xlu1 %v9932_v18 }
 0x346   : > { %v10078_v32 = vpop.xlane.xlu1 %1492 }
 0x347   : > { %v10092_v42 = vpop.xlane.xlu2 %1576 }
 0x349   : > { %v10082_v54 = vpop.eup %8241 }
 0x34a   : > { %13548 = vst [vmem:[#allocation80_spill] sm:$0xff] %v10082_v54  ;;  %1906 = vadd.xlane.f32.xlu2 %v10080_v33  ;;  %1904 = vadd.xlane.f32.xlu0 %v10082_v54 }
 0x34b   : > { %1596 = vmax.xlane.f32.xlu1 %v9943_v23 }
 0x34e   : > { %v1525_v37 = vpop.xlane.xlu1 %1524 }
 0x34f   : > { %v1629_v61 = vsub.f32 %v9877_v31, %v1525_v37  ;;  %v10100_v31 = vpop.xlane.xlu2 %1546 }
 0x351   : > { %v1716_v27 = vmul.f32 1.442695, %v1629_v61 }
 0x353   : > { %8243 = vpow2.f32 %v1716_v27  ;;  %1504 = vmax.xlane.f32.xlu1 %v10090_v24 }
 0x356   : > { %v1555_v29 = vpop.xlane.xlu1 %1554 }
 0x357   : > { %v1644_v49 = vsub.f32 %v9895_v50, %v1555_v29  ;;  %v10107_v50 = vpop.xlane.xlu2 %1582 }
 0x359   : > { %v10096_v17 = vpop.eup %8243  ;;  %v1746_v10 = vmul.f32 1.442695, %v1644_v49 }
 0x35a   : > { %13549 = vst [vmem:[#allocation81_spill] sm:$0xff] %v10096_v17  ;;  %1844 = vadd.xlane.f32.xlu0 %v10096_v17 }
 0x35b   : > { %1536 = vmax.xlane.f32.xlu1 %v9949_v58  ;;  %8245 = vpow2.f32 %v1746_v10 }
 0x35e   : > { %v1495_v37 = vpop.xlane.xlu1 %1494 }
 0x35f   : > { %v1614_v61 = vsub.f32 %v9992_v21, %v1495_v37  ;;  %v1645_v21 = vsub.f32 %v9905_v26, %v1557_v53  ;;  %v10117_v37 = vpop.xlane.xlu2 %1552  ;;  %v1593_v53 = vpop.xlane.xlu0 %1592 }
 0x360   : > { %v1663_v54 = vsub.f32 %v9924_v39, %v1593_v53 }
 0x361   : > { %v1686_v20 = vmul.f32 1.442695, %v1614_v61  ;;  %v10103_v27 = vpop.eup %8245  ;;  %v1748_v61 = vmul.f32 1.442695, %v1645_v21  ;;  %v10131_v21 = vpop.f32.mrf.mxu0 }
 0x362   : > { %13550 = vst [vmem:[#allocation82_spill] sm:$0xff] %v10103_v27  ;;  %1874 = vadd.xlane.f32.xlu0 %v10103_v27 }
 0x363   : > { %8247 = vpow2.f32 %v1686_v20  ;;  %1566 = vmax.xlane.f32.xlu1 %v9954_v16 }
 0x366   : > { %v1527_v49 = vpop.xlane.xlu1 %1526 }
 0x367   : > { %v1630_v29 = vsub.f32 %v9890_v28, %v1527_v49  ;;  %v10126_v26 = vpop.xlane.xlu2 %1588 }
 0x369   : > { %v10110_v10 = vpop.eup %8247  ;;  %v1718_v17 = vmul.f32 1.442695, %v1630_v29 }
 0x36a   : > { %1814 = vadd.xlane.f32.xlu0 %v10110_v10 }
 0x36b   : > { %8249 = vpow2.f32 %v1718_v17  ;;  %1506 = vmax.xlane.f32.xlu1 %v10112_v38 }
 0x36c   : > { %8251 = vpow2.f32 %v1748_v61 }
 0x36e   : > { %v1497_v20 = vpop.xlane.xlu1 %1496 }
 0x36f   : > { %v1615_v28 = vsub.f32 %v10013_v48, %v1497_v20  ;;  %v1622_v48 = vsub.f32 %v9792_v5, %v9958_v43  ;;  %v1784_v20 = vmul.f32 1.442695, %v1663_v54  ;;  %v10140_v33 = vpop.xlane.xlu2 %1558 }
 0x371   : > { %v10119_v27 = vpop.eup %8249  ;;  %v1688_v17 = vmul.f32 1.442695, %v1615_v28  ;;  %v1702_v51 = vmul.f32 1.442695, %v1622_v48 }
 0x372   : > { %13551 = vst [vmem:[#allocation83_spill] sm:$0xff] %v10119_v27  ;;  %1846 = vadd.xlane.f32.xlu2 %v10119_v27  ;;  %v10128_v29 = vpop.eup %8251 }
 0x373   : > { %1538 = vmax.xlane.f32.xlu1 %v9960_v52  ;;  %13552 = vst [vmem:[#allocation84_spill] sm:$0xff] %v10128_v29  ;;  %8253 = vpow2.f32 %v1688_v17 }
 0x374   : > { %8255 = vpow2.f32 %v1784_v20 }
 0x376   : > { %v10124_v49 = vpop.xlane.xlu1 %1528 }
 0x379   : > { %v10138_v28 = vpop.eup %8253 }
 0x37a   : > { %1876 = vadd.xlane.f32.xlu2 %v10128_v29  ;;  %v10146_v5 = vpop.eup %8255  ;;  %v1655_v29 = vsub.f32 %v9837_v19, %v10092_v42  ;;  %v1625_v19 = vsub.f32 %v9827_v46, %v10007_v47 }
 0x37b   : > { %1508 = vmax.xlane.f32.xlu1 %v10131_v21 }
 0x37e   : > { %v1591_v61 = vpop.xlane.xlu1 %1590 }
 0x37f   : > { %v1662_v27 = vsub.f32 %v9916_v1, %v1591_v61  ;;  %v10150_v1 = vpop.xlane.xlu2 %1594  ;;  %v10160_v61 = vpop.f32.mrf.mxu2 }
 0x381   : > { %v1782_v39 = vmul.f32 1.442695, %v1662_v27  ;;  %v1607_v27 = vsub.f32 %v9803_v22, %v10086_v6  ;;  %v1768_v22 = vmul.f32 1.442695, %v1655_v29  ;;  %v1708_v29 = vmul.f32 1.442695, %v1625_v19 }
 0x382   : > { %1816 = vadd.xlane.f32.xlu2 %v10138_v28 }
 0x383   : > { %8257 = vpow2.f32 %v1782_v39  ;;  %1602 = vmax.xlane.f32.xlu1 %v9973_v59  ;;  %v1672_v48 = vmul.f32 1.442695, %v1607_v27 }
 0x384   : > { %8259 = vpow2.f32 %v1702_v51 }
 0x386   : > { %v10144_v53 = vpop.xlane.xlu1 %1498 }
 0x387   : > { %v10162_v39 = vpop.xlane.xlu2 %1564 }
 0x389   : > { %v10148_v43 = vpop.eup %8257 }
 0x38a   : > { %13553 = vst [vmem:[#allocation85_spill] sm:$0xff] %v10148_v43  ;;  %v10152_v54 = vpop.eup %8259  ;;  %1912 = vadd.xlane.f32.xlu2 %v10146_v5  ;;  %1910 = vadd.xlane.f32.xlu0 %v10148_v43 }
 0x38b   : > { %13554 = vst [vmem:[#allocation86_spill] sm:$0xff] %v10152_v54  ;;  %1830 = vadd.xlane.f32.xlu1 %v10152_v54 }
 0x38e   : > { %v1531_v51 = vpop.xlane.xlu1 %1530 }
 0x38f   : > { %v1632_v17 = vsub.f32 %v9912_v63, %v1531_v51  ;;  %v10173_v51 = vpop.xlane.xlu2 %1600 }
 0x391   : > { %v1722_v20 = vmul.f32 1.442695, %v1632_v17 }
 0x393   : > { %8261 = vpow2.f32 %v1722_v20  ;;  %1572 = vmax.xlane.f32.xlu1 %v10160_v61  ;;  %v1640_v20 = vsub.f32 %v9846_v14, %v10100_v31  ;;  %v1610_v14 = vsub.f32 %v9887_v56, %v10025_v4 }
 0x394   : > { %8263 = vpow2.f32 %v1672_v48  ;;  %v1563_v48 = vpop.xlane.xlu0 %1562 }
 0x396   : > { %v1561_v54 = vpop.xlane.xlu1 %1560 }
 0x397   : > { %v1647_v13 = vsub.f32 %v9926_v55, %v1561_v54  ;;  %v10187_v46 = vpop.xlane.xlu2 %1540 }
 0x399   : > { %v10168_v6 = vpop.eup %8261  ;;  %v1752_v63 = vmul.f32 1.442695, %v1647_v13 }
 0x39a   : > { %13555 = vst [vmem:[#allocation87_spill] sm:$0xff] %v10168_v6  ;;  %v10170_v27 = vpop.eup %8263  ;;  %1850 = vadd.xlane.f32.xlu0 %v10168_v6 }
 0x39b   : > { %13556 = vst [vmem:[#allocation88_spill] sm:$0xff] %v10170_v27  ;;  %8265 = vpow2.f32 %v1752_v63  ;;  %1800 = vadd.xlane.f32.xlu1 %v10170_v27 }
 0x39c   : > { %8267 = vpow2.f32 %v1768_v22  ;;  %v1738_v22 = vmul.f32 1.442695, %v1640_v20  ;;  %v1678_v20 = vmul.f32 1.442695, %v1610_v14 }
 0x39e   : > { %v1501_v42 = vpop.xlane.xlu1 %1500 }
 0x39f   : > { %v1617_v55 = vsub.f32 %v10054_v60, %v1501_v42 }
 0x3a1   : > { %v10179_v54 = vpop.eup %8265  ;;  %v1692_v13 = vmul.f32 1.442695, %v1617_v55  ;;  %v1648_v55 = vsub.f32 %v9936_v57, %v1563_v48  ;;  %v1658_v48 = vsub.f32 %v9873_v34, %v10107_v50  ;;  %v1628_v34 = vsub.f32 %v9864_v7, %v10064_v8 }
 0x3a2   : > { %13557 = vst [vmem:[#allocation89_spill] sm:$0xff] %v10179_v54  ;;  %v10181_v17 = vpop.eup %8267  ;;  %1880 = vadd.xlane.f32.xlu0 %v10179_v54  ;;  %v1643_v7 = vsub.f32 %v9883_v3, %v10117_v37  ;;  %v1613_v3 = vsub.f32 %v9966_v44, %v10078_v32 }
 0x3a3   : > { %13558 = vst [vmem:[#allocation90_spill] sm:$0xff] %v10181_v17  ;;  %8269 = vpow2.f32 %v1692_v13  ;;  %1896 = vadd.xlane.f32.xlu1 %v10181_v17  ;;  %v1599_v13 = vpop.xlane.xlu0 %1598 }
 0x3a4   : > { %8271 = vpow2.f32 %v1708_v29  ;;  %v10199_v29 = vpop.xlane.xlu2 %1570 }
 0x3a6   : > { %v1533_v47 = vpop.xlane.xlu1 %1532 }
 0x3a7   : > { %v1633_v60 = vsub.f32 %v9922_v30, %v1533_v47  ;;  %v1754_v30 = vmul.f32 1.442695, %v1648_v55 }
 0x3a9   : > { %v10190_v63 = vpop.eup %8269  ;;  %v1724_v19 = vmul.f32 1.442695, %v1633_v60 }
 0x3aa   : > { %v10192_v42 = vpop.eup %8271  ;;  %1820 = vadd.xlane.f32.xlu0 %v10190_v63 }
 0x3ab   : > { %13559 = vst [vmem:[#allocation91_spill] sm:$0xff] %v10192_v42  ;;  %8273 = vpow2.f32 %v1724_v19  ;;  %1836 = vadd.xlane.f32.xlu1 %v10192_v42  ;;  %v10210_v56 = vpop.xlane.xlu0 %1568  ;;  %v1774_v19 = vmul.f32 1.442695, %v1658_v48 }
 0x3ac   : > { %8275 = vpow2.f32 %v1738_v22  ;;  %v10216_v14 = vpop.xlane.xlu2 %1798 }
 0x3ad   : > { %8277 = vpow2.f32 %v1754_v30 }
 0x3ae   : > { %v1503_v31 = vpop.xlane.xlu1 %1502  ;;  %8279 = vpow2.f32 %v1678_v20 }
 0x3af   : > { %v1618_v57 = vsub.f32 %v10069_v36, %v1503_v31  ;;  %v1666_v36 = vsub.f32 %v9952_v2, %v1599_v13 }
 0x3b1   : > { %v10201_v47 = vpop.eup %8273  ;;  %v1694_v22 = vmul.f32 1.442695, %v1618_v57  ;;  %v1790_v50 = vmul.f32 1.442695, %v1666_v36  ;;  %v1714_v57 = vmul.f32 1.442695, %v1628_v34 }
 0x3b2   : > { %13560 = vst [vmem:[#allocation92_spill] sm:$0xff] %v10201_v47  ;;  %v10203_v60 = vpop.eup %8275  ;;  %1852 = vadd.xlane.f32.xlu2 %v10201_v47 }
 0x3b3   : > { %13561 = vst [vmem:[#allocation93_spill] sm:$0xff] %v10203_v60  ;;  %1866 = vadd.xlane.f32.xlu1 %v10203_v60  ;;  %v10214_v55 = vpop.eup %8277  ;;  %8281 = vpow2.f32 %v1694_v22  ;;  %v10225_v30 = vpop.xlane.xlu0 %1604  ;;  %v1744_v22 = vmul.f32 1.442695, %v1643_v7 }
 0x3b4   : > { %13562 = vst [vmem:[#allocation94_spill] sm:$0xff] %v10214_v55  ;;  %v10218_v42 = vpop.eup %8279  ;;  %8283 = vpow2.f32 %v1774_v19  ;;  %v10233_v13 = vpop.xlane.xlu2 %1894 }
 0x3b5   : > { %13563 = vst [vmem:[#allocation95_spill] sm:$0xff] %v10218_v42  ;;  %8285 = vpow2.f32 %v1790_v50 }
 0x3b6   : > { %v10212_v4 = vpop.xlane.xlu1 %1534 }
 0x3b9   : > { %v10228_v48 = vpop.eup %8281 }
 0x3ba   : > { %1882 = vadd.xlane.f32.xlu2 %v10214_v55  ;;  %v10230_v2 = vpop.eup %8283 }
 0x3bb   : > { %1806 = vadd.xlane.f32.xlu1 %v10218_v42  ;;  %13564 = vst [vmem:[#allocation96_spill] sm:$0xff] %v10230_v2  ;;  %v10244_v36 = vpop.xlane.xlu0 %1832 }
 0x3bc   : > { %13565 = vst [vmem:[#allocation97_spill] sm:$0xff] %v10244_v36  ;;  %v10253_v37 = vpop.xlane.xlu2 %1834 }
 0x3bd   : > { %13567 = vst [vmem:[#allocation99_spill] sm:$0xff] %v10253_v37 }
 0x3be   : > { %v1597_v31 = vpop.xlane.xlu1 %1596 }
 0x3bf   : > { %v1665_v20 = vsub.f32 %v9943_v23, %v1597_v31  ;;  %v10240_v23 = vpop.eup %8285  ;;  %v1684_v31 = vmul.f32 1.442695, %v1613_v3 }
 0x3c1   : > { %v1788_v60 = vmul.f32 1.442695, %v1665_v20 }
 0x3c2   : > { %1822 = vadd.xlane.f32.xlu2 %v10228_v48 }
 0x3c3   : > { %8287 = vpow2.f32 %v1788_v60  ;;  %1902 = vadd.xlane.f32.xlu1 %v10230_v2  ;;  %v10258_v7 = vpop.xlane.xlu0 %1862 }
 0x3c4   : > { %8289 = vpow2.f32 %v1714_v57  ;;  %13569 = vst [vmem:[#allocation101_spill] sm:$0xff] %v10258_v7  ;;  %v10263_v44 = vpop.xlane.xlu2 %1864 }
 0x3c5   : > { %8291 = vpow2.f32 %v1744_v22  ;;  %v1661_v22 = vsub.f32 %v9907_v9, %v10126_v26  ;;  %13570 = vst [vmem:[#allocation102_spill] sm:$0xff] %v10263_v44  ;;  %v1631_v9 = vsub.f32 %v9900_v15, %v10124_v49  ;;  %v1646_v15 = vsub.f32 %v9914_v62, %v10140_v33 }
 0x3c6   : > { %v10238_v8 = vpop.xlane.xlu1 %1504  ;;  %v1616_v62 = vsub.f32 %v10037_v11, %v10144_v53  ;;  %v1664_v11 = vsub.f32 %v9934_v41, %v10150_v1  ;;  %v1634_v41 = vsub.f32 %v9932_v18, %v10212_v4  ;;  %v1649_v18 = vsub.f32 %v9945_v12, %v10162_v39 }
 0x3c7   : > { %v1780_v17 = vmul.f32 1.442695, %v1661_v22  ;;  %v1619_v12 = vsub.f32 %v10090_v24, %v10238_v8 }
 0x3c9   : > { %v10242_v19 = vpop.eup %8287 }
 0x3ca   : > { %v10246_v34 = vpop.eup %8289  ;;  %1918 = vadd.xlane.f32.xlu2 %v10240_v23  ;;  %1916 = vadd.xlane.f32.xlu0 %v10242_v19 }
 0x3cb   : > { %13566 = vst [vmem:[#allocation98_spill] sm:$0xff] %v10246_v34  ;;  %1842 = vadd.xlane.f32.xlu1 %v10246_v34  ;;  %v10256_v57 = vpop.eup %8291  ;;  %v10274_v26 = vpop.xlane.xlu0 %1802 }
 0x3cc   : > { %13568 = vst [vmem:[#allocation100_spill] sm:$0xff] %v10256_v57 }
 0x3ce   : > { %v1537_v60 = vpop.xlane.xlu1 %1536 }
 0x3cf   : > { %v1635_v50 = vsub.f32 %v9949_v58, %v1537_v60 }
 0x3d1   : > { %v1728_v20 = vmul.f32 1.442695, %v1635_v50 }
 0x3d3   : > { %8293 = vpow2.f32 %v1728_v20  ;;  %1872 = vadd.xlane.f32.xlu1 %v10256_v57  ;;  %v10279_v20 = vpop.xlane.xlu2 %1804  ;;  %v10287_v49 = vpop.xlane.xlu0 %1898 }
 0x3d4   : > { %8295 = vpow2.f32 %v1684_v31 }
 0x3d6   : > { %v1567_v36 = vpop.xlane.xlu1 %1566 }
 0x3d7   : > { %v1650_v32 = vsub.f32 %v9954_v16, %v1567_v36  ;;  %v1720_v36 = vmul.f32 1.442695, %v1631_v9 }
 0x3d9   : > { %v10266_v58 = vpop.eup %8293  ;;  %v1758_v3 = vmul.f32 1.442695, %v1650_v32 }
 0x3da   : > { %13571 = vst [vmem:[#allocation103_spill] sm:$0xff] %v10266_v58  ;;  %v10268_v60 = vpop.eup %8295  ;;  %1856 = vadd.xlane.f32.xlu0 %v10266_v58 }
 0x3db   : > { %8297 = vpow2.f32 %v1758_v3  ;;  %1812 = vadd.xlane.f32.xlu1 %v10268_v60  ;;  %v1750_v3 = vmul.f32 1.442695, %v1646_v15  ;;  %v10297_v7 = vpop.xlane.xlu2 %1900  ;;  %v1690_v15 = vmul.f32 1.442695, %v1616_v62  ;;  %v1786_v62 = vmul.f32 1.442695, %v1664_v11 }
 0x3dc   : > { %8299 = vpow2.f32 %v1780_v17  ;;  %13575 = vst [vmem:[#allocation107_spill] sm:$0xff] %v10297_v7  ;;  %v1726_v11 = vmul.f32 1.442695, %v1634_v41 }
 0x3de   : > { %v1507_v50 = vpop.xlane.xlu1 %1506 }
 0x3df   : > { %v1620_v16 = vsub.f32 %v10112_v38, %v1507_v50 }
 0x3e1   : > { %v10277_v31 = vpop.eup %8297  ;;  %v1698_v22 = vmul.f32 1.442695, %v1620_v16 }
 0x3e2   : > { %13572 = vst [vmem:[#allocation104_spill] sm:$0xff] %v10277_v31  ;;  %v10281_v32 = vpop.eup %8299  ;;  %1886 = vadd.xlane.f32.xlu0 %v10277_v31 }
 0x3e3   : > { %13573 = vst [vmem:[#allocation105_spill] sm:$0xff] %v10281_v32  ;;  %8301 = vpow2.f32 %v1698_v22  ;;  %1908 = vadd.xlane.f32.xlu1 %v10281_v32  ;;  %v1651_v22 = vsub.f32 %v9964_v45, %v10210_v56  ;;  %v10310_v56 = vpop.xlane.xlu2 %1840 }
 0x3e4   : > { %8303 = vpow2.f32 %v1720_v36  ;;  %13578 = vst [vmem:[#allocation110_spill] sm:$0xff] %v10310_v56 }
 0x3e5   : > { %v1760_v36 = vmul.f32 1.442695, %v1651_v22 }
 0x3e6   : > { %v1539_v38 = vpop.xlane.xlu1 %1538 }
 0x3e7   : > { %v1636_v17 = vsub.f32 %v9960_v52, %v1539_v38  ;;  %v10302_v52 = vpop.xlane.xlu0 %1838 }
 0x3e8   : > { %13576 = vst [vmem:[#allocation108_spill] sm:$0xff] %v10302_v52 }
 0x3e9   : > { %v10290_v9 = vpop.eup %8301  ;;  %v1730_v50 = vmul.f32 1.442695, %v1636_v17 }
 0x3ea   : > { %v10292_v16 = vpop.eup %8303  ;;  %1826 = vadd.xlane.f32.xlu0 %v10290_v9 }
 0x3eb   : > { %13574 = vst [vmem:[#allocation106_spill] sm:$0xff] %v10292_v16  ;;  %8305 = vpow2.f32 %v1730_v50  ;;  %1848 = vadd.xlane.f32.xlu1 %v10292_v16  ;;  %v224_v16 = vld [vmem:[%s13269_s2 + $0x80] sm:$0xff] }
 0x3ec   : > { %8307 = vpow2.f32 %v1750_v3 }
 0x3ed   : > { %8309 = vpow2.f32 %v1760_v36  ;;  %v1669_v36 = vsub.f32 %v9981_v35, %v10225_v30 }
 0x3ee   : > { %v1509_v33 = vpop.xlane.xlu1 %1508  ;;  %8311 = vpow2.f32 %v1690_v15 }
 0x3ef   : > { %v1621_v45 = vsub.f32 %v10131_v21, %v1509_v33  ;;  %v10315_v50 = vpop.xlane.xlu0 %1868  ;;  %v1796_v15 = vmul.f32 1.442695, %v1669_v36 }
 0x3f0   : > { %13579 = vst [vmem:[#allocation111_spill] sm:$0xff] %v10315_v50 }
 0x3f1   : > { %v10304_v38 = vpop.eup %8305  ;;  %v1700_v53 = vmul.f32 1.442695, %v1621_v45 }
 0x3f2   : > { %v10306_v17 = vpop.eup %8307  ;;  %1858 = vadd.xlane.f32.xlu2 %v10304_v38 }
 0x3f3   : > { %13577 = vst [vmem:[#allocation109_spill] sm:$0xff] %v10306_v17  ;;  %1878 = vadd.xlane.f32.xlu1 %v10306_v17  ;;  %v10318_v44 = vpop.eup %8309  ;;  %8313 = vpow2.f32 %v1700_v53 }
 0x3f4   : > { %13580 = vst [vmem:[#allocation112_spill] sm:$0xff] %v10318_v44  ;;  %v10320_v33 = vpop.eup %8311 }
 0x3f6   : > { %v1603_v3 = vpop.xlane.xlu1 %1602 }
 0x3f7   : > { %v1668_v22 = vsub.f32 %v9973_v59, %v1603_v3  ;;  %v10328_v59 = vpop.xlane.xlu2 %1870  ;;  %v10336_v3 = vpop.xlane.xlu0 %1808 }
 0x3f8   : > { %13581 = vst [vmem:[#allocation113_spill] sm:$0xff] %v10328_v59 }
 0x3f9   : > { %v1794_v21 = vmul.f32 1.442695, %v1668_v22  ;;  %v10332_v45 = vpop.eup %8313 }
 0x3fa   : > { %1888 = vadd.xlane.f32.xlu2 %v10318_v44 }
 0x3fb   : > { %8315 = vpow2.f32 %v1794_v21  ;;  %1818 = vadd.xlane.f32.xlu1 %v10320_v33 }
 0x3fc   : > { %8317 = vpow2.f32 %v1786_v62  ;;  %v1756_v62 = vmul.f32 1.442695, %v1649_v18 }
 0x3fd   : > { %8319 = vpow2.f32 %v1796_v15 }
 0x3fe   : > { %v10330_v1 = vpop.xlane.xlu1 %1830  ;;  %8321 = vpow2.f32 %v1726_v11 }
 0x3ff   : > { %13582 = vst [vmem:[#allocation114_spill] sm:$0xff] %v10330_v1  ;;  %v10345_v30 = vpop.xlane.xlu2 %1810  ;;  %v10350_v36 = vpop.xlane.xlu0 %1904  ;;  %v13592_v1 = vld [vmem:[#allocation64_spill] sm:$0xff] }
 0x400   : > { %13583 = vst [vmem:[#allocation115_spill] sm:$0xff] %v10350_v36  ;;  %v1637_v59 = vsub.f32 %v13592_v1, %v10187_v46 }
 0x401   : > { %v10334_v53 = vpop.eup %8315 }
 0x402   : > { %v10338_v35 = vpop.eup %8317  ;;  %1828 = vadd.xlane.f32.xlu2 %v10332_v45  ;;  %1922 = vadd.xlane.f32.xlu0 %v10334_v53  ;;  %v1732_v54 = vmul.f32 1.442695, %v1637_v59 }
 0x403   : > { %1914 = vadd.xlane.f32.xlu1 %v10338_v35  ;;  %v10348_v21 = vpop.eup %8319 }
 0x404   : > { %v10352_v50 = vpop.eup %8321 }
 0x406   : > { %v1573_v4 = vpop.xlane.xlu1 %1572 }
 0x407   : > { %v1653_v22 = vsub.f32 %v10160_v61, %v1573_v4  ;;  %v1696_v61 = vmul.f32 1.442695, %v1619_v12  ;;  %v10362_v11 = vpop.xlane.xlu2 %1906  ;;  %v10364_v18 = vpop.xlane.xlu0 %1844 }
 0x408   : > { %13586 = vst [vmem:[#allocation118_spill] sm:$0xff] %v10364_v18 }
 0x409   : > { %v1764_v41 = vmul.f32 1.442695, %v1653_v22  ;;  %v13588_v22 = vld [vmem:[#allocation63_spill] sm:$0xff] }
 0x40a   : > { %1924 = vadd.xlane.f32.xlu2 %v10348_v21 }
 0x40b   : > { %8323 = vpow2.f32 %v1764_v41  ;;  %1854 = vadd.xlane.f32.xlu1 %v10352_v50 }
 0x40c   : > { %8325 = vpow2.f32 %v1756_v62  ;;  %v1667_v62 = vsub.f32 %v13588_v22, %v10173_v51  ;;  %v13595_v22 = vld [vmem:[#allocation65_spill] sm:$0xff] }
 0x40d   : > { %8327 = vpow2.f32 %v1696_v61 }
 0x40e   : > { %v10358_v39 = vpop.xlane.xlu1 %1800  ;;  %v1792_v8 = vmul.f32 1.442695, %v1667_v62  ;;  %v1652_v62 = vsub.f32 %v13595_v22, %v10199_v29  ;;  %v13598_v29 = vld [vmem:[#allocation5_spill] sm:$0xff]  ;;  %v13599_v22 = vld [vmem:[#allocation6_spill] sm:$0xff] }
 0x40f   : > { %13584 = vst [vmem:[#allocation116_spill] sm:$0xff] %v10358_v39  ;;  %v10374_v41 = vpop.xlane.xlu2 %1846  ;;  %v10378_v57 = vpop.xlane.xlu0 %1874 }
 0x410   : > { %13590 = vst [vmem:[#allocation120_spill] sm:$0xff] %v10374_v41  ;;  %8329 = vpow2.f32 %v1792_v8  ;;  %v1762_v8 = vmul.f32 1.442695, %v1652_v62  ;;  %v13600_v62 = vld [vmem:[#allocation7_spill] sm:$0xff] }
 0x411   : > { %v10360_v15 = vpop.eup %8323  ;;  %13591 = vst [vmem:[#allocation121_spill] sm:$0xff] %v10378_v57  ;;  %8331 = vpow2.f32 %v1732_v54 }
 0x412   : > { %13585 = vst [vmem:[#allocation117_spill] sm:$0xff] %v10360_v15  ;;  %v10366_v4 = vpop.eup %8325  ;;  %1892 = vadd.xlane.f32.xlu0 %v10360_v15  ;;  %8333 = vpow2.f32 %v1762_v8 }
 0x413   : > { %13587 = vst [vmem:[#allocation119_spill] sm:$0xff] %v10366_v4  ;;  %1884 = vadd.xlane.f32.xlu1 %v10366_v4  ;;  %v10376_v12 = vpop.eup %8327 }
 0x416   : > { %v10372_v24 = vpop.xlane.xlu1 %1896  ;;  %v10385_v51 = vpop.eup %8329 }
 0x417   : > { %13589 = vst [vmem:[#allocation63_spill] sm:$0xff] %v10372_v24  ;;  %v10387_v61 = vpop.xlane.xlu2 %1876  ;;  %v10392_v17 = vpop.xlane.xlu0 %1814 }
 0x418   : > { %13594 = vst [vmem:[#allocation122_spill] sm:$0xff] %v10387_v61  ;;  %v10396_v34 = vpop.eup %8331 }
 0x419   : > { %v10405_v54 = vpop.eup %8333 }
 0x41a   : > { %13597 = vst [vmem:[#allocation123_spill] sm:$0xff] %v10405_v54 }
 0x41b   : > { %1824 = vadd.xlane.f32.xlu1 %v10376_v12 }
 0x41e   : > { %v10383_v37 = vpop.xlane.xlu1 %1836 }
 0x41f   : > { %13593 = vst [vmem:[#allocation64_spill] sm:$0xff] %v10383_v37  ;;  %v10399_v46 = vpop.xlane.xlu2 %1816  ;;  %v10401_v59 = vpop.xlane.xlu0 %1910  ;;  %v734_v37 = vadd.f32 %v13599_v22, %v13598_v29 }
 0x423   : > { %1920 = vadd.xlane.f32.xlu1 %v10385_v51 }
 0x426   : > { %v10394_v57 = vpop.xlane.xlu1 %1866 }
 0x427   : > { %13596 = vst [vmem:[#allocation65_spill] sm:$0xff] %v10394_v57  ;;  %v785_v57 = vadd.f32 %v13600_v62, %v13598_v29  ;;  %v10412_v27 = vpop.xlane.xlu0 %1850  ;;  %v10416_v8 = vpop.xlane.xlu2 %1912  ;;  %v218_v29 = vld [vmem:[%s13269_s2 + $0x50] sm:$0xff] }
 0x429   : > { %v7787_v61 = vpack.i.bf16 %v785_v57, %v734_v37  ;;  %v221_v57 = vld [vmem:[%s13269_s2 + $0x68] sm:$0xff] }
 0x42b   : > { %1860 = vadd.xlane.f32.xlu1 %v10396_v34 }
 0x42e   : > { %v10403_v1 = vpop.xlane.xlu1 %1806 }
 0x42f   : > { %v10420_v52 = vpop.xlane.xlu0 %1880  ;;  %v10422_v55 = vpop.xlane.xlu2 %1852 }
 0x430   : > { %13603 = vst [vmem:[#allocation7_spill] sm:$0xff] %v10420_v52 }
 0x433   : > { %1890 = vadd.xlane.f32.xlu1 %v10405_v54 }
 0x436   : > { %v10414_v24 = vpop.xlane.xlu1 %1902 }
 0x437   : > { %13601 = vst [vmem:[#allocation5_spill] sm:$0xff] %v10414_v24  ;;  %v1821_v22 = vpop.xlane.xlu0 %1820  ;;  %v10426_v4 = vpop.xlane.xlu2 %1882 }
 0x438   : > { %13605 = vst [vmem:[#allocation125_spill] sm:$0xff] %v10426_v4 }
 0x43b   : > { %7788 = vxpose.xlu0.b32.start.end [1/1] (short) %v7787_v61, 128 }
 0x43e   : > { %v10418_v56 = vpop.xlane.xlu1 %1842 }
 0x43f   : > { %13602 = vst [vmem:[#allocation6_spill] sm:$0xff] %v10418_v56  ;;  %v10433_v37 = vpop.xlane.xlu0 %1916  ;;  %v1823_v61 = vpop.xlane.xlu2 %1822 }
 0x446   : > { %v10424_v2 = vpop.xlane.xlu1 %1872 }
 0x447   : > { %13604 = vst [vmem:[#allocation124_spill] sm:$0xff] %v10424_v2 }
 0x44c   : > { %511 = vperm.xlu1 %7539, %v218_v29   ;;  %v1919_v29 = vpop.xlane.xlu2 %1918 }
 0x44d   : > { %v10440_v2 = vpop.xlane.xlu0 %1856 }
 0x44e   : > { %v10431_v62 = vpop.xlane.xlu1 %1812 }
 0x454   : > { %526 = vperm.xlu1 %7539, %v221_v57  }
 0x455   : > { %v10447_v39 = vpop.xlane.xlu0 %1886 }
 0x456   : > { %v10438_v52 = vpop.xlane.xlu1 %1908  ;;  %13607 = vst [vmem:[#allocation127_spill] sm:$0xff] %v10447_v39 }
 0x45c   : > { %541 = vperm.xlu1 %7539, %v224_v16  }
 0x45d   : > { %v1827_v7 = vpop.xlane.xlu0 %1826 }
 0x45e   : > { %v10445_v56 = vpop.xlane.xlu1 %1848  ;;  %8335 = vrcp.f32 %v1827_v7 }
 0x45f   : > { %13606 = vst [vmem:[#allocation126_spill] sm:$0xff] %v10445_v56 }
 0x464   : > { %v8336_v6 = vpop.eup %8335 }
 0x465   : > { %v10449_v18 = vpop.xlane.xlu2 %1858  ;;  %v2004_v16 = vmul.f32 %v8336_v6, %v10290_v9 }
 0x466   : > { %v10451_v31 = vpop.xlane.xlu1 %1878 }
 0x467   : > { %13608 = vst [vmem:[#allocation128_spill] sm:$0xff] %v10451_v31  ;;  %v2068_v56 = vpack.c.bf16 %v2004_v16, %v2004_v16 }
 0x469   : > { %v2148_v15 = vunpack.c.l.b16 %v2068_v56 }
 0x46d   : > { %v10453_v57 = vpop.xlane.xlu2 %1888 }
 0x46e   : > { %v1819_v4 = vpop.xlane.xlu1 %1818 }
 0x475   : > { %v1829_v32 = vpop.xlane.xlu2 %1828  ;;  %v1923_v44 = vpop.xlane.xlu0 %1922 }
 0x476   : > { %8337 = vrcp.f32 %v1829_v32  ;;  %v1915_v47 = vpop.xlane.xlu1 %1914 }
 0x477   : > { %8339 = vrcp.f32 %v1923_v44 }
 0x47c   : > { %v8338_v42 = vpop.eup %8337 }
 0x47d   : > { %v2005_v54 = vmul.f32 %v8338_v42, %v10332_v45  ;;  %v1925_v24 = vpop.xlane.xlu2 %1924  ;;  %v8340_v41 = vpop.eup %8339 }
 0x47e   : > { %8341 = vrcp.f32 %v1925_v24  ;;  %v10457_v31 = vpop.xlane.xlu1 %1854  ;;  %v2052_v7 = vmul.f32 %v8340_v41, %v10334_v53 }
 0x47f   : > { %v2069_v36 = vpack.c.bf16 %v2005_v54, %v2005_v54  ;;  %8343 = vrcp.f32 %v10216_v14 }
 0x480   : > { %v2116_v58 = vpack.c.bf16 %v2052_v7, %v2052_v7  ;;  %8345 = vrcp.f32 %v1823_v61 }
 0x481   : > { %v2149_v39 = vunpack.c.l.b16 %v2069_v36  ;;  %8347 = vrcp.f32 %v10233_v13 }
 0x482   : > { %v2331_v42 = vunpack.c.l.b16 %v2116_v58  ;;  %8349 = vrcp.f32 %v10274_v26 }
 0x483   : > { %v2157_v43 = vpack.c.b16 %v2149_v39, %v2148_v15  ;;  %8351 = vrcp.f32 %v10279_v20 }
 0x484   : > { %v8342_v32 = vpop.eup %8341  ;;  %8353 = vrcp.f32 %v10287_v49 }
 0x485   : > { %v2053_v44 = vmul.f32 %v8342_v32, %v10348_v21  ;;  %2166 = vmatpush.bf16.xpose.msra.mxu0 %v2157_v43  ;;  %v10468_v53 = vpop.eup %8343  ;;  %8355 = vrcp.f32 %v1819_v4 }
 0x486   : > { %v10461_v6 = vpop.xlane.xlu1 %1884  ;;  %v8346_v21 = vpop.eup %8345 }
 0x487   : > { %v2117_v9 = vpack.c.bf16 %v2053_v44, %v2053_v44  ;;  %v10470_v14 = vpop.eup %8347  ;;  %v2002_v26 = vmul.f32 %v8346_v21, %v10228_v48 }
 0x488   : > { %v10472_v58 = vpop.eup %8349 }
 0x489   : > { %v2332_v45 = vunpack.c.l.b16 %v2117_v9  ;;  %v10474_v13 = vpop.eup %8351  ;;  %v2066_v24 = vpack.c.bf16 %v2002_v26, %v2002_v26 }
 0x48a   : > { %v10478_v20 = vpop.eup %8353 }
 0x48b   : > { %v2340_v56 = vpack.c.b16 %v2332_v45, %v2331_v42  ;;  %v8356_v49 = vpop.eup %8355 }
 0x48d   : > { %2349 = vmatpush.bf16.xpose.msra.mxu3 %v2340_v56 }
 0x48e   : > { %v1825_v43 = vpop.xlane.xlu1 %1824 }
 0x48f   : > { %8357 = vrcp.f32 %v1825_v43 }
 0x490   : > { %8359 = vrcp.f32 %v1821_v22 }
 0x491   : > { %8361 = vrcp.f32 %v1919_v29 }
 0x492   : > { %8363 = vrcp.f32 %v10336_v3 }
 0x493   : > { %8365 = vrcp.f32 %v10345_v30  ;;  %v2000_v30 = vmul.f32 %v8356_v49, %v10320_v33 }
 0x494   : > { %8367 = vrcp.f32 %v10362_v11 }
 0x495   : > { %v8358_v36 = vpop.eup %8357  ;;  %8369 = vrcp.f32 %v10392_v17  ;;  %v2064_v29 = vpack.c.bf16 %v2000_v30, %v2000_v30 }
 0x496   : > { %v8360_v39 = vpop.eup %8359  ;;  %8371 = vrcp.f32 %v10399_v46  ;;  %v1921_v15 = vpop.xlane.xlu1 %1920  ;;  %v2003_v4 = vmul.f32 %v8358_v36, %v10376_v12  ;;  %v2146_v46 = vunpack.c.l.b16 %v2066_v24 }
 0x497   : > { %v8362_v3 = vpop.eup %8361  ;;  %8373 = vrcp.f32 %v1921_v15  ;;  %v2001_v17 = vmul.f32 %v8360_v39, %v10190_v63  ;;  %v2144_v9 = vunpack.c.l.b16 %v2064_v29  ;;  %v13612_v29 = vld [vmem:[#allocation117_spill] sm:$0xff] }
 0x498   : > { %v10485_v48 = vpop.eup %8363  ;;  %8375 = vrcp.f32 %v1915_v47  ;;  %v2067_v41 = vpack.c.bf16 %v2003_v4, %v2003_v4  ;;  %v2050_v22 = vmul.f32 %v8362_v3, %v10240_v23 }
 0x499   : > { %v8366_v54 = vpop.eup %8365  ;;  %8377 = vrcp.f32 %v10449_v18  ;;  %v1893_v18 = vpop.xlane.xlu0 %1892  ;;  %v2065_v7 = vpack.c.bf16 %v2001_v17, %v2001_v17 }
 0x49a   : > { %v10490_v11 = vpop.eup %8367  ;;  %8379 = vrcp.f32 %v10433_v37  ;;  %v2147_v12 = vunpack.c.l.b16 %v2067_v41  ;;  %v2114_v32 = vpack.c.bf16 %v2050_v22, %v2050_v22  ;;  %v1996_v56 = vmul.f32 %v8366_v54, %v10074_v0  ;;  %v13610_v22 = vld [vmem:[#allocation85_spill] sm:$0xff] }
 0x49b   : > { %v8370_v61 = vpop.eup %8369  ;;  %8381 = vrcp.f32 %v10416_v8  ;;  %v2145_v21 = vunpack.c.l.b16 %v2065_v7  ;;  %v10510_v0 = vmul.f32 %v10468_v53, %v9988_v25 }
 0x49c   : > { %v8372_v47 = vpop.eup %8371  ;;  %8383 = vrcp.f32 %v10401_v59  ;;  %v2156_v33 = vpack.c.b16 %v2147_v12, %v2146_v46  ;;  %v2329_v26 = vunpack.c.l.b16 %v2114_v32  ;;  %v2060_v25 = vpack.c.bf16 %v1996_v56, %v1996_v56  ;;  %v13609_v46 = vld [vmem:[#allocation103_spill] sm:$0xff] }
 0x49d   : > { %v8374_v16 = vpop.eup %8373  ;;  %8385 = vrcp.f32 %v10431_v62  ;;  %v1999_v8 = vmul.f32 %v8372_v47, %v10138_v28 }
 0x49e   : > { %v8376_v63 = vpop.eup %8375  ;;  %8387 = vrcp.f32 %v10457_v31  ;;  %2167 = vmatpush.bf16.xpose.msra.mxu0 %v2156_v33  ;;  %v1861_v37 = vpop.xlane.xlu1 %1860  ;;  %v2051_v23 = vmul.f32 %v8374_v16, %v10385_v51  ;;  %v1998_v31 = vmul.f32 %v8370_v61, %v10110_v10  ;;  %v2155_v10 = vpack.c.b16 %v2145_v21, %v2144_v9  ;;  %v13611_v33 = vld [vmem:[#allocation127_spill] sm:$0xff] }
 0x49f   : > { %v8378_v44 = vpop.eup %8377  ;;  %8389 = vrcp.f32 %v1861_v37  ;;  %v2048_v45 = vmul.f32 %v8376_v63, %v10338_v35  ;;  %v13617_v21 = vld [vmem:[#allocation123_spill] sm:$0xff] }
 0x4a0   : > { %v8380_v59 = vpop.eup %8379  ;;  %8391 = vrcp.f32 %v10440_v2  ;;  %v2115_v42 = vpack.c.bf16 %v2051_v23, %v2051_v23  ;;  %v2020_v51 = vmul.f32 %v8378_v44, %v10304_v38  ;;  %v2063_v2 = vpack.c.bf16 %v1999_v8, %v1999_v8 }
 0x4a1   : > { %v8382_v62 = vpop.eup %8381  ;;  %8393 = vrcp.f32 %v1893_v18  ;;  %v2049_v36 = vmul.f32 %v8380_v59, %v10242_v19  ;;  %v2062_v38 = vpack.c.bf16 %v1998_v31, %v1998_v31  ;;  %v2112_v4 = vpack.c.bf16 %v2048_v45, %v2048_v45  ;;  %v13613_v18 = vld [vmem:[#allocation115_spill] sm:$0xff] }
 0x4a2   : > { %v8384_v43 = vpop.eup %8383  ;;  %v2330_v49 = vunpack.c.l.b16 %v2115_v42  ;;  %8395 = vrcp.f32 %v10412_v27  ;;  %v10515_v27 = vmul.f32 %v10474_v13, %v10027_v40  ;;  %v2084_v19 = vpack.c.bf16 %v2020_v51, %v2020_v51  ;;  %v13615_v42 = vld [vmem:[#allocation120_spill] sm:$0xff] }
 0x4a3   : > { %v8386_v28 = vpop.eup %8385  ;;  %8397 = vrcp.f32 %v10422_v55  ;;  %v2143_v41 = vunpack.c.l.b16 %v2063_v2  ;;  %v2047_v30 = vmul.f32 %v8382_v62, %v10146_v5  ;;  %v2142_v17 = vunpack.c.l.b16 %v2062_v38  ;;  %v13619_v2 = vld [vmem:[#allocation95_spill] sm:$0xff] }
 0x4a4   : > { %v8388_v39 = vpop.eup %8387  ;;  %v2339_v15 = vpack.c.b16 %v2330_v49, %v2329_v26  ;;  %8399 = vrcp.f32 %v10403_v1  ;;  %v2113_v1 = vpack.c.bf16 %v2049_v36, %v2049_v36  ;;  %v1997_v13 = vmul.f32 %v8386_v28, %v10268_v60  ;;  %v13618_v49 = vld [vmem:[#allocation126_spill] sm:$0xff] }
 0x4a5   : > { %v8390_v35 = vpop.eup %8389  ;;  %8401 = vrcp.f32 %v10438_v52  ;;  %v2018_v52 = vmul.f32 %v8388_v39, %v10352_v50  ;;  %v2046_v61 = vmul.f32 %v8384_v43, %v13610_v22  ;;  %v2209_v63 = vunpack.c.l.b16 %v2084_v19  ;;  %v13614_v50 = vld [vmem:[#allocation76_spill] sm:$0xff]  ;;  %v13616_v43 = vld [vmem:[#allocation5_spill] sm:$0xff]  ;;  %v13627_v22 = vld [vmem:[#allocation79_spill] sm:$0xff] }
 0x4a6   : > { %v8392_v24 = vpop.eup %8391  ;;  %v2021_v55 = vmul.f32 %v8390_v35, %v10396_v34  ;;  %2168 = vmatpush.bf16.xpose.msra.mxu0 %v2155_v10  ;;  %2350 = vmatpush.bf16.xpose.msra.mxu3 %v2339_v15  ;;  %v1891_v3 = vpop.xlane.xlu1 %1890  ;;  %v2327_v34 = vunpack.c.l.b16 %v2112_v4  ;;  %v2328_v60 = vunpack.c.l.b16 %v2113_v1  ;;  %v2111_v37 = vpack.c.bf16 %v2047_v30, %v2047_v30  ;;  %v13620_v39 = vld [vmem:[#allocation92_spill] sm:$0xff]  ;;  %v13624_v30 = vld [vmem:[#allocation125_spill] sm:$0xff] }
 0x4a7   : > { %v8394_v53 = vpop.eup %8393  ;;  %8403 = vrcp.f32 %v1891_v3  ;;  %v2019_v12 = vmul.f32 %v8392_v24, %v13609_v46  ;;  %v10530_v7 = vmul.f32 %v10485_v48, %v13614_v50  ;;  %v2154_v32 = vpack.c.b16 %v2143_v41, %v2142_v17  ;;  %v13623_v41 = vld [vmem:[#allocation105_spill] sm:$0xff]  ;;  %v13626_v46 = vld [vmem:[#allocation104_spill] sm:$0xff] }
 0x4a8   : > { %8405 = vrcp.f32 %v10453_v57  ;;  %v2085_v40 = vpack.c.bf16 %v2021_v55, %v2021_v55  ;;  %v8396_v54 = vpop.eup %8395  ;;  %v2037_v16 = vmul.f32 %v8394_v53, %v13612_v29  ;;  %v2061_v8 = vpack.c.bf16 %v1997_v13, %v1997_v13  ;;  %v13621_v55 = vld [vmem:[#allocation87_spill] sm:$0xff]  ;;  %v13629_v50 = vld [vmem:[#allocation116_spill] sm:$0xff] }
 0x4a9   : > { %v8398_v47 = vpop.eup %8397  ;;  %8407 = vrcp.f32 %v13611_v33  ;;  %v2082_v59 = vpack.c.bf16 %v2018_v52, %v2018_v52  ;;  %v2338_v62 = vpack.c.b16 %v2328_v60, %v2327_v34  ;;  %v2140_v31 = vunpack.c.l.b16 %v2060_v25  ;;  %v13622_v25 = vld [vmem:[#allocation112_spill] sm:$0xff]  ;;  %v13625_v34 = vld [vmem:[#allocation107_spill] sm:$0xff] }
 0x4aa   : > { %v2210_v5 = vunpack.c.l.b16 %v2085_v40  ;;  %v8400_v57 = vpop.eup %8399  ;;  %8409 = vrcp.f32 %v13613_v18  ;;  %v2110_v45 = vpack.c.bf16 %v2046_v61, %v2046_v61  ;;  %v2101_v51 = vpack.c.bf16 %v2037_v16, %v2037_v16 }
 0x4ab   : > { %v8402_v23 = vpop.eup %8401  ;;  %8411 = vrcp.f32 %v13615_v42  ;;  %v2083_v48 = vpack.c.bf16 %v2019_v12, %v2019_v12  ;;  %v2326_v28 = vunpack.c.l.b16 %v2111_v37  ;;  %v1994_v36 = vmul.f32 %v8400_v57, %v13619_v2  ;;  %v13636_v2 = vld [vmem:[#allocation7_spill] sm:$0xff] }
 0x4ac   : > { %v2218_v44 = vpack.c.b16 %v2210_v5, %v2209_v63  ;;  %8413 = vrcp.f32 %v13616_v43  ;;  %v2017_v10 = vmul.f32 %v8398_v47, %v13620_v39  ;;  %v2141_v38 = vunpack.c.l.b16 %v2061_v8  ;;  %v13628_v63 = vld [vmem:[#allocation118_spill] sm:$0xff] }
 0x4ad   : > { %v8404_v9 = vpop.eup %8403  ;;  %8415 = vrcp.f32 %v13618_v49  ;;  %v2207_v4 = vunpack.c.l.b16 %v2082_v59  ;;  %v2325_v19 = vunpack.c.l.b16 %v2110_v45  ;;  %v2016_v3 = vmul.f32 %v8396_v54, %v13621_v55  ;;  %v13631_v8 = vld [vmem:[#allocation6_spill] sm:$0xff]  ;;  %v13635_v49 = vld [vmem:[#allocation96_spill] sm:$0xff] }
 0x4ae   : > { %v8406_v56 = vpop.eup %8405  ;;  %v2036_v26 = vmul.f32 %v8404_v9, %v13617_v21  ;;  %2169 = vmatpush.bf16.xpose.msra.mxu0 %v2154_v32  ;;  %2227 = vmatpush.bf16.xpose.msra.mxu1 %v2218_v44  ;;  %8417 = vrcp.f32 %v10461_v6  ;;  %v2045_v1 = vmul.f32 %v8402_v23, %v13623_v41  ;;  %v2208_v13 = vunpack.c.l.b16 %v2083_v48  ;;  %v13630_v32 = vld [vmem:[#allocation69_spill] sm:$0xff]  ;;  %v13633_v43 = vld [vmem:[#allocation106_spill] sm:$0xff]  ;;  %v13639_v55 = vld [vmem:[#allocation80_spill] sm:$0xff] }
 0x4af   : > { %2351 = vmatpush.bf16.xpose.msra.mxu3 %v2338_v62  ;;  %v8408_v15 = vpop.eup %8407  ;;  %v2035_v53 = vmul.f32 %v8406_v56, %v13622_v25  ;;  %8419 = vrcp.f32 %v13624_v30  ;;  %v2271_v52 = vunpack.c.l.b16 %v2101_v51  ;;  %v2081_v6 = vpack.c.bf16 %v2017_v10, %v2017_v10  ;;  %v13637_v10 = vld [vmem:[#allocation83_spill] sm:$0xff] }
 0x4b0   : > { %v2100_v35 = vpack.c.bf16 %v2036_v26, %v2036_v26  ;;  %v8410_v24 = vpop.eup %8409  ;;  %8421 = vrcp.f32 %v13625_v34  ;;  %v2034_v12 = vmul.f32 %v8408_v15, %v13626_v46  ;;  %v2044_v61 = vmul.f32 %v10490_v11, %v13627_v22 }
 0x4b1   : > { %v8412_v17 = vpop.eup %8411  ;;  %v2153_v54 = vpack.c.b16 %v2141_v38, %v2140_v31  ;;  %v2217_v33 = vpack.c.b16 %v2208_v13, %v2207_v4  ;;  %v2058_v16 = vpack.c.bf16 %v1994_v36, %v1994_v36  ;;  %8423 = vrcp.f32 %v13628_v63  ;;  %v13632_v31 = vld [vmem:[#allocation128_spill] sm:$0xff]  ;;  %v13638_v4 = vld [vmem:[#allocation94_spill] sm:$0xff]  ;;  %v13644_v63 = vld [vmem:[#allocation63_spill] sm:$0xff] }
 0x4b2   : > { %v2270_v40 = vunpack.c.l.b16 %v2100_v35  ;;  %v8414_v47 = vpop.eup %8413  ;;  %v2337_v57 = vpack.c.b16 %v2326_v28, %v2325_v19  ;;  %v2099_v18 = vpack.c.bf16 %v2035_v53, %v2035_v53  ;;  %v2109_v60 = vpack.c.bf16 %v2045_v1, %v2045_v1  ;;  %v13640_v53 = vld [vmem:[#allocation108_spill] sm:$0xff] }
 0x4b3   : > { %v8416_v5 = vpop.eup %8415  ;;  %8425 = vrcp.f32 %v13629_v50  ;;  %v2059_v23 = vpack.c.bf16 %v10530_v7, %v10530_v7  ;;  %v2080_v11 = vpack.c.bf16 %v2016_v3, %v2016_v3  ;;  %v1992_v44 = vmul.f32 %v10472_v58, %v13630_v32  ;;  %v13634_v58 = vld [vmem:[#allocation119_spill] sm:$0xff] }
 0x4b4   : > { %v2279_v29 = vpack.c.b16 %v2271_v52, %v2270_v40  ;;  %v8418_v37 = vpop.eup %8417  ;;  %8427 = vrcp.f32 %v13631_v8  ;;  %v2098_v59 = vpack.c.bf16 %v2034_v12, %v2034_v12  ;;  %v2108_v9 = vpack.c.bf16 %v2044_v61, %v2044_v61 }
 0x4b5   : > { %v2057_v42 = vpack.c.bf16 %v10515_v27, %v10515_v27  ;;  %v8420_v62 = vpop.eup %8419  ;;  %8429 = vrcp.f32 %v13632_v31  ;;  %v2138_v45 = vunpack.c.l.b16 %v2058_v16  ;;  %v2206_v56 = vunpack.c.l.b16 %v2081_v6  ;;  %v13649_v31 = vld [vmem:[#allocation81_spill] sm:$0xff] }
 0x4b6   : > { %2170 = vmatpush.bf16.xpose.msra.mxu0 %v2153_v54  ;;  %2228 = vmatpush.bf16.xpose.msra.mxu1 %v2217_v33  ;;  %v2015_v7 = vmul.f32 %v8416_v5, %v13633_v43  ;;  %v8422_v51 = vpop.eup %8421  ;;  %v2269_v21 = vunpack.c.l.b16 %v2099_v18  ;;  %v2324_v26 = vunpack.c.l.b16 %v2109_v60  ;;  %v2033_v48 = vmul.f32 %v8418_v37, %v13634_v58  ;;  %v13645_v18 = vld [vmem:[#allocation88_spill] sm:$0xff]  ;;  %v13646_v37 = vld [vmem:[#allocation98_spill] sm:$0xff] }
 0x4b7   : > { %2288 = vmatpush.bf16.xpose.msra.mxu2 %v2279_v29  ;;  %2352 = vmatpush.bf16.xpose.msra.mxu3 %v2337_v57  ;;  %v2042_v28 = vmul.f32 %v8414_v47, %v13635_v49  ;;  %8431 = vrcp.f32 %v13636_v2  ;;  %v2139_v36 = vunpack.c.l.b16 %v2059_v23  ;;  %v2205_v39 = vunpack.c.l.b16 %v2080_v11  ;;  %v8424_v15 = vpop.eup %8423  ;;  %v13642_v47 = vld [vmem:[#allocation122_spill] sm:$0xff]  ;;  %v13643_v29 = vld [vmem:[#allocation73_spill] sm:$0xff] }
 0x4b8   : > { %v2014_v27 = vmul.f32 %v8412_v17, %v13637_v10  ;;  %v2268_v35 = vunpack.c.l.b16 %v2098_v59  ;;  %v2323_v38 = vunpack.c.l.b16 %v2108_v9  ;;  %v2032_v19 = vmul.f32 %v8420_v62, %v13638_v4  ;;  %v13641_v17 = vld [vmem:[#allocation110_spill] sm:$0xff]  ;;  %v13647_v23 = vld [vmem:[#allocation121_spill] sm:$0xff] }
 0x4b9   : > { %v2043_v3 = vmul.f32 %v8410_v24, %v13639_v55  ;;  %v8426_v25 = vpop.eup %8425  ;;  %8433 = vrcp.f32 %v13640_v53  ;;  %v2152_v41 = vpack.c.b16 %v2139_v36, %v2138_v45  ;;  %v2216_v1 = vpack.c.b16 %v2206_v56, %v2205_v39 }
 0x4ba   : > { %v2079_v30 = vpack.c.bf16 %v2015_v7, %v2015_v7  ;;  %v8428_v40 = vpop.eup %8427  ;;  %v2278_v13 = vpack.c.b16 %v2269_v21, %v2268_v35  ;;  %v2336_v52 = vpack.c.b16 %v2324_v26, %v2323_v38  ;;  %v2097_v34 = vpack.c.bf16 %v2033_v48, %v2033_v48  ;;  %v13650_v7 = vld [vmem:[#allocation89_spill] sm:$0xff]  ;;  %v13651_v21 = vld [vmem:[#allocation72_spill] sm:$0xff]  ;;  %v13652_v38 = vld [vmem:[#allocation99_spill] sm:$0xff] }
 0x4bb   : > { %v2106_v6 = vpack.c.bf16 %v2042_v28, %v2042_v28  ;;  %v8430_v46 = vpop.eup %8429  ;;  %8435 = vrcp.f32 %v13641_v17  ;;  %v2056_v22 = vpack.c.bf16 %v1992_v44, %v1992_v44  ;;  %v2137_v24 = vunpack.c.l.b16 %v2057_v42  ;;  %v13648_v44 = vld [vmem:[#allocation109_spill] sm:$0xff] }
 0x4bc   : > { %v2078_v61 = vpack.c.bf16 %v2014_v27, %v2014_v27  ;;  %8437 = vrcp.f32 %v13642_v47  ;;  %v2096_v54 = vpack.c.bf16 %v2032_v19, %v2032_v19  ;;  %v2107_v33 = vpack.c.bf16 %v2043_v3, %v2043_v3  ;;  %v13660_v47 = vld [vmem:[#allocation113_spill] sm:$0xff] }
 0x4bd   : > { %v2041_v16 = vmul.f32 %v8422_v51, %v13643_v29  ;;  %v8432_v5 = vpop.eup %8431  ;;  %8439 = vrcp.f32 %v13644_v63  ;;  %v2204_v57 = vunpack.c.l.b16 %v2079_v30  ;;  %v1991_v60 = vmul.f32 %v8426_v25, %v13645_v18  ;;  %v13654_v25 = vld [vmem:[#allocation64_spill] sm:$0xff] }
 0x4be   : > { %2171 = vmatpush.bf16.xpose.msra.mxu0 %v2152_v41  ;;  %2229 = vmatpush.bf16.xpose.msra.mxu1 %v2216_v1  ;;  %v10566_v12 = vpop.permute.xlu1 %511  ;;  %v2012_v50 = vmul.f32 %v8428_v40, %v13646_v37  ;;  %8441 = vrcp.f32 %v13647_v23  ;;  %v2267_v11 = vunpack.c.l.b16 %v2097_v34  ;;  %v2321_v32 = vunpack.c.l.b16 %v2106_v6  ;;  %v13655_v1 = vld [vmem:[#allocation20_spill] sm:$0xff]  ;;  %v13657_v34 = vld [vmem:[#allocation77_spill] sm:$0xff] }
 0x4bf   : > { %2289 = vmatpush.bf16.xpose.msra.mxu2 %v2278_v13  ;;  %2353 = vmatpush.bf16.xpose.msra.mxu3 %v2336_v52  ;;  %v2030_v8 = vmul.f32 %v8430_v46, %v13648_v44  ;;  %v8434_v59 = vpop.eup %8433  ;;  %v2136_v9 = vunpack.c.l.b16 %v2056_v22  ;;  %v2203_v42 = vunpack.c.l.b16 %v2078_v61  ;;  %v2054_v62 = vpack.c.bf16 %v10510_v0, %v10510_v0  ;;  %v13656_v40 = vld [vmem:[#allocation124_spill] sm:$0xff] }
 0x4c0   : > { %v2013_v45 = vmul.f32 %v8424_v15, %v13649_v31  ;;  %v2266_v56 = vunpack.c.l.b16 %v2096_v54  ;;  %v2322_v43 = vunpack.c.l.b16 %v2107_v33  ;;  %v2031_v51 = vmul.f32 %v8432_v5, %v13650_v7  ;;  %v13658_v22 = vld [vmem:[#allocation84_spill] sm:$0xff]  ;;  %v13661_v33 = vld [vmem:[#allocation74_spill] sm:$0xff] }
 0x4c1   : > { %v2040_v26 = vmul.f32 %v10478_v20, %v13651_v21  ;;  %v8436_v58 = vpop.eup %8435  ;;  %v2151_v48 = vpack.c.b16 %v2137_v24, %v2136_v9  ;;  %v2215_v49 = vpack.c.b16 %v2204_v57, %v2203_v42  ;;  %v2055_v28 = vpack.c.bf16 %v1991_v60, %v1991_v60  ;;  %v13653_v20 = vld [vmem:[#allocation67_spill] sm:$0xff]  ;;  %v13659_v24 = vld [vmem:[#allocation90_spill] sm:$0xff] }
 0x4c2   : > { %v2076_v2 = vpack.c.bf16 %v2012_v50, %v2012_v50  ;;  %v8438_v36 = vpop.eup %8437  ;;  %v2277_v39 = vpack.c.b16 %v2267_v11, %v2266_v56  ;;  %v2335_v10 = vpack.c.b16 %v2322_v43, %v2321_v32  ;;  %v2094_v27 = vpack.c.bf16 %v2030_v8, %v2030_v8  ;;  %v13663_v56 = vld [vmem:[#allocation114_spill] sm:$0xff] }
 0x4c3   : > { %v2105_v35 = vpack.c.bf16 %v2041_v16, %v2041_v16  ;;  %v8440_v0 = vpop.eup %8439  ;;  %8443 = vrcp.f32 %v13652_v38  ;;  %v2134_v4 = vunpack.c.l.b16 %v2054_v62  ;;  %v2077_v19 = vpack.c.bf16 %v2013_v45, %v2013_v45  ;;  %v13662_v16 = vld [vmem:[#allocation82_spill] sm:$0xff] }
 0x4c4   : > { %v2038_v55 = vmul.f32 %v10470_v14, %v13653_v20  ;;  %v8442_v3 = vpop.eup %8441  ;;  %8445 = vrcp.f32 %v13654_v25  ;;  %v2095_v53 = vpack.c.bf16 %v2031_v51, %v2031_v51  ;;  %v2104_v41 = vpack.c.bf16 %v2040_v26, %v2040_v26  ;;  %v13664_v43 = vld [vmem:[#allocation30_spill] sm:$0xff] }
 0x4c5   : > { %8447 = vrcp.f32 %v13656_v40  ;;  %v2135_v13 = vunpack.c.l.b16 %v2055_v28  ;;  %v2201_v52 = vunpack.c.l.b16 %v2076_v2  ;;  %v2011_v6 = vmul.f32 %v8436_v58, %v13657_v34  ;;  %v13665_v21 = vld [vmem:[#allocation26_spill] sm:$0xff]  ;;  %v13667_v28 = vld [vmem:[#allocation91_spill] sm:$0xff] }
 0x4c6   : > { %2172 = vmatpush.bf16.xpose.msra.mxu0 %v2151_v48  ;;  %2230 = vmatpush.bf16.xpose.msra.mxu1 %v2215_v49  ;;  %v10582_v15 = vpop.permute.xlu1 %526  ;;  %v2264_v46 = vunpack.c.l.b16 %v2094_v27  ;;  %v2320_v17 = vunpack.c.l.b16 %v2105_v35  ;;  %v2029_v14 = vmul.f32 %v8438_v36, %v13658_v22  ;;  %v2039_v61 = vmul.f32 %v8440_v0, %v13659_v24  ;;  %v13666_v48 = vld [vmem:[#allocation65_spill] sm:$0xff]  ;;  %v13669_v27 = vld [vmem:[#allocation100_spill] sm:$0xff]  ;;  %v13670_v0 = vld [vmem:[#allocation111_spill] sm:$0xff] }
 0x4c7   : > { %2290 = vmatpush.bf16.xpose.msra.mxu2 %v2277_v39  ;;  %2354 = vmatpush.bf16.xpose.msra.mxu3 %v2335_v10  ;;  %v642_v30 = vadd.f32 %v13655_v1, %v10582_v15  ;;  %8449 = vrcp.f32 %v13660_v47  ;;  %v2202_v54 = vunpack.c.l.b16 %v2077_v19  ;;  %v2010_v29 = vmul.f32 %v8434_v59, %v13661_v33  ;;  %v13668_v36 = vld [vmem:[#allocation97_spill] sm:$0xff]  ;;  %v13671_v19 = vld [vmem:[#allocation70_spill] sm:$0xff]  ;;  %v13673_v22 = vld [vmem:[#allocation24_spill] sm:$0xff] }
 0x4c8   : > { %v2028_v5 = vmul.f32 %v8442_v3, %v13662_v16  ;;  %v2265_v63 = vunpack.c.l.b16 %v2095_v53  ;;  %v2319_v57 = vunpack.c.l.b16 %v2104_v41  ;;  %v2150_v37 = vpack.c.b16 %v2135_v13, %v2134_v4  ;;  %v13672_v53 = vld [vmem:[#allocation78_spill] sm:$0xff]  ;;  %v13674_v24 = vld [vmem:[#allocation28_spill] sm:$0xff] }
 0x4c9   : > { %v2554_v18 = vpack.c.bf16 %v642_v30, %v642_v30  ;;  %v8444_v60 = vpop.eup %8443  ;;  %v2214_v50 = vpack.c.b16 %v2202_v54, %v2201_v52  ;;  %v2075_v23 = vpack.c.bf16 %v2011_v6, %v2011_v6  ;;  %v2093_v8 = vpack.c.bf16 %v2029_v14, %v2029_v14  ;;  %v13676_v16 = vld [vmem:[#allocation42_spill] sm:$0xff] }
 0x4ca   : > { %v8446_v11 = vpop.eup %8445  ;;  %v2276_v32 = vpack.c.b16 %v2265_v63, %v2264_v46  ;;  %v2334_v44 = vpack.c.b16 %v2320_v17, %v2319_v57  ;;  %v2103_v9 = vpack.c.bf16 %v2039_v61, %v2039_v61  ;;  %v2074_v59 = vpack.c.bf16 %v2010_v29, %v2010_v29  ;;  %v13675_v29 = vld [vmem:[#allocation102_spill] sm:$0xff] }
 0x4cb   : > { %v8448_v42 = vpop.eup %8447  ;;  %v2092_v31 = vpack.c.bf16 %v2028_v5, %v2028_v5  ;;  %v2102_v45 = vpack.c.bf16 %v2038_v55, %v2038_v55  ;;  %8451 = vrcp.f32 %v13663_v56  ;;  %v2627_v51 = vsel %vm1077_vm14, %v2554_v18, 0  ;;  %v13677_v57 = vld [vmem:[#allocation86_spill] sm:$0xff] }
 0x4cc   : > { %v795_v26 = vadd.f32 %v13665_v21, %v10582_v15  ;;  %8453 = vrcp.f32 %v13666_v48  ;;  %v2200_v49 = vunpack.c.l.b16 %v2075_v23  ;;  %v2009_v2 = vmul.f32 %v8446_v11, %v13667_v28  ;;  %v13679_v23 = vld [vmem:[#allocation101_spill] sm:$0xff] }
 0x4cd   : > { %v8450_v58 = vpop.eup %8449  ;;  %8455 = vrcp.f32 %v13668_v36  ;;  %v2263_v39 = vunpack.c.l.b16 %v2093_v8  ;;  %v2318_v10 = vunpack.c.l.b16 %v2103_v9  ;;  %v2027_v35 = vmul.f32 %v8448_v42, %v13669_v27 }
 0x4ce   : > { %2173 = vmatpush.bf16.xpose.msra.mxu0 %v2150_v37  ;;  %2231 = vmatpush.bf16.xpose.msra.mxu1 %v2214_v50  ;;  %v10596_v62 = vpop.permute.xlu1 %541  ;;  %8457 = vrcp.f32 %v13670_v0  ;;  %v2199_v38 = vunpack.c.l.b16 %v2074_v59  ;;  %v2317_v4 = vunpack.c.l.b16 %v2102_v45  ;;  %v2008_v20 = vmul.f32 %v8444_v60, %v13671_v19  ;;  %v13678_v37 = vld [vmem:[#allocation93_spill] sm:$0xff]  ;;  %v13681_v59 = vld [vmem:[#allocation75_spill] sm:$0xff] }
 0x4cf   : > { %2291 = vmatpush.bf16.xpose.msra.mxu2 %v2276_v32  ;;  %2355 = vmatpush.bf16.xpose.msra.mxu3 %v2334_v44  ;;  %v650_v7 = vadd.f32 %v13664_v43, %v10596_v62  ;;  %v2262_v3 = vunpack.c.l.b16 %v2092_v31  ;;  %v2557_v25 = vpack.c.bf16 %v795_v26, %v795_v26  ;;  %v2026_v41 = vmul.f32 %v8450_v58, %v13672_v53  ;;  %v13680_v32 = vld [vmem:[#allocation66_spill] sm:$0xff]  ;;  %v13682_v58 = vld [vmem:[#allocation19_spill] sm:$0xff] }
 0x4d0   : > { %v2213_v1 = vpack.c.b16 %v2200_v49, %v2199_v38  ;;  %v2073_v30 = vpack.c.bf16 %v2009_v2, %v2009_v2  ;;  %v2333_v52 = vpack.c.b16 %v2318_v10, %v2317_v4  ;;  %v2091_v34 = vpack.c.bf16 %v2027_v35, %v2027_v35  ;;  %v13683_v35 = vld [vmem:[#allocation71_spill] sm:$0xff] }
 0x4d1   : > { %v1008_v55 = vpack.c.bf16 %v650_v7, %v650_v7  ;;  %v8452_v40 = vpop.eup %8451  ;;  %v2275_v13 = vpack.c.b16 %v2263_v39, %v2262_v3  ;;  %v2072_v46 = vpack.c.bf16 %v2008_v20, %v2008_v20  ;;  %v7708_v14 = vunpack.i.l.bf16 %v13673_v22  ;;  %v13684_v3 = vld [vmem:[#allocation68_spill] sm:$0xff] }
 0x4d2   : > { %v8454_v6 = vpop.eup %8453  ;;  %v7713_v61 = vunpack.i.l.bf16 %v13674_v24  ;;  %v2975_v47 = vsel %vm1077_vm14, %v2557_v25, 0  ;;  %v2090_v54 = vpack.c.bf16 %v2026_v41, %v2026_v41  ;;  %8459 = vrcp.f32 %v13675_v29 }
 0x4d3   : > { %v8456_v17 = vpop.eup %8455  ;;  %v803_v5 = vadd.f32 %v13676_v16, %v10596_v62  ;;  %v2198_v63 = vunpack.c.l.b16 %v2073_v30  ;;  %v2006_v18 = vmul.f32 %v8452_v40, %v13677_v57  ;;  %v2261_v60 = vunpack.c.l.b16 %v2091_v34  ;;  %v13685_v30 = vld [vmem:[#allocation33_spill] sm:$0xff] }
 0x4d4   : > { %v8458_v33 = vpop.eup %8457  ;;  %v2024_v50 = vmul.f32 %v8454_v6, %v13678_v37  ;;  %8461 = vrcp.f32 %v13679_v23  ;;  %v2197_v11 = vunpack.c.l.b16 %v2072_v46  ;;  %v2007_v44 = vmul.f32 %v8456_v17, %v13680_v32  ;;  %v13686_v34 = vld [vmem:[#allocation37_spill] sm:$0xff] }
 0x4d5   : > { %2174 = vmatmul.bf16.vlgmr.msra.gmra.mxu0 %v1008_v55  ;;  %v2490_v8 = vpack.c.bf16 %v7708_v14, %v7708_v14  ;;  %v2491_v9 = vpack.c.bf16 %v7713_v61, %v7713_v61  ;;  %v2260_v42 = vunpack.c.l.b16 %v2090_v54  ;;  %v2025_v31 = vmul.f32 %v8458_v33, %v13681_v59  ;;  %v13687_v46 = vld [vmem:[#allocation29_spill] sm:$0xff]  ;;  %v13689_v59 = vld [vmem:[#allocation43_spill] sm:$0xff] }
 0x4d6   : > { %2636 = vmatpush.bf16.msrb.mxu0 %v2627_v51  ;;  %2232 = vmatpush.bf16.xpose.msra.mxu1 %v2213_v1  ;;  %v1011_v45 = vpack.c.bf16 %v803_v5, %v803_v5  ;;  %v2212_v56 = vpack.c.b16 %v2198_v63, %v2197_v11  ;;  %v2070_v43 = vpack.c.bf16 %v2006_v18, %v2006_v18  ;;  %v7718_v40 = vunpack.i.l.bf16 %v13685_v30 }
 0x4d7   : > { %2292 = vmatpush.bf16.xpose.msra.mxu2 %v2275_v13  ;;  %2356 = vmatpush.bf16.xpose.msra.mxu3 %v2333_v52  ;;  %v2274_v7 = vpack.c.b16 %v2261_v60, %v2260_v42  ;;  %v2088_v51 = vpack.c.bf16 %v2024_v50, %v2024_v50  ;;  %v2071_v26 = vpack.c.bf16 %v2007_v44, %v2007_v44  ;;  %v2578_v49 = vunpack.c.l.b16 %v2490_v8 }
 0x4d8   : > { %v8460_v21 = vpop.eup %8459  ;;  %v693_v48 = vadd.f32 %v13682_v58, %v10582_v15  ;;  %v2579_v28 = vunpack.c.l.b16 %v2491_v9  ;;  %v2089_v36 = vpack.c.bf16 %v2025_v31, %v2025_v31  ;;  %v2195_v10 = vunpack.c.l.b16 %v2070_v43 }
 0x4d9   : > { %v2258_v27 = vunpack.c.l.b16 %v2088_v51  ;;  %v2023_v0 = vmul.f32 %v8460_v21, %v13683_v35  ;;  %v2196_v4 = vunpack.c.l.b16 %v2071_v26  ;;  %v7723_v6 = vunpack.i.l.bf16 %v13686_v34 }
 0x4da   : > { %v8462_v39 = vpop.eup %8461  ;;  %v2555_v19 = vpack.c.bf16 %v693_v48, %v693_v48  ;;  %v2594_v20 = vpack.c.b16 %v2579_v28, %v2578_v49  ;;  %v2259_v55 = vunpack.c.l.b16 %v2089_v36  ;;  %v701_v17 = vadd.f32 %v13687_v46, %v10596_v62  ;;  %v13690_v48 = vld [vmem:[#allocation41_spill] sm:$0xff] }
 0x4db   : > { %v2022_v25 = vmul.f32 %v8462_v39, %v13684_v3  ;;  %v2211_v53 = vpack.c.b16 %v2196_v4, %v2195_v10  ;;  %v2087_v1 = vpack.c.bf16 %v2023_v0, %v2023_v0  ;;  %v2492_v16 = vpack.c.bf16 %v7718_v40, %v7718_v40 }
 0x4dc   : > { %v2273_v41 = vpack.c.b16 %v2259_v55, %v2258_v27  ;;  %v2743_v52 = vsel %vm1077_vm14, %v2555_v19, 0  ;;  %v2493_v57 = vpack.c.bf16 %v7723_v6, %v7723_v6  ;;  %v1009_v18 = vpack.c.bf16 %v701_v17, %v701_v17 }
 0x4dd   : > { %v2086_v61 = vpack.c.bf16 %v2022_v25, %v2022_v25  ;;  %v2257_v29 = vunpack.c.l.b16 %v2087_v1  ;;  %v7711_v11 = vunpack.i.h.bf16 %v13673_v22  ;;  %v7716_v44 = vunpack.i.h.bf16 %v13674_v24 }
 0x4de   : > { %2357 = vmatmul.bf16.vlgmr.msra.gmra.mxu3 %v1011_v45  ;;  %2233 = vmatpush.bf16.xpose.msra.mxu1 %v2212_v56  ;;  %v2580_v9 = vunpack.c.l.b16 %v2492_v16  ;;  %v2581_v42 = vunpack.c.l.b16 %v2493_v57  ;;  %v752_v31 = vadd.f32 %v13689_v59, %v10596_v62  ;;  %v7728_v49 = vunpack.i.l.bf16 %v13690_v48  ;;  %v13691_v62 = vld [vmem:[#allocation46_spill] sm:$0xff] }
 0x4df   : > { %2984 = vmatpush.bf16.msrb.mxu3 %v2975_v47  ;;  %2293 = vmatpush.bf16.xpose.msra.mxu2 %v2274_v7  ;;  %v10624_v2 = vpop.trf.xlu0  ;;  %v13688_v47 = vld [vmem:[#allocation27_spill] sm:$0xff]  ;;  %v2256_v60 = vunpack.c.l.b16 %v2086_v61  ;;  %v2506_v56 = vpack.c.bf16 %v7711_v11, %v7711_v11  ;;  %v2507_v43 = vpack.c.bf16 %v7716_v44, %v7716_v44  ;;  %v7733_v28 = vunpack.i.l.bf16 %v13691_v62 }
 0x4e0   : > { %v7793_v38 = vunpack.i.h.bf16 %v10624_v2  ;;  %v744_v54 = vadd.f32 %v13688_v47, %v10582_v15  ;;  %v2595_v7 = vpack.c.b16 %v2581_v42, %v2580_v9  ;;  %v1010_v22 = vpack.c.bf16 %v752_v31, %v752_v31 }
 0x4e1   : > { %v2272_v23 = vpack.c.b16 %v2257_v29, %v2256_v60  ;;  %v7790_v24 = vunpack.i.l.bf16 %v10624_v2  ;;  %v2694_v26 = vunpack.c.l.b16 %v2506_v56  ;;  %v2695_v58 = vunpack.c.l.b16 %v2507_v43 }
 0x4e2   : > { %v2538_v13 = vpack.c.bf16 %v7793_v38, %v7793_v38  ;;  %v2556_v37 = vpack.c.bf16 %v744_v54, %v744_v54  ;;  %v2494_v4 = vpack.c.bf16 %v7728_v49, %v7728_v49  ;;  %v2495_v19 = vpack.c.bf16 %v7733_v28, %v7733_v28  ;;  %v13695_v49 = vld [vmem:[#allocation56_spill] sm:$0xff] }
 0x4e3   : > { %v2522_v10 = vpack.c.bf16 %v7790_v24, %v7790_v24  ;;  %v2710_v38 = vpack.c.b16 %v2695_v58, %v2694_v26  ;;  %v7721_v25 = vunpack.i.h.bf16 %v13685_v30  ;;  %v13692_v30 = vld [vmem:[#allocation49_spill] sm:$0xff]  ;;  %v7731_v9 = vunpack.i.h.bf16 %v13690_v48  ;;  %v13694_v58 = vld [vmem:[#allocation55_spill] sm:$0xff] }
 0x4e4   : > { %v2926_v5 = vunpack.c.l.b16 %v2538_v13  ;;  %v2859_v15 = vsel %vm1077_vm14, %v2556_v37, 0  ;;  %v2582_v1 = vunpack.c.l.b16 %v2494_v4  ;;  %v2583_v40 = vunpack.c.l.b16 %v2495_v19 }
 0x4e5   : > { %7365 = vmatmul.msk.bf16.vlgmr.msrb.gmra.mxu0 %vm1052_vm15, %v2594_v20  ;;  %v2810_v2 = vunpack.c.l.b16 %v2522_v10  ;;  %v2508_v6 = vpack.c.bf16 %v7721_v25, %v7721_v25  ;;  %v7738_v54 = vunpack.i.l.bf16 %v13692_v30  ;;  %v7736_v42 = vunpack.i.h.bf16 %v13691_v62 }
 0x4e6   : > { %2234 = vmatpush.bf16.xpose.msra.mxu1 %v2211_v53  ;;  %v7726_v53 = vunpack.i.h.bf16 %v13686_v34  ;;  %v2596_v17 = vpack.c.b16 %v2583_v40, %v2582_v1  ;;  %v13693_v34 = vld [vmem:[#allocation52_spill] sm:$0xff]  ;;  %v7748_v48 = vunpack.i.l.bf16 %v13694_v58  ;;  %v7753_v62 = vunpack.i.l.bf16 %v13695_v49 }
 0x4e7   : > { %2294 = vmatpush.bf16.xpose.msra.mxu2 %v2273_v41  ;;  %v7794_v14 = vpop.trf.xlu0  ;;  %v2696_v16 = vunpack.c.l.b16 %v2508_v6  ;;  %v7746_v1 = vunpack.i.h.bf16 %v13693_v34 }
 0x4e8   : > { %v7798_v33 = vunpack.i.h.bf16 %v7794_v14  ;;  %v7795_v51 = vunpack.i.l.bf16 %v7794_v14  ;;  %v2509_v46 = vpack.c.bf16 %v7726_v53, %v7726_v53  ;;  %v2498_v4 = vpack.c.bf16 %v7748_v48, %v7748_v48 }
 0x4e9   : > { %v2499_v19 = vpack.c.bf16 %v7753_v62, %v7753_v62 }
 0x4ea   : > { %v2539_v63 = vpack.c.bf16 %v7798_v33, %v7798_v33  ;;  %v2523_v27 = vpack.c.bf16 %v7795_v51, %v7795_v51  ;;  %v7743_v33 = vunpack.i.l.bf16 %v13693_v34  ;;  %v2586_v40 = vunpack.c.l.b16 %v2498_v4 }
 0x4ec   : > { %v2927_v50 = vunpack.c.l.b16 %v2539_v63  ;;  %v2811_v55 = vunpack.c.l.b16 %v2523_v27 }
 0x4ed   : > { %2235 = vmatmul.bf16.vlgmr.msra.gmra.mxu1 %v1009_v18 }
 0x4ee   : > { %2752 = vmatpush.bf16.msrb.mxu1 %v2743_v52  ;;  %v2942_v32 = vpack.c.b16 %v2927_v50, %v2926_v5  ;;  %v2826_v13 = vpack.c.b16 %v2811_v55, %v2810_v2  ;;  %v2697_v5 = vunpack.c.l.b16 %v2509_v46  ;;  %v2496_v50 = vpack.c.bf16 %v7738_v54, %v7738_v54  ;;  %v223_v55 = vld [vmem:[%s13269_s2 + $0x78] sm:$0xff] }
 0x4ef   : > { %2295 = vmatpush.bf16.xpose.msra.mxu2 %v2272_v23  ;;  %v7799_v8 = vpop.trf.xlu0  ;;  %v2497_v23 = vpack.c.bf16 %v7743_v33, %v7743_v33  ;;  %v13696_v33 = vld [vmem:[#allocation57_spill] sm:$0xff] }
 0x4f0   : > { %7389 = vmatmul.msk.bf16.vlgmr.msrb.gmra.mxu3 %vm1052_vm15, %v2942_v32  ;;  %v7803_v45 = vunpack.i.h.bf16 %v7799_v8  ;;  %v7800_v14 = vunpack.i.l.bf16 %v7799_v8  ;;  %v2711_v11 = vpack.c.b16 %v2697_v5, %v2696_v16  ;;  %v2584_v59 = vunpack.c.l.b16 %v2496_v50  ;;  %v13697_v16 = vld [vmem:[#allocation58_spill] sm:$0xff] }
 0x4f1   : > { %v2585_v31 = vunpack.c.l.b16 %v2497_v23  ;;  %v7763_v5 = vunpack.i.l.bf16 %v13697_v16 }
 0x4f2   : > { %v2540_v21 = vpack.c.bf16 %v7803_v45, %v7803_v45  ;;  %v2524_v57 = vpack.c.bf16 %v7800_v14, %v7800_v14  ;;  %v2513_v14 = vpack.c.bf16 %v7746_v1, %v7746_v1 }
 0x4f3   : > { %v2597_v24 = vpack.c.b16 %v2585_v31, %v2584_v59  ;;  %v7751_v31 = vunpack.i.h.bf16 %v13694_v58  ;;  %v13698_v58 = vld [vmem:[#allocation59_spill] sm:$0xff] }
 0x4f4   : > { %v2928_v0 = vunpack.c.l.b16 %v2540_v21  ;;  %v2812_v8 = vunpack.c.l.b16 %v2524_v57  ;;  %v2701_v57 = vunpack.c.l.b16 %v2513_v14 }
 0x4f5   : > { %7366 = vmatmul.msk.bf16.gmra.mxu0 %vm1052_vm15, %v2595_v7  ;;  %v2510_v7 = vpack.c.bf16 %v7731_v9, %v7731_v9 }
 0x4f6   : > { %2296 = vmatmul.bf16.vlgmr.msra.gmra.mxu2 %v1010_v22  ;;  %v2511_v22 = vpack.c.bf16 %v7736_v42, %v7736_v42 }
 0x4f7   : > { %2868 = vmatpush.bf16.msrb.mxu2 %v2859_v15  ;;  %v7804_v36 = vpop.trf.xlu0  ;;  %v2698_v28 = vunpack.c.l.b16 %v2510_v7 }
 0x4f8   : > { %v7808_v39 = vunpack.i.h.bf16 %v7804_v36  ;;  %v7805_v61 = vunpack.i.l.bf16 %v7804_v36  ;;  %v2699_v36 = vunpack.c.l.b16 %v2511_v22 }
 0x4fa   : > { %v2541_v35 = vpack.c.bf16 %v7808_v39, %v7808_v39  ;;  %v2525_v18 = vpack.c.bf16 %v7805_v61, %v7805_v61 }
 0x4fc   : > { %v2929_v20 = vunpack.c.l.b16 %v2541_v35  ;;  %v2813_v15 = vunpack.c.l.b16 %v2525_v18 }
 0x4fd   : > { %7373 = vmatmul.msk.bf16.vlgmr.msrb.gmra.mxu1 %vm1052_vm15, %v2710_v38 }
 0x4fe   : > { %v2943_v3 = vpack.c.b16 %v2929_v20, %v2928_v0  ;;  %v2827_v56 = vpack.c.b16 %v2813_v15, %v2812_v8  ;;  %v2712_v20 = vpack.c.b16 %v2699_v36, %v2698_v28  ;;  %v7768_v36 = vunpack.i.l.bf16 %v13698_v58 }
 0x4ff   : > { %v7809_v41 = vpop.trf.xlu0 }
 0x500   : > { %7390 = vmatmul.msk.bf16.gmra.mxu3 %vm1052_vm15, %v2943_v3  ;;  %v7813_v52 = vunpack.i.h.bf16 %v7809_v41  ;;  %v7810_v51 = vunpack.i.l.bf16 %v7809_v41  ;;  %v7741_v41 = vunpack.i.h.bf16 %v13692_v30  ;;  %v226_v30 = vld [vmem:[%s13269_s2 + $0x90] sm:$0xff] }
 0x502   : > { %v2542_v47 = vpack.c.bf16 %v7813_v52, %v7813_v52  ;;  %v2526_v27 = vpack.c.bf16 %v7810_v51, %v7810_v51  ;;  %v2514_v51 = vpack.c.bf16 %v7751_v31, %v7751_v31 }
 0x504   : > { %v2930_v37 = vunpack.c.l.b16 %v2542_v47  ;;  %v2814_v3 = vunpack.c.l.b16 %v2526_v27 }
 0x505   : > { %7367 = vmatmul.msk.bf16.gmra.mxu0 %vm1052_vm15, %v2596_v17  ;;  %v2512_v17 = vpack.c.bf16 %v7741_v41, %v7741_v41 }
 0x506   : > { %7381 = vmatmul.msk.bf16.vlgmr.msrb.gmra.mxu2 %vm1052_vm15, %v2826_v13  ;;  %v2587_v13 = vunpack.c.l.b16 %v2499_v19 }
 0x507   : > { %v7814_v29 = vpop.trf.xlu0 }
 0x508   : > { %v7818_v63 = vunpack.i.h.bf16 %v7814_v29  ;;  %v7815_v21 = vunpack.i.l.bf16 %v7814_v29  ;;  %v2598_v61 = vpack.c.b16 %v2587_v13, %v2586_v40  ;;  %v7758_v29 = vunpack.i.l.bf16 %v13696_v33 }
 0x509   : > { %v7761_v40 = vunpack.i.h.bf16 %v13696_v33  ;;  %v7766_v13 = vunpack.i.h.bf16 %v13697_v16  ;;  %v13700_v33 = vld [vmem:[#allocation61_spill] sm:$0xff]  ;;  %v13701_v16 = vld [vmem:[#allocation62_spill] sm:$0xff] }
 0x50a   : > { %v2543_v60 = vpack.c.bf16 %v7818_v63, %v7818_v63  ;;  %v2527_v35 = vpack.c.bf16 %v7815_v21, %v7815_v21  ;;  %v2700_v63 = vunpack.c.l.b16 %v2512_v17 }
 0x50c   : > { %v2931_v32 = vunpack.c.l.b16 %v2543_v60  ;;  %v2815_v25 = vunpack.c.l.b16 %v2527_v35  ;;  %v2713_v8 = vpack.c.b16 %v2701_v57, %v2700_v63  ;;  %v7783_v63 = vunpack.i.l.bf16 %v13701_v16 }
 0x50d   : > { %7374 = vmatmul.msk.bf16.gmra.mxu1 %vm1052_vm15, %v2711_v11 }
 0x50e   : > { %v2944_v44 = vpack.c.b16 %v2931_v32, %v2930_v37  ;;  %v2828_v6 = vpack.c.b16 %v2815_v25, %v2814_v3  ;;  %v2500_v32 = vpack.c.bf16 %v7758_v29, %v7758_v29 }
 0x50f   : > { %v7819_v45 = vpop.trf.xlu0 }
 0x510   : > { %7391 = vmatmul.msk.bf16.gmra.mxu3 %vm1052_vm15, %v2944_v44  ;;  %v7823_v43 = vunpack.i.h.bf16 %v7819_v45  ;;  %v7820_v47 = vunpack.i.l.bf16 %v7819_v45  ;;  %v2501_v44 = vpack.c.bf16 %v7763_v5, %v7763_v5  ;;  %v7756_v45 = vunpack.i.h.bf16 %v13695_v49  ;;  %v13699_v49 = vld [vmem:[#allocation60_spill] sm:$0xff] }
 0x511   : > { %v7778_v5 = vunpack.i.l.bf16 %v13700_v33 }
 0x512   : > { %v2544_v26 = vpack.c.bf16 %v7823_v43, %v7823_v43  ;;  %v2528_v37 = vpack.c.bf16 %v7820_v47, %v7820_v47  ;;  %v2589_v43 = vunpack.c.l.b16 %v2501_v44  ;;  %v2515_v21 = vpack.c.bf16 %v7756_v45, %v7756_v45 }
 0x513   : > { %v2517_v47 = vpack.c.bf16 %v7766_v13, %v7766_v13  ;;  %v2504_v44 = vpack.c.bf16 %v7778_v5, %v7778_v5  ;;  %v7771_v45 = vunpack.i.h.bf16 %v13698_v58 }
 0x514   : > { %v2932_v38 = vunpack.c.l.b16 %v2544_v26  ;;  %v2816_v9 = vunpack.c.l.b16 %v2528_v37  ;;  %v2703_v27 = vunpack.c.l.b16 %v2515_v21 }
 0x515   : > { %7368 = vmatmul.msk.bf16.gmra.mxu0 %vm1052_vm15, %v2597_v24 }
 0x516   : > { %7382 = vmatmul.msk.bf16.gmra.mxu2 %vm1052_vm15, %v2827_v56  ;;  %v2588_v56 = vunpack.c.l.b16 %v2500_v32 }
 0x517   : > { %v7824_v39 = vpop.trf.xlu0 }
 0x518   : > { %v7828_v10 = vunpack.i.h.bf16 %v7824_v39  ;;  %v7825_v54 = vunpack.i.l.bf16 %v7824_v39  ;;  %v2599_v26 = vpack.c.b16 %v2589_v43, %v2588_v56  ;;  %v7773_v39 = vunpack.i.l.bf16 %v13699_v49 }
 0x519   : > { %v7776_v56 = vunpack.i.h.bf16 %v13699_v49  ;;  %v2592_v43 = vunpack.c.l.b16 %v2504_v44 }
 0x51a   : > { %v2545_v0 = vpack.c.bf16 %v7828_v10, %v7828_v10  ;;  %v2529_v50 = vpack.c.bf16 %v7825_v54, %v7825_v54  ;;  %v2702_v10 = vunpack.c.l.b16 %v2514_v51  ;;  %v2518_v51 = vpack.c.bf16 %v7771_v45, %v7771_v45 }
 0x51b   : > { %v2519_v21 = vpack.c.bf16 %v7776_v56, %v7776_v56 }
 0x51c   : > { %v2933_v2 = vunpack.c.l.b16 %v2545_v0  ;;  %v2817_v42 = vunpack.c.l.b16 %v2529_v50  ;;  %v2714_v3 = vpack.c.b16 %v2703_v27, %v2702_v10  ;;  %v2706_v58 = vunpack.c.l.b16 %v2518_v51 }
 0x51d   : > { %7375 = vmatmul.msk.bf16.gmra.mxu1 %vm1052_vm15, %v2712_v20 }
 0x51e   : > { %v2945_v53 = vpack.c.b16 %v2933_v2, %v2932_v38  ;;  %v2829_v22 = vpack.c.b16 %v2817_v42, %v2816_v9  ;;  %v2502_v2 = vpack.c.bf16 %v7768_v36, %v7768_v36  ;;  %v2707_v36 = vunpack.c.l.b16 %v2519_v21 }
 0x51f   : > { %v7829_v52 = vpop.trf.xlu0 }
 0x520   : > { %7392 = vmatmul.msk.bf16.gmra.mxu3 %vm1052_vm15, %v2945_v53  ;;  %v7833_v46 = vunpack.i.h.bf16 %v7829_v52  ;;  %v7830_v48 = vunpack.i.l.bf16 %v7829_v52  ;;  %v2590_v52 = vunpack.c.l.b16 %v2502_v2  ;;  %v2716_v27 = vpack.c.b16 %v2707_v36, %v2706_v58 }
 0x521   : > { %536 = vperm.xlu0 %7538, %v223_v55   ;;  %v2503_v55 = vpack.c.bf16 %v7773_v39, %v7773_v39  ;;  %v7786_v2 = vunpack.i.h.bf16 %v13701_v16 }
 0x522   : > { %v2546_v34 = vpack.c.bf16 %v7833_v46, %v7833_v46  ;;  %v2530_v38 = vpack.c.bf16 %v7830_v48, %v7830_v48 }
 0x524   : > { %v2934_v11 = vunpack.c.l.b16 %v2546_v34  ;;  %v2818_v53 = vunpack.c.l.b16 %v2530_v38 }
 0x525   : > { %7369 = vmatmul.msk.bf16.gmra.mxu0 %vm1052_vm15, %v2598_v61  ;;  %v2516_v61 = vpack.c.bf16 %v7761_v40, %v7761_v40  ;;  %v2521_v40 = vpack.c.bf16 %v7786_v2, %v7786_v2 }
 0x526   : > { %7383 = vmatmul.msk.bf16.gmra.mxu2 %vm1052_vm15, %v2828_v6  ;;  %v2591_v6 = vunpack.c.l.b16 %v2503_v55 }
 0x527   : > { %v7834_v18 = vpop.trf.xlu0  ;;  %v2704_v57 = vunpack.c.l.b16 %v2516_v61  ;;  %v2709_v61 = vunpack.c.l.b16 %v2521_v40 }
 0x528   : > { %v7838_v60 = vunpack.i.h.bf16 %v7834_v18  ;;  %v7835_v62 = vunpack.i.l.bf16 %v7834_v18  ;;  %v2600_v54 = vpack.c.b16 %v2591_v6, %v2590_v52  ;;  %v2705_v18 = vunpack.c.l.b16 %v2517_v47 }
 0x529   : > { %551 = vperm.xlu0 %7538, %v226_v30  }
 0x52a   : > { %v2547_v23 = vpack.c.bf16 %v7838_v60, %v7838_v60  ;;  %v2531_v4 = vpack.c.bf16 %v7835_v62, %v7835_v62 }
 0x52c   : > { %v2935_v15 = vunpack.c.l.b16 %v2547_v23  ;;  %v2819_v41 = vunpack.c.l.b16 %v2531_v4 }
 0x52d   : > { %7376 = vmatmul.msk.bf16.gmra.mxu1 %vm1052_vm15, %v2713_v8  ;;  %v2505_v8 = vpack.c.bf16 %v7783_v63, %v7783_v63 }
 0x52e   : > { %v2946_v59 = vpack.c.b16 %v2935_v15, %v2934_v11  ;;  %v2830_v17 = vpack.c.b16 %v2819_v41, %v2818_v53  ;;  %v2715_v15 = vpack.c.b16 %v2705_v18, %v2704_v57 }
 0x52f   : > { %v7839_v7 = vpop.trf.xlu0 }
 0x530   : > { %7393 = vmatmul.msk.bf16.gmra.mxu3 %vm1052_vm15, %v2946_v59  ;;  %v7843_v24 = vunpack.i.h.bf16 %v7839_v7  ;;  %v7840_v30 = vunpack.i.l.bf16 %v7839_v7  ;;  %v2593_v7 = vunpack.c.l.b16 %v2505_v8 }
 0x532   : > { %v2548_v28 = vpack.c.bf16 %v7843_v24, %v7843_v24  ;;  %v2532_v50 = vpack.c.bf16 %v7840_v30, %v7840_v30 }
 0x534   : > { %v2936_v20 = vunpack.c.l.b16 %v2548_v28  ;;  %v2820_v42 = vunpack.c.l.b16 %v2532_v50 }
 0x535   : > { %7370 = vmatmul.msk.bf16.gmra.mxu0 %vm1052_vm15, %v2599_v26  ;;  %v2601_v26 = vpack.c.b16 %v2593_v7, %v2592_v43 }
 0x536   : > { %7384 = vmatmul.msk.bf16.gmra.mxu2 %vm1052_vm15, %v2829_v22 }
 0x537   : > { %v7844_v35 = vpop.trf.xlu0 }
 0x538   : > { %v7848_v0 = vunpack.i.h.bf16 %v7844_v35  ;;  %v7845_v34 = vunpack.i.l.bf16 %v7844_v35 }
 0x53a   : > { %v2549_v19 = vpack.c.bf16 %v7848_v0, %v7848_v0  ;;  %v2533_v23 = vpack.c.bf16 %v7845_v34, %v7845_v34 }
 0x53c   : > { %v2937_v25 = vunpack.c.l.b16 %v2549_v19  ;;  %v2821_v59 = vunpack.c.l.b16 %v2533_v23 }
 0x53d   : > { %7377 = vmatmul.msk.bf16.gmra.mxu1 %vm1052_vm15, %v2714_v3 }
 0x53e   : > { %v2947_v1 = vpack.c.b16 %v2937_v25, %v2936_v20  ;;  %v2831_v24 = vpack.c.b16 %v2821_v59, %v2820_v42  ;;  %v7781_v20 = vunpack.i.h.bf16 %v13700_v33 }
 0x53f   : > { %v7849_v46 = vpop.trf.xlu0 }
 0x540   : > { %7394 = vmatmul.msk.bf16.gmra.mxu3 %vm1052_vm15, %v2947_v1  ;;  %v7853_v14 = vunpack.i.h.bf16 %v7849_v46  ;;  %v7850_v62 = vunpack.i.l.bf16 %v7849_v46  ;;  %v2520_v1 = vpack.c.bf16 %v7781_v20, %v7781_v20 }
 0x542   : > { %v2550_v29 = vpack.c.bf16 %v7853_v14, %v7853_v14  ;;  %v2534_v49 = vpack.c.bf16 %v7850_v62, %v7850_v62  ;;  %v2708_v14 = vunpack.c.l.b16 %v2520_v1 }
 0x544   : > { %v2938_v32 = vunpack.c.l.b16 %v2550_v29  ;;  %v2822_v4 = vunpack.c.l.b16 %v2534_v49  ;;  %v2717_v33 = vpack.c.b16 %v2709_v61, %v2708_v14 }
 0x545   : > { %7371 = vmatmul.msk.bf16.gmra.mxu0 %vm1052_vm15, %v2600_v54 }
 0x546   : > { %7385 = vmatmul.msk.bf16.gmra.mxu2 %vm1052_vm15, %v2830_v17 }
 0x547   : > { %v7854_v60 = vpop.trf.xlu0 }
 0x548   : > { %v7858_v37 = vunpack.i.h.bf16 %v7854_v60  ;;  %v7855_v28 = vunpack.i.l.bf16 %v7854_v60 }
 0x54a   : > { %v2551_v11 = vpack.c.bf16 %v7858_v37, %v7858_v37  ;;  %v2535_v39 = vpack.c.bf16 %v7855_v28, %v7855_v28 }
 0x54c   : > { %v2939_v9 = vunpack.c.l.b16 %v2551_v11  ;;  %v2823_v19 = vunpack.c.l.b16 %v2535_v39 }
 0x54d   : > { %7378 = vmatmul.msk.bf16.gmra.mxu1 %vm1052_vm15, %v2715_v15 }
 0x54e   : > { %v2948_v31 = vpack.c.b16 %v2939_v9, %v2938_v32  ;;  %v2832_v41 = vpack.c.b16 %v2823_v19, %v2822_v4 }
 0x54f   : > { %v7859_v48 = vpop.trf.xlu0 }
 0x550   : > { %7395 = vmatmul.msk.bf16.gmra.mxu3 %vm1052_vm15, %v2948_v31  ;;  %v7863_v35 = vunpack.i.h.bf16 %v7859_v48  ;;  %v7860_v46 = vunpack.i.l.bf16 %v7859_v48 }
 0x552   : > { %v10697_v22 = vpop.f32.mrf.mxu0  ;;  %v2552_v55 = vpack.c.bf16 %v7863_v35, %v7863_v35  ;;  %v2536_v34 = vpack.c.bf16 %v7860_v46, %v7860_v46 }
 0x553   : > { %13702 = vst [vmem:[#allocation103_spill] sm:$0xff] %v10697_v22 }
 0x554   : > { %v2940_v13 = vunpack.c.l.b16 %v2552_v55  ;;  %v2824_v5 = vunpack.c.l.b16 %v2536_v34 }
 0x555   : > { %7372 = vmatmul.msk.bf16.gmra.mxu0 %vm1052_vm15, %v2601_v26 }
 0x556   : > { %7386 = vmatmul.msk.bf16.gmra.mxu2 %vm1052_vm15, %v2831_v24 }
 0x557   : > { %v7864_v0 = vpop.trf.xlu0 }
 0x558   : > { %v7868_v38 = vunpack.i.h.bf16 %v7864_v0  ;;  %v7865_v17 = vunpack.i.l.bf16 %v7864_v0 }
 0x55a   : > { %v2177_v10 = vpop.f32.mrf.mxu0  ;;  %v2553_v3 = vpack.c.bf16 %v7868_v38, %v7868_v38  ;;  %v2537_v29 = vpack.c.bf16 %v7865_v17, %v7865_v17 }
 0x55c   : > { %v2941_v52 = vunpack.c.l.b16 %v2553_v3  ;;  %v2825_v16 = vunpack.c.l.b16 %v2537_v29 }
 0x55d   : > { %7379 = vmatmul.msk.bf16.gmra.mxu1 %vm1052_vm15, %v2716_v27 }
 0x55e   : > { %v2949_v6 = vpack.c.b16 %v2941_v52, %v2940_v13  ;;  %v2833_v18 = vpack.c.b16 %v2825_v16, %v2824_v5 }
 0x560   : > { %7396 = vmatmul.msk.bf16.gmra.mxu3 %vm1052_vm15, %v2949_v6 }
 0x561   : > { %v10704_v25 = vpop.f32.mrf.mxu3 }
 0x562   : > { %13703 = vst [vmem:[#allocation85_spill] sm:$0xff] %v10704_v25  ;;  %v10706_v53 = vpop.f32.mrf.mxu0 }
 0x563   : > { %3026 = vmax.xlane.f32.xlu2 %v10706_v53 }
 0x566   : > { %7387 = vmatmul.msk.bf16.gmra.mxu2 %vm1052_vm15, %v2832_v41 }
 0x569   : > { %v2360_v47 = vpop.f32.mrf.mxu3 }
 0x56a   : > { %v10711_v54 = vpop.f32.mrf.mxu1  ;;  %v10713_v30 = vpop.f32.mrf.mxu0 }
 0x56b   : > { %13704 = vst [vmem:[#allocation127_spill] sm:$0xff] %v10711_v54 }
 0x56d   : > { %7380 = vmatmul.msk.bf16.gmra.mxu1 %vm1052_vm15, %v2717_v33 }
 0x572   : > { %v2238_v63 = vpop.f32.mrf.mxu1  ;;  %v10716_v57 = vpop.f32.mrf.mxu0 }
 0x573   : > { %v10718_v60 = vpop.f32.mrf.mxu3 }
 0x574   : > { %3122 = vmax.xlane.f32.xlu1 %v10718_v60 }
 0x576   : > { %7388 = vmatmul.msk.bf16.gmra.mxu2 %vm1052_vm15, %v2833_v18 }
 0x579   : > { %v10722_v37 = vpop.f32.mrf.mxu2 }
 0x57a   : > { %13705 = vst [vmem:[#allocation117_spill] sm:$0xff] %v10722_v37  ;;  %v10724_v50 = vpop.f32.mrf.mxu0  ;;  %v10726_v23 = vpop.f32.mrf.mxu1 }
 0x57b   : > { %v10728_v11 = vpop.f32.mrf.mxu3  ;;  %3058 = vmax.xlane.f32.xlu2 %v10726_v23 }
 0x57c   : > { %3124 = vmax.xlane.f32.xlu0 %v10728_v11 }
 0x581   : > { %v2299_v32 = vpop.f32.mrf.mxu2 }
 0x582   : > { %v10732_v44 = vpop.f32.mrf.mxu0  ;;  %v10739_v9 = vpop.f32.mrf.mxu1 }
 0x583   : > { %v10734_v8 = vpop.f32.mrf.mxu3  ;;  %3028 = vmax.xlane.f32.xlu2 %v10713_v30 }
 0x589   : > { %v10737_v15 = vpop.f32.mrf.mxu2 }
 0x58a   : > { %v10741_v42 = vpop.f32.mrf.mxu0  ;;  %v10756_v43 = vpop.f32.mrf.mxu1 }
 0x58b   : > { %v10743_v59 = vpop.f32.mrf.mxu3  ;;  %3060 = vmax.xlane.f32.xlu2 %v10739_v9  ;;  %3036 = vmax.xlane.f32.xlu0 %v10741_v42 }
 0x58c   : > { %3128 = vmax.xlane.f32.xlu1 %v10743_v59 }
 0x591   : > { %v10748_v31 = vpop.f32.mrf.mxu2 }
 0x592   : > { %v10761_v24 = vpop.f32.mrf.mxu0  ;;  %v10780_v36 = vpop.f32.mrf.mxu1 }
 0x593   : > { %v10750_v45 = vpop.f32.mrf.mxu3  ;;  %3030 = vmax.xlane.f32.xlu2 %v10716_v57 }
 0x594   : > { %3130 = vmax.xlane.f32.xlu0 %v10750_v45 }
 0x599   : > { %v10754_v56 = vpop.f32.mrf.mxu2 }
 0x59a   : > { %v10768_v26 = vpop.f32.mrf.mxu0  ;;  %v10802_v38 = vpop.f32.mrf.mxu1 }
 0x59b   : > { %3062 = vmax.xlane.f32.xlu2 %v10756_v43  ;;  %v10759_v7 = vpop.f32.mrf.mxu3 }
 0x5a1   : > { %v10763_v51 = vpop.f32.mrf.mxu2 }
 0x5a2   : > { %v10776_v28 = vpop.f32.mrf.mxu0  ;;  %v10821_v41 = vpop.f32.mrf.mxu1 }
 0x5a3   : > { %3090 = vmax.xlane.f32.xlu2 %v10737_v15  ;;  %v10766_v21 = vpop.f32.mrf.mxu3 }
 0x5a9   : > { %v10770_v48 = vpop.f32.mrf.mxu2 }
 0x5aa   : > { %3098 = vmax.xlane.f32.xlu1 %v10770_v48  ;;  %v10846_v61 = vpop.f32.mrf.mxu1 }
 0x5ab   : > { %3032 = vmax.xlane.f32.xlu2 %v10724_v50  ;;  %v10774_v62 = vpop.f32.mrf.mxu3 }
 0x5b1   : > { %v10778_v58 = vpop.f32.mrf.mxu2 }
 0x5b2   : > { %3100 = vmax.xlane.f32.xlu0 %v10778_v58  ;;  %3042 = vmax.xlane.f32.xlu1 %v10776_v28  ;;  %v10856_v63 = vpop.f32.mrf.mxu1 }
 0x5b3   : > { %3064 = vmax.xlane.f32.xlu2 %v10780_v36  ;;  %v10785_v49 = vpop.f32.mrf.mxu3 }
 0x5b9   : > { %v10787_v39 = vpop.f32.mrf.mxu2 }
 0x5ba   : > { %3136 = vmax.xlane.f32.xlu0 %v10774_v62  ;;  %3134 = vmax.xlane.f32.xlu1 %v10766_v21  ;;  %v10871_v25 = vpop.f32.mrf.mxu1 }
 0x5bb   : > { %3092 = vmax.xlane.f32.xlu2 %v10748_v31  ;;  %v10792_v10 = vpop.f32.mrf.mxu3 }
 0x5c1   : > { %v10794_v27 = vpop.f32.mrf.mxu2 }
 0x5c2   : > { %3104 = vmax.xlane.f32.xlu1 %v10794_v27 }
 0x5c3   : > { %3034 = vmax.xlane.f32.xlu2 %v10732_v44  ;;  %v10800_v0 = vpop.f32.mrf.mxu3 }
 0x5c9   : > { %v10798_v35 = vpop.f32.mrf.mxu2 }
 0x5ca   : > { %3106 = vmax.xlane.f32.xlu0 %v10798_v35  ;;  %3140 = vmax.xlane.f32.xlu1 %v10792_v10 }
 0x5cb   : > { %3066 = vmax.xlane.f32.xlu2 %v10802_v38  ;;  %v10811_v19 = vpop.f32.mrf.mxu3 }
 0x5d1   : > { %v10807_v4 = vpop.f32.mrf.mxu2 }
 0x5d2   : > { %3142 = vmax.xlane.f32.xlu0 %v10800_v0 }
 0x5d3   : > { %3094 = vmax.xlane.f32.xlu2 %v10754_v56  ;;  %v10817_v2 = vpop.f32.mrf.mxu3 }
 0x5d6   : > { %v3027_v55 = vpop.xlane.xlu2 %3026 }
 0x5d7   : > { %v3154_v1 = vsub.f32 %v10706_v53, %v3027_v55 }
 0x5d9   : > { %v10813_v20 = vpop.f32.mrf.mxu2  ;;  %v3218_v40 = vmul.f32 1.442695, %v3154_v1 }
 0x5da   : > { %3110 = vmax.xlane.f32.xlu1 %v10813_v20 }
 0x5db   : > { %3126 = vmax.xlane.f32.xlu2 %v10734_v8  ;;  %v10827_v13 = vpop.f32.mrf.mxu3  ;;  %8463 = vpow2.f32 %v3218_v40 }
 0x5e1   : > { %v10819_v3 = vpop.f32.mrf.mxu2  ;;  %v10835_v46 = vpop.eup %8463 }
 0x5e2   : > { %3112 = vmax.xlane.f32.xlu0 %v10819_v3  ;;  %3146 = vmax.xlane.f32.xlu1 %v10817_v2  ;;  %13706 = vst [vmem:[#allocation115_spill] sm:$0xff] %v10835_v46 }
 0x5e3   : > { %3068 = vmax.xlane.f32.xlu2 %v10821_v41  ;;  %v10852_v33 = vpop.f32.mrf.mxu3 }
 0x5e9   : > { %v10829_v52 = vpop.f32.mrf.mxu2 }
 0x5ea   : > { %3148 = vmax.xlane.f32.xlu0 %v10827_v13 }
 0x5eb   : > { %3096 = vmax.xlane.f32.xlu2 %v10763_v51  ;;  %v10862_v1 = vpop.f32.mrf.mxu3 }
 0x5ee   : > { %v10833_v6 = vpop.xlane.xlu2 %3058 }
 0x5f1   : > { %v10837_v17 = vpop.f32.mrf.mxu2 }
 0x5f2   : > { %3346 = vadd.xlane.f32.xlu0 %v10835_v46  ;;  %3116 = vmax.xlane.f32.xlu1 %v10837_v17 }
 0x5f3   : > { %3038 = vmax.xlane.f32.xlu2 %v10761_v24 }
 0x5f6   : > { %v10842_v53 = vpop.xlane.xlu2 %3028 }
 0x5f9   : > { %v10844_v14 = vpop.f32.mrf.mxu2 }
 0x5fa   : > { %3118 = vmax.xlane.f32.xlu0 %v10844_v14 }
 0x5fb   : > { %3070 = vmax.xlane.f32.xlu2 %v10846_v61 }
 0x5fe   : > { %v3061_v47 = vpop.xlane.xlu2 %3060 }
 0x5ff   : > { %v3171_v34 = vsub.f32 %v10739_v9, %v3061_v47 }
 0x601   : > { %v3252_v29 = vmul.f32 1.442695, %v3171_v34  ;;  %v3123_v34 = vpop.xlane.xlu1 %3122 }
 0x603   : > { %8465 = vpow2.f32 %v3252_v29  ;;  %3040 = vmax.xlane.f32.xlu2 %v10768_v26 }
 0x606   : > { %v3031_v5 = vpop.xlane.xlu2 %3030 }
 0x607   : > { %v3156_v18 = vsub.f32 %v10716_v57, %v3031_v5 }
 0x609   : > { %v10854_v16 = vpop.eup %8465  ;;  %v3222_v32 = vmul.f32 1.442695, %v3156_v18 }
 0x60a   : > { %13707 = vst [vmem:[#allocation76_spill] sm:$0xff] %v10854_v16  ;;  %3380 = vadd.xlane.f32.xlu1 %v10854_v16 }
 0x60b   : > { %3072 = vmax.xlane.f32.xlu2 %v10856_v63  ;;  %8467 = vpow2.f32 %v3222_v32 }
 0x60e   : > { %v3063_v55 = vpop.xlane.xlu2 %3062 }
 0x60f   : > { %v3172_v9 = vsub.f32 %v10756_v43, %v3063_v55  ;;  %v3202_v43 = vsub.f32 %v10718_v60, %v3123_v34 }
 0x611   : > { %v3254_v40 = vmul.f32 1.442695, %v3172_v9  ;;  %v10867_v29 = vpop.eup %8467  ;;  %v3314_v32 = vmul.f32 1.442695, %v3202_v43  ;;  %v10877_v9 = vpop.permute.xlu0 %536 }
 0x612   : > { %3152 = vmax.xlane.f32.xlu1 %v10862_v1  ;;  %13708 = vst [vmem:[#allocation120_spill] sm:$0xff] %v10867_v29  ;;  %v10892_v43 = vpop.f32.mrf.mxu0 }
 0x613   : > { %8469 = vpow2.f32 %v3254_v40  ;;  %3132 = vmax.xlane.f32.xlu2 %v10759_v7  ;;  %13710 = vst [vmem:[#allocation123_spill] sm:$0xff] %v10877_v9 }
 0x616   : > { %v3091_v47 = vpop.xlane.xlu2 %3090 }
 0x617   : > { %v3186_v57 = vsub.f32 %v10737_v15, %v3091_v47 }
 0x619   : > { %v10869_v5 = vpop.eup %8469  ;;  %v3282_v18 = vmul.f32 1.442695, %v3186_v57 }
 0x61a   : > { %13709 = vst [vmem:[#allocation5_spill] sm:$0xff] %v10869_v5  ;;  %3382 = vadd.xlane.f32.xlu0 %v10869_v5  ;;  %3350 = vadd.xlane.f32.xlu1 %v10867_v29  ;;  %v10906_v22 = vpop.f32.mrf.mxu0 }
 0x61b   : > { %8471 = vpow2.f32 %v3282_v18  ;;  %3074 = vmax.xlane.f32.xlu2 %v10871_v25  ;;  %v10890_v18 = vpop.permute.xlu0 %551 }
 0x61c   : > { %8473 = vpow2.f32 %v3314_v32  ;;  %13714 = vst [vmem:[#allocation87_spill] sm:$0xff] %v10890_v18 }
 0x61e   : > { %v3033_v55 = vpop.xlane.xlu2 %3032 }
 0x61f   : > { %v3157_v15 = vsub.f32 %v10724_v50, %v3033_v55 }
 0x621   : > { %v10880_v40 = vpop.eup %8471  ;;  %v3224_v47 = vmul.f32 1.442695, %v3157_v15 }
 0x622   : > { %13711 = vst [vmem:[#allocation126_spill] sm:$0xff] %v10880_v40  ;;  %3410 = vadd.xlane.f32.xlu1 %v10880_v40  ;;  %v10886_v34 = vpop.eup %8473 }
 0x623   : > { %8475 = vpow2.f32 %v3224_v47  ;;  %3102 = vmax.xlane.f32.xlu2 %v10787_v39  ;;  %13712 = vst [vmem:[#allocation95_spill] sm:$0xff] %v10886_v34  ;;  %v3125_v55 = vpop.xlane.xlu0 %3124  ;;  %v10898_v47 = vpop.f32.mrf.mxu1 }
 0x624   : > { %v3203_v9 = vsub.f32 %v10728_v11, %v3125_v55 }
 0x626   : > { %v10884_v60 = vpop.xlane.xlu2 %3064  ;;  %v3316_v37 = vmul.f32 1.442695, %v3203_v9 }
 0x629   : > { %v10888_v57 = vpop.eup %8475 }
 0x62a   : > { %13713 = vst [vmem:[#allocation92_spill] sm:$0xff] %v10888_v57  ;;  %3352 = vadd.xlane.f32.xlu0 %v10888_v57  ;;  %3442 = vadd.xlane.f32.xlu1 %v10886_v34 }
 0x62b   : > { %3044 = vmax.xlane.f32.xlu2 %v10892_v43  ;;  %v10913_v11 = vpop.f32.mrf.mxu1 }
 0x62e   : > { %v3093_v50 = vpop.xlane.xlu2 %3092 }
 0x62f   : > { %v3187_v32 = vsub.f32 %v10748_v31, %v3093_v50 }
 0x631   : > { %v3284_v15 = vmul.f32 1.442695, %v3187_v32  ;;  %v3037_v32 = vpop.xlane.xlu0 %3036 }
 0x632   : > { %v3159_v9 = vsub.f32 %v10741_v42, %v3037_v32 }
 0x633   : > { %3076 = vmax.xlane.f32.xlu2 %v10898_v47  ;;  %8477 = vpow2.f32 %v3284_v15  ;;  %v10934_v16 = vpop.f32.mrf.mxu1 }
 0x634   : > { %8479 = vpow2.f32 %v3316_v37  ;;  %v3228_v15 = vmul.f32 1.442695, %v3159_v9 }
 0x636   : > { %v10902_v18 = vpop.xlane.xlu2 %3034 }
 0x639   : > { %v10904_v54 = vpop.eup %8477 }
 0x63a   : > { %13715 = vst [vmem:[#allocation112_spill] sm:$0xff] %v10904_v54  ;;  %3412 = vadd.xlane.f32.xlu0 %v10904_v54  ;;  %v10911_v40 = vpop.eup %8479 }
 0x63b   : > { %3046 = vmax.xlane.f32.xlu2 %v10906_v22  ;;  %13716 = vst [vmem:[#allocation105_spill] sm:$0xff] %v10911_v40 }
 0x63e   : > { %v3067_v31 = vpop.xlane.xlu2 %3066 }
 0x63f   : > { %v3174_v50 = vsub.f32 %v10802_v38, %v3067_v31 }
 0x641   : > { %v3258_v34 = vmul.f32 1.442695, %v3174_v50 }
 0x642   : > { %3444 = vadd.xlane.f32.xlu0 %v10911_v40 }
 0x643   : > { %8481 = vpow2.f32 %v3258_v34  ;;  %3078 = vmax.xlane.f32.xlu2 %v10913_v11  ;;  %v10927_v34 = vpop.f32.mrf.mxu0 }
 0x644   : > { %8483 = vpow2.f32 %v3228_v15 }
 0x646   : > { %v10918_v55 = vpop.xlane.xlu2 %3094 }
 0x649   : > { %v10920_v37 = vpop.eup %8481 }
 0x64a   : > { %13717 = vst [vmem:[#allocation125_spill] sm:$0xff] %v10920_v37  ;;  %3386 = vadd.xlane.f32.xlu1 %v10920_v37  ;;  %v10925_v50 = vpop.eup %8483  ;;  %v10957_v37 = vpop.f32.mrf.mxu1 }
 0x64b   : > { %3138 = vmax.xlane.f32.xlu2 %v10785_v49  ;;  %13718 = vst [vmem:[#allocation107_spill] sm:$0xff] %v10925_v50  ;;  %v10948_v5 = vpop.f32.mrf.mxu0 }
 0x64e   : > { %v3127_v38 = vpop.xlane.xlu2 %3126 }
 0x64f   : > { %v3204_v31 = vsub.f32 %v10734_v8, %v3127_v38 }
 0x651   : > { %v3318_v42 = vmul.f32 1.442695, %v3204_v31  ;;  %v10939_v31 = vpop.xlane.xlu1 %3128 }
 0x652   : > { %3356 = vadd.xlane.f32.xlu1 %v10925_v50 }
 0x653   : > { %8485 = vpow2.f32 %v3318_v42  ;;  %3048 = vmax.xlane.f32.xlu2 %v10927_v34 }
 0x656   : > { %v3069_v32 = vpop.xlane.xlu2 %3068 }
 0x657   : > { %v3175_v9 = vsub.f32 %v10821_v41, %v3069_v32 }
 0x659   : > { %v10932_v40 = vpop.eup %8485  ;;  %v3260_v15 = vmul.f32 1.442695, %v3175_v9  ;;  %v3099_v9 = vpop.xlane.xlu1 %3098 }
 0x65a   : > { %13719 = vst [vmem:[#allocation104_spill] sm:$0xff] %v10932_v40  ;;  %3446 = vadd.xlane.f32.xlu0 %v10932_v40 }
 0x65b   : > { %8487 = vpow2.f32 %v3260_v15  ;;  %3080 = vmax.xlane.f32.xlu2 %v10934_v16 }
 0x65e   : > { %v3097_v8 = vpop.xlane.xlu2 %3096 }
 0x65f   : > { %v3189_v38 = vsub.f32 %v10763_v51, %v3097_v8  ;;  %v3190_v51 = vsub.f32 %v10770_v48, %v3099_v9  ;;  %v10965_v48 = vpop.f32.mrf.mxu0 }
 0x661   : > { %v10941_v42 = vpop.eup %8487  ;;  %v3288_v54 = vmul.f32 1.442695, %v3189_v38 }
 0x662   : > { %13720 = vst [vmem:[#allocation79_spill] sm:$0xff] %v10941_v42  ;;  %3388 = vadd.xlane.f32.xlu0 %v10941_v42 }
 0x663   : > { %8489 = vpow2.f32 %v3288_v54  ;;  %3108 = vmax.xlane.f32.xlu2 %v10807_v4  ;;  %v3290_v54 = vmul.f32 1.442695, %v3190_v51  ;;  %v10970_v51 = vpop.f32.mrf.mxu1 }
 0x666   : > { %v3039_v41 = vpop.xlane.xlu2 %3038 }
 0x667   : > { %v3160_v32 = vsub.f32 %v10761_v24, %v3039_v41  ;;  %v10982_v50 = vpop.f32.mrf.mxu0 }
 0x669   : > { %v10946_v15 = vpop.eup %8489  ;;  %v3230_v40 = vmul.f32 1.442695, %v3160_v32 }
 0x66a   : > { %13721 = vst [vmem:[#allocation118_spill] sm:$0xff] %v10946_v15  ;;  %3416 = vadd.xlane.f32.xlu1 %v10946_v15  ;;  %v3043_v15 = vpop.xlane.xlu1 %3042 }
 0x66b   : > { %8491 = vpow2.f32 %v3230_v40  ;;  %3050 = vmax.xlane.f32.xlu2 %v10948_v5 }
 0x66c   : > { %8493 = vpow2.f32 %v3290_v54 }
 0x66e   : > { %v10953_v8 = vpop.xlane.xlu2 %3070 }
 0x671   : > { %v10955_v38 = vpop.eup %8491 }
 0x672   : > { %3358 = vadd.xlane.f32.xlu0 %v10955_v38  ;;  %v10963_v41 = vpop.eup %8493 }
 0x673   : > { %3082 = vmax.xlane.f32.xlu2 %v10957_v37  ;;  %13722 = vst [vmem:[#allocation116_spill] sm:$0xff] %v10963_v41 }
 0x676   : > { %v10961_v24 = vpop.xlane.xlu2 %3040 }
 0x67a   : > { %3418 = vadd.xlane.f32.xlu0 %v10963_v41  ;;  %v3162_v41 = vsub.f32 %v10776_v28, %v3043_v15  ;;  %v3135_v28 = vpop.xlane.xlu1 %3134 }
 0x67b   : > { %3052 = vmax.xlane.f32.xlu2 %v10965_v48 }
 0x67e   : > { %v3073_v40 = vpop.xlane.xlu2 %3072 }
 0x67f   : > { %v3177_v32 = vsub.f32 %v10856_v63, %v3073_v40  ;;  %v3234_v63 = vmul.f32 1.442695, %v3162_v41 }
 0x681   : > { %v3264_v9 = vmul.f32 1.442695, %v3177_v32 }
 0x683   : > { %8495 = vpow2.f32 %v3264_v9  ;;  %3084 = vmax.xlane.f32.xlu2 %v10970_v51 }
 0x686   : > { %v3133_v54 = vpop.xlane.xlu2 %3132 }
 0x687   : > { %v3207_v42 = vsub.f32 %v10759_v7, %v3133_v54  ;;  %v10986_v7 = vpop.xlane.xlu0 %3130  ;;  %v10993_v54 = vpop.f32.mrf.mxu1 }
 0x689   : > { %v10974_v46 = vpop.eup %8495  ;;  %v3324_v57 = vmul.f32 1.442695, %v3207_v42 }
 0x68a   : > { %13723 = vst [vmem:[#allocation69_spill] sm:$0xff] %v10974_v46  ;;  %3392 = vadd.xlane.f32.xlu1 %v10974_v46 }
 0x68b   : > { %8497 = vpow2.f32 %v3324_v57  ;;  %3144 = vmax.xlane.f32.xlu2 %v10811_v19 }
 0x68c   : > { %8499 = vpow2.f32 %v3234_v63  ;;  %v3208_v63 = vsub.f32 %v10766_v21, %v3135_v28 }
 0x68e   : > { %v3075_v40 = vpop.xlane.xlu2 %3074 }
 0x68f   : > { %v3178_v32 = vsub.f32 %v10871_v25, %v3075_v40  ;;  %v3326_v40 = vmul.f32 1.442695, %v3208_v63 }
 0x691   : > { %v10980_v9 = vpop.eup %8497  ;;  %v3266_v29 = vmul.f32 1.442695, %v3178_v32 }
 0x692   : > { %13724 = vst [vmem:[#allocation6_spill] sm:$0xff] %v10980_v9  ;;  %3452 = vadd.xlane.f32.xlu1 %v10980_v9  ;;  %v10989_v15 = vpop.eup %8499 }
 0x693   : > { %8501 = vpow2.f32 %v3266_v29  ;;  %3054 = vmax.xlane.f32.xlu2 %v10982_v50  ;;  %v10999_v29 = vpop.xlane.xlu0 %3100 }
 0x696   : > { %v3103_v57 = vpop.xlane.xlu2 %3102 }
 0x697   : > { %v3192_v42 = vsub.f32 %v10787_v39, %v3103_v57  ;;  %v3105_v57 = vpop.xlane.xlu1 %3104 }
 0x698   : > { %v3193_v21 = vsub.f32 %v10794_v27, %v3105_v57  ;;  %v3170_v27 = vsub.f32 %v10726_v23, %v10833_v6 }
 0x699   : > { %v10991_v25 = vpop.eup %8501  ;;  %v3294_v41 = vmul.f32 1.442695, %v3192_v42 }
 0x69a   : > { %13725 = vst [vmem:[#allocation128_spill] sm:$0xff] %v10991_v25  ;;  %3394 = vadd.xlane.f32.xlu0 %v10991_v25  ;;  %3362 = vadd.xlane.f32.xlu1 %v10989_v15  ;;  %v3250_v57 = vmul.f32 1.442695, %v3170_v27 }
 0x69b   : > { %8503 = vpow2.f32 %v3294_v41  ;;  %3086 = vmax.xlane.f32.xlu2 %v10993_v54  ;;  %v3296_v41 = vmul.f32 1.442695, %v3193_v21  ;;  %v3137_v63 = vpop.xlane.xlu0 %3136  ;;  %v11025_v21 = vpop.f32.mrf.mxu1 }
 0x69c   : > { %8505 = vpow2.f32 %v3326_v40  ;;  %v3209_v40 = vsub.f32 %v10774_v62, %v3137_v63 }
 0x69e   : > { %v3045_v39 = vpop.xlane.xlu2 %3044 }
 0x69f   : > { %v3163_v32 = vsub.f32 %v10892_v43, %v3045_v39  ;;  %v11013_v43 = vpop.f32.mrf.mxu0 }
 0x6a1   : > { %v11002_v9 = vpop.eup %8503  ;;  %v3236_v42 = vmul.f32 1.442695, %v3163_v32  ;;  %v3328_v32 = vmul.f32 1.442695, %v3209_v40  ;;  %v3155_v40 = vsub.f32 %v10713_v30, %v10842_v53 }
 0x6a2   : > { %13726 = vst [vmem:[#allocation106_spill] sm:$0xff] %v11002_v9  ;;  %3422 = vadd.xlane.f32.xlu1 %v11002_v9  ;;  %v11009_v46 = vpop.eup %8505 }
 0x6a3   : > { %8507 = vpow2.f32 %v3236_v42  ;;  %3114 = vmax.xlane.f32.xlu2 %v10829_v52  ;;  %13727 = vst [vmem:[#allocation119_spill] sm:$0xff] %v11009_v46 }
 0x6a4   : > { %8509 = vpow2.f32 %v3296_v41 }
 0x6a5   : > { %8511 = vpow2.f32 %v3328_v32 }
 0x6a6   : > { %v11007_v28 = vpop.xlane.xlu2 %3076  ;;  %8513 = vpow2.f32 %v3250_v57  ;;  %v3220_v57 = vmul.f32 1.442695, %v3155_v40  ;;  %v3173_v40 = vsub.f32 %v10780_v36, %v10884_v60  ;;  %v3158_v36 = vsub.f32 %v10732_v44, %v10902_v18 }
 0x6a7   : > { %v3188_v44 = vsub.f32 %v10754_v56, %v10918_v55  ;;  %v3205_v56 = vsub.f32 %v10743_v59, %v10939_v31  ;;  %v3176_v59 = vsub.f32 %v10846_v61, %v10953_v8 }
 0x6a9   : > { %v11011_v25 = vpop.eup %8507 }
 0x6aa   : > { %3454 = vadd.xlane.f32.xlu1 %v11009_v46  ;;  %3364 = vadd.xlane.f32.xlu0 %v11011_v25  ;;  %v11023_v42 = vpop.eup %8509 }
 0x6ab   : > { %3056 = vmax.xlane.f32.xlu2 %v11013_v43  ;;  %13728 = vst [vmem:[#allocation96_spill] sm:$0xff] %v11023_v42  ;;  %v11030_v63 = vpop.eup %8511 }
 0x6ac   : > { %13729 = vst [vmem:[#allocation7_spill] sm:$0xff] %v11030_v63  ;;  %v11032_v6 = vpop.eup %8513 }
 0x6ad   : > { %13730 = vst [vmem:[#allocation83_spill] sm:$0xff] %v11032_v6 }
 0x6ae   : > { %v11021_v39 = vpop.xlane.xlu2 %3046 }
 0x6b2   : > { %3424 = vadd.xlane.f32.xlu0 %v11023_v42  ;;  %v13774_v42 = vld [vmem:[#allocation8_spill] sm:$0xff] }
 0x6b3   : > { %3088 = vmax.xlane.f32.xlu2 %v11025_v21 }
 0x6b6   : > { %v3079_v62 = vpop.xlane.xlu2 %3078 }
 0x6b7   : > { %v3180_v41 = vsub.f32 %v10913_v11, %v3079_v62 }
 0x6b9   : > { %v3270_v23 = vmul.f32 1.442695, %v3180_v41 }
 0x6ba   : > { %3456 = vadd.xlane.f32.xlu0 %v11030_v63  ;;  %v11061_v63 = vpop.f32.mrf.mxu2 }
 0x6bb   : > { %8515 = vpow2.f32 %v3270_v23  ;;  %3378 = vadd.xlane.f32.xlu2 %v11032_v6  ;;  %v11046_v6 = vpop.xlane.xlu0 %3106 }
 0x6be   : > { %v3139_v27 = vpop.xlane.xlu2 %3138 }
 0x6bf   : > { %v3210_v32 = vsub.f32 %v10785_v49, %v3139_v27  ;;  %v11050_v49 = vpop.xlane.xlu1 %3140 }
 0x6c1   : > { %v11039_v46 = vpop.eup %8515  ;;  %v3330_v11 = vmul.f32 1.442695, %v3210_v32  ;;  %v3256_v32 = vmul.f32 1.442695, %v3173_v40 }
 0x6c2   : > { %3398 = vadd.xlane.f32.xlu1 %v11039_v46 }
 0x6c3   : > { %8517 = vpow2.f32 %v3330_v11  ;;  %3150 = vmax.xlane.f32.xlu2 %v10852_v33  ;;  %v11059_v11 = vpop.xlane.xlu0 %3142 }
 0x6c4   : > { %8519 = vpow2.f32 %v3220_v57 }
 0x6c6   : > { %v3049_v62 = vpop.xlane.xlu2 %3048 }
 0x6c7   : > { %v3165_v41 = vsub.f32 %v10927_v34, %v3049_v62 }
 0x6c9   : > { %v11044_v23 = vpop.eup %8517  ;;  %v3240_v30 = vmul.f32 1.442695, %v3165_v41  ;;  %v3111_v41 = vpop.xlane.xlu1 %3110 }
 0x6ca   : > { %13731 = vst [vmem:[#allocation94_spill] sm:$0xff] %v11044_v23  ;;  %v11048_v53 = vpop.eup %8519  ;;  %3458 = vadd.xlane.f32.xlu0 %v11044_v23 }
 0x6cb   : > { %13732 = vst [vmem:[#allocation80_spill] sm:$0xff] %v11048_v53  ;;  %8521 = vpow2.f32 %v3240_v30  ;;  %3348 = vadd.xlane.f32.xlu2 %v11048_v53  ;;  %v3226_v30 = vmul.f32 1.442695, %v3158_v36  ;;  %v11073_v23 = vpop.xlane.xlu0 %3112  ;;  %v13775_v53 = vld [vmem:[#allocation9_spill] sm:$0xff] }
 0x6ce   : > { %v3081_v27 = vpop.xlane.xlu2 %3080 }
 0x6cf   : > { %v3181_v34 = vsub.f32 %v10934_v16, %v3081_v27 }
 0x6d1   : > { %v11057_v57 = vpop.eup %8521  ;;  %v3272_v62 = vmul.f32 1.442695, %v3181_v34  ;;  %v11078_v18 = vpop.xlane.xlu1 %3146 }
 0x6d2   : > { %3368 = vadd.xlane.f32.xlu1 %v11057_v57 }
 0x6d3   : > { %8523 = vpow2.f32 %v3272_v62  ;;  %3120 = vmax.xlane.f32.xlu2 %v11061_v63  ;;  %v3286_v62 = vmul.f32 1.442695, %v3188_v44  ;;  %v11090_v55 = vpop.xlane.xlu0 %3148 }
 0x6d4   : > { %8525 = vpow2.f32 %v3256_v32 }
 0x6d6   : > { %v3109_v60 = vpop.xlane.xlu2 %3108 }
 0x6d7   : > { %v3195_v16 = vsub.f32 %v10807_v4, %v3109_v60 }
 0x6d9   : > { %v11068_v40 = vpop.eup %8523  ;;  %v3300_v27 = vmul.f32 1.442695, %v3195_v16 }
 0x6da   : > { %v11070_v34 = vpop.eup %8525  ;;  %3400 = vadd.xlane.f32.xlu0 %v11068_v40 }
 0x6db   : > { %13733 = vst [vmem:[#allocation108_spill] sm:$0xff] %v11070_v34  ;;  %8527 = vpow2.f32 %v3300_v27  ;;  %3384 = vadd.xlane.f32.xlu2 %v11070_v34  ;;  %v3196_v27 = vsub.f32 %v10813_v20, %v3111_v41  ;;  %v11106_v31 = vpop.xlane.xlu0 %3346  ;;  %v3262_v41 = vmul.f32 1.442695, %v3176_v59 }
 0x6dc   : > { %8529 = vpow2.f32 %v3226_v30 }
 0x6dd   : > { %v3302_v44 = vmul.f32 1.442695, %v3196_v27 }
 0x6de   : > { %v3051_v4 = vpop.xlane.xlu2 %3050 }
 0x6df   : > { %v3166_v32 = vsub.f32 %v10948_v5, %v3051_v4  ;;  %v11092_v5 = vpop.xlane.xlu1 %3116  ;;  %v3320_v4 = vmul.f32 1.442695, %v3205_v56  ;;  %v3206_v56 = vsub.f32 %v10750_v45, %v10986_v7 }
 0x6e1   : > { %v11081_v36 = vpop.eup %8527  ;;  %v3242_v60 = vmul.f32 1.442695, %v3166_v32 }
 0x6e2   : > { %13734 = vst [vmem:[#allocation110_spill] sm:$0xff] %v11081_v36  ;;  %v11083_v16 = vpop.eup %8529  ;;  %3428 = vadd.xlane.f32.xlu1 %v11081_v36 }
 0x6e3   : > { %8531 = vpow2.f32 %v3242_v60  ;;  %3354 = vadd.xlane.f32.xlu2 %v11083_v16  ;;  %v3119_v8 = vpop.xlane.xlu0 %3118 }
 0x6e4   : > { %8533 = vpow2.f32 %v3286_v62 }
 0x6e5   : > { %8535 = vpow2.f32 %v3302_v44 }
 0x6e6   : > { %v11094_v30 = vpop.xlane.xlu2 %3082  ;;  %8537 = vpow2.f32 %v3320_v4  ;;  %v3322_v4 = vmul.f32 1.442695, %v3206_v56 }
 0x6e7   : > { %v11108_v62 = vpop.xlane.xlu1 %3380  ;;  %8539 = vpow2.f32 %v3262_v41 }
 0x6e8   : > { %13736 = vst [vmem:[#allocation73_spill] sm:$0xff] %v11108_v62 }
 0x6e9   : > { %v11096_v32 = vpop.eup %8531 }
 0x6ea   : > { %v11098_v34 = vpop.eup %8533  ;;  %3370 = vadd.xlane.f32.xlu0 %v11096_v32 }
 0x6eb   : > { %13735 = vst [vmem:[#allocation122_spill] sm:$0xff] %v11098_v34  ;;  %3414 = vadd.xlane.f32.xlu2 %v11098_v34  ;;  %v11110_v60 = vpop.eup %8535 }
 0x6ec   : > { %v11112_v27 = vpop.eup %8537 }
 0x6ed   : > { %13737 = vst [vmem:[#allocation63_spill] sm:$0xff] %v11112_v27  ;;  %v11119_v34 = vpop.eup %8539 }
 0x6ee   : > { %v11104_v20 = vpop.xlane.xlu2 %3052  ;;  %13738 = vst [vmem:[#allocation88_spill] sm:$0xff] %v11119_v34 }
 0x6ef   : > { %v11121_v62 = vpop.xlane.xlu1 %3152 }
 0x6f2   : > { %3430 = vadd.xlane.f32.xlu0 %v11110_v60 }
 0x6f3   : > { %3448 = vadd.xlane.f32.xlu2 %v11112_v27  ;;  %v3161_v27 = vsub.f32 %v10768_v26, %v10961_v24 }
 0x6f5   : > { %v3232_v7 = vmul.f32 1.442695, %v3161_v27 }
 0x6f6   : > { %v3085_v61 = vpop.xlane.xlu2 %3084 }
 0x6f7   : > { %v3183_v44 = vsub.f32 %v10970_v51, %v3085_v61  ;;  %v11129_v51 = vpop.xlane.xlu0 %3382  ;;  %v11137_v26 = vpop.xlane.xlu1 %3350 }
 0x6f9   : > { %v3276_v59 = vmul.f32 1.442695, %v3183_v44  ;;  %v3191_v44 = vsub.f32 %v10778_v58, %v10999_v29  ;;  %v3179_v58 = vsub.f32 %v10898_v47, %v11007_v28  ;;  %v3164_v47 = vsub.f32 %v10906_v22, %v11021_v39 }
 0x6fb   : > { %8541 = vpow2.f32 %v3276_v59  ;;  %3390 = vadd.xlane.f32.xlu2 %v11119_v34  ;;  %v635_v34 = vadd.f32 %v13774_v42, %v10566_v12 }
 0x6fc   : > { %8543 = vpow2.f32 %v3322_v4 }
 0x6fe   : > { %v3145_v9 = vpop.xlane.xlu2 %3144 }
 0x6ff   : > { %v3213_v45 = vsub.f32 %v10811_v19, %v3145_v9  ;;  %v3292_v9 = vmul.f32 1.442695, %v3191_v44  ;;  %v11142_v4 = vpop.xlane.xlu0 %3352  ;;  %v11152_v29 = vpop.xlane.xlu1 %3410 }
 0x700   : > { %13741 = vst [vmem:[#allocation109_spill] sm:$0xff] %v11152_v29 }
 0x701   : > { %v11127_v41 = vpop.eup %8541  ;;  %v3336_v56 = vmul.f32 1.442695, %v3213_v45 }
 0x702   : > { %v11131_v61 = vpop.eup %8543  ;;  %3404 = vadd.xlane.f32.xlu1 %v11127_v41 }
 0x703   : > { %13739 = vst [vmem:[#allocation98_spill] sm:$0xff] %v11131_v61  ;;  %8545 = vpow2.f32 %v3336_v56  ;;  %3450 = vadd.xlane.f32.xlu2 %v11131_v61  ;;  %v3214_v56 = vsub.f32 %v10817_v2, %v11078_v18 }
 0x704   : > { %8547 = vpow2.f32 %v3232_v7 }
 0x706   : > { %v3055_v19 = vpop.xlane.xlu2 %3054 }
 0x707   : > { %v3168_v24 = vsub.f32 %v10982_v50, %v3055_v19  ;;  %v3338_v50 = vmul.f32 1.442695, %v3214_v56  ;;  %v3268_v19 = vmul.f32 1.442695, %v3179_v58  ;;  %v11157_v61 = vpop.xlane.xlu0 %3412  ;;  %v11169_v58 = vpop.xlane.xlu1 %3442 }
 0x708   : > { %13742 = vst [vmem:[#allocation81_spill] sm:$0xff] %v11157_v61 }
 0x709   : > { %v11140_v27 = vpop.eup %8545  ;;  %v3246_v59 = vmul.f32 1.442695, %v3168_v24  ;;  %13745 = vst [vmem:[#allocation99_spill] sm:$0xff] %v11169_v58 }
 0x70a   : > { %13740 = vst [vmem:[#allocation121_spill] sm:$0xff] %v11140_v27  ;;  %v11144_v45 = vpop.eup %8547  ;;  %3464 = vadd.xlane.f32.xlu1 %v11140_v27 }
 0x70b   : > { %8549 = vpow2.f32 %v3246_v59  ;;  %3360 = vadd.xlane.f32.xlu2 %v11144_v45 }
 0x70c   : > { %8551 = vpow2.f32 %v3292_v9  ;;  %v3200_v9 = vsub.f32 %v10844_v14, %v3119_v8 }
 0x70d   : > { %8553 = vpow2.f32 %v3338_v50  ;;  %v3238_v50 = vmul.f32 1.442695, %v3164_v47 }
 0x70e   : > { %v3087_v7 = vpop.xlane.xlu2 %3086 }
 0x70f   : > { %v3184_v44 = vsub.f32 %v10993_v54, %v3087_v7  ;;  %v3310_v54 = vmul.f32 1.442695, %v3200_v9  ;;  %v11179_v22 = vpop.xlane.xlu0 %3444 }
 0x710   : > { %13747 = vst [vmem:[#allocation64_spill] sm:$0xff] %v11179_v22 }
 0x711   : > { %v11155_v24 = vpop.eup %8549  ;;  %v3278_v2 = vmul.f32 1.442695, %v3184_v44  ;;  %v3217_v44 = vsub.f32 %v10862_v1, %v11121_v62  ;;  %v11187_v62 = vpop.xlane.xlu1 %3386 }
 0x712   : > { %v11159_v18 = vpop.eup %8551  ;;  %3374 = vadd.xlane.f32.xlu1 %v11155_v24  ;;  %13748 = vst [vmem:[#allocation20_spill] sm:$0xff] %v11187_v62 }
 0x713   : > { %13743 = vst [vmem:[#allocation89_spill] sm:$0xff] %v11159_v18  ;;  %8555 = vpow2.f32 %v3278_v2  ;;  %3420 = vadd.xlane.f32.xlu2 %v11159_v18  ;;  %v11167_v56 = vpop.eup %8553  ;;  %v3344_v39 = vmul.f32 1.442695, %v3217_v44 }
 0x714   : > { %8557 = vpow2.f32 %v3268_v19  ;;  %13744 = vst [vmem:[#allocation72_spill] sm:$0xff] %v11167_v56 }
 0x715   : > { %8559 = vpow2.f32 %v3310_v54 }
 0x716   : > { %v3115_v28 = vpop.xlane.xlu2 %3114 }
 0x717   : > { %v3198_v59 = vsub.f32 %v10829_v52, %v3115_v28  ;;  %v3194_v52 = vsub.f32 %v10798_v35, %v11046_v6  ;;  %v3215_v35 = vsub.f32 %v10827_v13, %v11090_v55  ;;  %v11197_v6 = vpop.xlane.xlu0 %3446 }
 0x718   : > { %13749 = vst [vmem:[#allocation124_spill] sm:$0xff] %v11197_v6 }
 0x719   : > { %v11171_v7 = vpop.eup %8555  ;;  %v3306_v14 = vmul.f32 1.442695, %v3198_v59  ;;  %v3298_v1 = vmul.f32 1.442695, %v3194_v52 }
 0x71a   : > { %v11173_v8 = vpop.eup %8557  ;;  %3466 = vadd.xlane.f32.xlu1 %v11167_v56  ;;  %3406 = vadd.xlane.f32.xlu0 %v11171_v7 }
 0x71b   : > { %13746 = vst [vmem:[#allocation67_spill] sm:$0xff] %v11173_v8  ;;  %8561 = vpow2.f32 %v3306_v14  ;;  %3396 = vadd.xlane.f32.xlu2 %v11173_v8  ;;  %v11185_v9 = vpop.eup %8559 }
 0x71c   : > { %8563 = vpow2.f32 %v3238_v50  ;;  %v3340_v50 = vmul.f32 1.442695, %v3215_v35  ;;  %v3212_v35 = vsub.f32 %v10800_v0, %v11059_v11 }
 0x71d   : > { %8565 = vpow2.f32 %v3344_v39 }
 0x71e   : > { %v3057_v19 = vpop.xlane.xlu2 %3056 }
 0x71f   : > { %v3169_v2 = vsub.f32 %v11013_v43, %v3057_v19  ;;  %v3211_v43 = vsub.f32 %v10792_v10, %v11050_v49  ;;  %v11208_v19 = vpop.xlane.xlu1 %3356  ;;  %v3182_v10 = vsub.f32 %v10957_v37, %v11094_v30  ;;  %v11215_v13 = vpop.xlane.xlu0 %3388 }
 0x720   : > { %13751 = vst [vmem:[#allocation84_spill] sm:$0xff] %v11215_v13 }
 0x721   : > { %v11189_v47 = vpop.eup %8561  ;;  %v3248_v54 = vmul.f32 1.442695, %v3169_v2  ;;  %v3332_v44 = vmul.f32 1.442695, %v3211_v43  ;;  %v3274_v55 = vmul.f32 1.442695, %v3182_v10  ;;  %v3167_v10 = vsub.f32 %v10965_v48, %v11104_v20 }
 0x722   : > { %v11191_v28 = vpop.eup %8563  ;;  %3438 = vadd.xlane.f32.xlu1 %v11185_v9  ;;  %3434 = vadd.xlane.f32.xlu0 %v11189_v47  ;;  %v3334_v43 = vmul.f32 1.442695, %v3212_v35 }
 0x723   : > { %8567 = vpow2.f32 %v3248_v54  ;;  %3366 = vadd.xlane.f32.xlu2 %v11191_v28  ;;  %v11202_v14 = vpop.eup %8565  ;;  %v3244_v0 = vmul.f32 1.442695, %v3167_v10 }
 0x724   : > { %8569 = vpow2.f32 %v3298_v1 }
 0x725   : > { %8571 = vpow2.f32 %v3340_v50 }
 0x726   : > { %v3089_v59 = vpop.xlane.xlu2 %3088  ;;  %8573 = vpow2.f32 %v3332_v44 }
 0x727   : > { %v11223_v54 = vpop.xlane.xlu1 %3416  ;;  %8575 = vpow2.f32 %v3274_v55  ;;  %v11229_v37 = vpop.xlane.xlu0 %3358  ;;  %v3197_v55 = vsub.f32 %v10819_v3, %v11073_v23  ;;  %v3185_v10 = vsub.f32 %v11025_v21, %v3089_v59 }
 0x728   : > { %13755 = vst [vmem:[#allocation82_spill] sm:$0xff] %v11223_v54  ;;  %8577 = vpow2.f32 %v3334_v43 }
 0x729   : > { %v11204_v52 = vpop.eup %8567  ;;  %8579 = vpow2.f32 %v3244_v0  ;;  %v3304_v20 = vmul.f32 1.442695, %v3197_v55  ;;  %v3280_v0 = vmul.f32 1.442695, %v3185_v10  ;;  %v13762_v10 = vld [vmem:[#allocation10_spill] sm:$0xff] }
 0x72a   : > { %v11206_v39 = vpop.eup %8569  ;;  %3472 = vadd.xlane.f32.xlu1 %v11202_v14  ;;  %3376 = vadd.xlane.f32.xlu0 %v11204_v52 }
 0x72b   : > { %13750 = vst [vmem:[#allocation77_spill] sm:$0xff] %v11206_v39  ;;  %3426 = vadd.xlane.f32.xlu2 %v11206_v39  ;;  %v11219_v2 = vpop.eup %8571 }
 0x72c   : > { %13753 = vst [vmem:[#allocation113_spill] sm:$0xff] %v11219_v2  ;;  %v11221_v1 = vpop.eup %8573 }
 0x72d   : > { %13754 = vst [vmem:[#allocation74_spill] sm:$0xff] %v11221_v1  ;;  %v11231_v50 = vpop.eup %8575 }
 0x72e   : > { %v11217_v49 = vpop.xlane.xlu2 %3378  ;;  %v11242_v11 = vpop.eup %8577 }
 0x72f   : > { %13752 = vst [vmem:[#allocation90_spill] sm:$0xff] %v11217_v49  ;;  %v11233_v44 = vpop.xlane.xlu1 %3392  ;;  %v11240_v22 = vpop.xlane.xlu0 %3418 }
 0x730   : > { %13757 = vst [vmem:[#allocation30_spill] sm:$0xff] %v11240_v22  ;;  %v11252_v49 = vpop.eup %8579 }
 0x731   : > { %13758 = vst [vmem:[#allocation26_spill] sm:$0xff] %v11242_v11 }
 0x732   : > { %3468 = vadd.xlane.f32.xlu0 %v11219_v2 }
 0x733   : > { %3460 = vadd.xlane.f32.xlu2 %v11221_v1  ;;  %v737_v1 = vadd.f32 %v13762_v10, %v10566_v12 }
 0x736   : > { %v3151_v30 = vpop.xlane.xlu2 %3150 }
 0x737   : > { %v11247_v35 = vpop.xlane.xlu1 %3452  ;;  %v11249_v43 = vpop.xlane.xlu0 %3394 }
 0x738   : > { %13759 = vst [vmem:[#allocation65_spill] sm:$0xff] %v11247_v35 }
 0x73b   : > { %3402 = vadd.xlane.f32.xlu2 %v11231_v50 }
 0x73e   : > { %v11238_v58 = vpop.xlane.xlu2 %3348 }
 0x73f   : > { %13756 = vst [vmem:[#allocation114_spill] sm:$0xff] %v11238_v58  ;;  %v11256_v61 = vpop.xlane.xlu1 %3362  ;;  %v11260_v23 = vpop.xlane.xlu0 %3364 }
 0x743   : > { %3462 = vadd.xlane.f32.xlu2 %v11242_v11 }
 0x746   : > { %v3121_v6 = vpop.xlane.xlu2 %3120 }
 0x747   : > { %v3201_v48 = vsub.f32 %v11061_v63, %v3121_v6  ;;  %v11272_v59 = vpop.xlane.xlu1 %3422  ;;  %v11274_v55 = vpop.xlane.xlu0 %3424 }
 0x748   : > { %13761 = vst [vmem:[#allocation97_spill] sm:$0xff] %v11272_v59 }
 0x749   : > { %v3312_v29 = vmul.f32 1.442695, %v3201_v48 }
 0x74b   : > { %8581 = vpow2.f32 %v3312_v29  ;;  %3372 = vadd.xlane.f32.xlu2 %v11252_v49  ;;  %v3199_v29 = vsub.f32 %v10837_v17, %v11092_v5  ;;  %v13763_v17 = vld [vmem:[#allocation11_spill] sm:$0xff] }
 0x74c   : > { %8583 = vpow2.f32 %v3304_v20  ;;  %v3216_v20 = vsub.f32 %v10852_v33, %v3151_v30  ;;  %v788_v5 = vadd.f32 %v13763_v17, %v10566_v12 }
 0x74d   : > { %8585 = vpow2.f32 %v3280_v0  ;;  %v3308_v6 = vmul.f32 1.442695, %v3199_v29 }
 0x74e   : > { %v11258_v3 = vpop.xlane.xlu2 %3384  ;;  %v3342_v29 = vmul.f32 1.442695, %v3216_v20 }
 0x74f   : > { %13760 = vst [vmem:[#allocation91_spill] sm:$0xff] %v11258_v3  ;;  %8587 = vpow2.f32 %v3308_v6  ;;  %v7951_v3 = vpack.i.bf16 %v788_v5, %v737_v1  ;;  %v11288_v54 = vpop.xlane.xlu1 %3454  ;;  %v11290_v27 = vpop.xlane.xlu0 %3456 }
 0x750   : > { %13765 = vst [vmem:[#allocation111_spill] sm:$0xff] %v11288_v54  ;;  %8589 = vpow2.f32 %v3342_v29 }
 0x751   : > { %v11262_v35 = vpop.eup %8581  ;;  %13766 = vst [vmem:[#allocation70_spill] sm:$0xff] %v11290_v27 }
 0x752   : > { %v11264_v63 = vpop.eup %8583  ;;  %3440 = vadd.xlane.f32.xlu0 %v11262_v35 }
 0x753   : > { %3432 = vadd.xlane.f32.xlu2 %v11264_v63  ;;  %v11276_v48 = vpop.eup %8585 }
 0x755   : > { %v11286_v18 = vpop.eup %8587 }
 0x756   : > { %v11270_v21 = vpop.xlane.xlu2 %3354  ;;  %v11295_v30 = vpop.eup %8589 }
 0x757   : > { %13768 = vst [vmem:[#allocation24_spill] sm:$0xff] %v11295_v30  ;;  %v11297_v6 = vpop.xlane.xlu1 %3398  ;;  %v11299_v10 = vpop.xlane.xlu0 %3458 }
 0x758   : > { %13769 = vst [vmem:[#allocation28_spill] sm:$0xff] %v11299_v10 }
 0x75b   : > { %3408 = vadd.xlane.f32.xlu2 %v11276_v48 }
 0x75e   : > { %v11284_v0 = vpop.xlane.xlu2 %3414 }
 0x75f   : > { %13764 = vst [vmem:[#allocation100_spill] sm:$0xff] %v11284_v0  ;;  %v3369_v1 = vpop.xlane.xlu1 %3368  ;;  %v11304_v17 = vpop.xlane.xlu0 %3400 }
 0x763   : > { %3436 = vadd.xlane.f32.xlu2 %v11286_v18 }
 0x764   : > { %7952 = vxpose.xlu1.b32.start.end [1/1] (short) %v7951_v3, 128 }
 0x766   : > { %v11293_v33 = vpop.xlane.xlu2 %3448 }
 0x767   : > { %13767 = vst [vmem:[#allocation78_spill] sm:$0xff] %v11293_v33  ;;  %v11308_v54 = vpop.xlane.xlu1 %3428  ;;  %v3371_v3 = vpop.xlane.xlu0 %3370 }
 0x76b   : > { %3470 = vadd.xlane.f32.xlu2 %v11295_v30 }
 0x76e   : > { %v11302_v20 = vpop.xlane.xlu2 %3390 }
 0x76f   : > { %13770 = vst [vmem:[#allocation102_spill] sm:$0xff] %v11302_v20  ;;  %v11314_v0 = vpop.xlane.xlu0 %3430 }
 0x775   : > { %v11312_v33 = vpop.xlane.xlu1 %3404 }
 0x776   : > { %v11306_v5 = vpop.xlane.xlu2 %3450 }
 0x777   : > { %13771 = vst [vmem:[#allocation42_spill] sm:$0xff] %v11306_v5  ;;  %v686_v5 = vadd.f32 %v13775_v53, %v10566_v12 }
 0x779   : > { %v7869_v13 = vpack.i.bf16 %v686_v5, %v635_v34 }
 0x77d   : > { %v11318_v10 = vpop.xlane.xlu1 %3464 }
 0x77e   : > { %v11310_v29 = vpop.xlane.xlu2 %3360  ;;  %13773 = vst [vmem:[#allocation93_spill] sm:$0xff] %v11318_v10 }
 0x785   : > { %v3375_v36 = vpop.xlane.xlu1 %3374 }
 0x786   : > { %v11316_v27 = vpop.xlane.xlu2 %3420  ;;  %8591 = vrcp.f32 %v3375_v36 }
 0x787   : > { %13772 = vst [vmem:[#allocation86_spill] sm:$0xff] %v11316_v27 }
 0x78c   : > { %v8592_v10 = vpop.eup %8591 }
 0x78d   : > { %v3407_v11 = vpop.xlane.xlu0 %3406  ;;  %v3552_v39 = vmul.f32 %v8592_v10, %v11155_v24  ;;  %v11334_v36 = vpop.xlane.xlu1 %3466 }
 0x78e   : > { %v11324_v22 = vpop.xlane.xlu2 %3396 }
 0x78f   : > { %v3616_v59 = vpack.c.bf16 %v3552_v39, %v3552_v39 }
 0x794   : > { %7870 = vxpose.xlu2.b32.start.end [1/1] (short) %v7869_v13, 128  ;;  %v3696_v13 = vunpack.c.l.b16 %v3616_v59 }
 0x795   : > { %v11326_v56 = vpop.xlane.xlu0 %3434 }
 0x796   : > { %v3367_v62 = vpop.xlane.xlu2 %3366 }
 0x79d   : > { %v3377_v2 = vpop.xlane.xlu0 %3376 }
 0x79e   : > { %v11328_v27 = vpop.xlane.xlu2 %3426  ;;  %8593 = vrcp.f32 %v3377_v2  ;;  %v3439_v2 = vpop.xlane.xlu1 %3438 }
 0x79f   : > { %8595 = vrcp.f32 %v3371_v3 }
 0x7a0   : > { %8597 = vrcp.f32 %v3367_v62 }
 0x7a4   : > { %v8594_v42 = vpop.eup %8593 }
 0x7a5   : > { %v3553_v12 = vmul.f32 %v8594_v42, %v11204_v52  ;;  %v11338_v58 = vpop.xlane.xlu0 %3468  ;;  %v8596_v39 = vpop.eup %8595 }
 0x7a6   : > { %v11332_v53 = vpop.xlane.xlu2 %3460  ;;  %v3550_v52 = vmul.f32 %v8596_v39, %v11096_v32  ;;  %v8598_v59 = vpop.eup %8597 }
 0x7a7   : > { %v3617_v34 = vpack.c.bf16 %v3553_v12, %v3553_v12  ;;  %v3548_v32 = vmul.f32 %v8598_v59, %v11191_v28 }
 0x7a9   : > { %v3697_v5 = vunpack.c.l.b16 %v3617_v34  ;;  %v3614_v34 = vpack.c.bf16 %v3550_v52, %v3550_v52 }
 0x7ab   : > { %v3705_v8 = vpack.c.b16 %v3697_v5, %v3696_v13 }
 0x7ad   : > { %3714 = vmatpush.bf16.xpose.msra.mxu0 %v3705_v8 }
 0x7ae   : > { %v3403_v20 = vpop.xlane.xlu2 %3402 }
 0x7b6   : > { %v11336_v30 = vpop.xlane.xlu2 %3462 }
 0x7be   : > { %v3373_v24 = vpop.xlane.xlu2 %3372 }
 0x7bf   : > { %8599 = vrcp.f32 %v3373_v24 }
 0x7c0   : > { %8601 = vrcp.f32 %v3439_v2 }
 0x7c1   : > { %8603 = vrcp.f32 %v3369_v1 }
 0x7c2   : > { %8605 = vrcp.f32 %v11260_v23  ;;  %v3694_v23 = vunpack.c.l.b16 %v3614_v34 }
 0x7c5   : > { %v8600_v10 = vpop.eup %8599  ;;  %v3441_v8 = vpop.xlane.xlu0 %3440 }
 0x7c6   : > { %v8602_v42 = vpop.eup %8601  ;;  %8607 = vrcp.f32 %v3441_v8  ;;  %v11342_v12 = vpop.xlane.xlu2 %3432  ;;  %v3551_v3 = vmul.f32 %v8600_v10, %v11252_v49 }
 0x7c7   : > { %v8604_v62 = vpop.eup %8603  ;;  %8609 = vrcp.f32 %v11106_v31  ;;  %v3584_v13 = vmul.f32 %v8602_v42, %v11185_v9 }
 0x7c8   : > { %8611 = vrcp.f32 %v11256_v61  ;;  %v3615_v1 = vpack.c.bf16 %v3551_v3, %v3551_v3  ;;  %v3549_v2 = vmul.f32 %v8604_v62, %v11057_v57  ;;  %v8606_v24 = vpop.eup %8605  ;;  %v3612_v61 = vpack.c.bf16 %v3548_v32, %v3548_v32 }
 0x7c9   : > { %8613 = vrcp.f32 %v3407_v11  ;;  %v3648_v28 = vpack.c.bf16 %v3584_v13, %v3584_v13 }
 0x7ca   : > { %8615 = vrcp.f32 %v11129_v51  ;;  %v3695_v5 = vunpack.c.l.b16 %v3615_v1  ;;  %v3613_v57 = vpack.c.bf16 %v3549_v2, %v3549_v2  ;;  %v3692_v10 = vunpack.c.l.b16 %v3612_v61 }
 0x7cb   : > { %8617 = vrcp.f32 %v11208_v19  ;;  %v3547_v19 = vmul.f32 %v8606_v24, %v11011_v25 }
 0x7cc   : > { %v8608_v49 = vpop.eup %8607  ;;  %8619 = vrcp.f32 %v11229_v37  ;;  %v3704_v31 = vpack.c.b16 %v3695_v5, %v3694_v23  ;;  %v3693_v34 = vunpack.c.l.b16 %v3613_v57 }
 0x7cd   : > { %v11353_v39 = vpop.eup %8609  ;;  %8621 = vrcp.f32 %v11310_v29  ;;  %v3585_v9 = vmul.f32 %v8608_v49, %v11262_v35  ;;  %v3818_v29 = vunpack.c.l.b16 %v3648_v28  ;;  %v3611_v1 = vpack.c.bf16 %v3547_v19, %v3547_v19  ;;  %v13776_v28 = vld [vmem:[#allocation107_spill] sm:$0xff] }
 0x7ce   : > { %v8612_v51 = vpop.eup %8611  ;;  %8623 = vrcp.f32 %v3403_v20  ;;  %3715 = vmatpush.bf16.xpose.msra.mxu0 %v3704_v31  ;;  %v3409_v11 = vpop.xlane.xlu2 %3408  ;;  %v3703_v32 = vpack.c.b16 %v3693_v34, %v3692_v10 }
 0x7cf   : > { %v8614_v52 = vpop.eup %8613  ;;  %v3649_v59 = vpack.c.bf16 %v3585_v9, %v3585_v9  ;;  %8625 = vrcp.f32 %v3409_v11  ;;  %v3546_v20 = vmul.f32 %v8612_v51, %v10989_v15  ;;  %v3691_v2 = vunpack.c.l.b16 %v3611_v1 }
 0x7d0   : > { %v11358_v37 = vpop.eup %8615  ;;  %8627 = vrcp.f32 %v11312_v33  ;;  %v3568_v3 = vmul.f32 %v8614_v52, %v11171_v7  ;;  %v3473_v7 = vpop.xlane.xlu1 %3472  ;;  %v13777_v52 = vld [vmem:[#allocation17_spill] sm:$0xff] }
 0x7d1   : > { %v8618_v8 = vpop.eup %8617  ;;  %8629 = vrcp.f32 %v11326_v56  ;;  %v3819_v35 = vunpack.c.l.b16 %v3649_v59  ;;  %v3610_v15 = vpack.c.bf16 %v3546_v20, %v3546_v20  ;;  %v13778_v59 = vld [vmem:[#allocation22_spill] sm:$0xff]  ;;  %v13779_v20 = vld [vmem:[#allocation120_spill] sm:$0xff] }
 0x7d2   : > { %v8620_v42 = vpop.eup %8619  ;;  %8631 = vrcp.f32 %v11137_v26  ;;  %v3632_v26 = vpack.c.bf16 %v3568_v3, %v3568_v3  ;;  %v3543_v9 = vmul.f32 %v8618_v8, %v13776_v28 }
 0x7d3   : > { %v8622_v62 = vpop.eup %8621  ;;  %8633 = vrcp.f32 %v11142_v4  ;;  %v3827_v25 = vpack.c.b16 %v3819_v35, %v3818_v29  ;;  %v3690_v61 = vunpack.c.l.b16 %v3610_v15 }
 0x7d4   : > { %v8624_v33 = vpop.eup %8623  ;;  %8635 = vrcp.f32 %v11297_v6  ;;  %v3544_v6 = vmul.f32 %v8620_v42, %v10955_v38  ;;  %v3545_v49 = vmul.f32 %v8622_v62, %v11144_v45  ;;  %v3757_v11 = vunpack.c.l.b16 %v3632_v26 }
 0x7d5   : > { %v8626_v13 = vpop.eup %8625  ;;  %8637 = vrcp.f32 %v11304_v17  ;;  %3836 = vmatpush.bf16.xpose.msra.mxu2 %v3827_v25  ;;  %v3566_v31 = vmul.f32 %v8624_v33, %v11231_v50  ;;  %v11380_v45 = vadd.f32 %v13778_v59, %v13777_v52  ;;  %v3702_v10 = vpack.c.b16 %v3691_v2, %v3690_v61  ;;  %v13781_v61 = vld [vmem:[#allocation114_spill] sm:$0xff] }
 0x7d6   : > { %v8628_v56 = vpop.eup %8627  ;;  %8639 = vrcp.f32 %v11270_v21  ;;  %v3569_v23 = vmul.f32 %v8626_v13, %v11276_v48  ;;  %3716 = vmatpush.bf16.xpose.msra.mxu0 %v3703_v32  ;;  %v3437_v4 = vpop.xlane.xlu2 %3436  ;;  %v3608_v50 = vpack.c.bf16 %v3544_v6, %v3544_v6  ;;  %v3609_v29 = vpack.c.bf16 %v3545_v49, %v3545_v49 }
 0x7d7   : > { %v8630_v5 = vpop.eup %8629  ;;  %8641 = vrcp.f32 %v3437_v4  ;;  %v3567_v48 = vmul.f32 %v8628_v56, %v11127_v41  ;;  %v3630_v8 = vpack.c.bf16 %v3566_v31, %v3566_v31  ;;  %v3607_v1 = vpack.c.bf16 %v3543_v9, %v3543_v9 }
 0x7d8   : > { %v8632_v24 = vpop.eup %8631  ;;  %8643 = vrcp.f32 %v11342_v12  ;;  %v3633_v17 = vpack.c.bf16 %v3569_v23, %v3569_v23  ;;  %v3582_v57 = vmul.f32 %v8630_v5, %v11189_v47  ;;  %v13780_v47 = vld [vmem:[#allocation92_spill] sm:$0xff]  ;;  %v3689_v56 = vunpack.c.l.b16 %v3609_v29 }
 0x7d9   : > { %v8634_v21 = vpop.eup %8633  ;;  %8645 = vrcp.f32 %v3473_v7  ;;  %v11385_v42 = vmul.f32 %v8632_v24, %v13779_v20  ;;  %v3755_v26 = vunpack.c.l.b16 %v3630_v8  ;;  %v13786_v8 = vld [vmem:[#allocation97_spill] sm:$0xff] }
 0x7da   : > { %v8636_v51 = vpop.eup %8635  ;;  %8647 = vrcp.f32 %v11314_v0  ;;  %v3758_v38 = vunpack.c.l.b16 %v3633_v17  ;;  %v3631_v0 = vpack.c.bf16 %v3567_v48, %v3567_v48  ;;  %v11388_v3 = vmul.f32 %v8634_v21, %v13780_v47  ;;  %v13782_v48 = vld [vmem:[#allocation24_spill] sm:$0xff]  ;;  %v13788_v47 = vld [vmem:[#allocation113_spill] sm:$0xff] }
 0x7db   : > { %v8638_v12 = vpop.eup %8637  ;;  %8649 = vrcp.f32 %v11249_v43  ;;  %v3646_v25 = vpack.c.bf16 %v3582_v57, %v3582_v57  ;;  %v13784_v57 = vld [vmem:[#allocation128_spill] sm:$0xff] }
 0x7dc   : > { %v8640_v19 = vpop.eup %8639  ;;  %v3766_v41 = vpack.c.b16 %v3758_v38, %v3757_v11  ;;  %8651 = vrcp.f32 %v11324_v22  ;;  %v3688_v22 = vunpack.c.l.b16 %v3608_v50  ;;  %v3565_v13 = vmul.f32 %v8638_v12, %v11068_v40  ;;  %v13783_v11 = vld [vmem:[#allocation102_spill] sm:$0xff] }
 0x7dd   : > { %v8642_v35 = vpop.eup %8641  ;;  %8653 = vrcp.f32 %v11328_v27  ;;  %v3542_v32 = vmul.f32 %v8640_v19, %v11083_v16  ;;  %v3756_v23 = vunpack.c.l.b16 %v3631_v0  ;;  %v3816_v5 = vunpack.c.l.b16 %v3646_v25  ;;  %v13787_v0 = vld [vmem:[#allocation77_spill] sm:$0xff] }
 0x7de   : > { %v8644_v34 = vpop.eup %8643  ;;  %3717 = vmatpush.bf16.xpose.msra.mxu0 %v3702_v10  ;;  %3775 = vmatpush.bf16.xpose.msra.mxu1 %v3766_v41  ;;  %v3471_v43 = vpop.xlane.xlu2 %3470  ;;  %v3583_v62 = vmul.f32 %v8642_v35, %v11286_v18  ;;  %v3564_v18 = vmul.f32 %v8636_v51, %v11039_v46  ;;  %v3701_v17 = vpack.c.b16 %v3689_v56, %v3688_v22  ;;  %v13785_v10 = vld [vmem:[#allocation67_spill] sm:$0xff]  ;;  %v13791_v22 = vld [vmem:[#allocation110_spill] sm:$0xff] }
 0x7df   : > { %v8646_v33 = vpop.eup %8645  ;;  %8655 = vrcp.f32 %v3471_v43  ;;  %v3581_v4 = vmul.f32 %v8644_v34, %v11264_v63  ;;  %v3765_v46 = vpack.c.b16 %v3756_v23, %v3755_v26  ;;  %v3606_v63 = vpack.c.bf16 %v3542_v32, %v3542_v32  ;;  %v13789_v34 = vld [vmem:[#allocation93_spill] sm:$0xff] }
 0x7e0   : > { %v8648_v15 = vpop.eup %8647  ;;  %8657 = vrcp.f32 %v11338_v58  ;;  %v3647_v27 = vpack.c.bf16 %v3583_v62, %v3583_v62  ;;  %v3601_v16 = vmul.f32 %v8646_v33, %v11202_v14  ;;  %v3629_v58 = vpack.c.bf16 %v3565_v13, %v3565_v13  ;;  %v13790_v33 = vld [vmem:[#allocation20_spill] sm:$0xff] }
 0x7e1   : > { %v8650_v7 = vpop.eup %8649  ;;  %8659 = vrcp.f32 %v11308_v54  ;;  %v3580_v6 = vmul.f32 %v8648_v15, %v11110_v60  ;;  %v3604_v54 = vpack.c.bf16 %v11385_v42, %v11385_v42  ;;  %v3687_v14 = vunpack.c.l.b16 %v3607_v1  ;;  %v13792_v13 = vld [vmem:[#allocation72_spill] sm:$0xff] }
 0x7e2   : > { %8661 = vrcp.f32 %v11334_v36  ;;  %v3817_v40 = vunpack.c.l.b16 %v3647_v27  ;;  %v8652_v2 = vpop.eup %8651  ;;  %v3645_v36 = vpack.c.bf16 %v3581_v4, %v3581_v4  ;;  %v3605_v21 = vpack.c.bf16 %v11388_v3, %v11388_v3  ;;  %v13793_v4 = vld [vmem:[#allocation84_spill] sm:$0xff] }
 0x7e3   : > { %8663 = vrcp.f32 %v11233_v44  ;;  %v8654_v24 = vpop.eup %8653  ;;  %v3665_v60 = vpack.c.bf16 %v3601_v16, %v3601_v16  ;;  %v3628_v9 = vpack.c.bf16 %v3564_v18, %v3564_v18  ;;  %v3754_v38 = vunpack.c.l.b16 %v3629_v58  ;;  %v13794_v58 = vld [vmem:[#allocation30_spill] sm:$0xff] }
 0x7e4   : > { %v3826_v49 = vpack.c.b16 %v3817_v40, %v3816_v5  ;;  %8665 = vrcp.f32 %v11274_v55  ;;  %v3644_v55 = vpack.c.bf16 %v3580_v6, %v3580_v6  ;;  %v3562_v12 = vmul.f32 %v8650_v7, %v13784_v57 }
 0x7e5   : > { %v8656_v31 = vpop.eup %8655  ;;  %8667 = vrcp.f32 %v13781_v61  ;;  %v3686_v19 = vunpack.c.l.b16 %v3606_v63  ;;  %v3563_v41 = vmul.f32 %v8652_v2, %v13785_v10  ;;  %v3815_v35 = vunpack.c.l.b16 %v3645_v36  ;;  %v13796_v63 = vld [vmem:[#allocation86_spill] sm:$0xff] }
 0x7e6   : > { %v8658_v44 = vpop.eup %8657  ;;  %v3600_v28 = vmul.f32 %v8656_v31, %v13782_v48  ;;  %3718 = vmatpush.bf16.xpose.msra.mxu0 %v3701_v17  ;;  %3776 = vmatpush.bf16.xpose.msra.mxu1 %v3765_v46  ;;  %8669 = vrcp.f32 %v13783_v11  ;;  %v3578_v20 = vmul.f32 %v8654_v24, %v13787_v0  ;;  %v3880_v43 = vunpack.c.l.b16 %v3665_v60  ;;  %v13795_v17 = vld [vmem:[#allocation115_spill] sm:$0xff]  ;;  %v13798_v48 = vld [vmem:[#allocation88_spill] sm:$0xff] }
 0x7e7   : > { %v8660_v51 = vpop.eup %8659  ;;  %3837 = vmatpush.bf16.xpose.msra.mxu2 %v3826_v49  ;;  %8671 = vrcp.f32 %v11336_v30  ;;  %v3599_v3 = vmul.f32 %v8658_v44, %v13788_v47  ;;  %v3753_v25 = vunpack.c.l.b16 %v3628_v9  ;;  %v3814_v30 = vunpack.c.l.b16 %v3644_v55  ;;  %v13799_v11 = vld [vmem:[#allocation96_spill] sm:$0xff]  ;;  %v13800_v55 = vld [vmem:[#allocation26_spill] sm:$0xff] }
 0x7e8   : > { %v8662_v59 = vpop.eup %8661  ;;  %v3664_v50 = vpack.c.bf16 %v3600_v28, %v3600_v28  ;;  %8673 = vrcp.f32 %v13786_v8  ;;  %v3579_v32 = vmul.f32 %v8660_v51, %v13791_v22  ;;  %v3700_v26 = vpack.c.b16 %v3687_v14, %v3686_v19  ;;  %v13805_v47 = vld [vmem:[#allocation82_spill] sm:$0xff] }
 0x7e9   : > { %v8664_v29 = vpop.eup %8663  ;;  %8675 = vrcp.f32 %v13789_v34  ;;  %v3598_v15 = vmul.f32 %v8662_v59, %v13792_v13  ;;  %v3764_v27 = vpack.c.b16 %v3754_v38, %v3753_v25  ;;  %v3627_v23 = vpack.c.bf16 %v3563_v41, %v3563_v41  ;;  %v13802_v59 = vld [vmem:[#allocation69_spill] sm:$0xff]  ;;  %v13803_v41 = vld [vmem:[#allocation106_spill] sm:$0xff] }
 0x7ea   : > { %v3879_v62 = vunpack.c.l.b16 %v3664_v50  ;;  %v8666_v1 = vpop.eup %8665  ;;  %8677 = vrcp.f32 %v13790_v33  ;;  %v3825_v16 = vpack.c.b16 %v3815_v35, %v3814_v30  ;;  %v3642_v5 = vpack.c.bf16 %v3578_v20, %v3578_v20  ;;  %v13804_v35 = vld [vmem:[#allocation121_spill] sm:$0xff] }
 0x7eb   : > { %v8668_v56 = vpop.eup %8667  ;;  %8679 = vrcp.f32 %v13793_v4  ;;  %v3663_v40 = vpack.c.bf16 %v3599_v3, %v3599_v3  ;;  %v3685_v6 = vunpack.c.l.b16 %v3605_v21  ;;  %v3626_v24 = vpack.c.bf16 %v3562_v12, %v3562_v12  ;;  %v13797_v21 = vld [vmem:[#allocation80_spill] sm:$0xff] }
 0x7ec   : > { %v3888_v7 = vpack.c.b16 %v3880_v43, %v3879_v62  ;;  %v8670_v18 = vpop.eup %8669  ;;  %8681 = vrcp.f32 %v13794_v58  ;;  %v3538_v46 = vmul.f32 %v11353_v39, %v13795_v17  ;;  %v3684_v31 = vunpack.c.l.b16 %v3604_v54  ;;  %v13801_v12 = vld [vmem:[#allocation28_spill] sm:$0xff]  ;;  %v13810_v58 = vld [vmem:[#allocation89_spill] sm:$0xff] }
 0x7ed   : > { %v8672_v2 = vpop.eup %8671  ;;  %8683 = vrcp.f32 %v13796_v63  ;;  %v3643_v14 = vpack.c.bf16 %v3579_v32, %v3579_v32  ;;  %v3662_v36 = vpack.c.bf16 %v3598_v15, %v3598_v15  ;;  %v3752_v61 = vunpack.c.l.b16 %v3627_v23  ;;  %v13808_v23 = vld [vmem:[#allocation100_spill] sm:$0xff] }
 0x7ee   : > { %3719 = vmatpush.bf16.xpose.msra.mxu0 %v3700_v26  ;;  %3777 = vmatpush.bf16.xpose.msra.mxu1 %v3764_v27  ;;  %v8674_v49 = vpop.eup %8673  ;;  %8685 = vrcp.f32 %v11332_v53  ;;  %v3539_v60 = vmul.f32 %v8668_v56, %v13797_v21  ;;  %v3560_v28 = vmul.f32 %v8670_v18, %v13798_v48  ;;  %v3812_v9 = vunpack.c.l.b16 %v3642_v5  ;;  %v13807_v56 = vld [vmem:[#allocation91_spill] sm:$0xff] }
 0x7ef   : > { %3838 = vmatpush.bf16.xpose.msra.mxu2 %v3825_v16  ;;  %3897 = vmatpush.bf16.xpose.msra.mxu3 %v3888_v7  ;;  %v8676_v44 = vpop.eup %8675  ;;  %v3878_v51 = vunpack.c.l.b16 %v3663_v40  ;;  %v3577_v38 = vmul.f32 %v8666_v1, %v13799_v11  ;;  %v3596_v57 = vmul.f32 %v8672_v2, %v13800_v55  ;;  %8687 = vrcp.f32 %v13801_v12  ;;  %v13809_v16 = vld [vmem:[#allocation79_spill] sm:$0xff] }
 0x7f0   : > { %v8678_v39 = vpop.eup %8677  ;;  %v3699_v42 = vpack.c.b16 %v3685_v6, %v3684_v31  ;;  %v3751_v54 = vunpack.c.l.b16 %v3626_v24  ;;  %v3561_v50 = vmul.f32 %v8664_v29, %v13802_v59  ;;  %v3813_v53 = vunpack.c.l.b16 %v3643_v14  ;;  %v13806_v29 = vld [vmem:[#allocation70_spill] sm:$0xff]  ;;  %v13813_v31 = vld [vmem:[#allocation125_spill] sm:$0xff] }
 0x7f1   : > { %v8680_v19 = vpop.eup %8679  ;;  %v3877_v10 = vunpack.c.l.b16 %v3662_v36  ;;  %v3576_v8 = vmul.f32 %v8674_v49, %v13803_v41  ;;  %v3597_v0 = vmul.f32 %v8676_v44, %v13804_v35  ;;  %8689 = vrcp.f32 %v13805_v47  ;;  %v13811_v24 = vld [vmem:[#allocation74_spill] sm:$0xff] }
 0x7f2   : > { %v8682_v20 = vpop.eup %8681  ;;  %v3763_v3 = vpack.c.b16 %v3752_v61, %v3751_v54  ;;  %v3603_v34 = vpack.c.bf16 %v3539_v60, %v3539_v60  ;;  %v3624_v43 = vpack.c.bf16 %v3560_v28, %v3560_v28  ;;  %v3824_v25 = vpack.c.b16 %v3813_v53, %v3812_v9  ;;  %v13814_v61 = vld [vmem:[#allocation116_spill] sm:$0xff]  ;;  %v13815_v60 = vld [vmem:[#allocation94_spill] sm:$0xff]  ;;  %v13816_v9 = vld [vmem:[#allocation73_spill] sm:$0xff] }
 0x7f3   : > { %v8684_v62 = vpop.eup %8683  ;;  %v3887_v1 = vpack.c.b16 %v3878_v51, %v3877_v10  ;;  %v3641_v33 = vpack.c.bf16 %v3577_v38, %v3577_v38  ;;  %v3660_v30 = vpack.c.bf16 %v3596_v57, %v3596_v57  ;;  %8691 = vrcp.f32 %v13806_v29  ;;  %v13819_v53 = vld [vmem:[#allocation81_spill] sm:$0xff]  ;;  %v13821_v47 = vld [vmem:[#allocation42_spill] sm:$0xff] }
 0x7f4   : > { %v8686_v22 = vpop.eup %8685  ;;  %v3602_v32 = vpack.c.bf16 %v3538_v46, %v3538_v46  ;;  %v3625_v13 = vpack.c.bf16 %v3561_v50, %v3561_v50  ;;  %v4102_v15 = vpack.c.bf16 %v11380_v45, %v11380_v45  ;;  %8693 = vrcp.f32 %v13807_v56  ;;  %v13812_v46 = vld [vmem:[#allocation111_spill] sm:$0xff]  ;;  %v13817_v50 = vld [vmem:[#allocation18_spill] sm:$0xff] }
 0x7f5   : > { %v3640_v26 = vpack.c.bf16 %v3576_v8, %v3576_v8  ;;  %v3661_v27 = vpack.c.bf16 %v3597_v0, %v3597_v0  ;;  %v8688_v7 = vpop.eup %8687  ;;  %8695 = vrcp.f32 %v13808_v23  ;;  %v3683_v18 = vunpack.c.l.b16 %v3603_v34  ;;  %v13820_v8 = vld [vmem:[#allocation90_spill] sm:$0xff]  ;;  %v13822_v34 = vld [vmem:[#allocation108_spill] sm:$0xff] }
 0x7f6   : > { %3720 = vmatpush.bf16.xpose.msra.mxu0 %v3699_v42  ;;  %3778 = vmatpush.bf16.xpose.msra.mxu1 %v3763_v3  ;;  %v3749_v4 = vunpack.c.l.b16 %v3624_v43  ;;  %v3559_v5 = vmul.f32 %v8680_v19, %v13809_v16  ;;  %v3811_v40 = vunpack.c.l.b16 %v3641_v33  ;;  %v3875_v2 = vunpack.c.l.b16 %v3660_v30  ;;  %v13829_v16 = vld [vmem:[#allocation119_spill] sm:$0xff] }
 0x7f7   : > { %3839 = vmatpush.bf16.xpose.msra.mxu2 %v3824_v25  ;;  %3898 = vmatpush.bf16.xpose.msra.mxu3 %v3887_v1  ;;  %v3575_v6 = vmul.f32 %v8684_v62, %v13810_v58  ;;  %v3595_v17 = vmul.f32 %v8686_v22, %v13811_v24  ;;  %v8690_v45 = vpop.eup %8689  ;;  %8697 = vrcp.f32 %v13812_v46  ;;  %v3682_v49 = vunpack.c.l.b16 %v3602_v32  ;;  %v13823_v62 = vld [vmem:[#allocation7_spill] sm:$0xff]  ;;  %v13824_v1 = vld [vmem:[#allocation109_spill] sm:$0xff]  ;;  %v13825_v22 = vld [vmem:[#allocation122_spill] sm:$0xff] }
 0x7f8   : > { %v3750_v63 = vunpack.c.l.b16 %v3625_v13  ;;  %v3558_v14 = vmul.f32 %v8678_v39, %v13813_v31  ;;  %v3810_v36 = vunpack.c.l.b16 %v3640_v26  ;;  %v3876_v44 = vunpack.c.l.b16 %v3661_v27  ;;  %v13818_v39 = vld [vmem:[#allocation35_spill] sm:$0xff]  ;;  %v13827_v26 = vld [vmem:[#allocation5_spill] sm:$0xff] }
 0x7f9   : > { %v3574_v21 = vmul.f32 %v8682_v20, %v13814_v61  ;;  %v3594_v48 = vmul.f32 %v8688_v7, %v13815_v60  ;;  %v8692_v28 = vpop.eup %8691  ;;  %8699 = vrcp.f32 %v13816_v9  ;;  %v3698_v51 = vpack.c.b16 %v3683_v18, %v3682_v49  ;;  %v13828_v18 = vld [vmem:[#allocation118_spill] sm:$0xff] }
 0x7fa   : > { %v3762_v11 = vpack.c.b16 %v3750_v63, %v3749_v4  ;;  %v3623_v38 = vpack.c.bf16 %v3559_v5, %v3559_v5  ;;  %v8694_v55 = vpop.eup %8693  ;;  %v3823_v57 = vpack.c.b16 %v3811_v40, %v3810_v36  ;;  %v3886_v12 = vpack.c.b16 %v3876_v44, %v3875_v2 }
 0x7fb   : > { %v3639_v42 = vpack.c.bf16 %v3575_v6, %v3575_v6  ;;  %v3659_v54 = vpack.c.bf16 %v3595_v17, %v3595_v17  ;;  %v8696_v59 = vpop.eup %8695  ;;  %v652_v19 = vadd.f32 %v13818_v39, %v13817_v50  ;;  %8701 = vrcp.f32 %v13819_v53 }
 0x7fc   : > { %v3622_v10 = vpack.c.bf16 %v3558_v14, %v3558_v14  ;;  %v4175_v41 = vsel %vm1077_vm14, %v4102_v15, 0  ;;  %8703 = vrcp.f32 %v13820_v8  ;;  %v3638_v35 = vpack.c.bf16 %v3574_v21, %v3574_v21  ;;  %v13826_v15 = vld [vmem:[#allocation65_spill] sm:$0xff]  ;;  %v13831_v21 = vld [vmem:[#allocation78_spill] sm:$0xff] }
 0x7fd   : > { %v3658_v0 = vpack.c.bf16 %v3594_v48, %v3594_v48  ;;  %v8698_v20 = vpop.eup %8697  ;;  %8705 = vrcp.f32 %v13821_v47  ;;  %v3748_v3 = vunpack.c.l.b16 %v3623_v38  ;;  %v3557_v43 = vmul.f32 %v8694_v55, %v13822_v34  ;;  %v13833_v38 = vld [vmem:[#allocation98_spill] sm:$0xff]  ;;  %v13838_v8 = vld [vmem:[#allocation21_spill] sm:$0xff] }
 0x7fe   : > { %3721 = vmatpush.bf16.xpose.msra.mxu0 %v3698_v51  ;;  %3779 = vmatpush.bf16.xpose.msra.mxu1 %v3762_v11  ;;  %v3593_v25 = vmul.f32 %v8692_v28, %v13823_v62  ;;  %8707 = vrcp.f32 %v13824_v1  ;;  %v3809_v33 = vunpack.c.l.b16 %v3639_v42  ;;  %v3874_v30 = vunpack.c.l.b16 %v3659_v54  ;;  %v13832_v28 = vld [vmem:[#allocation83_spill] sm:$0xff]  ;;  %v13835_v42 = vld [vmem:[#allocation76_spill] sm:$0xff] }
 0x7ff   : > { %3840 = vmatpush.bf16.xpose.msra.mxu2 %v3823_v57  ;;  %3899 = vmatpush.bf16.xpose.msra.mxu3 %v3886_v12  ;;  %v3572_v29 = vmul.f32 %v8696_v59, %v13825_v22  ;;  %v8700_v32 = vpop.eup %8699  ;;  %v2558_v13 = vpack.c.bf16 %v652_v19, %v652_v19  ;;  %8709 = vrcp.f32 %v13826_v15  ;;  %v3747_v56 = vunpack.c.l.b16 %v3622_v10  ;;  %v13834_v57 = vld [vmem:[#allocation124_spill] sm:$0xff]  ;;  %v13836_v59 = vld [vmem:[#allocation126_spill] sm:$0xff] }
 0x800   : > { %v3556_v27 = vmul.f32 %v11358_v37, %v13827_v26  ;;  %v3808_v7 = vunpack.c.l.b16 %v3638_v35  ;;  %v3873_v23 = vunpack.c.l.b16 %v3658_v0  ;;  %v3573_v4 = vmul.f32 %v8690_v45, %v13828_v18  ;;  %v13830_v45 = vld [vmem:[#allocation112_spill] sm:$0xff]  ;;  %v13837_v10 = vld [vmem:[#allocation6_spill] sm:$0xff]  ;;  %v13842_v18 = vld [vmem:[#allocation99_spill] sm:$0xff] }
 0x801   : > { %v3592_v5 = vmul.f32 %v8698_v20, %v13829_v16  ;;  %v8702_v40 = vpop.eup %8701  ;;  %v3761_v2 = vpack.c.b16 %v3748_v3, %v3747_v56  ;;  %v3621_v58 = vpack.c.bf16 %v3557_v43, %v3557_v43  ;;  %v3657_v6 = vpack.c.bf16 %v3593_v25, %v3593_v25  ;;  %v13839_v25 = vld [vmem:[#allocation32_spill] sm:$0xff] }
 0x802   : > { %v8704_v24 = vpop.eup %8703  ;;  %v3822_v17 = vpack.c.b16 %v3809_v33, %v3808_v7  ;;  %v3885_v46 = vpack.c.b16 %v3874_v30, %v3873_v23  ;;  %v3636_v49 = vpack.c.bf16 %v3572_v29, %v3572_v29  ;;  %v3620_v31 = vpack.c.bf16 %v3556_v27, %v3556_v27  ;;  %v13841_v27 = vld [vmem:[#allocation63_spill] sm:$0xff] }
 0x803   : > { %v8706_v63 = vpop.eup %8705  ;;  %v3637_v37 = vpack.c.bf16 %v3573_v4, %v3573_v4  ;;  %v3656_v36 = vpack.c.bf16 %v3592_v5, %v3592_v5  ;;  %v3571_v44 = vmul.f32 %v8702_v40, %v13830_v45  ;;  %8711 = vrcp.f32 %v13831_v21 }
 0x804   : > { %v8708_v14 = vpop.eup %8707  ;;  %v3746_v60 = vunpack.c.l.b16 %v3621_v58  ;;  %v3872_v48 = vunpack.c.l.b16 %v3657_v6  ;;  %v3554_v9 = vmul.f32 %v8704_v24, %v13832_v28  ;;  %v3806_v11 = vunpack.c.l.b16 %v3636_v49 }
 0x805   : > { %3722 = vmatmul.bf16.vlgmr.msra.gmra.mxu0 %v2558_v13  ;;  %v8710_v61 = vpop.eup %8709  ;;  %v3590_v55 = vmul.f32 %v8706_v63, %v13833_v38  ;;  %8713 = vrcp.f32 %v13834_v57  ;;  %v3745_v12 = vunpack.c.l.b16 %v3620_v31  ;;  %v3555_v54 = vmul.f32 %v8700_v32, %v13835_v42  ;;  %v13840_v32 = vld [vmem:[#allocation64_spill] sm:$0xff] }
 0x806   : > { %4184 = vmatpush.bf16.msrb.mxu0 %v4175_v41  ;;  %3780 = vmatpush.bf16.xpose.msra.mxu1 %v3761_v2  ;;  %v3570_v39 = vmul.f32 %v8708_v14, %v13836_v59  ;;  %v3807_v19 = vunpack.c.l.b16 %v3637_v37  ;;  %v3871_v53 = vunpack.c.l.b16 %v3656_v36  ;;  %v3591_v41 = vmul.f32 %v8710_v61, %v13837_v10  ;;  %v13843_v2 = vld [vmem:[#allocation104_spill] sm:$0xff]  ;;  %v13844_v14 = vld [vmem:[#allocation34_spill] sm:$0xff] }
 0x807   : > { %3841 = vmatpush.bf16.xpose.msra.mxu2 %v3822_v17  ;;  %3900 = vmatpush.bf16.xpose.msra.mxu3 %v3885_v46  ;;  %v696_v35 = vadd.f32 %v13838_v8, %v13777_v52  ;;  %v3760_v0 = vpack.c.b16 %v3746_v60, %v3745_v12  ;;  %v3618_v20 = vpack.c.bf16 %v3554_v9, %v3554_v9  ;;  %8715 = vrcp.f32 %v13840_v32  ;;  %v13846_v60 = vld [vmem:[#allocation105_spill] sm:$0xff] }
 0x808   : > { %v11469_v51 = vpop.trf.xlu1  ;;  %v3821_v47 = vpack.c.b16 %v3807_v19, %v3806_v11  ;;  %v3884_v3 = vpack.c.b16 %v3872_v48, %v3871_v53  ;;  %v3635_v34 = vpack.c.bf16 %v3571_v44, %v3571_v44  ;;  %v3654_v43 = vpack.c.bf16 %v3590_v55, %v3590_v55  ;;  %v13845_v44 = vld [vmem:[#allocation48_spill] sm:$0xff]  ;;  %v13847_v11 = vld [vmem:[#allocation95_spill] sm:$0xff] }
 0x809   : > { %v8712_v62 = vpop.eup %8711  ;;  %v747_v1 = vadd.f32 %v13839_v25, %v13777_v52  ;;  %v3619_v33 = vpack.c.bf16 %v3555_v54, %v3555_v54  ;;  %v3634_v30 = vpack.c.bf16 %v3570_v39, %v3570_v39  ;;  %v3655_v22 = vpack.c.bf16 %v3591_v41, %v3591_v41  ;;  %v13848_v39 = vld [vmem:[#allocation31_spill] sm:$0xff] }
 0x80a   : > { %v3743_v13 = vunpack.c.l.b16 %v3618_v20  ;;  %v4103_v15 = vpack.c.bf16 %v696_v35, %v696_v35  ;;  %v3805_v56 = vunpack.c.l.b16 %v3635_v34  ;;  %v3869_v26 = vunpack.c.l.b16 %v3654_v43 }
 0x80b   : > { %v8714_v29 = vpop.eup %8713  ;;  %v3589_v7 = vmul.f32 %v8712_v62, %v13841_v27  ;;  %v4104_v23 = vpack.c.bf16 %v747_v1, %v747_v1  ;;  %8717 = vrcp.f32 %v13842_v18  ;;  %v3744_v4 = vunpack.c.l.b16 %v3619_v33  ;;  %v13849_v62 = vld [vmem:[#allocation47_spill] sm:$0xff] }
 0x80c   : > { %v3804_v16 = vunpack.c.l.b16 %v3634_v30  ;;  %v3870_v40 = vunpack.c.l.b16 %v3655_v22  ;;  %v3588_v58 = vmul.f32 %v8714_v29, %v13843_v2  ;;  %v4291_v63 = vsel %vm1077_vm14, %v4103_v15, 0 }
 0x80d   : > { %v3759_v6 = vpack.c.b16 %v3744_v4, %v3743_v13  ;;  %v3653_v46 = vpack.c.bf16 %v3589_v7, %v3589_v7  ;;  %v8716_v49 = vpop.eup %8715  ;;  %v4407_v31 = vsel %vm1077_vm14, %v4104_v23, 0  ;;  %v703_v37 = vadd.f32 %v13844_v14, %v13817_v50 }
 0x80e   : > { %3781 = vmatpush.bf16.xpose.msra.mxu1 %v3760_v0  ;;  %v3820_v24 = vpack.c.b16 %v3805_v56, %v3804_v16  ;;  %v3883_v17 = vpack.c.b16 %v3870_v40, %v3869_v26  ;;  %v3652_v36 = vpack.c.bf16 %v3588_v58, %v3588_v58  ;;  %v754_v61 = vadd.f32 %v13845_v44, %v13817_v50 }
 0x80f   : > { %3842 = vmatpush.bf16.xpose.msra.mxu2 %v3821_v47  ;;  %3901 = vmatpush.bf16.xpose.msra.mxu3 %v3884_v3  ;;  %v3868_v21 = vunpack.c.l.b16 %v3653_v46  ;;  %v3587_v48 = vmul.f32 %v8716_v49, %v13846_v60  ;;  %v2559_v28 = vpack.c.bf16 %v703_v37, %v703_v37  ;;  %v7954_v54 = vunpack.i.l.bf16 %v11469_v51 }
 0x810   : > { %v7958_v5 = vpop.trf.xlu1  ;;  %v3867_v9 = vunpack.c.l.b16 %v3652_v36  ;;  %v2560_v55 = vpack.c.bf16 %v754_v61, %v754_v61  ;;  %v798_v19 = vadd.f32 %v13848_v39, %v13777_v52  ;;  %v805_v25 = vadd.f32 %v13849_v62, %v13817_v50 }
 0x811   : > { %v8718_v45 = vpop.eup %8717  ;;  %v3651_v42 = vpack.c.bf16 %v3587_v48, %v3587_v48  ;;  %v7959_v59 = vunpack.i.l.bf16 %v7958_v5  ;;  %v4070_v41 = vpack.c.bf16 %v7954_v54, %v7954_v54  ;;  %v7957_v33 = vunpack.i.h.bf16 %v11469_v51 }
 0x812   : > { %v3586_v38 = vmul.f32 %v8718_v45, %v13847_v11  ;;  %v3882_v12 = vpack.c.b16 %v3868_v21, %v3867_v9  ;;  %v4105_v35 = vpack.c.bf16 %v798_v19, %v798_v19  ;;  %v2561_v52 = vpack.c.bf16 %v805_v25, %v805_v25 }
 0x813   : > { %v3866_v10 = vunpack.c.l.b16 %v3651_v42  ;;  %v4071_v8 = vpack.c.bf16 %v7959_v59, %v7959_v59  ;;  %v4358_v3 = vunpack.c.l.b16 %v4070_v41  ;;  %v7962_v30 = vunpack.i.h.bf16 %v7958_v5 }
 0x814   : > { %v3650_v53 = vpack.c.bf16 %v3586_v38, %v3586_v38  ;;  %v4523_v43 = vsel %vm1077_vm14, %v4105_v35, 0  ;;  %v4086_v15 = vpack.c.bf16 %v7957_v33, %v7957_v33 }
 0x815   : > { %v4359_v34 = vunpack.c.l.b16 %v4071_v8  ;;  %v4087_v56 = vpack.c.bf16 %v7962_v30, %v7962_v30 }
 0x816   : > { %3782 = vmatpush.bf16.xpose.msra.mxu1 %v3759_v6  ;;  %v3865_v0 = vunpack.c.l.b16 %v3650_v53  ;;  %v4474_v23 = vunpack.c.l.b16 %v4086_v15 }
 0x817   : > { %3843 = vmatpush.bf16.xpose.msra.mxu2 %v3820_v24  ;;  %3902 = vmatpush.bf16.xpose.msra.mxu3 %v3883_v17  ;;  %v4374_v1 = vpack.c.b16 %v4359_v34, %v4358_v3  ;;  %v4475_v18 = vunpack.c.l.b16 %v4087_v56 }
 0x818   : > { %v11492_v57 = vpop.trf.xlu1  ;;  %v3881_v47 = vpack.c.b16 %v3866_v10, %v3865_v0 }
 0x819   : > { %v7964_v32 = vunpack.i.l.bf16 %v11492_v57  ;;  %v4490_v46 = vpack.c.b16 %v4475_v18, %v4474_v23  ;;  %v7967_v44 = vunpack.i.h.bf16 %v11492_v57 }
 0x81b   : > { %v4072_v50 = vpack.c.bf16 %v7964_v32, %v7964_v32  ;;  %v4088_v11 = vpack.c.bf16 %v7967_v44, %v7967_v44 }
 0x81d   : > { %3783 = vmatmul.bf16.vlgmr.msra.gmra.mxu1 %v2559_v28  ;;  %v4360_v58 = vunpack.c.l.b16 %v4072_v50  ;;  %v4476_v54 = vunpack.c.l.b16 %v4088_v11 }
 0x81e   : > { %4300 = vmatpush.bf16.msrb.mxu1 %v4291_v63  ;;  %3844 = vmatmul.bf16.vlgmr.msra.gmra.mxu2 %v2560_v55 }
 0x81f   : > { %4416 = vmatpush.bf16.msrb.mxu2 %v4407_v31  ;;  %3903 = vmatpush.bf16.xpose.msra.mxu3 %v3882_v12 }
 0x820   : > { %v7968_v20 = vpop.trf.xlu1 }
 0x821   : > { %v7969_v13 = vunpack.i.l.bf16 %v7968_v20  ;;  %v7972_v21 = vunpack.i.h.bf16 %v7968_v20 }
 0x823   : > { %v4073_v7 = vpack.c.bf16 %v7969_v13, %v7969_v13  ;;  %v4089_v38 = vpack.c.bf16 %v7972_v21, %v7972_v21 }
 0x825   : > { %v4361_v6 = vunpack.c.l.b16 %v4073_v7  ;;  %v4477_v59 = vunpack.c.l.b16 %v4089_v38 }
 0x827   : > { %3904 = vmatpush.bf16.xpose.msra.mxu3 %v3881_v47  ;;  %v4375_v37 = vpack.c.b16 %v4361_v6, %v4360_v58  ;;  %v4491_v34 = vpack.c.b16 %v4477_v59, %v4476_v54 }
 0x828   : > { %v11501_v22 = vpop.trf.xlu1 }
 0x829   : > { %v7974_v60 = vunpack.i.l.bf16 %v11501_v22 }
 0x82b   : > { %v4074_v55 = vpack.c.bf16 %v7974_v60, %v7974_v60 }
 0x82d   : > { %v7871_v29 = vpop.trf.xlu2  ;;  %v4362_v10 = vunpack.c.l.b16 %v4074_v55 }
 0x82e   : > { %3905 = vmatmul.bf16.vlgmr.msra.gmra.mxu3 %v2561_v52  ;;  %7413 = vmatmul.msk.bf16.vlgmr.msrb.gmra.mxu2 %vm1052_vm15, %v4374_v1  ;;  %v7875_v26 = vunpack.i.h.bf16 %v7871_v29  ;;  %v7872_v27 = vunpack.i.l.bf16 %v7871_v29  ;;  %v7977_v1 = vunpack.i.h.bf16 %v11501_v22 }
 0x82f   : > { %4532 = vmatpush.bf16.msrb.mxu3 %v4523_v43 }
 0x830   : > { %v11505_v4 = vpop.trf.xlu1  ;;  %v4054_v51 = vpack.c.bf16 %v7875_v26, %v7875_v26  ;;  %v4038_v16 = vpack.c.bf16 %v7872_v27, %v7872_v27  ;;  %v4090_v32 = vpack.c.bf16 %v7977_v1, %v7977_v1 }
 0x831   : > { %v7979_v48 = vunpack.i.l.bf16 %v11505_v4  ;;  %v7982_v33 = vunpack.i.h.bf16 %v11505_v4 }
 0x832   : > { %v4242_v49 = vunpack.c.l.b16 %v4054_v51  ;;  %v4126_v63 = vunpack.c.l.b16 %v4038_v16  ;;  %v4478_v27 = vunpack.c.l.b16 %v4090_v32 }
 0x833   : > { %v4075_v57 = vpack.c.bf16 %v7979_v48, %v7979_v48  ;;  %v4091_v13 = vpack.c.bf16 %v7982_v33, %v7982_v33 }
 0x835   : > { %v7876_v5 = vpop.trf.xlu2  ;;  %v4363_v41 = vunpack.c.l.b16 %v4075_v57  ;;  %v4479_v22 = vunpack.c.l.b16 %v4091_v13 }
 0x836   : > { %v7880_v40 = vunpack.i.h.bf16 %v7876_v5  ;;  %v7877_v2 = vunpack.i.l.bf16 %v7876_v5 }
 0x837   : > { %v4376_v43 = vpack.c.b16 %v4363_v41, %v4362_v10  ;;  %v4492_v6 = vpack.c.b16 %v4479_v22, %v4478_v27 }
 0x838   : > { %v4055_v24 = vpack.c.bf16 %v7880_v40, %v7880_v40  ;;  %v4039_v17 = vpack.c.bf16 %v7877_v2, %v7877_v2  ;;  %v7983_v15 = vpop.trf.xlu1 }
 0x839   : > { %v7984_v7 = vunpack.i.l.bf16 %v7983_v15 }
 0x83a   : > { %v4243_v31 = vunpack.c.l.b16 %v4055_v24  ;;  %v4127_v14 = vunpack.c.l.b16 %v4039_v17 }
 0x83b   : > { %v4076_v40 = vpack.c.bf16 %v7984_v7, %v7984_v7 }
 0x83c   : > { %v4142_v36 = vpack.c.b16 %v4127_v14, %v4126_v63  ;;  %v4258_v45 = vpack.c.b16 %v4243_v31, %v4242_v49  ;;  %v7987_v31 = vunpack.i.h.bf16 %v7983_v15 }
 0x83d   : > { %v7881_v61 = vpop.trf.xlu2  ;;  %v4364_v14 = vunpack.c.l.b16 %v4076_v40  ;;  %v13850_v40 = vld [vmem:[#allocation103_spill] sm:$0xff] }
 0x83e   : > { %7421 = vmatmul.msk.bf16.vlgmr.msrb.gmra.mxu3 %vm1052_vm15, %v4490_v46  ;;  %7397 = vmatmul.msk.bf16.vlgmr.msrb.gmra.mxu0 %vm1052_vm15, %v4142_v36  ;;  %v7885_v28 = vunpack.i.h.bf16 %v7881_v61  ;;  %v7882_v9 = vunpack.i.l.bf16 %v7881_v61  ;;  %v4092_v61 = vpack.c.bf16 %v7987_v31, %v7987_v31 }
 0x83f   : > { %7405 = vmatmul.msk.bf16.vlgmr.msrb.gmra.mxu1 %vm1052_vm15, %v4258_v45  ;;  %7414 = vmatmul.msk.bf16.gmra.mxu2 %vm1052_vm15, %v4375_v37 }
 0x840   : > { %v4056_v12 = vpack.c.bf16 %v7885_v28, %v7885_v28  ;;  %v4040_v42 = vpack.c.bf16 %v7882_v9, %v7882_v9  ;;  %v7988_v24 = vpop.trf.xlu1  ;;  %v4480_v9 = vunpack.c.l.b16 %v4092_v61 }
 0x841   : > { %v7989_v17 = vunpack.i.l.bf16 %v7988_v24  ;;  %v7992_v36 = vunpack.i.h.bf16 %v7988_v24 }
 0x842   : > { %v4244_v8 = vunpack.c.l.b16 %v4056_v12  ;;  %v4128_v35 = vunpack.c.l.b16 %v4040_v42 }
 0x843   : > { %v4077_v37 = vpack.c.bf16 %v7989_v17, %v7989_v17  ;;  %v4093_v60 = vpack.c.bf16 %v7992_v36, %v7992_v36 }
 0x845   : > { %v7886_v39 = vpop.trf.xlu2  ;;  %v4365_v45 = vunpack.c.l.b16 %v4077_v37  ;;  %v4481_v38 = vunpack.c.l.b16 %v4093_v60 }
 0x846   : > { %v7890_v19 = vunpack.i.h.bf16 %v7886_v39  ;;  %v7887_v53 = vunpack.i.l.bf16 %v7886_v39 }
 0x847   : > { %v4377_v21 = vpack.c.b16 %v4365_v45, %v4364_v14  ;;  %v4493_v54 = vpack.c.b16 %v4481_v38, %v4480_v9 }
 0x848   : > { %v4057_v0 = vpack.c.bf16 %v7890_v19, %v7890_v19  ;;  %v4041_v20 = vpack.c.bf16 %v7887_v53, %v7887_v53  ;;  %v7993_v55 = vpop.trf.xlu1 }
 0x849   : > { %v7994_v59 = vunpack.i.l.bf16 %v7993_v55  ;;  %v7997_v53 = vunpack.i.h.bf16 %v7993_v55 }
 0x84a   : > { %v4245_v47 = vunpack.c.l.b16 %v4057_v0  ;;  %v4129_v3 = vunpack.c.l.b16 %v4041_v20 }
 0x84b   : > { %v4078_v10 = vpack.c.bf16 %v7994_v59, %v7994_v59  ;;  %v4094_v0 = vpack.c.bf16 %v7997_v53, %v7997_v53 }
 0x84c   : > { %v4143_v62 = vpack.c.b16 %v4129_v3, %v4128_v35  ;;  %v4259_v25 = vpack.c.b16 %v4245_v47, %v4244_v8 }
 0x84d   : > { %v7891_v52 = vpop.trf.xlu2  ;;  %v4366_v3 = vunpack.c.l.b16 %v4078_v10 }
 0x84e   : > { %7422 = vmatmul.msk.bf16.gmra.mxu3 %vm1052_vm15, %v4491_v34  ;;  %7398 = vmatmul.msk.bf16.gmra.mxu0 %vm1052_vm15, %v4143_v62  ;;  %v7895_v30 = vunpack.i.h.bf16 %v7891_v52  ;;  %v7892_v29 = vunpack.i.l.bf16 %v7891_v52 }
 0x84f   : > { %7406 = vmatmul.msk.bf16.gmra.mxu1 %vm1052_vm15, %v4259_v25  ;;  %7415 = vmatmul.msk.bf16.gmra.mxu2 %vm1052_vm15, %v4376_v43  ;;  %v4482_v25 = vunpack.c.l.b16 %v4094_v0  ;;  %v13853_v0 = vld [vmem:[#allocation127_spill] sm:$0xff] }
 0x850   : > { %v4058_v56 = vpack.c.bf16 %v7895_v30, %v7895_v30  ;;  %v4042_v26 = vpack.c.bf16 %v7892_v29, %v7892_v29  ;;  %v7998_v41 = vpop.trf.xlu1 }
 0x851   : > { %v8002_v35 = vunpack.i.h.bf16 %v7998_v41  ;;  %v7999_v20 = vunpack.i.l.bf16 %v7998_v41 }
 0x852   : > { %v4246_v4 = vunpack.c.l.b16 %v4058_v56  ;;  %v4130_v51 = vunpack.c.l.b16 %v4042_v26 }
 0x853   : > { %v4095_v47 = vpack.c.bf16 %v8002_v35, %v8002_v35  ;;  %v4079_v34 = vpack.c.bf16 %v7999_v20, %v7999_v20  ;;  %v7010_v20 = vpack.c.bf16 %v13853_v0, %v13853_v0 }
 0x855   : > { %v7896_v50 = vpop.trf.xlu2  ;;  %v4367_v1 = vunpack.c.l.b16 %v4079_v34  ;;  %v4483_v33 = vunpack.c.l.b16 %v4095_v47 }
 0x856   : > { %v7900_v23 = vunpack.i.h.bf16 %v7896_v50  ;;  %v7897_v18 = vunpack.i.l.bf16 %v7896_v50 }
 0x857   : > { %v4378_v29 = vpack.c.b16 %v4367_v1, %v4366_v3  ;;  %v4494_v22 = vpack.c.b16 %v4483_v33, %v4482_v25  ;;  %v11549_v25 = vunpack.c.l.b16 %v7010_v20  ;;  %v13856_v33 = vld [vmem:[#allocation117_spill] sm:$0xff] }
 0x858   : > { %v4059_v16 = vpack.c.bf16 %v7900_v23, %v7900_v23  ;;  %v4043_v5 = vpack.c.bf16 %v7897_v18, %v7897_v18  ;;  %v8003_v30 = vpop.trf.xlu1 }
 0x859   : > { %v8004_v27 = vunpack.i.l.bf16 %v8003_v30  ;;  %v8007_v18 = vunpack.i.h.bf16 %v8003_v30  ;;  %13854 = vst [vmem:[#allocation75_spill] sm:$0xff] %v11549_v25  ;;  %v7014_v30 = vpack.c.bf16 %v13856_v33, %v13856_v33 }
 0x85a   : > { %v4247_v2 = vunpack.c.l.b16 %v4059_v16  ;;  %v4131_v58 = vunpack.c.l.b16 %v4043_v5 }
 0x85b   : > { %v4096_v17 = vpack.c.bf16 %v8007_v18, %v8007_v18 }
 0x85c   : > { %v4144_v46 = vpack.c.b16 %v4131_v58, %v4130_v51  ;;  %v4260_v49 = vpack.c.b16 %v4247_v2, %v4246_v4  ;;  %v4080_v4 = vpack.c.bf16 %v8004_v27, %v8004_v27  ;;  %v7006_v2 = vpack.c.bf16 %v13850_v40, %v13850_v40 }
 0x85d   : > { %v7901_v63 = vpop.trf.xlu2  ;;  %v4484_v45 = vunpack.c.l.b16 %v4096_v17 }
 0x85e   : > { %7423 = vmatmul.msk.bf16.gmra.mxu3 %vm1052_vm15, %v4492_v6  ;;  %7399 = vmatmul.msk.bf16.gmra.mxu0 %vm1052_vm15, %v4144_v46  ;;  %v7902_v44 = vunpack.i.l.bf16 %v7901_v63  ;;  %v7905_v15 = vunpack.i.h.bf16 %v7901_v63  ;;  %v4368_v46 = vunpack.c.l.b16 %v4080_v4  ;;  %v11537_v37 = vunpack.c.l.b16 %v7006_v2  ;;  %v13859_v2 = vld [vmem:[#allocation85_spill] sm:$0xff] }
 0x85f   : > { %7407 = vmatmul.msk.bf16.gmra.mxu1 %vm1052_vm15, %v4260_v49  ;;  %7416 = vmatmul.msk.bf16.gmra.mxu2 %vm1052_vm15, %v4377_v21 }
 0x860   : > { %v4044_v48 = vpack.c.bf16 %v7902_v44, %v7902_v44  ;;  %v4060_v7 = vpack.c.bf16 %v7905_v15, %v7905_v15  ;;  %v8008_v51 = vpop.trf.xlu1  ;;  %13851 = vst [vmem:[#allocation101_spill] sm:$0xff] %v11537_v37  ;;  %v11558_v15 = vunpack.c.l.b16 %v7014_v30 }
 0x861   : > { %v8012_v16 = vunpack.i.h.bf16 %v8008_v51  ;;  %v8009_v5 = vunpack.i.l.bf16 %v8008_v51 }
 0x862   : > { %v4132_v57 = vunpack.c.l.b16 %v4044_v48  ;;  %v4248_v58 = vunpack.c.l.b16 %v4060_v7  ;;  %13857 = vst [vmem:[#allocation71_spill] sm:$0xff] %v11558_v15 }
 0x863   : > { %v4097_v49 = vpack.c.bf16 %v8012_v16, %v8012_v16  ;;  %v4081_v63 = vpack.c.bf16 %v8009_v5, %v8009_v5 }
 0x865   : > { %v7906_v28 = vpop.trf.xlu2  ;;  %v4369_v14 = vunpack.c.l.b16 %v4081_v63  ;;  %v4485_v44 = vunpack.c.l.b16 %v4097_v49 }
 0x866   : > { %v7907_v11 = vunpack.i.l.bf16 %v7906_v28  ;;  %v7910_v56 = vunpack.i.h.bf16 %v7906_v28 }
 0x867   : > { %v4379_v21 = vpack.c.b16 %v4369_v14, %v4368_v46  ;;  %v4495_v9 = vpack.c.b16 %v4485_v44, %v4484_v45 }
 0x868   : > { %v4045_v12 = vpack.c.bf16 %v7907_v11, %v7907_v11  ;;  %v4061_v23 = vpack.c.bf16 %v7910_v56, %v7910_v56  ;;  %v8013_v48 = vpop.trf.xlu1 }
 0x869   : > { %v8014_v11 = vunpack.i.l.bf16 %v8013_v48  ;;  %v8017_v38 = vunpack.i.h.bf16 %v8013_v48 }
 0x86a   : > { %v4133_v42 = vunpack.c.l.b16 %v4045_v12  ;;  %v4249_v6 = vunpack.c.l.b16 %v4061_v23 }
 0x86b   : > { %v4082_v55 = vpack.c.bf16 %v8014_v11, %v8014_v11 }
 0x86c   : > { %v4145_v39 = vpack.c.b16 %v4133_v42, %v4132_v57  ;;  %v4261_v61 = vpack.c.b16 %v4249_v6, %v4248_v58  ;;  %v7018_v58 = vpack.c.bf16 %v13859_v2, %v13859_v2 }
 0x86d   : > { %v11524_v19 = vpop.trf.xlu2  ;;  %v4370_v53 = vunpack.c.l.b16 %v4082_v55 }
 0x86e   : > { %7400 = vmatmul.msk.bf16.gmra.mxu0 %vm1052_vm15, %v4145_v39  ;;  %7424 = vmatmul.msk.bf16.gmra.mxu3 %vm1052_vm15, %v4493_v54  ;;  %v7912_v8 = vunpack.i.l.bf16 %v11524_v19  ;;  %v4098_v54 = vpack.c.bf16 %v8017_v38, %v8017_v38  ;;  %v7915_v6 = vunpack.i.h.bf16 %v11524_v19  ;;  %v11571_v14 = vunpack.c.l.b16 %v7018_v58 }
 0x86f   : > { %7417 = vmatmul.msk.bf16.gmra.mxu2 %vm1052_vm15, %v4378_v29  ;;  %7408 = vmatmul.msk.bf16.gmra.mxu1 %vm1052_vm15, %v4261_v61 }
 0x870   : > { %v4046_v43 = vpack.c.bf16 %v7912_v8, %v7912_v8  ;;  %v8018_v57 = vpop.trf.xlu1  ;;  %v4486_v10 = vunpack.c.l.b16 %v4098_v54  ;;  %13860 = vst [vmem:[#allocation33_spill] sm:$0xff] %v11571_v14  ;;  %v4062_v45 = vpack.c.bf16 %v7915_v6, %v7915_v6 }
 0x871   : > { %v8022_v12 = vunpack.i.h.bf16 %v8018_v57  ;;  %v8019_v42 = vunpack.i.l.bf16 %v8018_v57 }
 0x872   : > { %v4134_v32 = vunpack.c.l.b16 %v4046_v43 }
 0x873   : > { %v4099_v59 = vpack.c.bf16 %v8022_v12, %v8022_v12  ;;  %v4083_v39 = vpack.c.bf16 %v8019_v42, %v8019_v42 }
 0x875   : > { %v11529_v62 = vpop.trf.xlu2  ;;  %v4371_v41 = vunpack.c.l.b16 %v4083_v39  ;;  %v4487_v8 = vunpack.c.l.b16 %v4099_v59 }
 0x876   : > { %v7917_v52 = vunpack.i.l.bf16 %v11529_v62 }
 0x877   : > { %v4380_v35 = vpack.c.b16 %v4371_v41, %v4370_v53  ;;  %v4496_v3 = vpack.c.b16 %v4487_v8, %v4486_v10 }
 0x878   : > { %v4047_v13 = vpack.c.bf16 %v7917_v52, %v7917_v52  ;;  %v8023_v43 = vpop.trf.xlu1 }
 0x879   : > { %v8027_v4 = vunpack.i.h.bf16 %v8023_v43 }
 0x87a   : > { %v4135_v26 = vunpack.c.l.b16 %v4047_v13 }
 0x87b   : > { %v4100_v17 = vpack.c.bf16 %v8027_v4, %v8027_v4 }
 0x87c   : > { %v4146_v50 = vpack.c.b16 %v4135_v26, %v4134_v32  ;;  %v8024_v26 = vunpack.i.l.bf16 %v8023_v43 }
 0x87d   : > { %v7921_v41 = vpop.trf.xlu2 }
 0x87e   : > { %7401 = vmatmul.msk.bf16.gmra.mxu0 %vm1052_vm15, %v4146_v50  ;;  %7425 = vmatmul.msk.bf16.gmra.mxu3 %vm1052_vm15, %v4494_v22  ;;  %v4084_v7 = vpack.c.bf16 %v8024_v26, %v8024_v26  ;;  %v7925_v8 = vunpack.i.h.bf16 %v7921_v41 }
 0x87f   : > { %7418 = vmatmul.msk.bf16.gmra.mxu2 %vm1052_vm15, %v4379_v21  ;;  %v4488_v21 = vunpack.c.l.b16 %v4100_v17 }
 0x880   : > { %v8028_v27 = vpop.trf.xlu1  ;;  %v4372_v16 = vunpack.c.l.b16 %v4084_v7 }
 0x881   : > { %v8029_v22 = vunpack.i.l.bf16 %v8028_v27  ;;  %v8032_v51 = vunpack.i.h.bf16 %v8028_v27 }
 0x882   : > { %v3723_v24 = vpop.f32.mrf.mxu0 }
 0x883   : > { %v7007_v31 = vpack.c.bf16 %v3723_v24, %v3723_v24  ;;  %v4085_v23 = vpack.c.bf16 %v8029_v22, %v8029_v22  ;;  %v7920_v24 = vunpack.i.h.bf16 %v11529_v62  ;;  %v4101_v46 = vpack.c.bf16 %v8032_v51, %v8032_v51 }
 0x885   : > { %v11539_v36 = vunpack.c.l.b16 %v7007_v31  ;;  %v4373_v5 = vunpack.c.l.b16 %v4085_v23  ;;  %v4063_v44 = vpack.c.bf16 %v7920_v24, %v7920_v24  ;;  %v4489_v48 = vunpack.c.l.b16 %v4101_v46  ;;  %v7926_v33 = vpop.trf.xlu2 }
 0x886   : > { %v7930_v30 = vunpack.i.h.bf16 %v7926_v33 }
 0x887   : > { %13852 = vst [vmem:[#allocation66_spill] sm:$0xff] %v11539_v36  ;;  %v4381_v40 = vpack.c.b16 %v4373_v5, %v4372_v16  ;;  %v4497_v62 = vpack.c.b16 %v4489_v48, %v4488_v21 }
 0x88a   : > { %v3725_v28 = vpop.f32.mrf.mxu0 }
 0x88b   : > { %v4250_v28 = vunpack.c.l.b16 %v4062_v45 }
 0x88d   : > { %v7931_v17 = vpop.trf.xlu2 }
 0x88e   : > { %7426 = vmatmul.msk.bf16.gmra.mxu3 %vm1052_vm15, %v4495_v9  ;;  %v4251_v9 = vunpack.c.l.b16 %v4063_v44  ;;  %v7935_v21 = vunpack.i.h.bf16 %v7931_v17  ;;  %v7932_v48 = vunpack.i.l.bf16 %v7931_v17 }
 0x88f   : > { %7419 = vmatmul.msk.bf16.gmra.mxu2 %vm1052_vm15, %v4380_v35  ;;  %v7922_v35 = vunpack.i.l.bf16 %v7921_v41 }
 0x890   : > { %v4262_v57 = vpack.c.b16 %v4251_v9, %v4250_v28  ;;  %v4050_v41 = vpack.c.bf16 %v7932_v48, %v7932_v48 }
 0x891   : > { %v4048_v43 = vpack.c.bf16 %v7922_v35, %v7922_v35 }
 0x892   : > { %7409 = vmatmul.msk.bf16.gmra.mxu1 %vm1052_vm15, %v4262_v57  ;;  %v4066_v57 = vpack.c.bf16 %v7935_v21, %v7935_v21 }
 0x893   : > { %v4136_v27 = vunpack.c.l.b16 %v4048_v43 }
 0x895   : > { %v7936_v44 = vpop.trf.xlu2 }
 0x896   : > { %v7937_v28 = vunpack.i.l.bf16 %v7936_v44 }
 0x89a   : > { %v3784_v47 = vpop.f32.mrf.mxu1 }
 0x89b   : > { %v7011_v34 = vpack.c.bf16 %v3784_v47, %v3784_v47 }
 0x89d   : > { %v11551_v1 = vunpack.c.l.b16 %v7011_v34  ;;  %v4064_v34 = vpack.c.bf16 %v7925_v8, %v7925_v8  ;;  %v7941_v43 = vpop.trf.xlu2 }
 0x89e   : > { %7427 = vmatmul.msk.bf16.gmra.mxu3 %vm1052_vm15, %v4496_v3 }
 0x89f   : > { %13855 = vst [vmem:[#allocation19_spill] sm:$0xff] %v11551_v1  ;;  %7420 = vmatmul.msk.bf16.gmra.mxu2 %vm1052_vm15, %v4381_v40  ;;  %v4252_v26 = vunpack.c.l.b16 %v4064_v34  ;;  %v4051_v34 = vpack.c.bf16 %v7937_v28, %v7937_v28 }
 0x8a1   : > { %v3845_v29 = vpop.f32.mrf.mxu2 }
 0x8a2   : > { %v7015_v32 = vpack.c.bf16 %v3845_v29, %v3845_v29  ;;  %v3786_v13 = vpop.f32.mrf.mxu1  ;;  %v7927_v29 = vunpack.i.l.bf16 %v7926_v33  ;;  %v4254_v33 = vunpack.c.l.b16 %v4066_v57 }
 0x8a4   : > { %v11560_v56 = vunpack.c.l.b16 %v7015_v32  ;;  %v4065_v32 = vpack.c.bf16 %v7930_v30, %v7930_v30  ;;  %v4049_v13 = vpack.c.bf16 %v7927_v29, %v7927_v29  ;;  %v4138_v30 = vunpack.c.l.b16 %v4050_v41 }
 0x8a6   : > { %13858 = vst [vmem:[#allocation68_spill] sm:$0xff] %v11560_v56  ;;  %v4253_v7 = vunpack.c.l.b16 %v4065_v32  ;;  %v4137_v23 = vunpack.c.l.b16 %v4049_v13  ;;  %v4139_v32 = vunpack.c.l.b16 %v4051_v34  ;;  %v7945_v34 = vunpack.i.h.bf16 %v7941_v43 }
 0x8a8   : > { %v4147_v4 = vpack.c.b16 %v4137_v23, %v4136_v27  ;;  %v4263_v51 = vpack.c.b16 %v4253_v7, %v4252_v26  ;;  %v4148_v7 = vpack.c.b16 %v4139_v32, %v4138_v30 }
 0x8a9   : > { %v3847_v18 = vpop.f32.mrf.mxu2 }
 0x8aa   : > { %7402 = vmatmul.msk.bf16.gmra.mxu0 %vm1052_vm15, %v4147_v4  ;;  %7410 = vmatmul.msk.bf16.gmra.mxu1 %vm1052_vm15, %v4263_v51  ;;  %v7946_v4 = vpop.trf.xlu2 }
 0x8ab   : > { %v7947_v30 = vunpack.i.l.bf16 %v7946_v4 }
 0x8ad   : > { %v4053_v52 = vpack.c.bf16 %v7947_v30, %v7947_v30 }
 0x8ae   : > { %7428 = vmatmul.msk.bf16.gmra.mxu3 %vm1052_vm15, %v4497_v62  ;;  %v7940_v62 = vunpack.i.h.bf16 %v7936_v44 }
 0x8af   : > { %v4141_v50 = vunpack.c.l.b16 %v4053_v52 }
 0x8b0   : > { %v4067_v35 = vpack.c.bf16 %v7940_v62, %v7940_v62 }
 0x8b1   : > { %v3906_v49 = vpop.f32.mrf.mxu3  ;;  %v11569_v63 = vpop.f32.mrf.mxu2 }
 0x8b2   : > { %v7019_v31 = vpack.c.bf16 %v3906_v49, %v3906_v49  ;;  %v4255_v29 = vunpack.c.l.b16 %v4067_v35 }
 0x8b4   : > { %v11573_v61 = vunpack.c.l.b16 %v7019_v31  ;;  %v4264_v23 = vpack.c.b16 %v4255_v29, %v4254_v33  ;;  %v7942_v33 = vunpack.i.l.bf16 %v7941_v43  ;;  %v7950_v29 = vunpack.i.h.bf16 %v7946_v4 }
 0x8b6   : > { %13861 = vst [vmem:[#allocation37_spill] sm:$0xff] %v11573_v61  ;;  %v4069_v60 = vpack.c.bf16 %v7950_v29, %v7950_v29 }
 0x8b8   : > { %v4257_v1 = vunpack.c.l.b16 %v4069_v60 }
 0x8b9   : > { %v3908_v11 = vpop.f32.mrf.mxu3  ;;  %v11578_v38 = vpop.f32.mrf.mxu2 }
 0x8ba   : > { %7403 = vmatmul.msk.bf16.gmra.mxu0 %vm1052_vm15, %v4148_v7  ;;  %7411 = vmatmul.msk.bf16.gmra.mxu1 %vm1052_vm15, %v4264_v23  ;;  %v4068_v7 = vpack.c.bf16 %v7945_v34, %v7945_v34  ;;  %v4052_v23 = vpack.c.bf16 %v7942_v33, %v7942_v33 }
 0x8bb   : > { %v11580_v55 = vpop.f32.mrf.mxu0 }
 0x8bc   : > { %4574 = vmax.xlane.f32.xlu0 %v11580_v55  ;;  %v11589_v54 = vpop.f32.mrf.mxu1  ;;  %v4140_v19 = vunpack.c.l.b16 %v4052_v23  ;;  %v4256_v25 = vunpack.c.l.b16 %v4068_v7 }
 0x8be   : > { %v4149_v37 = vpack.c.b16 %v4141_v50, %v4140_v19  ;;  %v4265_v36 = vpack.c.b16 %v4257_v1, %v4256_v25 }
 0x8c1   : > { %v11584_v12 = vpop.f32.mrf.mxu3 }
 0x8c2   : > { %4670 = vmax.xlane.f32.xlu2 %v11584_v12  ;;  %v11587_v42 = vpop.f32.mrf.mxu2 }
 0x8c3   : > { %v11591_v59 = vpop.f32.mrf.mxu0 }
 0x8c4   : > { %4606 = vmax.xlane.f32.xlu0 %v11589_v54  ;;  %v11605_v47 = vpop.f32.mrf.mxu1 }
 0x8c9   : > { %v11594_v39 = vpop.f32.mrf.mxu3 }
 0x8ca   : > { %v11596_v53 = vpop.f32.mrf.mxu2  ;;  %7404 = vmatmul.msk.bf16.gmra.mxu0 %vm1052_vm15, %v4149_v37  ;;  %7412 = vmatmul.msk.bf16.gmra.mxu1 %vm1052_vm15, %v4265_v36 }
 0x8cb   : > { %v11598_v10 = vpop.f32.mrf.mxu0 }
 0x8cc   : > { %4576 = vmax.xlane.f32.xlu0 %v11591_v59  ;;  %v11622_v40 = vpop.f32.mrf.mxu1 }
 0x8d1   : > { %v11601_v0 = vpop.f32.mrf.mxu3 }
 0x8d2   : > { %v11603_v20 = vpop.f32.mrf.mxu2 }
 0x8d3   : > { %v11607_v3 = vpop.f32.mrf.mxu0  ;;  %4646 = vmax.xlane.f32.xlu1 %v11603_v20 }
 0x8d4   : > { %4608 = vmax.xlane.f32.xlu0 %v11605_v47  ;;  %v11639_v49 = vpop.f32.mrf.mxu1 }
 0x8d9   : > { %v11611_v22 = vpop.f32.mrf.mxu3 }
 0x8da   : > { %v11620_v5 = vpop.f32.mrf.mxu2 }
 0x8db   : > { %v11613_v18 = vpop.f32.mrf.mxu0 }
 0x8dc   : > { %4578 = vmax.xlane.f32.xlu0 %v11598_v10  ;;  %v11668_v17 = vpop.f32.mrf.mxu1 }
 0x8e1   : > { %v11618_v16 = vpop.f32.mrf.mxu3 }
 0x8e2   : > { %v11631_v6 = vpop.f32.mrf.mxu2 }
 0x8e3   : > { %v11624_v2 = vpop.f32.mrf.mxu0 }
 0x8e4   : > { %4610 = vmax.xlane.f32.xlu0 %v11622_v40  ;;  %4584 = vmax.xlane.f32.xlu2 %v11624_v2  ;;  %v11691_v41 = vpop.f32.mrf.mxu1 }
 0x8e9   : > { %v11628_v58 = vpop.f32.mrf.mxu3 }
 0x8ea   : > { %4680 = vmax.xlane.f32.xlu1 %v11628_v58  ;;  %v11645_v45 = vpop.f32.mrf.mxu2 }
 0x8eb   : > { %v11633_v24 = vpop.f32.mrf.mxu0 }
 0x8ec   : > { %4580 = vmax.xlane.f32.xlu0 %v11607_v3  ;;  %4674 = vmax.xlane.f32.xlu2 %v11601_v0  ;;  %v11705_v34 = vpop.f32.mrf.mxu1 }
 0x8f1   : > { %v11637_v46 = vpop.f32.mrf.mxu3 }
 0x8f2   : > { %v11653_v8 = vpop.f32.mrf.mxu2 }
 0x8f3   : > { %v11641_v31 = vpop.f32.mrf.mxu0 }
 0x8f4   : > { %4612 = vmax.xlane.f32.xlu0 %v11639_v49  ;;  %4648 = vmax.xlane.f32.xlu2 %v11620_v5 }
 0x8f9   : > { %v11647_v9 = vpop.f32.mrf.mxu3 }
 0x8fa   : > { %v11661_v27 = vpop.f32.mrf.mxu2 }
 0x8fb   : > { %v11649_v11 = vpop.f32.mrf.mxu0 }
 0x8fc   : > { %4638 = vmax.xlane.f32.xlu0 %v11569_v63  ;;  %4682 = vmax.xlane.f32.xlu2 %v11637_v46 }
 0x901   : > { %v11655_v13 = vpop.f32.mrf.mxu3 }
 0x902   : > { %v11672_v44 = vpop.f32.mrf.mxu2 }
 0x903   : > { %v11657_v26 = vpop.f32.mrf.mxu0 }
 0x904   : > { %4582 = vmax.xlane.f32.xlu0 %v11613_v18  ;;  %4592 = vmax.xlane.f32.xlu1 %v11657_v26 }
 0x905   : > { %4654 = vmax.xlane.f32.xlu2 %v11653_v8 }
 0x909   : > { %v11666_v51 = vpop.f32.mrf.mxu3 }
 0x90a   : > { %v11679_v48 = vpop.f32.mrf.mxu2 }
 0x90c   : > { %4614 = vmax.xlane.f32.xlu0 %v11668_v17  ;;  %4652 = vmax.xlane.f32.xlu1 %v11645_v45 }
 0x90d   : > { %4688 = vmax.xlane.f32.xlu2 %v11666_v51 }
 0x911   : > { %v11675_v21 = vpop.f32.mrf.mxu3 }
 0x912   : > { %v11686_v28 = vpop.f32.mrf.mxu2 }
 0x914   : > { %4640 = vmax.xlane.f32.xlu0 %v11578_v38  ;;  %4686 = vmax.xlane.f32.xlu1 %v11655_v13 }
 0x915   : > { %4660 = vmax.xlane.f32.xlu2 %v11679_v48 }
 0x919   : > { %v11682_v62 = vpop.f32.mrf.mxu3 }
 0x91a   : > { %v11695_v35 = vpop.f32.mrf.mxu2 }
 0x91c   : > { %4672 = vmax.xlane.f32.xlu0 %v11594_v39  ;;  %4658 = vmax.xlane.f32.xlu1 %v11672_v44 }
 0x921   : > { %v11688_v57 = vpop.f32.mrf.mxu3 }
 0x922   : > { %4694 = vmax.xlane.f32.xlu2 %v11688_v57  ;;  %v11717_v25 = vpop.f32.mrf.mxu2 }
 0x924   : > { %4616 = vmax.xlane.f32.xlu0 %v11691_v41  ;;  %4692 = vmax.xlane.f32.xlu1 %v11682_v62 }
 0x929   : > { %v11713_v37 = vpop.f32.mrf.mxu3 }
 0x92c   : > { %4642 = vmax.xlane.f32.xlu0 %v11587_v42  ;;  %4664 = vmax.xlane.f32.xlu1 %v11695_v35 }
 0x92f   : > { %v11699_v32 = vpop.xlane.xlu0 %4574 }
 0x931   : > { %v11725_v19 = vpop.f32.mrf.mxu3 }
 0x932   : > { %13864 = vst [vmem:[#allocation43_spill] sm:$0xff] %v11725_v19 }
 0x934   : > { %4586 = vmax.xlane.f32.xlu0 %v11633_v24 }
 0x935   : > { %v4671_v7 = vpop.xlane.xlu2 %4670 }
 0x937   : > { %v4607_v43 = vpop.xlane.xlu0 %4606 }
 0x938   : > { %v4718_v14 = vsub.f32 %v11589_v54, %v4607_v43 }
 0x93a   : > { %v4798_v4 = vmul.f32 1.442695, %v4718_v14 }
 0x93c   : > { %8719 = vpow2.f32 %v4798_v4  ;;  %4618 = vmax.xlane.f32.xlu0 %v11705_v34  ;;  %v11732_v4 = vpop.f32.mrf.mxu1 }
 0x93f   : > { %v4577_v33 = vpop.xlane.xlu0 %4576 }
 0x940   : > { %v4703_v52 = vsub.f32 %v11591_v59, %v4577_v33 }
 0x942   : > { %v11709_v30 = vpop.eup %8719  ;;  %v4768_v60 = vmul.f32 1.442695, %v4703_v52 }
 0x943   : > { %13862 = vst [vmem:[#allocation29_spill] sm:$0xff] %v11709_v30  ;;  %4926 = vadd.xlane.f32.xlu2 %v11709_v30 }
 0x944   : > { %8721 = vpow2.f32 %v4768_v60  ;;  %4644 = vmax.xlane.f32.xlu0 %v11596_v53  ;;  %v11739_v60 = vpop.f32.mrf.mxu3 }
 0x947   : > { %v11715_v36 = vpop.xlane.xlu0 %4608 }
 0x94a   : > { %v11719_v1 = vpop.eup %8721 }
 0x94b   : > { %13863 = vst [vmem:[#allocation27_spill] sm:$0xff] %v11719_v1  ;;  %4896 = vadd.xlane.f32.xlu1 %v11719_v1  ;;  %4666 = vmax.xlane.f32.xlu2 %v11717_v25 }
 0x94c   : > { %4676 = vmax.xlane.f32.xlu0 %v11611_v22 }
 0x94f   : > { %v4579_v50 = vpop.xlane.xlu0 %4578 }
 0x950   : > { %v4704_v14 = vsub.f32 %v11598_v10, %v4579_v50  ;;  %v4750_v10 = vsub.f32 %v11584_v12, %v4671_v7 }
 0x952   : > { %v4770_v54 = vmul.f32 1.442695, %v4704_v14  ;;  %v4862_v52 = vmul.f32 1.442695, %v4750_v10  ;;  %v11754_v10 = vpop.f32.mrf.mxu1 }
 0x953   : > { %4698 = vmax.xlane.f32.xlu1 %v11725_v19 }
 0x954   : > { %8723 = vpow2.f32 %v4770_v54  ;;  %4588 = vmax.xlane.f32.xlu0 %v11641_v31 }
 0x957   : > { %v4611_v59 = vpop.xlane.xlu0 %4610  ;;  %v4585_v14 = vpop.xlane.xlu2 %4584 }
 0x958   : > { %v4720_v29 = vsub.f32 %v11622_v40, %v4611_v59 }
 0x95a   : > { %v11730_v23 = vpop.eup %8723  ;;  %v4802_v43 = vmul.f32 1.442695, %v4720_v29  ;;  %v4707_v29 = vsub.f32 %v11624_v2, %v4585_v14 }
 0x95b   : > { %13865 = vst [vmem:[#allocation41_spill] sm:$0xff] %v11730_v23  ;;  %4898 = vadd.xlane.f32.xlu2 %v11730_v23 }
 0x95c   : > { %8725 = vpow2.f32 %v4802_v43  ;;  %4620 = vmax.xlane.f32.xlu0 %v11732_v4  ;;  %v4776_v43 = vmul.f32 1.442695, %v4707_v29 }
 0x95d   : > { %8727 = vpow2.f32 %v4862_v52 }
 0x95f   : > { %v11737_v33 = vpop.xlane.xlu0 %4580 }
 0x962   : > { %v11741_v50 = vpop.eup %8725 }
 0x963   : > { %13866 = vst [vmem:[#allocation46_spill] sm:$0xff] %v11741_v50  ;;  %4700 = vmax.xlane.f32.xlu2 %v11739_v60  ;;  %4930 = vadd.xlane.f32.xlu1 %v11741_v50  ;;  %v11747_v54 = vpop.eup %8727 }
 0x964   : > { %4678 = vmax.xlane.f32.xlu0 %v11618_v16  ;;  %13867 = vst [vmem:[#allocation49_spill] sm:$0xff] %v11747_v54 }
 0x967   : > { %v4613_v40 = vpop.xlane.xlu0 %4612 }
 0x968   : > { %v4721_v12 = vsub.f32 %v11639_v49, %v4613_v40 }
 0x96a   : > { %v4804_v59 = vmul.f32 1.442695, %v4721_v12  ;;  %v11762_v12 = vpop.f32.mrf.mxu1 }
 0x96b   : > { %4990 = vadd.xlane.f32.xlu2 %v11747_v54 }
 0x96c   : > { %8729 = vpow2.f32 %v4804_v59  ;;  %4590 = vmax.xlane.f32.xlu0 %v11649_v11 }
 0x96d   : > { %8731 = vpow2.f32 %v4776_v43  ;;  %v11770_v43 = vpop.f32.mrf.mxu0 }
 0x96f   : > { %v11752_v7 = vpop.xlane.xlu0 %4638 }
 0x972   : > { %v11756_v52 = vpop.eup %8729  ;;  %v11778_v30 = vpop.f32.mrf.mxu1 }
 0x973   : > { %13868 = vst [vmem:[#allocation52_spill] sm:$0xff] %v11756_v52  ;;  %4932 = vadd.xlane.f32.xlu2 %v11756_v52  ;;  %v11760_v40 = vpop.eup %8731 }
 0x974   : > { %4622 = vmax.xlane.f32.xlu0 %v11754_v10  ;;  %13869 = vst [vmem:[#allocation55_spill] sm:$0xff] %v11760_v40 }
 0x977   : > { %v4583_v49 = vpop.xlane.xlu0 %4582 }
 0x978   : > { %v4706_v61 = vsub.f32 %v11613_v18, %v4583_v49 }
 0x97a   : > { %v4774_v56 = vmul.f32 1.442695, %v4706_v61  ;;  %v11793_v1 = vpop.f32.mrf.mxu1 }
 0x97b   : > { %4904 = vadd.xlane.f32.xlu2 %v11760_v40 }
 0x97c   : > { %4624 = vmax.xlane.f32.xlu0 %v11762_v12 }
 0x97f   : > { %v11766_v2 = vpop.xlane.xlu0 %4614 }
 0x984   : > { %4650 = vmax.xlane.f32.xlu0 %v11631_v6 }
 0x987   : > { %v4641_v14 = vpop.xlane.xlu0 %4640 }
 0x988   : > { %v4735_v59 = vsub.f32 %v11578_v38, %v4641_v14 }
 0x98a   : > { %v4832_v29 = vmul.f32 1.442695, %v4735_v59  ;;  %v11787_v59 = vpop.f32.mrf.mxu0 }
 0x98c   : > { %8733 = vpow2.f32 %v4832_v29  ;;  %4594 = vmax.xlane.f32.xlu0 %v11770_v43 }
 0x98d   : > { %8735 = vpow2.f32 %v4774_v56 }
 0x98f   : > { %v11774_v15 = vpop.xlane.xlu0 %4672 }
 0x992   : > { %v11776_v54 = vpop.eup %8733 }
 0x993   : > { %13870 = vst [vmem:[#allocation56_spill] sm:$0xff] %v11776_v54  ;;  %4960 = vadd.xlane.f32.xlu1 %v11776_v54  ;;  %v11782_v14 = vpop.eup %8735 }
 0x994   : > { %4626 = vmax.xlane.f32.xlu0 %v11778_v30  ;;  %13871 = vst [vmem:[#allocation57_spill] sm:$0xff] %v11782_v14 }
 0x997   : > { %v4617_v38 = vpop.xlane.xlu0 %4616 }
 0x998   : > { %v4723_v29 = vsub.f32 %v11691_v41, %v4617_v38 }
 0x99a   : > { %v4808_v50 = vmul.f32 1.442695, %v4723_v29  ;;  %v11804_v29 = vpop.f32.mrf.mxu1 }
 0x99b   : > { %4902 = vadd.xlane.f32.xlu1 %v11782_v14 }
 0x99c   : > { %4684 = vmax.xlane.f32.xlu0 %v11647_v9 }
 0x99f   : > { %v4643_v18 = vpop.xlane.xlu0 %4642 }
 0x9a0   : > { %v4736_v49 = vsub.f32 %v11587_v42, %v4643_v18 }
 0x9a2   : > { %v4834_v61 = vmul.f32 1.442695, %v4736_v49  ;;  %v11799_v49 = vpop.f32.mrf.mxu0 }
 0x9a4   : > { %8737 = vpow2.f32 %v4834_v61  ;;  %4596 = vmax.xlane.f32.xlu0 %v11787_v59 }
 0x9a5   : > { %8739 = vpow2.f32 %v4808_v50 }
 0x9a7   : > { %v4587_v56 = vpop.xlane.xlu0 %4586 }
 0x9a8   : > { %v4708_v54 = vsub.f32 %v11633_v24, %v4587_v56 }
 0x9aa   : > { %v11791_v52 = vpop.eup %8737  ;;  %v4778_v50 = vmul.f32 1.442695, %v4708_v54 }
 0x9ab   : > { %13872 = vst [vmem:[#allocation58_spill] sm:$0xff] %v11791_v52  ;;  %4962 = vadd.xlane.f32.xlu1 %v11791_v52  ;;  %v11797_v18 = vpop.eup %8739 }
 0x9ac   : > { %4628 = vmax.xlane.f32.xlu0 %v11793_v1  ;;  %13873 = vst [vmem:[#allocation59_spill] sm:$0xff] %v11797_v18 }
 0x9af   : > { %v4619_v42 = vpop.xlane.xlu0 %4618 }
 0x9b3   : > { %4936 = vadd.xlane.f32.xlu1 %v11797_v18  ;;  %v4647_v18 = vpop.xlane.xlu1 %4646 }
 0x9b4   : > { %4598 = vmax.xlane.f32.xlu0 %v11799_v49  ;;  %v4738_v19 = vsub.f32 %v11603_v20, %v4647_v18 }
 0x9b6   : > { %v4838_v24 = vmul.f32 1.442695, %v4738_v19 }
 0x9b7   : > { %v4645_v41 = vpop.xlane.xlu0 %4644 }
 0x9b8   : > { %v4737_v38 = vsub.f32 %v11596_v53, %v4645_v41  ;;  %v4724_v53 = vsub.f32 %v11705_v34, %v4619_v42 }
 0x9ba   : > { %v4836_v61 = vmul.f32 1.442695, %v4737_v38  ;;  %v4810_v54 = vmul.f32 1.442695, %v4724_v53  ;;  %v11832_v38 = vpop.f32.mrf.mxu1  ;;  %v11837_v53 = vpop.xlane.xlu2 %4674 }
 0x9bb   : > { %v4681_v20 = vpop.xlane.xlu1 %4680 }
 0x9bc   : > { %8741 = vpow2.f32 %v4836_v61  ;;  %4630 = vmax.xlane.f32.xlu0 %v11804_v29  ;;  %v4755_v18 = vsub.f32 %v11628_v58, %v4681_v20 }
 0x9bd   : > { %8743 = vpow2.f32 %v4778_v50 }
 0x9be   : > { %v4872_v50 = vmul.f32 1.442695, %v4755_v18 }
 0x9bf   : > { %v4677_v52 = vpop.xlane.xlu0 %4676 }
 0x9c0   : > { %v4753_v14 = vsub.f32 %v11611_v22, %v4677_v52  ;;  %v11821_v52 = vpop.f32.mrf.mxu0 }
 0x9c2   : > { %v11809_v23 = vpop.eup %8741  ;;  %v4868_v40 = vmul.f32 1.442695, %v4753_v14 }
 0x9c3   : > { %13874 = vst [vmem:[#allocation60_spill] sm:$0xff] %v11809_v23  ;;  %4964 = vadd.xlane.f32.xlu2 %v11809_v23  ;;  %v11817_v41 = vpop.eup %8743  ;;  %v4593_v61 = vpop.xlane.xlu1 %4592 }
 0x9c4   : > { %8745 = vpow2.f32 %v4868_v40  ;;  %4656 = vmax.xlane.f32.xlu0 %v11661_v27  ;;  %13875 = vst [vmem:[#allocation61_spill] sm:$0xff] %v11817_v41  ;;  %v4711_v58 = vsub.f32 %v11657_v26, %v4593_v61 }
 0x9c5   : > { %8747 = vpow2.f32 %v4838_v24 }
 0x9c6   : > { %8749 = vpow2.f32 %v4810_v54 }
 0x9c7   : > { %v11815_v56 = vpop.xlane.xlu0 %4588 }
 0x9ca   : > { %v11819_v22 = vpop.eup %8745 }
 0x9cb   : > { %13876 = vst [vmem:[#allocation62_spill] sm:$0xff] %v11819_v22  ;;  %4906 = vadd.xlane.f32.xlu2 %v11817_v41  ;;  %4996 = vadd.xlane.f32.xlu1 %v11819_v22  ;;  %v11827_v40 = vpop.eup %8747  ;;  %v11849_v22 = vpop.xlane.xlu2 %4648 }
 0x9cc   : > { %4600 = vmax.xlane.f32.xlu0 %v11821_v52  ;;  %13877 = vst [vmem:[#allocation10_spill] sm:$0xff] %v11827_v40  ;;  %v11829_v14 = vpop.eup %8749 }
 0x9cd   : > { %13878 = vst [vmem:[#allocation11_spill] sm:$0xff] %v11829_v14 }
 0x9cf   : > { %v4621_v34 = vpop.xlane.xlu0 %4620 }
 0x9d0   : > { %v4725_v19 = vsub.f32 %v11732_v4, %v4621_v34 }
 0x9d2   : > { %v4812_v42 = vmul.f32 1.442695, %v4725_v19  ;;  %v4784_v19 = vmul.f32 1.442695, %v4711_v58 }
 0x9d3   : > { %4966 = vadd.xlane.f32.xlu2 %v11827_v40  ;;  %4938 = vadd.xlane.f32.xlu1 %v11829_v14 }
 0x9d4   : > { %8751 = vpow2.f32 %v4812_v42  ;;  %4632 = vmax.xlane.f32.xlu0 %v11832_v38  ;;  %v4653_v42 = vpop.xlane.xlu1 %4652 }
 0x9d5   : > { %8753 = vpow2.f32 %v4872_v50  ;;  %v11854_v50 = vpop.f32.mrf.mxu0 }
 0x9d7   : > { %v4679_v4 = vpop.xlane.xlu0 %4678 }
 0x9d8   : > { %v4754_v24 = vsub.f32 %v11618_v16, %v4679_v4  ;;  %v4741_v4 = vsub.f32 %v11645_v45, %v4653_v42 }
 0x9da   : > { %v11840_v54 = vpop.eup %8751  ;;  %v4870_v34 = vmul.f32 1.442695, %v4754_v24  ;;  %v4844_v26 = vmul.f32 1.442695, %v4741_v4 }
 0x9db   : > { %13879 = vst [vmem:[#allocation8_spill] sm:$0xff] %v11840_v54  ;;  %4940 = vadd.xlane.f32.xlu2 %v11840_v54  ;;  %v11847_v18 = vpop.eup %8753  ;;  %v11862_v54 = vpop.f32.mrf.mxu1 }
 0x9dc   : > { %8755 = vpow2.f32 %v4870_v34  ;;  %4690 = vmax.xlane.f32.xlu0 %v11675_v21  ;;  %13880 = vst [vmem:[#allocation9_spill] sm:$0xff] %v11847_v18  ;;  %v4683_v34 = vpop.xlane.xlu2 %4682 }
 0x9dd   : > { %8757 = vpow2.f32 %v4784_v19  ;;  %v4756_v45 = vsub.f32 %v11637_v46, %v4683_v34 }
 0x9de   : > { %8759 = vpow2.f32 %v4844_v26 }
 0x9df   : > { %v11845_v20 = vpop.xlane.xlu0 %4590  ;;  %v4874_v42 = vmul.f32 1.442695, %v4756_v45 }
 0x9e2   : > { %v11851_v16 = vpop.eup %8755 }
 0x9e3   : > { %13881 = vst [vmem:[#allocation107_spill] sm:$0xff] %v11851_v16  ;;  %5000 = vadd.xlane.f32.xlu2 %v11847_v18  ;;  %4998 = vadd.xlane.f32.xlu1 %v11851_v16  ;;  %v11860_v58 = vpop.eup %8757  ;;  %v11882_v26 = vpop.f32.mrf.mxu1 }
 0x9e4   : > { %4602 = vmax.xlane.f32.xlu0 %v11854_v50  ;;  %v11869_v4 = vpop.eup %8759  ;;  %v4655_v16 = vpop.xlane.xlu2 %4654 }
 0x9e5   : > { %v4742_v23 = vsub.f32 %v11653_v8, %v4655_v16 }
 0x9e7   : > { %v4623_v61 = vpop.xlane.xlu0 %4622 }
 0x9e8   : > { %v4726_v24 = vsub.f32 %v11754_v10, %v4623_v61  ;;  %v11873_v61 = vpop.f32.mrf.mxu0 }
 0x9ea   : > { %v4814_v14 = vmul.f32 1.442695, %v4726_v24  ;;  %v4702_v24 = vsub.f32 %v11580_v55, %v11699_v32  ;;  %v4719_v55 = vsub.f32 %v11605_v47, %v11715_v36  ;;  %v4734_v47 = vsub.f32 %v11569_v63, %v11752_v7 }
 0x9eb   : > { %4912 = vadd.xlane.f32.xlu1 %v11860_v58  ;;  %v4705_v63 = vsub.f32 %v11607_v3, %v11737_v33 }
 0x9ec   : > { %8761 = vpow2.f32 %v4814_v14  ;;  %4634 = vmax.xlane.f32.xlu0 %v11862_v54  ;;  %v4766_v18 = vmul.f32 1.442695, %v4702_v24  ;;  %v4800_v32 = vmul.f32 1.442695, %v4719_v55  ;;  %v4689_v55 = vpop.xlane.xlu2 %4688 }
 0x9ed   : > { %8763 = vpow2.f32 %v4874_v42 }
 0x9ef   : > { %v11867_v19 = vpop.xlane.xlu0 %4624 }
 0x9f2   : > { %v11871_v10 = vpop.eup %8761 }
 0x9f3   : > { %13882 = vst [vmem:[#allocation17_spill] sm:$0xff] %v11871_v10  ;;  %4942 = vadd.xlane.f32.xlu2 %v11871_v10  ;;  %4972 = vadd.xlane.f32.xlu1 %v11869_v4  ;;  %v11880_v14 = vpop.eup %8763 }
 0x9f4   : > { %4604 = vmax.xlane.f32.xlu0 %v11873_v61  ;;  %13883 = vst [vmem:[#allocation22_spill] sm:$0xff] %v11880_v14 }
 0x9f7   : > { %v11878_v46 = vpop.xlane.xlu0 %4650 }
 0x9fb   : > { %5002 = vadd.xlane.f32.xlu2 %v11880_v14  ;;  %v4846_v14 = vmul.f32 1.442695, %v4742_v23 }
 0x9fc   : > { %4636 = vmax.xlane.f32.xlu0 %v11882_v26 }
 0x9ff   : > { %v4595_v34 = vpop.xlane.xlu0 %4594 }
 0xa00   : > { %v4712_v45 = vsub.f32 %v11770_v43, %v4595_v34  ;;  %v4830_v34 = vmul.f32 1.442695, %v4734_v47  ;;  %v11928_v47 = vpop.xlane.xlu1 %4686 }
 0xa02   : > { %v4786_v42 = vmul.f32 1.442695, %v4712_v45 }
 0xa04   : > { %8765 = vpow2.f32 %v4786_v42  ;;  %4662 = vmax.xlane.f32.xlu0 %v11686_v28 }
 0xa05   : > { %8767 = vpow2.f32 %v4766_v18 }
 0xa06   : > { %8769 = vpow2.f32 %v4846_v14 }
 0xa07   : > { %v11891_v10 = vpop.xlane.xlu0 %4626  ;;  %8771 = vpow2.f32 %v4800_v32  ;;  %v11916_v32 = vpop.f32.mrf.mxu2 }
 0xa0a   : > { %v11893_v40 = vpop.eup %8765 }
 0xa0b   : > { %v11895_v41 = vpop.eup %8767  ;;  %4914 = vadd.xlane.f32.xlu1 %v11893_v40 }
 0xa0c   : > { %13884 = vst [vmem:[#allocation120_spill] sm:$0xff] %v11895_v41  ;;  %4894 = vadd.xlane.f32.xlu0 %v11895_v41  ;;  %v11903_v43 = vpop.eup %8769 }
 0xa0d   : > { %v11908_v14 = vpop.eup %8771 }
 0xa0e   : > { %13885 = vst [vmem:[#allocation92_spill] sm:$0xff] %v11908_v14 }
 0xa0f   : > { %v11901_v8 = vpop.xlane.xlu0 %4684 }
 0xa13   : > { %4974 = vadd.xlane.f32.xlu1 %v11903_v43 }
 0xa14   : > { %4696 = vmax.xlane.f32.xlu0 %v11713_v37 }
 0xa17   : > { %v4597_v23 = vpop.xlane.xlu0 %4596 }
 0xa18   : > { %v4713_v18 = vsub.f32 %v11787_v59, %v4597_v23  ;;  %v4759_v59 = vsub.f32 %v11666_v51, %v4689_v55  ;;  %v4772_v23 = vmul.f32 1.442695, %v4705_v63  ;;  %v4751_v51 = vsub.f32 %v11594_v39, %v11774_v15  ;;  %v4659_v15 = vpop.xlane.xlu1 %4658 }
 0xa1a   : > { %v4788_v16 = vmul.f32 1.442695, %v4713_v18 }
 0xa1c   : > { %8773 = vpow2.f32 %v4788_v16  ;;  %4928 = vadd.xlane.f32.xlu0 %v11908_v14 }
 0xa1f   : > { %v4629_v36 = vpop.xlane.xlu0 %4628 }
 0xa20   : > { %v4729_v24 = vsub.f32 %v11793_v1, %v4629_v36  ;;  %v4880_v1 = vmul.f32 1.442695, %v4759_v59  ;;  %v4864_v36 = vmul.f32 1.442695, %v4751_v51  ;;  %v4722_v59 = vsub.f32 %v11668_v17, %v11766_v2  ;;  %v4693_v2 = vpop.xlane.xlu1 %4692 }
 0xa21   : > { %v4752_v17 = vsub.f32 %v11601_v0, %v11837_v53  ;;  %v4709_v0 = vsub.f32 %v11641_v31, %v11815_v56  ;;  %v4739_v31 = vsub.f32 %v11620_v5, %v11849_v22  ;;  %v4710_v5 = vsub.f32 %v11649_v11, %v11845_v20 }
 0xa22   : > { %v11914_v45 = vpop.eup %8773  ;;  %v4820_v42 = vmul.f32 1.442695, %v4729_v24  ;;  %v4806_v63 = vmul.f32 1.442695, %v4722_v59  ;;  %v4740_v11 = vsub.f32 %v11631_v6, %v11878_v46  ;;  %v4727_v6 = vsub.f32 %v11762_v12, %v11867_v19 }
 0xa23   : > { %4916 = vadd.xlane.f32.xlu2 %v11914_v45  ;;  %v4757_v12 = vsub.f32 %v11647_v9, %v11901_v8 }
 0xa24   : > { %8775 = vpow2.f32 %v4820_v42  ;;  %4668 = vmax.xlane.f32.xlu0 %v11916_v32 }
 0xa25   : > { %8777 = vpow2.f32 %v4830_v34  ;;  %v11936_v34 = vpop.xlane.xlu2 %4660 }
 0xa26   : > { %8779 = vpow2.f32 %v4880_v1 }
 0xa27   : > { %v4599_v7 = vpop.xlane.xlu0 %4598  ;;  %8781 = vpow2.f32 %v4772_v23 }
 0xa2a   : > { %v11923_v18 = vpop.eup %8775 }
 0xa2b   : > { %13886 = vst [vmem:[#allocation114_spill] sm:$0xff] %v11923_v18  ;;  %v11925_v16 = vpop.eup %8777  ;;  %4948 = vadd.xlane.f32.xlu1 %v11923_v18 }
 0xa2c   : > { %13887 = vst [vmem:[#allocation24_spill] sm:$0xff] %v11925_v16  ;;  %4958 = vadd.xlane.f32.xlu0 %v11925_v16  ;;  %v11934_v24 = vpop.eup %8779 }
 0xa2d   : > { %13888 = vst [vmem:[#allocation102_spill] sm:$0xff] %v11934_v24  ;;  %v11938_v55 = vpop.eup %8781 }
 0xa2e   : > { %13889 = vst [vmem:[#allocation128_spill] sm:$0xff] %v11938_v55 }
 0xa2f   : > { %v4631_v3 = vpop.xlane.xlu0 %4630 }
 0xa30   : > { %v4730_v33 = vsub.f32 %v11804_v29, %v4631_v3  ;;  %v11950_v3 = vpop.xlane.xlu2 %4694 }
 0xa32   : > { %v4822_v42 = vmul.f32 1.442695, %v4730_v33  ;;  %v4714_v33 = vsub.f32 %v11799_v49, %v4599_v7  ;;  %v4744_v49 = vsub.f32 %v11672_v44, %v4659_v15 }
 0xa33   : > { %5008 = vadd.xlane.f32.xlu1 %v11934_v24 }
 0xa34   : > { %8783 = vpow2.f32 %v4822_v42  ;;  %4900 = vadd.xlane.f32.xlu0 %v11938_v55  ;;  %v4866_v42 = vmul.f32 1.442695, %v4752_v17 }
 0xa35   : > { %8785 = vpow2.f32 %v4864_v36  ;;  %v4790_v36 = vmul.f32 1.442695, %v4714_v33  ;;  %v4665_v33 = vpop.xlane.xlu1 %4664 }
 0xa37   : > { %v4657_v39 = vpop.xlane.xlu0 %4656 }
 0xa38   : > { %v4743_v29 = vsub.f32 %v11661_v27, %v4657_v39  ;;  %v11967_v53 = vpop.xlane.xlu2 %4926 }
 0xa39   : > { %13892 = vst [vmem:[#allocation77_spill] sm:$0xff] %v11967_v53 }
 0xa3a   : > { %v11945_v1 = vpop.eup %8783  ;;  %v4848_v23 = vmul.f32 1.442695, %v4743_v29  ;;  %v4850_v29 = vmul.f32 1.442695, %v4744_v49 }
 0xa3b   : > { %v11947_v51 = vpop.eup %8785  ;;  %4950 = vadd.xlane.f32.xlu1 %v11945_v1 }
 0xa3c   : > { %13890 = vst [vmem:[#allocation67_spill] sm:$0xff] %v11947_v51  ;;  %8787 = vpow2.f32 %v4848_v23  ;;  %4992 = vadd.xlane.f32.xlu0 %v11947_v51 }
 0xa3d   : > { %8789 = vpow2.f32 %v4806_v63  ;;  %v4780_v63 = vmul.f32 1.442695, %v4709_v0 }
 0xa3e   : > { %8791 = vpow2.f32 %v4790_v36 }
 0xa3f   : > { %v11956_v27 = vpop.xlane.xlu0 %4600  ;;  %8793 = vpow2.f32 %v4866_v42  ;;  %v4840_v42 = vmul.f32 1.442695, %v4739_v31  ;;  %v4782_v31 = vmul.f32 1.442695, %v4710_v5 }
 0xa40   : > { %8795 = vpow2.f32 %v4850_v29  ;;  %v11978_v44 = vpop.xlane.xlu2 %4666  ;;  %v11987_v29 = vpop.xlane.xlu1 %4896 }
 0xa41   : > { %8797 = vpow2.f32 %v4780_v63 }
 0xa42   : > { %v11958_v59 = vpop.eup %8787 }
 0xa43   : > { %v11960_v39 = vpop.eup %8789  ;;  %4976 = vadd.xlane.f32.xlu2 %v11958_v59 }
 0xa44   : > { %13891 = vst [vmem:[#allocation97_spill] sm:$0xff] %v11960_v39  ;;  %4934 = vadd.xlane.f32.xlu0 %v11960_v39  ;;  %v11969_v23 = vpop.eup %8791 }
 0xa45   : > { %v11971_v17 = vpop.eup %8793 }
 0xa46   : > { %13893 = vst [vmem:[#allocation113_spill] sm:$0xff] %v11971_v17  ;;  %v11981_v49 = vpop.eup %8795 }
 0xa47   : > { %v4633_v7 = vpop.xlane.xlu0 %4632 }
 0xa48   : > { %v4731_v51 = vsub.f32 %v11832_v38, %v4633_v7  ;;  %v11983_v38 = vpop.eup %8797  ;;  %v4761_v7 = vsub.f32 %v11682_v62, %v4693_v2  ;;  %v12004_v2 = vpop.xlane.xlu1 %4698 }
 0xa49   : > { %13894 = vst [vmem:[#allocation93_spill] sm:$0xff] %v11983_v38 }
 0xa4a   : > { %v4824_v56 = vmul.f32 1.442695, %v4731_v51  ;;  %v4884_v22 = vmul.f32 1.442695, %v4761_v7  ;;  %v11994_v51 = vpop.xlane.xlu2 %4898 }
 0xa4b   : > { %4918 = vadd.xlane.f32.xlu2 %v11969_v23 }
 0xa4c   : > { %4994 = vadd.xlane.f32.xlu0 %v11971_v17  ;;  %8799 = vpow2.f32 %v4824_v56 }
 0xa4f   : > { %v4691_v15 = vpop.xlane.xlu0 %4690 }
 0xa50   : > { %v4760_v36 = vsub.f32 %v11675_v21, %v4691_v15 }
 0xa52   : > { %v4882_v0 = vmul.f32 1.442695, %v4760_v36  ;;  %v11996_v63 = vpop.eup %8799  ;;  %v4842_v36 = vmul.f32 1.442695, %v4740_v11  ;;  %v4816_v11 = vmul.f32 1.442695, %v4727_v6  ;;  %v4728_v6 = vsub.f32 %v11778_v30, %v11891_v10 }
 0xa53   : > { %4978 = vadd.xlane.f32.xlu2 %v11981_v49  ;;  %v4758_v30 = vsub.f32 %v11655_v13, %v11928_v47  ;;  %v4715_v13 = vsub.f32 %v11821_v52, %v11956_v27  ;;  %v4745_v52 = vsub.f32 %v11679_v48, %v11936_v34 }
 0xa54   : > { %8801 = vpow2.f32 %v4882_v0  ;;  %4908 = vadd.xlane.f32.xlu0 %v11983_v38  ;;  %v12012_v0 = vpop.xlane.xlu2 %4700 }
 0xa55   : > { %8803 = vpow2.f32 %v4840_v42 }
 0xa56   : > { %8805 = vpow2.f32 %v4884_v22  ;;  %v4747_v22 = vsub.f32 %v11695_v35, %v4665_v33 }
 0xa57   : > { %v11992_v21 = vpop.xlane.xlu0 %4602  ;;  %8807 = vpow2.f32 %v4782_v31 }
 0xa58   : > { %v4856_v31 = vmul.f32 1.442695, %v4747_v22  ;;  %v4716_v48 = vsub.f32 %v11854_v50, %v11992_v21  ;;  %v4762_v50 = vsub.f32 %v11688_v57, %v11950_v3 }
 0xa5a   : > { %v11998_v56 = vpop.eup %8801 }
 0xa5b   : > { %13895 = vst [vmem:[#allocation20_spill] sm:$0xff] %v11998_v56  ;;  %v12000_v62 = vpop.eup %8803  ;;  %4952 = vadd.xlane.f32.xlu2 %v11996_v63  ;;  %5010 = vadd.xlane.f32.xlu1 %v11998_v56 }
 0xa5c   : > { %13896 = vst [vmem:[#allocation110_spill] sm:$0xff] %v12000_v62  ;;  %4968 = vadd.xlane.f32.xlu0 %v12000_v62  ;;  %v12010_v42 = vpop.eup %8805  ;;  %v12028_v35 = vpop.xlane.xlu2 %4990 }
 0xa5d   : > { %13897 = vst [vmem:[#allocation72_spill] sm:$0xff] %v12010_v42  ;;  %v12014_v5 = vpop.eup %8807 }
 0xa5e   : > { %13899 = vst [vmem:[#allocation30_spill] sm:$0xff] %v12028_v35 }
 0xa5f   : > { %v4635_v20 = vpop.xlane.xlu0 %4634 }
 0xa60   : > { %v4732_v15 = vsub.f32 %v11862_v54, %v4635_v20  ;;  %v12021_v54 = vpop.xlane.xlu1 %4930 }
 0xa61   : > { %13898 = vst [vmem:[#allocation84_spill] sm:$0xff] %v12021_v54 }
 0xa62   : > { %v4826_v7 = vmul.f32 1.442695, %v4732_v15 }
 0xa63   : > { %5012 = vadd.xlane.f32.xlu2 %v12010_v42 }
 0xa64   : > { %8809 = vpow2.f32 %v4826_v7  ;;  %4910 = vadd.xlane.f32.xlu0 %v12014_v5 }
 0xa65   : > { %8811 = vpow2.f32 %v4842_v36  ;;  %v4876_v36 = vmul.f32 1.442695, %v4757_v12  ;;  %v4818_v12 = vmul.f32 1.442695, %v4728_v6  ;;  %v4878_v6 = vmul.f32 1.442695, %v4758_v30 }
 0xa66   : > { %8813 = vpow2.f32 %v4856_v31  ;;  %v12045_v31 = vpop.xlane.xlu2 %4932 }
 0xa67   : > { %v4605_v46 = vpop.xlane.xlu0 %4604  ;;  %8815 = vpow2.f32 %v4816_v11  ;;  %13902 = vst [vmem:[#allocation80_spill] sm:$0xff] %v12045_v31 }
 0xa68   : > { %v12033_v19 = vpop.xlane.xlu1 %4960  ;;  %8817 = vpow2.f32 %v4876_v36  ;;  %v4717_v14 = vsub.f32 %v11873_v61, %v4605_v46 }
 0xa69   : > { %13900 = vst [vmem:[#allocation115_spill] sm:$0xff] %v12033_v19 }
 0xa6a   : > { %v12023_v20 = vpop.eup %8809 }
 0xa6b   : > { %v12025_v15 = vpop.eup %8811  ;;  %4954 = vadd.xlane.f32.xlu2 %v12023_v20 }
 0xa6c   : > { %4970 = vadd.xlane.f32.xlu0 %v12025_v15  ;;  %v12037_v7 = vpop.eup %8813 }
 0xa6d   : > { %v12039_v22 = vpop.eup %8815 }
 0xa6e   : > { %13901 = vst [vmem:[#allocation86_spill] sm:$0xff] %v12039_v22  ;;  %v12050_v17 = vpop.eup %8817  ;;  %v12058_v36 = vpop.xlane.xlu2 %4904 }
 0xa6f   : > { %v12035_v33 = vpop.xlane.xlu0 %4636  ;;  %13903 = vst [vmem:[#allocation88_spill] sm:$0xff] %v12050_v17 }
 0xa70   : > { %v12047_v8 = vpop.xlane.xlu1 %4902  ;;  %v4733_v57 = vsub.f32 %v11882_v26, %v12035_v33 }
 0xa73   : > { %4984 = vadd.xlane.f32.xlu2 %v12037_v7 }
 0xa74   : > { %4944 = vadd.xlane.f32.xlu0 %v12039_v22 }
 0xa76   : > { %v12070_v47 = vpop.xlane.xlu2 %4964 }
 0xa77   : > { %v4663_v9 = vpop.xlane.xlu0 %4662 }
 0xa78   : > { %v4746_v11 = vsub.f32 %v11686_v28, %v4663_v9  ;;  %v12060_v53 = vpop.xlane.xlu1 %4962  ;;  %v4796_v28 = vmul.f32 1.442695, %v4717_v14  ;;  %v4792_v14 = vmul.f32 1.442695, %v4715_v13 }
 0xa7a   : > { %v4854_v35 = vmul.f32 1.442695, %v4746_v11 }
 0xa7c   : > { %8819 = vpow2.f32 %v4854_v35  ;;  %5004 = vadd.xlane.f32.xlu0 %v12050_v17 }
 0xa7d   : > { %8821 = vpow2.f32 %v4818_v12 }
 0xa7e   : > { %8823 = vpow2.f32 %v4796_v28  ;;  %v4748_v28 = vsub.f32 %v11717_v25, %v11978_v44  ;;  %v4765_v25 = vsub.f32 %v11739_v60, %v12012_v0 }
 0xa7f   : > { %v12056_v10 = vpop.xlane.xlu0 %4894  ;;  %8825 = vpow2.f32 %v4878_v6  ;;  %v4852_v6 = vmul.f32 1.442695, %v4745_v52 }
 0xa80   : > { %13904 = vst [vmem:[#allocation96_spill] sm:$0xff] %v12056_v10  ;;  %v12075_v12 = vpop.xlane.xlu1 %4936  ;;  %v4858_v27 = vmul.f32 1.442695, %v4748_v28  ;;  %v4892_v34 = vmul.f32 1.442695, %v4765_v25 }
 0xa81   : > { %13906 = vst [vmem:[#allocation28_spill] sm:$0xff] %v12075_v12 }
 0xa82   : > { %v12062_v9 = vpop.eup %8819 }
 0xa83   : > { %v12064_v11 = vpop.eup %8821  ;;  %4982 = vadd.xlane.f32.xlu1 %v12062_v9 }
 0xa84   : > { %13905 = vst [vmem:[#allocation26_spill] sm:$0xff] %v12064_v11  ;;  %4946 = vadd.xlane.f32.xlu0 %v12064_v11  ;;  %v12073_v35 = vpop.eup %8823 }
 0xa85   : > { %v12077_v17 = vpop.eup %8825 }
 0xa86   : > { %13907 = vst [vmem:[#allocation69_spill] sm:$0xff] %v12077_v17 }
 0xa87   : > { %v4697_v61 = vpop.xlane.xlu0 %4696 }
 0xa88   : > { %v4763_v46 = vsub.f32 %v11713_v37, %v4697_v61  ;;  %v12089_v61 = vpop.xlane.xlu2 %4906 }
 0xa8a   : > { %v4888_v30 = vmul.f32 1.442695, %v4763_v46  ;;  %v12091_v46 = vpop.xlane.xlu1 %4996 }
 0xa8b   : > { %4924 = vadd.xlane.f32.xlu1 %v12073_v35  ;;  %13910 = vst [vmem:[#allocation82_spill] sm:$0xff] %v12091_v46 }
 0xa8c   : > { %8827 = vpow2.f32 %v4888_v30  ;;  %5006 = vadd.xlane.f32.xlu0 %v12077_v17  ;;  %v4794_v30 = vmul.f32 1.442695, %v4716_v48 }
 0xa8d   : > { %8829 = vpow2.f32 %v4792_v14 }
 0xa8e   : > { %8831 = vpow2.f32 %v4858_v27  ;;  %v4886_v27 = vmul.f32 1.442695, %v4762_v50 }
 0xa8f   : > { %v12085_v37 = vpop.xlane.xlu0 %4928  ;;  %8833 = vpow2.f32 %v4852_v6 }
 0xa90   : > { %13908 = vst [vmem:[#allocation106_spill] sm:$0xff] %v12085_v37  ;;  %8835 = vpow2.f32 %v4892_v34  ;;  %v12107_v60 = vpop.xlane.xlu2 %4966 }
 0xa92   : > { %v12087_v13 = vpop.eup %8827  ;;  %v12109_v0 = vpop.xlane.xlu1 %4938 }
 0xa93   : > { %13909 = vst [vmem:[#allocation121_spill] sm:$0xff] %v12087_v13  ;;  %v12093_v41 = vpop.eup %8829  ;;  %5016 = vadd.xlane.f32.xlu1 %v12087_v13 }
 0xa94   : > { %4920 = vadd.xlane.f32.xlu0 %v12093_v41  ;;  %v12102_v28 = vpop.eup %8831  ;;  %13911 = vst [vmem:[#allocation70_spill] sm:$0xff] %v12109_v0 }
 0xa95   : > { %v12104_v46 = vpop.eup %8833 }
 0xa96   : > { %v12116_v21 = vpop.eup %8835 }
 0xa97   : > { %v4669_v44 = vpop.xlane.xlu0 %4668 }
 0xa98   : > { %v4749_v14 = vsub.f32 %v11916_v32, %v4669_v44  ;;  %v12129_v3 = vpop.xlane.xlu2 %4940  ;;  %v4828_v44 = vmul.f32 1.442695, %v4733_v57 }
 0xa99   : > { %13914 = vst [vmem:[#allocation79_spill] sm:$0xff] %v12129_v3 }
 0xa9a   : > { %v4860_v52 = vmul.f32 1.442695, %v4749_v14  ;;  %v12124_v48 = vpop.xlane.xlu1 %4998 }
 0xa9b   : > { %4986 = vadd.xlane.f32.xlu1 %v12102_v28  ;;  %13913 = vst [vmem:[#allocation100_spill] sm:$0xff] %v12124_v48  ;;  %v13924_v48 = vld [vmem:[#allocation12_spill] sm:$0xff] }
 0xa9c   : > { %8837 = vpow2.f32 %v4860_v52  ;;  %4980 = vadd.xlane.f32.xlu0 %v12104_v46 }
 0xa9d   : > { %8839 = vpow2.f32 %v4794_v30  ;;  %v13917_v30 = vld [vmem:[#allocation43_spill] sm:$0xff] }
 0xa9e   : > { %8841 = vpow2.f32 %v4886_v27  ;;  %v4764_v52 = vsub.f32 %v13917_v30, %v12004_v2 }
 0xa9f   : > { %v12114_v32 = vpop.xlane.xlu0 %4958  ;;  %8843 = vpow2.f32 %v4828_v44 }
 0xaa0   : > { %13912 = vst [vmem:[#allocation91_spill] sm:$0xff] %v12114_v32  ;;  %v12142_v27 = vpop.xlane.xlu2 %5000  ;;  %v4890_v26 = vmul.f32 1.442695, %v4764_v52 }
 0xaa1   : > { %13919 = vst [vmem:[#allocation125_spill] sm:$0xff] %v12142_v27 }
 0xaa2   : > { %v12118_v6 = vpop.eup %8837  ;;  %v12138_v50 = vpop.xlane.xlu1 %4912  ;;  %8845 = vpow2.f32 %v4890_v26  ;;  %v13925_v26 = vld [vmem:[#allocation13_spill] sm:$0xff] }
 0xaa3   : > { %v12120_v25 = vpop.eup %8839  ;;  %5020 = vadd.xlane.f32.xlu1 %v12116_v21  ;;  %4988 = vadd.xlane.f32.xlu2 %v12118_v6  ;;  %8847 = vrcp.f32 %v11987_v29 }
 0xaa4   : > { %4922 = vadd.xlane.f32.xlu0 %v12120_v25  ;;  %v12133_v14 = vpop.eup %8841  ;;  %8849 = vrcp.f32 %v11994_v51 }
 0xaa5   : > { %13916 = vst [vmem:[#allocation74_spill] sm:$0xff] %v12133_v14  ;;  %v12144_v33 = vpop.eup %8843  ;;  %8851 = vrcp.f32 %v12058_v36 }
 0xaa7   : > { %v12131_v34 = vpop.xlane.xlu0 %4900 }
 0xaa8   : > { %13915 = vst [vmem:[#allocation89_spill] sm:$0xff] %v12131_v34  ;;  %v12149_v39 = vpop.xlane.xlu2 %4942  ;;  %v12153_v2 = vpop.eup %8845 }
 0xaaa   : > { %v12151_v16 = vpop.xlane.xlu1 %4972 }
 0xaac   : > { %5014 = vadd.xlane.f32.xlu0 %v12133_v14 }
 0xaaf   : > { %v12140_v37 = vpop.xlane.xlu0 %4992 }
 0xab0   : > { %13918 = vst [vmem:[#allocation111_spill] sm:$0xff] %v12140_v37  ;;  %v12160_v52 = vpop.xlane.xlu2 %5002  ;;  %v13923_v37 = vld [vmem:[#allocation16_spill] sm:$0xff] }
 0xab1   : > { %13922 = vst [vmem:[#allocation73_spill] sm:$0xff] %v12160_v52  ;;  %v637_v27 = vadd.f32 %v13924_v48, %v13923_v37  ;;  %v688_v31 = vadd.f32 %v13925_v26, %v13923_v37  ;;  %v13926_v52 = vld [vmem:[#allocation14_spill] sm:$0xff]  ;;  %v13927_v48 = vld [vmem:[#allocation15_spill] sm:$0xff] }
 0xab2   : > { %v12158_v30 = vpop.xlane.xlu1 %4914  ;;  %v739_v32 = vadd.f32 %v13926_v52, %v13923_v37  ;;  %v790_v10 = vadd.f32 %v13927_v48, %v13923_v37 }
 0xab3   : > { %v8115_v24 = vpack.i.bf16 %v688_v31, %v637_v27 }
 0xab4   : > { %4956 = vadd.xlane.f32.xlu0 %v12144_v33  ;;  %v8033_v56 = vpack.i.bf16 %v790_v10, %v739_v32 }
 0xab7   : > { %v12147_v57 = vpop.xlane.xlu0 %4934 }
 0xab8   : > { %13920 = vst [vmem:[#allocation116_spill] sm:$0xff] %v12147_v57  ;;  %v4917_v55 = vpop.xlane.xlu2 %4916 }
 0xaba   : > { %v12168_v17 = vpop.xlane.xlu1 %4974 }
 0xabc   : > { %5018 = vadd.xlane.f32.xlu0 %v12153_v2 }
 0xabf   : > { %v12156_v44 = vpop.xlane.xlu0 %4994 }
 0xac0   : > { %13921 = vst [vmem:[#allocation94_spill] sm:$0xff] %v12156_v44  ;;  %v12174_v57 = vpop.xlane.xlu2 %4976 }
 0xac2   : > { %v12172_v44 = vpop.xlane.xlu1 %4948 }
 0xac7   : > { %v12166_v54 = vpop.xlane.xlu0 %4908 }
 0xac8   : > { %v4919_v27 = vpop.xlane.xlu2 %4918 }
 0xaca   : > { %v12182_v31 = vpop.xlane.xlu1 %5008 }
 0xacb   : > { %13928 = vst [vmem:[#allocation18_spill] sm:$0xff] %v12182_v31 }
 0xacc   : > { %8116 = vxpose.xlu2.b32.start.end [1/1] (short) %v8115_v24, 128 }
 0xacf   : > { %v12170_v12 = vpop.xlane.xlu0 %4968 }
 0xad0   : > { %v4979_v42 = vpop.xlane.xlu2 %4978 }
 0xad2   : > { %v12186_v19 = vpop.xlane.xlu1 %4950 }
 0xad7   : > { %v12180_v26 = vpop.xlane.xlu0 %4910 }
 0xad8   : > { %v12194_v34 = vpop.xlane.xlu2 %4952 }
 0xada   : > { %v12190_v62 = vpop.xlane.xlu1 %5010 }
 0xadb   : > { %13929 = vst [vmem:[#allocation35_spill] sm:$0xff] %v12190_v62 }
 0xadd   : > { %8034 = vxpose.xlu1.b32.start.end [1/1] (short) %v8033_v56, 128 }
 0xadf   : > { %v12184_v24 = vpop.xlane.xlu0 %4970 }
 0xae0   : > { %v12198_v10 = vpop.xlane.xlu2 %5012 }
 0xae7   : > { %v12188_v22 = vpop.xlane.xlu0 %4944 }
 0xae8   : > { %v4955_v31 = vpop.xlane.xlu2 %4954 }
 0xaef   : > { %v12192_v52 = vpop.xlane.xlu0 %5004 }
 0xaf0   : > { %13930 = vst [vmem:[#allocation81_spill] sm:$0xff] %v12192_v52  ;;  %v4985_v13 = vpop.xlane.xlu2 %4984  ;;  %v12208_v52 = vpop.eup %8847 }
 0xaf1   : > { %13932 = vst [vmem:[#allocation42_spill] sm:$0xff] %v12208_v52 }
 0xaf6   : > { %v4983_v37 = vpop.xlane.xlu1 %4982 }
 0xaf7   : > { %v12196_v48 = vpop.xlane.xlu0 %4946 }
 0xafe   : > { %v4925_v32 = vpop.xlane.xlu1 %4924 }
 0xaff   : > { %v12200_v56 = vpop.xlane.xlu0 %5006 }
 0xb00   : > { %13931 = vst [vmem:[#allocation90_spill] sm:$0xff] %v12200_v56  ;;  %v12211_v56 = vpop.eup %8849 }
 0xb01   : > { %v12213_v38 = vpop.eup %8851 }
 0xb06   : > { %v12202_v3 = vpop.xlane.xlu1 %5016 }
 0xb07   : > { %v4921_v0 = vpop.xlane.xlu0 %4920 }
 0xb0e   : > { %v4987_v62 = vpop.xlane.xlu1 %4986 }
 0xb0f   : > { %v4981_v14 = vpop.xlane.xlu0 %4980  ;;  %8853 = vrcp.f32 %v4987_v62 }
 0xb10   : > { %8855 = vrcp.f32 %v4925_v32 }
 0xb11   : > { %8857 = vrcp.f32 %v12047_v8 }
 0xb12   : > { %8859 = vrcp.f32 %v12060_v53 }
 0xb13   : > { %8861 = vrcp.f32 %v4983_v37 }
 0xb14   : > { %8863 = vrcp.f32 %v4921_v0 }
 0xb15   : > { %v8854_v11 = vpop.eup %8853 }
 0xb16   : > { %v4989_v18 = vpop.xlane.xlu2 %4988  ;;  %v8856_v51 = vpop.eup %8855  ;;  %v5132_v53 = vmul.f32 %v8854_v11, %v12102_v28 }
 0xb17   : > { %v4923_v29 = vpop.xlane.xlu0 %4922  ;;  %8865 = vrcp.f32 %v4989_v18  ;;  %v12215_v62 = vpop.eup %8857  ;;  %v5101_v37 = vmul.f32 %v8856_v51, %v12073_v35 }
 0xb18   : > { %8867 = vrcp.f32 %v4923_v29  ;;  %v12217_v8 = vpop.eup %8859  ;;  %v5196_v29 = vpack.c.bf16 %v5132_v53, %v5132_v53 }
 0xb19   : > { %8869 = vrcp.f32 %v4985_v13  ;;  %v8862_v36 = vpop.eup %8861  ;;  %v5165_v11 = vpack.c.bf16 %v5101_v37, %v5101_v37 }
 0xb1a   : > { %8871 = vrcp.f32 %v4919_v27  ;;  %v8864_v32 = vpop.eup %8863 }
 0xb1b   : > { %8873 = vrcp.f32 %v12070_v47 }
 0xb1c   : > { %8875 = vrcp.f32 %v12089_v61  ;;  %v5130_v61 = vmul.f32 %v8862_v36, %v12062_v9 }
 0xb1d   : > { %v8866_v0 = vpop.eup %8865  ;;  %8877 = vrcp.f32 %v12138_v50 }
 0xb1e   : > { %v8868_v18 = vpop.eup %8867  ;;  %8879 = vrcp.f32 %v4917_v55  ;;  %v5133_v13 = vmul.f32 %v8866_v0, %v12118_v6  ;;  %v5099_v55 = vmul.f32 %v8864_v32, %v12093_v41  ;;  %v5366_v6 = vunpack.c.l.b16 %v5196_v29 }
 0xb1f   : > { %v12225_v52 = vpop.xlane.xlu0 %5014  ;;  %v8870_v27 = vpop.eup %8869  ;;  %8881 = vrcp.f32 %v4981_v14  ;;  %v5100_v47 = vmul.f32 %v8868_v18, %v12120_v25  ;;  %v5245_v0 = vunpack.c.l.b16 %v5165_v11  ;;  %v5194_v41 = vpack.c.bf16 %v5130_v61, %v5130_v61  ;;  %v13933_v11 = vld [vmem:[#allocation55_spill] sm:$0xff] }
 0xb20   : > { %v8872_v28 = vpop.eup %8871  ;;  %8883 = vrcp.f32 %v4979_v42  ;;  %v5197_v35 = vpack.c.bf16 %v5133_v13, %v5133_v13  ;;  %v5131_v14 = vmul.f32 %v8870_v27, %v12037_v7  ;;  %v5163_v18 = vpack.c.bf16 %v5099_v55, %v5099_v55  ;;  %v5021_v7 = vpop.xlane.xlu1 %5020 }
 0xb21   : > { %v12229_v51 = vpop.eup %8873  ;;  %8885 = vrcp.f32 %v4955_v31  ;;  %v5164_v50 = vpack.c.bf16 %v5100_v47, %v5100_v47  ;;  %v5098_v9 = vmul.f32 %v8872_v28, %v11969_v23 }
 0xb22   : > { %v12232_v53 = vpop.eup %8875  ;;  %8887 = vrcp.f32 %v12158_v30  ;;  %v5367_v37 = vunpack.c.l.b16 %v5197_v35  ;;  %v5195_v13 = vpack.c.bf16 %v5131_v14, %v5131_v14 }
 0xb23   : > { %v8878_v25 = vpop.eup %8877  ;;  %8889 = vrcp.f32 %v12168_v17  ;;  %v5244_v42 = vunpack.c.l.b16 %v5164_v50  ;;  %v5162_v23 = vpack.c.bf16 %v5098_v9, %v5098_v9 }
 0xb24   : > { %v8880_v36 = vpop.eup %8879  ;;  %8891 = vrcp.f32 %v12186_v19  ;;  %v5375_v31 = vpack.c.b16 %v5367_v37, %v5366_v6  ;;  %v12243_v19 = vmul.f32 %v12213_v38, %v13933_v11  ;;  %v5365_v38 = vunpack.c.l.b16 %v5195_v13  ;;  %v13934_v37 = vld [vmem:[#allocation41_spill] sm:$0xff] }
 0xb25   : > { %v8882_v32 = vpop.eup %8881  ;;  %8893 = vrcp.f32 %v12174_v57  ;;  %v5253_v30 = vpack.c.b16 %v5245_v0, %v5244_v42  ;;  %v5364_v57 = vunpack.c.l.b16 %v5194_v41  ;;  %v5097_v50 = vmul.f32 %v8880_v36, %v11914_v45 }
 0xb26   : > { %v8884_v29 = vpop.eup %8883  ;;  %8895 = vrcp.f32 %v12194_v34  ;;  %5384 = vmatpush.bf16.xpose.msra.mxu2 %v5375_v31  ;;  %v5129_v28 = vmul.f32 %v8882_v32, %v12104_v46  ;;  %v5243_v34 = vunpack.c.l.b16 %v5163_v18  ;;  %v12253_v14 = vmul.f32 %v12211_v56, %v13934_v37 }
 0xb27   : > { %v4957_v17 = vpop.xlane.xlu0 %4956  ;;  %v8886_v27 = vpop.eup %8885  ;;  %5262 = vmatpush.bf16.xpose.msra.mxu0 %v5253_v30  ;;  %v5128_v61 = vmul.f32 %v8884_v29, %v11981_v49  ;;  %v5242_v46 = vunpack.c.l.b16 %v5162_v23  ;;  %v5155_v49 = vpack.c.bf16 %v12243_v19, %v12243_v19  ;;  %v5161_v31 = vpack.c.bf16 %v5097_v50, %v5097_v50 }
 0xb28   : > { %8897 = vrcp.f32 %v4957_v17  ;;  %v8888_v47 = vpop.eup %8887  ;;  %v5116_v6 = vmul.f32 %v8886_v27, %v12023_v20  ;;  %v5193_v0 = vpack.c.bf16 %v5129_v28, %v5129_v28  ;;  %v13935_v20 = vld [vmem:[#allocation57_spill] sm:$0xff]  ;;  %v12268_v30 = vmul.f32 %v8878_v25, %v11860_v58 }
 0xb29   : > { %8899 = vrcp.f32 %v12180_v26  ;;  %v8890_v35 = vpop.eup %8889  ;;  %v5096_v42 = vmul.f32 %v8888_v47, %v11893_v40  ;;  %v12262_v9 = vmul.f32 %v12215_v62, %v13935_v20  ;;  %v5252_v36 = vpack.c.b16 %v5243_v34, %v5242_v46 }
 0xb2a   : > { %8901 = vrcp.f32 %v5021_v7  ;;  %v8892_v55 = vpop.eup %8891  ;;  %v5180_v40 = vpack.c.bf16 %v5116_v6, %v5116_v6  ;;  %v5241_v23 = vunpack.c.l.b16 %v5161_v31  ;;  %v13939_v31 = vld [vmem:[#allocation74_spill] sm:$0xff] }
 0xb2b   : > { %8903 = vrcp.f32 %v12151_v16  ;;  %v8894_v26 = vpop.eup %8893  ;;  %v5374_v16 = vpack.c.b16 %v5365_v38, %v5364_v57  ;;  %v5160_v62 = vpack.c.bf16 %v5096_v42, %v5096_v42  ;;  %v5114_v25 = vmul.f32 %v8892_v55, %v11945_v1 }
 0xb2c   : > { %8905 = vrcp.f32 %v12172_v44  ;;  %v8896_v45 = vpop.eup %8895  ;;  %v5192_v44 = vpack.c.bf16 %v5128_v61, %v5128_v61  ;;  %v5127_v29 = vmul.f32 %v8894_v26, %v11958_v59  ;;  %v5305_v59 = vunpack.c.l.b16 %v5180_v40  ;;  %v13940_v40 = vld [vmem:[#allocation35_spill] sm:$0xff] }
 0xb2d   : > { %8907 = vrcp.f32 %v12166_v54 }
 0xb2e   : > { %v8898_v56 = vpop.eup %8897  ;;  %8909 = vrcp.f32 %v12184_v24  ;;  %5385 = vmatpush.bf16.xpose.msra.mxu2 %v5374_v16  ;;  %v5126_v24 = vmul.f32 %v8890_v35, %v11903_v43  ;;  %v5362_v27 = vunpack.c.l.b16 %v5192_v44  ;;  %v13936_v16 = vld [vmem:[#allocation26_spill] sm:$0xff] }
 0xb2f   : > { %v8900_v41 = vpop.eup %8899  ;;  %8911 = vrcp.f32 %v12196_v48  ;;  %v5117_v32 = vmul.f32 %v8898_v56, %v12144_v33  ;;  %v5019_v54 = vpop.xlane.xlu0 %5018  ;;  %5263 = vmatpush.bf16.xpose.msra.mxu0 %v5252_v36  ;;  %v5363_v48 = vunpack.c.l.b16 %v5193_v0  ;;  %v5115_v33 = vmul.f32 %v8896_v45, %v11996_v63  ;;  %v13938_v36 = vld [vmem:[#allocation114_spill] sm:$0xff] }
 0xb30   : > { %v8902_v18 = vpop.eup %8901  ;;  %8913 = vrcp.f32 %v5019_v54  ;;  %v5094_v58 = vmul.f32 %v8900_v41, %v12014_v5  ;;  %v5190_v28 = vpack.c.bf16 %v5126_v24, %v5126_v24  ;;  %v5191_v63 = vpack.c.bf16 %v5127_v29, %v5127_v29  ;;  %v13942_v29 = vld [vmem:[#allocation121_spill] sm:$0xff] }
 0xb31   : > { %v8904_v7 = vpop.eup %8903  ;;  %8915 = vrcp.f32 %v12225_v52  ;;  %v5181_v17 = vpack.c.bf16 %v5117_v32, %v5117_v32  ;;  %v5149_v43 = vmul.f32 %v8902_v18, %v12116_v21  ;;  %v5240_v52 = vunpack.c.l.b16 %v5160_v62 }
 0xb32   : > { %v8906_v13 = vpop.eup %8905  ;;  %8917 = vrcp.f32 %v12202_v3  ;;  %v5373_v34 = vpack.c.b16 %v5363_v48, %v5362_v27  ;;  %v5179_v61 = vpack.c.bf16 %v5115_v33, %v5115_v33  ;;  %v5158_v50 = vpack.c.bf16 %v5094_v58, %v5094_v58  ;;  %v13943_v58 = vld [vmem:[#allocation70_spill] sm:$0xff] }
 0xb33   : > { %v8908_v11 = vpop.eup %8907  ;;  %v5306_v47 = vunpack.c.l.b16 %v5181_v17  ;;  %8919 = vrcp.f32 %v12107_v60  ;;  %v5251_v3 = vpack.c.b16 %v5241_v23, %v5240_v52  ;;  %v5159_v21 = vpack.c.bf16 %v12268_v30, %v12268_v30  ;;  %v13945_v52 = vld [vmem:[#allocation89_spill] sm:$0xff] }
 0xb34   : > { %v8910_v57 = vpop.eup %8909  ;;  %8921 = vrcp.f32 %v12149_v39  ;;  %v5213_v60 = vpack.c.bf16 %v5149_v43, %v5149_v43  ;;  %v5178_v39 = vpack.c.bf16 %v5114_v25, %v5114_v25  ;;  %v5360_v38 = vunpack.c.l.b16 %v5190_v28 }
 0xb35   : > { %v8912_v35 = vpop.eup %8911  ;;  %v5314_v5 = vpack.c.b16 %v5306_v47, %v5305_v59  ;;  %8923 = vrcp.f32 %v12170_v12  ;;  %v5361_v37 = vunpack.c.l.b16 %v5191_v63  ;;  %v5125_v12 = vmul.f32 %v8904_v7, %v11869_v4  ;;  %v13944_v59 = vld [vmem:[#allocation79_spill] sm:$0xff] }
 0xb36   : > { %v8914_v1 = vpop.eup %8913  ;;  %8925 = vrcp.f32 %v12198_v10  ;;  %5386 = vmatpush.bf16.xpose.msra.mxu2 %v5373_v34  ;;  %v5304_v42 = vunpack.c.l.b16 %v5179_v61  ;;  %v5124_v45 = vmul.f32 %v8910_v57, %v12025_v15  ;;  %v5112_v10 = vmul.f32 %v8912_v35, %v13936_v16  ;;  %v13941_v15 = vld [vmem:[#allocation61_spill] sm:$0xff]  ;;  %v13946_v35 = vld [vmem:[#allocation110_spill] sm:$0xff]  ;;  %v13953_v16 = vld [vmem:[#allocation115_spill] sm:$0xff] }
 0xb37   : > { %v8916_v55 = vpop.eup %8915  ;;  %v5148_v6 = vmul.f32 %v8914_v1, %v12153_v2  ;;  %5323 = vmatpush.bf16.xpose.msra.mxu1 %v5314_v5  ;;  %8927 = vrcp.f32 %v12188_v22  ;;  %5264 = vmatpush.bf16.xpose.msra.mxu0 %v5251_v3  ;;  %v5238_v20 = vunpack.c.l.b16 %v5158_v50  ;;  %v13937_v2 = vld [vmem:[#allocation93_spill] sm:$0xff]  ;;  %v5113_v44 = vmul.f32 %v8906_v13, %v13938_v36  ;;  %v13947_v61 = vld [vmem:[#allocation90_spill] sm:$0xff] }
 0xb38   : > { %v8918_v26 = vpop.eup %8917  ;;  %v5093_v56 = vmul.f32 %v8908_v11, %v13937_v2  ;;  %v5146_v22 = vmul.f32 %v8916_v55, %v13939_v31  ;;  %8929 = vrcp.f32 %v13940_v40  ;;  %v5303_v32 = vunpack.c.l.b16 %v5178_v39  ;;  %v13948_v50 = vld [vmem:[#allocation86_spill] sm:$0xff]  ;;  %v13954_v2 = vld [vmem:[#allocation20_spill] sm:$0xff] }
 0xb39   : > { %v5212_v46 = vpack.c.bf16 %v5148_v6, %v5148_v6  ;;  %v8920_v0 = vpop.eup %8919  ;;  %v5428_v54 = vunpack.c.l.b16 %v5213_v60  ;;  %v5372_v18 = vpack.c.b16 %v5361_v37, %v5360_v38  ;;  %v5239_v62 = vunpack.c.l.b16 %v5159_v21  ;;  %v13949_v6 = vld [vmem:[#allocation10_spill] sm:$0xff] }
 0xb3a   : > { %v8922_v41 = vpop.eup %8921  ;;  %v5092_v24 = vmul.f32 %v12232_v53, %v13941_v15  ;;  %v5147_v7 = vmul.f32 %v8918_v26, %v13942_v29  ;;  %v5313_v48 = vpack.c.b16 %v5304_v42, %v5303_v32  ;;  %v5188_v13 = vpack.c.bf16 %v5124_v45, %v5124_v45  ;;  %v13951_v37 = vld [vmem:[#allocation18_spill] sm:$0xff]  ;;  %v13955_v32 = vld [vmem:[#allocation96_spill] sm:$0xff] }
 0xb3b   : > { %v5427_v4 = vunpack.c.l.b16 %v5212_v46  ;;  %v8924_v30 = vpop.eup %8923  ;;  %v5176_v27 = vpack.c.bf16 %v5112_v10, %v5112_v10  ;;  %8931 = vrcp.f32 %v13943_v58  ;;  %v5250_v25 = vpack.c.b16 %v5239_v62, %v5238_v20  ;;  %v13952_v46 = vld [vmem:[#allocation17_spill] sm:$0xff]  ;;  %v13957_v29 = vld [vmem:[#allocation116_spill] sm:$0xff] }
 0xb3c   : > { %v8926_v17 = vpop.eup %8925  ;;  %v5157_v11 = vpack.c.bf16 %v5093_v56, %v5093_v56  ;;  %v5210_v43 = vpack.c.bf16 %v5146_v22, %v5146_v22  ;;  %8933 = vrcp.f32 %v13944_v59  ;;  %v5189_v47 = vpack.c.bf16 %v5125_v12, %v5125_v12 }
 0xb3d   : > { %v5436_v33 = vpack.c.b16 %v5428_v54, %v5427_v4  ;;  %v8928_v23 = vpop.eup %8927  ;;  %v5177_v57 = vpack.c.bf16 %v5113_v44, %v5113_v44  ;;  %v5154_v53 = vpack.c.bf16 %v12262_v9, %v12262_v9  ;;  %8935 = vrcp.f32 %v13945_v52  ;;  %v13950_v9 = vld [vmem:[#allocation72_spill] sm:$0xff] }
 0xb3e   : > { %5387 = vmatpush.bf16.xpose.msra.mxu2 %v5372_v18  ;;  %v5156_v28 = vpack.c.bf16 %v5092_v24, %v5092_v24  ;;  %v5211_v63 = vpack.c.bf16 %v5147_v7, %v5147_v7  ;;  %v5123_v34 = vmul.f32 %v8924_v30, %v13946_v35  ;;  %v8930_v5 = vpop.eup %8929  ;;  %8937 = vrcp.f32 %v13947_v61  ;;  %v13965_v35 = vld [vmem:[#allocation73_spill] sm:$0xff] }
 0xb3f   : > { %5324 = vmatpush.bf16.xpose.msra.mxu1 %v5313_v48  ;;  %5265 = vmatpush.bf16.xpose.msra.mxu0 %v5250_v25  ;;  %v5358_v1 = vunpack.c.l.b16 %v5188_v13  ;;  %v5301_v3 = vunpack.c.l.b16 %v5176_v27  ;;  %v5111_v21 = vmul.f32 %v8928_v23, %v13948_v50  ;;  %v5237_v55 = vunpack.c.l.b16 %v5157_v11  ;;  %v13960_v23 = vld [vmem:[#allocation81_spill] sm:$0xff]  ;;  %v13961_v11 = vld [vmem:[#allocation8_spill] sm:$0xff] }
 0xb40   : > { %5445 = vmatpush.bf16.xpose.msra.mxu3 %v5436_v33  ;;  %v5425_v60 = vunpack.c.l.b16 %v5210_v43  ;;  %v5122_v39 = vmul.f32 %v8920_v0, %v13949_v6  ;;  %v5145_v38 = vmul.f32 %v8926_v17, %v13950_v9  ;;  %8939 = vrcp.f32 %v13951_v37  ;;  %v13958_v17 = vld [vmem:[#allocation58_spill] sm:$0xff]  ;;  %v13959_v33 = vld [vmem:[#allocation60_spill] sm:$0xff] }
 0xb41   : > { %v5359_v12 = vunpack.c.l.b16 %v5189_v47  ;;  %v5302_v26 = vunpack.c.l.b16 %v5177_v57  ;;  %v5110_v42 = vmul.f32 %v8922_v41, %v13952_v46  ;;  %v8932_v45 = vpop.eup %8931  ;;  %8941 = vrcp.f32 %v13953_v16  ;;  %v13956_v41 = vld [vmem:[#allocation91_spill] sm:$0xff]  ;;  %v13962_v47 = vld [vmem:[#allocation28_spill] sm:$0xff] }
 0xb42   : > { %v5236_v10 = vunpack.c.l.b16 %v5156_v28  ;;  %v5426_v20 = vunpack.c.l.b16 %v5211_v63  ;;  %v5144_v56 = vmul.f32 %v8930_v5, %v13954_v2  ;;  %v8934_v36 = vpop.eup %8933  ;;  %v5187_v22 = vpack.c.bf16 %v5123_v34, %v5123_v34  ;;  %v13964_v28 = vld [vmem:[#allocation69_spill] sm:$0xff]  ;;  %v13968_v6 = vld [vmem:[#allocation84_spill] sm:$0xff] }
 0xb43   : > { %v5371_v44 = vpack.c.b16 %v5359_v12, %v5358_v1  ;;  %v5312_v31 = vpack.c.b16 %v5302_v26, %v5301_v3  ;;  %v5175_v0 = vpack.c.bf16 %v5111_v21, %v5111_v21  ;;  %v8936_v40 = vpop.eup %8935  ;;  %8943 = vrcp.f32 %v13955_v32  ;;  %v13967_v21 = vld [vmem:[#allocation102_spill] sm:$0xff]  ;;  %v13969_v16 = vld [vmem:[#allocation80_spill] sm:$0xff]  ;;  %v13973_v32 = vld [vmem:[#allocation97_spill] sm:$0xff] }
 0xb44   : > { %v5249_v4 = vpack.c.b16 %v5237_v55, %v5236_v10  ;;  %v5435_v54 = vpack.c.b16 %v5426_v20, %v5425_v60  ;;  %v5209_v30 = vpack.c.bf16 %v5145_v38, %v5145_v38  ;;  %v8938_v18 = vpop.eup %8937  ;;  %8945 = vrcp.f32 %v13956_v41  ;;  %v13970_v20 = vld [vmem:[#allocation125_spill] sm:$0xff] }
 0xb45   : > { %v5186_v62 = vpack.c.bf16 %v5122_v39, %v5122_v39  ;;  %v5234_v15 = vunpack.c.l.b16 %v5154_v53  ;;  %v5174_v24 = vpack.c.bf16 %v5110_v42, %v5110_v42  ;;  %8947 = vrcp.f32 %v13957_v29  ;;  %v13963_v53 = vld [vmem:[#allocation128_spill] sm:$0xff] }
 0xb46   : > { %5388 = vmatpush.bf16.xpose.msra.mxu2 %v5371_v44  ;;  %v5208_v7 = vpack.c.bf16 %v5144_v56, %v5144_v56  ;;  %v5120_v48 = vmul.f32 %v12217_v8, %v13958_v17  ;;  %v5121_v13 = vmul.f32 %v12229_v51, %v13959_v33  ;;  %v8940_v27 = vpop.eup %8939  ;;  %8949 = vrcp.f32 %v13960_v23  ;;  %v13966_v51 = vld [vmem:[#allocation11_spill] sm:$0xff]  ;;  %v13976_v17 = vld [vmem:[#allocation56_spill] sm:$0xff] }
 0xb47   : > { %5325 = vmatpush.bf16.xpose.msra.mxu1 %v5312_v31  ;;  %5266 = vmatpush.bf16.xpose.msra.mxu0 %v5249_v4  ;;  %v5357_v58 = vunpack.c.l.b16 %v5187_v22  ;;  %v5300_v25 = vunpack.c.l.b16 %v5175_v0  ;;  %v5109_v43 = vmul.f32 %v8934_v36, %v13961_v11  ;;  %v8942_v59 = vpop.eup %8941  ;;  %8951 = vrcp.f32 %v13962_v47  ;;  %v13971_v31 = vld [vmem:[#allocation100_spill] sm:$0xff]  ;;  %v13978_v23 = vld [vmem:[#allocation27_spill] sm:$0xff]  ;;  %v13980_v11 = vld [vmem:[#allocation22_spill] sm:$0xff] }
 0xb48   : > { %5446 = vmatpush.bf16.xpose.msra.mxu3 %v5435_v54  ;;  %v5424_v57 = vunpack.c.l.b16 %v5209_v30  ;;  %v5089_v52 = vmul.f32 %v8936_v40, %v13963_v53  ;;  %v5142_v63 = vmul.f32 %v8938_v18, %v13964_v28  ;;  %8953 = vrcp.f32 %v13965_v35  ;;  %v13972_v0 = vld [vmem:[#allocation24_spill] sm:$0xff] }
 0xb49   : > { %v5356_v8 = vunpack.c.l.b16 %v5186_v62  ;;  %v5299_v34 = vunpack.c.l.b16 %v5174_v24  ;;  %v5108_v5 = vmul.f32 %v8932_v45, %v13966_v51  ;;  %v8944_v61 = vpop.eup %8943  ;;  %v5235_v1 = vunpack.c.l.b16 %v5155_v49  ;;  %v13974_v18 = vld [vmem:[#allocation120_spill] sm:$0xff] }
 0xb4a   : > { %v5423_v3 = vunpack.c.l.b16 %v5208_v7  ;;  %v5185_v50 = vpack.c.bf16 %v5121_v13, %v5121_v13  ;;  %v5143_v55 = vmul.f32 %v8940_v27, %v13967_v21  ;;  %v8946_v60 = vpop.eup %8945  ;;  %8955 = vrcp.f32 %v13968_v6  ;;  %v13975_v62 = vld [vmem:[#allocation88_spill] sm:$0xff] }
 0xb4b   : > { %v5370_v39 = vpack.c.b16 %v5357_v58, %v5356_v8  ;;  %v5311_v9 = vpack.c.b16 %v5300_v25, %v5299_v34  ;;  %v5173_v38 = vpack.c.bf16 %v5109_v43, %v5109_v43  ;;  %v8948_v37 = vpop.eup %8947  ;;  %v5248_v12 = vpack.c.b16 %v5235_v1, %v5234_v15  ;;  %v13979_v58 = vld [vmem:[#allocation42_spill] sm:$0xff] }
 0xb4c   : > { %v5434_v26 = vpack.c.b16 %v5424_v57, %v5423_v3  ;;  %v5153_v46 = vpack.c.bf16 %v5089_v52, %v5089_v52  ;;  %v5206_v42 = vpack.c.bf16 %v5142_v63, %v5142_v63  ;;  %v8950_v45 = vpop.eup %8949  ;;  %8957 = vrcp.f32 %v13969_v16  ;;  %v13982_v3 = vld [vmem:[#allocation123_spill] sm:$0xff] }
 0xb4d   : > { %v5184_v19 = vpack.c.bf16 %v5120_v48, %v5120_v48  ;;  %v5172_v49 = vpack.c.bf16 %v5108_v5, %v5108_v5  ;;  %v8952_v10 = vpop.eup %8951  ;;  %8959 = vrcp.f32 %v13970_v20  ;;  %v5355_v2 = vunpack.c.l.b16 %v5185_v50  ;;  %v13977_v48 = vld [vmem:[#allocation59_spill] sm:$0xff]  ;;  %v13981_v5 = vld [vmem:[#allocation77_spill] sm:$0xff]  ;;  %v13983_v50 = vld [vmem:[#allocation38_spill] sm:$0xff] }
 0xb4e   : > { %5389 = vmatpush.bf16.xpose.msra.mxu2 %v5370_v39  ;;  %v5152_v56 = vpack.c.bf16 %v12253_v14, %v12253_v14  ;;  %v5207_v36 = vpack.c.bf16 %v5143_v55, %v5143_v55  ;;  %v8954_v44 = vpop.eup %8953  ;;  %8961 = vrcp.f32 %v13971_v31  ;;  %v5298_v22 = vunpack.c.l.b16 %v5173_v38  ;;  %v13984_v55 = vld [vmem:[#allocation106_spill] sm:$0xff]  ;;  %v13985_v39 = vld [vmem:[#allocation25_spill] sm:$0xff]  ;;  %v13988_v16 = vld [vmem:[#allocation107_spill] sm:$0xff] }
 0xb4f   : > { %5326 = vmatpush.bf16.xpose.msra.mxu1 %v5311_v9  ;;  %5267 = vmatpush.bf16.xpose.msra.mxu0 %v5248_v12  ;;  %v5118_v40 = vmul.f32 %v8946_v60, %v13972_v0  ;;  %v5106_v4 = vmul.f32 %v8948_v37, %v13973_v32  ;;  %v5233_v54 = vunpack.c.l.b16 %v5153_v46  ;;  %v5421_v30 = vunpack.c.l.b16 %v5206_v42  ;;  %v13986_v38 = vld [vmem:[#allocation94_spill] sm:$0xff] }
 0xb50   : > { %5447 = vmatpush.bf16.xpose.msra.mxu3 %v5434_v26  ;;  %v5086_v41 = vmul.f32 %v8944_v61, %v13974_v18  ;;  %v5141_v15 = vmul.f32 %v8950_v45, %v13975_v62  ;;  %v8956_v24 = vpop.eup %8955  ;;  %v5354_v29 = vunpack.c.l.b16 %v5184_v19  ;;  %v5297_v7 = vunpack.c.l.b16 %v5172_v49  ;;  %v13987_v26 = vld [vmem:[#allocation52_spill] sm:$0xff]  ;;  %v13989_v49 = vld [vmem:[#allocation9_spill] sm:$0xff]  ;;  %v13990_v20 = vld [vmem:[#allocation82_spill] sm:$0xff] }
 0xb51   : > { %v5119_v14 = vmul.f32 %v8942_v59, %v13976_v17  ;;  %v5107_v33 = vmul.f32 %v8952_v10, %v13977_v48  ;;  %v5232_v13 = vunpack.c.l.b16 %v5152_v56  ;;  %v5422_v27 = vunpack.c.l.b16 %v5207_v36  ;;  %v13991_v36 = vld [vmem:[#allocation46_spill] sm:$0xff]  ;;  %v13993_v48 = vld [vmem:[#allocation51_spill] sm:$0xff] }
 0xb52   : > { %v5087_v25 = vmul.f32 %v13979_v58, %v13978_v23  ;;  %v5140_v43 = vmul.f32 %v8954_v44, %v13980_v11  ;;  %v8958_v47 = vpop.eup %8957  ;;  %v5369_v57 = vpack.c.b16 %v5355_v2, %v5354_v29  ;;  %v5310_v53 = vpack.c.b16 %v5298_v22, %v5297_v7  ;;  %v13995_v58 = vld [vmem:[#allocation40_spill] sm:$0xff] }
 0xb53   : > { %v5182_v52 = vpack.c.bf16 %v5118_v40, %v5118_v40  ;;  %v5170_v28 = vpack.c.bf16 %v5106_v4, %v5106_v4  ;;  %v8960_v63 = vpop.eup %8959  ;;  %v5247_v35 = vpack.c.b16 %v5233_v54, %v5232_v13  ;;  %v5433_v8 = vpack.c.b16 %v5422_v27, %v5421_v30 }
 0xb54   : > { %v5150_v34 = vpack.c.bf16 %v5086_v41, %v5086_v41  ;;  %v5205_v51 = vpack.c.bf16 %v5141_v15, %v5141_v15  ;;  %v8962_v59 = vpop.eup %8961  ;;  %8963 = vrcp.f32 %v13981_v5  ;;  %v5183_v61 = vpack.c.bf16 %v5119_v14, %v5119_v14  ;;  %v13992_v14 = vld [vmem:[#allocation87_spill] sm:$0xff] }
 0xb55   : > { %v5171_v1 = vpack.c.bf16 %v5107_v33, %v5107_v33  ;;  %v749_v21 = vadd.f32 %v13983_v50, %v13982_v3  ;;  %8965 = vrcp.f32 %v13984_v55  ;;  %v5151_v60 = vpack.c.bf16 %v5087_v25, %v5087_v25  ;;  %v13994_v33 = vld [vmem:[#allocation111_spill] sm:$0xff] }
 0xb56   : > { %5390 = vmatpush.bf16.xpose.msra.mxu2 %v5369_v57  ;;  %v5204_v6 = vpack.c.bf16 %v5140_v43, %v5140_v43  ;;  %v647_v9 = vadd.f32 %v13985_v39, %v13982_v3  ;;  %8967 = vrcp.f32 %v13986_v38  ;;  %v5352_v37 = vunpack.c.l.b16 %v5182_v52  ;;  %v13996_v43 = vld [vmem:[#allocation92_spill] sm:$0xff]  ;;  %v13997_v52 = vld [vmem:[#allocation113_spill] sm:$0xff] }
 0xb57   : > { %5327 = vmatpush.bf16.xpose.msra.mxu1 %v5310_v53  ;;  %5268 = vmatpush.bf16.xpose.msra.mxu0 %v5247_v35  ;;  %v5295_v12 = vunpack.c.l.b16 %v5170_v28  ;;  %v5105_v46 = vmul.f32 %v8958_v47, %v13987_v26  ;;  %v5230_v42 = vunpack.c.l.b16 %v5150_v34  ;;  %v5420_v45 = vunpack.c.l.b16 %v5205_v51 }
 0xb58   : > { %5448 = vmatpush.bf16.xpose.msra.mxu3 %v5433_v8  ;;  %v5138_v19 = vmul.f32 %v8962_v59, %v13988_v16  ;;  %v5139_v10 = vmul.f32 %v8960_v63, %v13989_v49  ;;  %8969 = vrcp.f32 %v13990_v20  ;;  %v5353_v2 = vunpack.c.l.b16 %v5183_v61  ;;  %v13998_v63 = vld [vmem:[#allocation30_spill] sm:$0xff]  ;;  %v13999_v8 = vld [vmem:[#allocation29_spill] sm:$0xff] }
 0xb59   : > { %v5296_v56 = vunpack.c.l.b16 %v5171_v1  ;;  %v5104_v44 = vmul.f32 %v8956_v24, %v13991_v36  ;;  %v5231_v31 = vunpack.c.l.b16 %v5151_v60  ;;  %v5419_v22 = vunpack.c.l.b16 %v5204_v6  ;;  %v14000_v59 = vld [vmem:[#allocation62_spill] sm:$0xff] }
 0xb5a   : > { %v5652_v0 = vpack.c.bf16 %v749_v21, %v749_v21  ;;  %v5650_v40 = vpack.c.bf16 %v647_v9, %v647_v9  ;;  %v8964_v32 = vpop.eup %8963  ;;  %v5368_v4 = vpack.c.b16 %v5353_v2, %v5352_v37  ;;  %v5169_v30 = vpack.c.bf16 %v5105_v46, %v5105_v46  ;;  %v14001_v9 = vld [vmem:[#allocation23_spill] sm:$0xff]  ;;  %v14003_v2 = vld [vmem:[#allocation49_spill] sm:$0xff] }
 0xb5b   : > { %v5309_v54 = vpack.c.b16 %v5296_v56, %v5295_v12  ;;  %v8966_v18 = vpop.eup %8965  ;;  %v5246_v41 = vpack.c.b16 %v5231_v31, %v5230_v42  ;;  %v5432_v62 = vpack.c.b16 %v5420_v45, %v5419_v22  ;;  %v5202_v15 = vpack.c.bf16 %v5138_v19, %v5138_v19  ;;  %v14002_v42 = vld [vmem:[#allocation67_spill] sm:$0xff] }
 0xb5c   : > { %v5203_v29 = vpack.c.bf16 %v5139_v10, %v5139_v10  ;;  %v8968_v7 = vpop.eup %8967  ;;  %v5168_v17 = vpack.c.bf16 %v5104_v44, %v5104_v44  ;;  %v757_v24 = vadd.f32 %v13993_v48, %v13992_v14  ;;  %8971 = vrcp.f32 %v13994_v33 }
 0xb5d   : > { %v5955_v13 = vsel %vm1077_vm14, %v5652_v0, 0  ;;  %v5723_v27 = vsel %vm1077_vm14, %v5650_v40, 0  ;;  %v655_v25 = vadd.f32 %v13995_v58, %v13992_v14  ;;  %v5294_v11 = vunpack.c.l.b16 %v5169_v30 }
 0xb5e   : > { %5391 = vmatpush.bf16.xpose.msra.mxu2 %v5368_v4  ;;  %v8970_v23 = vpop.eup %8969  ;;  %v5103_v47 = vmul.f32 %v8966_v18, %v13996_v43  ;;  %v5417_v57 = vunpack.c.l.b16 %v5202_v15  ;;  %v5418_v53 = vunpack.c.l.b16 %v5203_v29  ;;  %v5136_v28 = vmul.f32 %v8968_v7, %v13997_v52 }
 0xb5f   : > { %5328 = vmatpush.bf16.xpose.msra.mxu1 %v5309_v54  ;;  %5269 = vmatpush.bf16.xpose.msra.mxu0 %v5246_v41  ;;  %8973 = vrcp.f32 %v13998_v63  ;;  %v5293_v35 = vunpack.c.l.b16 %v5168_v17  ;;  %v5102_v34 = vmul.f32 %v8964_v32, %v13999_v8  ;;  %v4108_v51 = vpack.c.bf16 %v757_v24, %v757_v24  ;;  %v14004_v32 = vld [vmem:[#allocation36_spill] sm:$0xff]  ;;  %v14005_v54 = vld [vmem:[#allocation39_spill] sm:$0xff] }
 0xb60   : > { %5449 = vmatpush.bf16.xpose.msra.mxu3 %v5432_v62  ;;  %v5137_v5 = vmul.f32 %v8970_v23, %v14000_v59  ;;  %v4106_v61 = vpack.c.bf16 %v655_v25, %v655_v25  ;;  %v5167_v21 = vpack.c.bf16 %v5103_v47, %v5103_v47  ;;  %v5431_v60 = vpack.c.b16 %v5418_v53, %v5417_v57  ;;  %v14006_v25 = vld [vmem:[#allocation50_spill] sm:$0xff] }
 0xb61   : > { %v5308_v50 = vpack.c.b16 %v5294_v11, %v5293_v35  ;;  %v5200_v6 = vpack.c.bf16 %v5136_v28, %v5136_v28  ;;  %v5166_v39 = vpack.c.bf16 %v5102_v34, %v5102_v34  ;;  %v698_v38 = vadd.f32 %v14001_v9, %v13982_v3 }
 0xb62   : > { %v8972_v55 = vpop.eup %8971  ;;  %v5201_v12 = vpack.c.bf16 %v5137_v5, %v5137_v5  ;;  %v5292_v46 = vunpack.c.l.b16 %v5167_v21  ;;  %v800_v4 = vadd.f32 %v14004_v32, %v13982_v3  ;;  %v706_v30 = vadd.f32 %v14005_v54, %v13992_v14 }
 0xb63   : > { %v5135_v45 = vmul.f32 %v8972_v55, %v14002_v42  ;;  %v5415_v16 = vunpack.c.l.b16 %v5200_v6  ;;  %v5291_v19 = vunpack.c.l.b16 %v5166_v39  ;;  %v5651_v49 = vpack.c.bf16 %v698_v38, %v698_v38 }
 0xb64   : > { %v5416_v20 = vunpack.c.l.b16 %v5201_v12  ;;  %v4107_v7 = vpack.c.bf16 %v706_v30, %v706_v30  ;;  %v5653_v24 = vpack.c.bf16 %v800_v4, %v800_v4  ;;  %v808_v11 = vadd.f32 %v14006_v25, %v13992_v14 }
 0xb65   : > { %v8117_v1 = vpop.trf.xlu2  ;;  %5392 = vmatmul.bf16.vlgmr.msra.gmra.mxu2 %v4108_v51  ;;  %v8974_v26 = vpop.eup %8973  ;;  %v5307_v44 = vpack.c.b16 %v5292_v46, %v5291_v19  ;;  %v5199_v31 = vpack.c.bf16 %v5135_v45, %v5135_v45  ;;  %v5839_v40 = vsel %vm1077_vm14, %v5651_v49, 0 }
 0xb66   : > { %5964 = vmatpush.bf16.msrb.mxu2 %v5955_v13  ;;  %5270 = vmatmul.bf16.vlgmr.msra.gmra.mxu0 %v4106_v61  ;;  %v8118_v37 = vunpack.i.l.bf16 %v8117_v1  ;;  %v5134_v56 = vmul.f32 %v8974_v26, %v14003_v2  ;;  %v5430_v0 = vpack.c.b16 %v5416_v20, %v5415_v16  ;;  %v8121_v3 = vunpack.i.h.bf16 %v8117_v1 }
 0xb67   : > { %5732 = vmatpush.bf16.msrb.mxu0 %v5723_v27  ;;  %5329 = vmatpush.bf16.xpose.msra.mxu1 %v5308_v50  ;;  %v5414_v29 = vunpack.c.l.b16 %v5199_v31  ;;  %v6071_v58 = vsel %vm1077_vm14, %v5653_v24, 0  ;;  %v4109_v53 = vpack.c.bf16 %v808_v11, %v808_v11 }
 0xb68   : > { %5450 = vmatpush.bf16.xpose.msra.mxu3 %v5431_v60  ;;  %v5586_v10 = vpack.c.bf16 %v8118_v37, %v8118_v37  ;;  %v5198_v62 = vpack.c.bf16 %v5134_v56, %v5134_v56  ;;  %v5602_v43 = vpack.c.bf16 %v8121_v3, %v8121_v3 }
 0xb6a   : > { %v5674_v18 = vunpack.c.l.b16 %v5586_v10  ;;  %v5413_v48 = vunpack.c.l.b16 %v5198_v62  ;;  %v5790_v63 = vunpack.c.l.b16 %v5602_v43 }
 0xb6c   : > { %v5429_v13 = vpack.c.b16 %v5414_v29, %v5413_v48 }
 0xb6d   : > { %v8122_v36 = vpop.trf.xlu2 }
 0xb6e   : > { %v8123_v22 = vunpack.i.l.bf16 %v8122_v36  ;;  %v8126_v27 = vunpack.i.h.bf16 %v8122_v36 }
 0xb6f   : > { %5330 = vmatpush.bf16.xpose.msra.mxu1 %v5307_v44 }
 0xb70   : > { %v5587_v41 = vpack.c.bf16 %v8123_v22, %v8123_v22  ;;  %5451 = vmatpush.bf16.xpose.msra.mxu3 %v5430_v0  ;;  %v5603_v47 = vpack.c.bf16 %v8126_v27, %v8126_v27 }
 0xb72   : > { %v5675_v15 = vunpack.c.l.b16 %v5587_v41  ;;  %v5791_v35 = vunpack.c.l.b16 %v5603_v47 }
 0xb74   : > { %v5690_v17 = vpack.c.b16 %v5675_v15, %v5674_v18  ;;  %v5806_v5 = vpack.c.b16 %v5791_v35, %v5790_v63 }
 0xb75   : > { %v8127_v33 = vpop.trf.xlu2 }
 0xb76   : > { %5331 = vmatmul.bf16.vlgmr.msra.gmra.mxu1 %v4107_v7  ;;  %7429 = vmatmul.msk.bf16.vlgmr.msrb.gmra.mxu0 %vm1052_vm15, %v5690_v17  ;;  %v8128_v23 = vunpack.i.l.bf16 %v8127_v33  ;;  %v8131_v14 = vunpack.i.h.bf16 %v8127_v33 }
 0xb77   : > { %5848 = vmatpush.bf16.msrb.mxu1 %v5839_v40 }
 0xb78   : > { %5452 = vmatpush.bf16.xpose.msra.mxu3 %v5429_v13  ;;  %v5588_v57 = vpack.c.bf16 %v8128_v23, %v8128_v23  ;;  %v5604_v12 = vpack.c.bf16 %v8131_v14, %v8131_v14 }
 0xb7a   : > { %v5676_v8 = vunpack.c.l.b16 %v5588_v57  ;;  %v5792_v56 = vunpack.c.l.b16 %v5604_v12 }
 0xb7d   : > { %v8132_v52 = vpop.trf.xlu2 }
 0xb7e   : > { %v8133_v28 = vunpack.i.l.bf16 %v8132_v52  ;;  %v8136_v55 = vunpack.i.h.bf16 %v8132_v52 }
 0xb7f   : > { %5453 = vmatmul.bf16.vlgmr.msra.gmra.mxu3 %v4109_v53 }
 0xb80   : > { %6080 = vmatpush.bf16.msrb.mxu3 %v6071_v58  ;;  %v5589_v34 = vpack.c.bf16 %v8133_v28, %v8133_v28  ;;  %v5605_v26 = vpack.c.bf16 %v8136_v55, %v8136_v55 }
 0xb81   : > { %v8035_v51 = vpop.trf.xlu1 }
 0xb82   : > { %v5677_v59 = vunpack.c.l.b16 %v5589_v34  ;;  %v8039_v61 = vunpack.i.h.bf16 %v8035_v51  ;;  %v8036_v1 = vunpack.i.l.bf16 %v8035_v51  ;;  %v5793_v36 = vunpack.c.l.b16 %v5605_v26 }
 0xb84   : > { %v5691_v50 = vpack.c.b16 %v5677_v59, %v5676_v8  ;;  %v5634_v60 = vpack.c.bf16 %v8039_v61, %v8039_v61  ;;  %v5618_v6 = vpack.c.bf16 %v8036_v1, %v8036_v1  ;;  %v5807_v4 = vpack.c.b16 %v5793_v36, %v5792_v56 }
 0xb85   : > { %v8137_v21 = vpop.trf.xlu2 }
 0xb86   : > { %7437 = vmatmul.msk.bf16.vlgmr.msrb.gmra.mxu1 %vm1052_vm15, %v5806_v5  ;;  %7430 = vmatmul.msk.bf16.gmra.mxu0 %vm1052_vm15, %v5691_v50  ;;  %v8138_v9 = vunpack.i.l.bf16 %v8137_v21  ;;  %v6022_v46 = vunpack.c.l.b16 %v5634_v60  ;;  %v5906_v42 = vunpack.c.l.b16 %v5618_v6  ;;  %v8141_v18 = vunpack.i.h.bf16 %v8137_v21 }
 0xb88   : > { %v5590_v19 = vpack.c.bf16 %v8138_v9, %v8138_v9  ;;  %v5606_v17 = vpack.c.bf16 %v8141_v18, %v8141_v18 }
 0xb89   : > { %v8040_v39 = vpop.trf.xlu1 }
 0xb8a   : > { %v8044_v38 = vunpack.i.h.bf16 %v8040_v39  ;;  %v8041_v37 = vunpack.i.l.bf16 %v8040_v39  ;;  %v5678_v22 = vunpack.c.l.b16 %v5590_v19  ;;  %v5794_v11 = vunpack.c.l.b16 %v5606_v17 }
 0xb8c   : > { %v5635_v45 = vpack.c.bf16 %v8044_v38, %v8044_v38  ;;  %v5619_v16 = vpack.c.bf16 %v8041_v37, %v8041_v37 }
 0xb8d   : > { %v8142_v49 = vpop.trf.xlu2 }
 0xb8e   : > { %v6023_v10 = vunpack.c.l.b16 %v5635_v45  ;;  %v5907_v20 = vunpack.c.l.b16 %v5619_v16  ;;  %v8143_v2 = vunpack.i.l.bf16 %v8142_v49  ;;  %v8146_v41 = vunpack.i.h.bf16 %v8142_v49 }
 0xb90   : > { %v5922_v44 = vpack.c.b16 %v5907_v20, %v5906_v42  ;;  %v6038_v31 = vpack.c.b16 %v6023_v10, %v6022_v46  ;;  %v5591_v0 = vpack.c.bf16 %v8143_v2, %v8143_v2  ;;  %v5607_v48 = vpack.c.bf16 %v8146_v41, %v8146_v41  ;;  %v227_v46 = vld [vmem:[%s13269_s2 + $0x98] sm:$0xff] }
 0xb91   : > { %v8045_v40 = vpop.trf.xlu1 }
 0xb92   : > { %7445 = vmatmul.msk.bf16.vlgmr.msrb.gmra.mxu2 %vm1052_vm15, %v5922_v44  ;;  %7453 = vmatmul.msk.bf16.vlgmr.msrb.gmra.mxu3 %vm1052_vm15, %v6038_v31  ;;  %v5679_v32 = vunpack.c.l.b16 %v5591_v0  ;;  %v8049_v54 = vunpack.i.h.bf16 %v8045_v40  ;;  %v8046_v30 = vunpack.i.l.bf16 %v8045_v40  ;;  %v5795_v57 = vunpack.c.l.b16 %v5607_v48 }
 0xb94   : > { %v5692_v62 = vpack.c.b16 %v5679_v32, %v5678_v22  ;;  %v5636_v29 = vpack.c.bf16 %v8049_v54, %v8049_v54  ;;  %v5620_v7 = vpack.c.bf16 %v8046_v30, %v8046_v30  ;;  %v5808_v59 = vpack.c.b16 %v5795_v57, %v5794_v11 }
 0xb95   : > { %v8147_v15 = vpop.trf.xlu2 }
 0xb96   : > { %7438 = vmatmul.msk.bf16.gmra.mxu1 %vm1052_vm15, %v5807_v4  ;;  %7431 = vmatmul.msk.bf16.gmra.mxu0 %vm1052_vm15, %v5692_v62  ;;  %v8148_v33 = vunpack.i.l.bf16 %v8147_v15  ;;  %v6024_v27 = vunpack.c.l.b16 %v5636_v29  ;;  %v5908_v23 = vunpack.c.l.b16 %v5620_v7  ;;  %v8151_v50 = vunpack.i.h.bf16 %v8147_v15 }
 0xb98   : > { %v5592_v43 = vpack.c.bf16 %v8148_v33, %v8148_v33  ;;  %v5608_v39 = vpack.c.bf16 %v8151_v50, %v8151_v50 }
 0xb99   : > { %v8050_v24 = vpop.trf.xlu1 }
 0xb9a   : > { %v8054_v13 = vunpack.i.h.bf16 %v8050_v24  ;;  %v8051_v3 = vunpack.i.l.bf16 %v8050_v24  ;;  %v5680_v8 = vunpack.c.l.b16 %v5592_v43  ;;  %v5796_v49 = vunpack.c.l.b16 %v5608_v39 }
 0xb9c   : > { %v5637_v58 = vpack.c.bf16 %v8054_v13, %v8054_v13  ;;  %v5621_v25 = vpack.c.bf16 %v8051_v3, %v8051_v3 }
 0xb9d   : > { %v8152_v47 = vpop.trf.xlu2 }
 0xb9e   : > { %v6025_v53 = vunpack.c.l.b16 %v5637_v58  ;;  %v5909_v52 = vunpack.c.l.b16 %v5621_v25  ;;  %v8153_v28 = vunpack.i.l.bf16 %v8152_v47  ;;  %v8156_v21 = vunpack.i.h.bf16 %v8152_v47 }
 0xba0   : > { %v5923_v63 = vpack.c.b16 %v5909_v52, %v5908_v23  ;;  %v6039_v35 = vpack.c.b16 %v6025_v53, %v6024_v27  ;;  %v5593_v34 = vpack.c.bf16 %v8153_v28, %v8153_v28  ;;  %v5609_v9 = vpack.c.bf16 %v8156_v21, %v8156_v21 }
 0xba1   : > { %v8055_v51 = vpop.trf.xlu1 }
 0xba2   : > { %7446 = vmatmul.msk.bf16.gmra.mxu2 %vm1052_vm15, %v5923_v63  ;;  %7454 = vmatmul.msk.bf16.gmra.mxu3 %vm1052_vm15, %v6039_v35  ;;  %v5681_v5 = vunpack.c.l.b16 %v5593_v34  ;;  %v8059_v61 = vunpack.i.h.bf16 %v8055_v51  ;;  %v8056_v1 = vunpack.i.l.bf16 %v8055_v51  ;;  %v5797_v2 = vunpack.c.l.b16 %v5609_v9 }
 0xba4   : > { %v5693_v55 = vpack.c.b16 %v5681_v5, %v5680_v8  ;;  %v5638_v60 = vpack.c.bf16 %v8059_v61, %v8059_v61  ;;  %v5622_v6 = vpack.c.bf16 %v8056_v1, %v8056_v1  ;;  %v5809_v4 = vpack.c.b16 %v5797_v2, %v5796_v49 }
 0xba5   : > { %v8157_v14 = vpop.trf.xlu2 }
 0xba6   : > { %7439 = vmatmul.msk.bf16.gmra.mxu1 %vm1052_vm15, %v5808_v59  ;;  %7432 = vmatmul.msk.bf16.gmra.mxu0 %vm1052_vm15, %v5693_v55  ;;  %v8158_v37 = vunpack.i.l.bf16 %v8157_v14  ;;  %v6026_v42 = vunpack.c.l.b16 %v5638_v60  ;;  %v5910_v45 = vunpack.c.l.b16 %v5622_v6  ;;  %v8161_v30 = vunpack.i.h.bf16 %v8157_v14 }
 0xba8   : > { %v5594_v10 = vpack.c.bf16 %v8158_v37, %v8158_v37  ;;  %v5610_v29 = vpack.c.bf16 %v8161_v30, %v8161_v30 }
 0xba9   : > { %v8060_v38 = vpop.trf.xlu1 }
 0xbaa   : > { %v8064_v12 = vunpack.i.h.bf16 %v8060_v38  ;;  %v8061_v26 = vunpack.i.l.bf16 %v8060_v38  ;;  %v5682_v0 = vunpack.c.l.b16 %v5594_v10  ;;  %v5798_v23 = vunpack.c.l.b16 %v5610_v29 }
 0xbac   : > { %v5639_v16 = vpack.c.bf16 %v8064_v12, %v8064_v12  ;;  %v5623_v19 = vpack.c.bf16 %v8061_v26, %v8061_v26 }
 0xbad   : > { %v8162_v20 = vpop.trf.xlu2 }
 0xbae   : > { %v6027_v56 = vunpack.c.l.b16 %v5639_v16  ;;  %v5911_v36 = vunpack.c.l.b16 %v5623_v19  ;;  %v8163_v44 = vunpack.i.l.bf16 %v8162_v20  ;;  %v8166_v18 = vunpack.i.h.bf16 %v8162_v20 }
 0xbaf   : > { %556 = vperm.xlu1 %7539, %v227_v46  }
 0xbb0   : > { %v5924_v31 = vpack.c.b16 %v5911_v36, %v5910_v45  ;;  %v6040_v22 = vpack.c.b16 %v6027_v56, %v6026_v42  ;;  %v5595_v40 = vpack.c.bf16 %v8163_v44, %v8163_v44  ;;  %v5611_v7 = vpack.c.bf16 %v8166_v18, %v8166_v18 }
 0xbb1   : > { %v8065_v32 = vpop.trf.xlu1 }
 0xbb2   : > { %7447 = vmatmul.msk.bf16.gmra.mxu2 %vm1052_vm15, %v5924_v31  ;;  %7455 = vmatmul.msk.bf16.gmra.mxu3 %vm1052_vm15, %v6040_v22  ;;  %v5683_v54 = vunpack.c.l.b16 %v5595_v40  ;;  %v8069_v62 = vunpack.i.h.bf16 %v8065_v32  ;;  %v8066_v15 = vunpack.i.l.bf16 %v8065_v32  ;;  %v5799_v58 = vunpack.c.l.b16 %v5611_v7 }
 0xbb4   : > { %v5694_v41 = vpack.c.b16 %v5683_v54, %v5682_v0  ;;  %v5640_v33 = vpack.c.bf16 %v8069_v62, %v8069_v62  ;;  %v5624_v13 = vpack.c.bf16 %v8066_v15, %v8066_v15  ;;  %v5810_v53 = vpack.c.b16 %v5799_v58, %v5798_v23 }
 0xbb5   : > { %v8167_v63 = vpop.trf.xlu2 }
 0xbb6   : > { %7440 = vmatmul.msk.bf16.gmra.mxu1 %vm1052_vm15, %v5809_v4  ;;  %7433 = vmatmul.msk.bf16.gmra.mxu0 %vm1052_vm15, %v5694_v41  ;;  %v6028_v25 = vunpack.c.l.b16 %v5640_v33  ;;  %v5912_v11 = vunpack.c.l.b16 %v5624_v13  ;;  %v8171_v8 = vunpack.i.h.bf16 %v8167_v63  ;;  %v8168_v34 = vunpack.i.l.bf16 %v8167_v63 }
 0xbb8   : > { %v5612_v51 = vpack.c.bf16 %v8171_v8, %v8171_v8  ;;  %v5596_v59 = vpack.c.bf16 %v8168_v34, %v8168_v34 }
 0xbb9   : > { %v8070_v17 = vpop.trf.xlu1 }
 0xbba   : > { %v8074_v48 = vunpack.i.h.bf16 %v8070_v17  ;;  %v8071_v24 = vunpack.i.l.bf16 %v8070_v17  ;;  %v5800_v21 = vunpack.c.l.b16 %v5612_v51  ;;  %v5684_v14 = vunpack.c.l.b16 %v5596_v59 }
 0xbbc   : > { %v5641_v3 = vpack.c.bf16 %v8074_v48, %v8074_v48  ;;  %v5625_v27 = vpack.c.bf16 %v8071_v24, %v8071_v24 }
 0xbbd   : > { %v8172_v5 = vpop.trf.xlu2 }
 0xbbe   : > { %v6029_v43 = vunpack.c.l.b16 %v5641_v3  ;;  %v5913_v47 = vunpack.c.l.b16 %v5625_v27  ;;  %v8176_v1 = vunpack.i.h.bf16 %v8172_v5  ;;  %v8173_v50 = vunpack.i.l.bf16 %v8172_v5 }
 0xbc0   : > { %v5925_v52 = vpack.c.b16 %v5913_v47, %v5912_v11  ;;  %v6041_v28 = vpack.c.b16 %v6029_v43, %v6028_v25  ;;  %v5613_v55 = vpack.c.bf16 %v8176_v1, %v8176_v1  ;;  %v5597_v60 = vpack.c.bf16 %v8173_v50, %v8173_v50 }
 0xbc1   : > { %v8075_v57 = vpop.trf.xlu1 }
 0xbc2   : > { %7448 = vmatmul.msk.bf16.gmra.mxu2 %vm1052_vm15, %v5925_v52  ;;  %7456 = vmatmul.msk.bf16.gmra.mxu3 %vm1052_vm15, %v6041_v28  ;;  %v5801_v6 = vunpack.c.l.b16 %v5613_v55  ;;  %v5685_v39 = vunpack.c.l.b16 %v5597_v60  ;;  %v8079_v12 = vunpack.i.h.bf16 %v8075_v57  ;;  %v8076_v10 = vunpack.i.l.bf16 %v8075_v57 }
 0xbc4   : > { %v5695_v9 = vpack.c.b16 %v5685_v39, %v5684_v14  ;;  %v5811_v38 = vpack.c.b16 %v5801_v6, %v5800_v21  ;;  %v5642_v45 = vpack.c.bf16 %v8079_v12, %v8079_v12  ;;  %v5626_v44 = vpack.c.bf16 %v8076_v10, %v8076_v10 }
 0xbc5   : > { %v8177_v8 = vpop.trf.xlu2 }
 0xbc6   : > { %7441 = vmatmul.msk.bf16.gmra.mxu1 %vm1052_vm15, %v5810_v53  ;;  %7434 = vmatmul.msk.bf16.gmra.mxu0 %vm1052_vm15, %v5695_v9  ;;  %v6030_v49 = vunpack.c.l.b16 %v5642_v45  ;;  %v5914_v40 = vunpack.c.l.b16 %v5626_v44  ;;  %v8181_v1 = vunpack.i.h.bf16 %v8177_v8  ;;  %v8178_v50 = vunpack.i.l.bf16 %v8177_v8 }
 0xbc8   : > { %v5614_v6 = vpack.c.bf16 %v8181_v1, %v8181_v1  ;;  %v5598_v39 = vpack.c.bf16 %v8178_v50, %v8178_v50 }
 0xbc9   : > { %v8080_v35 = vpop.trf.xlu1 }
 0xbca   : > { %v8084_v26 = vunpack.i.h.bf16 %v8080_v35  ;;  %v8081_v2 = vunpack.i.l.bf16 %v8080_v35  ;;  %v5686_v10 = vunpack.c.l.b16 %v5598_v39 }
 0xbcc   : > { %v5643_v16 = vpack.c.bf16 %v8084_v26, %v8084_v26  ;;  %v5627_v31 = vpack.c.bf16 %v8081_v2, %v8081_v2 }
 0xbce   : > { %v6031_v20 = vunpack.c.l.b16 %v5643_v16  ;;  %v5915_v32 = vunpack.c.l.b16 %v5627_v31 }
 0xbd0   : > { %v6042_v22 = vpack.c.b16 %v6031_v20, %v6030_v49  ;;  %v5926_v29 = vpack.c.b16 %v5915_v32, %v5914_v40  ;;  %v5802_v49 = vunpack.c.l.b16 %v5614_v6 }
 0xbd1   : > { %v8085_v61 = vpop.trf.xlu1 }
 0xbd2   : > { %7457 = vmatmul.msk.bf16.gmra.mxu3 %vm1052_vm15, %v6042_v22  ;;  %v8089_v4 = vunpack.i.h.bf16 %v8085_v61  ;;  %7449 = vmatmul.msk.bf16.gmra.mxu2 %vm1052_vm15, %v5926_v29  ;;  %v8086_v17 = vunpack.i.l.bf16 %v8085_v61 }
 0xbd4   : > { %v5644_v62 = vpack.c.bf16 %v8089_v4, %v8089_v4  ;;  %v5628_v27 = vpack.c.bf16 %v8086_v17, %v8086_v17 }
 0xbd6   : > { %7442 = vmatmul.msk.bf16.gmra.mxu1 %vm1052_vm15, %v5811_v38  ;;  %v6032_v7 = vunpack.c.l.b16 %v5644_v62  ;;  %v5916_v11 = vunpack.c.l.b16 %v5628_v27  ;;  %v8182_v38 = vpop.trf.xlu2 }
 0xbd7   : > { %v8183_v12 = vunpack.i.l.bf16 %v8182_v38 }
 0xbd9   : > { %v8090_v37 = vpop.trf.xlu1 }
 0xbda   : > { %v8094_v54 = vunpack.i.h.bf16 %v8090_v37  ;;  %v8091_v24 = vunpack.i.l.bf16 %v8090_v37  ;;  %v8186_v37 = vunpack.i.h.bf16 %v8182_v38 }
 0xbdc   : > { %v5645_v15 = vpack.c.bf16 %v8094_v54, %v8094_v54  ;;  %v5629_v23 = vpack.c.bf16 %v8091_v24, %v8091_v24  ;;  %v5615_v26 = vpack.c.bf16 %v8186_v37, %v8186_v37 }
 0xbde   : > { %v6033_v48 = vunpack.c.l.b16 %v5645_v15  ;;  %v5917_v43 = vunpack.c.l.b16 %v5629_v23  ;;  %v5803_v2 = vunpack.c.l.b16 %v5615_v26 }
 0xbe0   : > { %v6043_v58 = vpack.c.b16 %v6033_v48, %v6032_v7  ;;  %v5927_v35 = vpack.c.b16 %v5917_v43, %v5916_v11 }
 0xbe1   : > { %v12404_v42 = vpop.trf.xlu1 }
 0xbe2   : > { %7458 = vmatmul.msk.bf16.gmra.mxu3 %vm1052_vm15, %v6043_v58  ;;  %v8099_v25 = vunpack.i.h.bf16 %v12404_v42  ;;  %7450 = vmatmul.msk.bf16.gmra.mxu2 %vm1052_vm15, %v5927_v35  ;;  %v8096_v51 = vunpack.i.l.bf16 %v12404_v42  ;;  %v5599_v42 = vpack.c.bf16 %v8183_v12, %v8183_v12 }
 0xbe3   : > { %v12402_v46 = vpop.f32.mrf.mxu0 }
 0xbe4   : > { %14007 = vst [vmem:[#allocation108_spill] sm:$0xff] %v12402_v46  ;;  %v5646_v28 = vpack.c.bf16 %v8099_v25, %v8099_v25  ;;  %v5630_v55 = vpack.c.bf16 %v8096_v51, %v8096_v51 }
 0xbe6   : > { %v6034_v34 = vunpack.c.l.b16 %v5646_v28  ;;  %v5918_v45 = vunpack.c.l.b16 %v5630_v55  ;;  %v8187_v28 = vpop.trf.xlu2 }
 0xbe7   : > { %v8191_v35 = vunpack.i.h.bf16 %v8187_v28  ;;  %v8188_v8 = vunpack.i.l.bf16 %v8187_v28 }
 0xbe8   : > { %v12406_v19 = vpop.f32.mrf.mxu2 }
 0xbe9   : > { %14008 = vst [vmem:[#allocation7_spill] sm:$0xff] %v12406_v19  ;;  %v8100_v36 = vpop.trf.xlu1  ;;  %v5600_v51 = vpack.c.bf16 %v8188_v8, %v8188_v8 }
 0xbea   : > { %v8104_v57 = vunpack.i.h.bf16 %v8100_v36  ;;  %v8101_v5 = vunpack.i.l.bf16 %v8100_v36 }
 0xbeb   : > { %v5273_v56 = vpop.f32.mrf.mxu0  ;;  %v5688_v55 = vunpack.c.l.b16 %v5600_v51 }
 0xbec   : > { %v5647_v63 = vpack.c.bf16 %v8104_v57, %v8104_v57  ;;  %v5631_v60 = vpack.c.bf16 %v8101_v5, %v8101_v5  ;;  %v5687_v56 = vunpack.c.l.b16 %v5599_v42 }
 0xbee   : > { %v6035_v59 = vunpack.c.l.b16 %v5647_v63  ;;  %v5919_v16 = vunpack.c.l.b16 %v5631_v60  ;;  %v5696_v22 = vpack.c.b16 %v5687_v56, %v5686_v10 }
 0xbf0   : > { %v5395_v0 = vpop.f32.mrf.mxu2  ;;  %v6044_v9 = vpack.c.b16 %v6035_v59, %v6034_v34  ;;  %v5928_v31 = vpack.c.b16 %v5919_v16, %v5918_v45  ;;  %7435 = vmatmul.msk.bf16.gmra.mxu0 %vm1052_vm15, %v5696_v22  ;;  %v5616_v34 = vpack.c.bf16 %v8191_v35, %v8191_v35  ;;  %v8192_v59 = vpop.trf.xlu2 }
 0xbf1   : > { %v12413_v41 = vpop.trf.xlu1  ;;  %v5812_v0 = vpack.c.b16 %v5803_v2, %v5802_v49  ;;  %v8193_v1 = vunpack.i.l.bf16 %v8192_v59 }
 0xbf2   : > { %7459 = vmatmul.msk.bf16.gmra.mxu3 %vm1052_vm15, %v6044_v9  ;;  %7451 = vmatmul.msk.bf16.gmra.mxu2 %vm1052_vm15, %v5928_v31  ;;  %v5804_v50 = vunpack.c.l.b16 %v5616_v34 }
 0xbf3   : > { %v12409_v30 = vpop.f32.mrf.mxu1  ;;  %v12411_v18 = vpop.f32.mrf.mxu0  ;;  %7443 = vmatmul.msk.bf16.gmra.mxu1 %vm1052_vm15, %v5812_v0  ;;  %v5601_v6 = vpack.c.bf16 %v8193_v1, %v8193_v1  ;;  %v8109_v1 = vunpack.i.h.bf16 %v12413_v41 }
 0xbf4   : > { %14009 = vst [vmem:[#allocation109_spill] sm:$0xff] %v12409_v30  ;;  %6122 = vmax.xlane.f32.xlu0 %v12411_v18 }
 0xbf5   : > { %14010 = vst [vmem:[#allocation122_spill] sm:$0xff] %v12411_v18  ;;  %v5689_v9 = vunpack.c.l.b16 %v5601_v6 }
 0xbf7   : > { %v5697_v38 = vpack.c.b16 %v5689_v9, %v5688_v55 }
 0xbf9   : > { %v12419_v3 = vpop.trf.xlu1 }
 0xbfa   : > { %v8114_v55 = vunpack.i.h.bf16 %v12419_v3 }
 0xbfb   : > { %v5334_v33 = vpop.f32.mrf.mxu1  ;;  %v12417_v13 = vpop.f32.mrf.mxu0 }
 0xbfc   : > { %14011 = vst [vmem:[#allocation65_spill] sm:$0xff] %v12417_v13  ;;  %6124 = vmax.xlane.f32.xlu0 %v12417_v13 }
 0xc00   : > { %7436 = vmatmul.msk.bf16.gmra.mxu0 %vm1052_vm15, %v5697_v38  ;;  %v5649_v38 = vpack.c.bf16 %v8114_v55, %v8114_v55 }
 0xc02   : > { %v12424_v47 = vpop.f32.mrf.mxu3 }
 0xc03   : > { %14012 = vst [vmem:[#allocation5_spill] sm:$0xff] %v12424_v47  ;;  %v12426_v53 = vpop.f32.mrf.mxu1  ;;  %v12428_v52 = vpop.f32.mrf.mxu0 }
 0xc04   : > { %14013 = vst [vmem:[#allocation118_spill] sm:$0xff] %v12426_v53  ;;  %6154 = vmax.xlane.f32.xlu1 %v12426_v53  ;;  %6126 = vmax.xlane.f32.xlu0 %v12428_v52 }
 0xc05   : > { %14014 = vst [vmem:[#allocation119_spill] sm:$0xff] %v12428_v52 }
 0xc0a   : > { %v5456_v61 = vpop.f32.mrf.mxu3 }
 0xc0b   : > { %v12434_v21 = vpop.f32.mrf.mxu1  ;;  %v12436_v14 = vpop.f32.mrf.mxu0  ;;  %v8196_v61 = vunpack.i.h.bf16 %v8192_v59 }
 0xc0c   : > { %14015 = vst [vmem:[#allocation112_spill] sm:$0xff] %v12434_v21  ;;  %6156 = vmax.xlane.f32.xlu2 %v12434_v21  ;;  %6128 = vmax.xlane.f32.xlu1 %v12436_v14  ;;  %v6037_v21 = vunpack.c.l.b16 %v5649_v38 }
 0xc0d   : > { %14016 = vst [vmem:[#allocation78_spill] sm:$0xff] %v12436_v14  ;;  %v5617_v60 = vpack.c.bf16 %v8196_v61, %v8196_v61 }
 0xc0f   : > { %v5805_v39 = vunpack.c.l.b16 %v5617_v60  ;;  %v8111_v60 = vunpack.i.l.bf16 %v12419_v3 }
 0xc11   : > { %v5813_v37 = vpack.c.b16 %v5805_v39, %v5804_v50  ;;  %v8106_v50 = vunpack.i.l.bf16 %v12413_v41  ;;  %v5648_v39 = vpack.c.bf16 %v8109_v1, %v8109_v1 }
 0xc13   : > { %v12441_v20 = vpop.f32.mrf.mxu1  ;;  %v12454_v32 = vpop.f32.mrf.mxu0  ;;  %7444 = vmatmul.msk.bf16.gmra.mxu1 %vm1052_vm15, %v5813_v37  ;;  %v5632_v9 = vpack.c.bf16 %v8106_v50, %v8106_v50  ;;  %v5633_v37 = vpack.c.bf16 %v8111_v60, %v8111_v60 }
 0xc14   : > { %14017 = vst [vmem:[#allocation83_spill] sm:$0xff] %v12441_v20  ;;  %6158 = vmax.xlane.f32.xlu2 %v12441_v20 }
 0xc15   : > { %v12444_v36 = vpop.f32.mrf.mxu2  ;;  %v12446_v44 = vpop.f32.mrf.mxu3  ;;  %14021 = vst [vmem:[#allocation126_spill] sm:$0xff] %v12454_v32  ;;  %v5920_v3 = vunpack.c.l.b16 %v5632_v9 }
 0xc16   : > { %14018 = vst [vmem:[#allocation98_spill] sm:$0xff] %v12444_v36  ;;  %6186 = vmax.xlane.f32.xlu1 %v12444_v36 }
 0xc17   : > { %14019 = vst [vmem:[#allocation124_spill] sm:$0xff] %v12446_v44 }
 0xc1b   : > { %v12452_v40 = vpop.f32.mrf.mxu1  ;;  %v12466_v15 = vpop.f32.mrf.mxu0 }
 0xc1c   : > { %14020 = vst [vmem:[#allocation76_spill] sm:$0xff] %v12452_v40  ;;  %6160 = vmax.xlane.f32.xlu0 %v12452_v40 }
 0xc1d   : > { %v12457_v4 = vpop.f32.mrf.mxu3  ;;  %v12463_v62 = vpop.f32.mrf.mxu2  ;;  %14025 = vst [vmem:[#allocation64_spill] sm:$0xff] %v12466_v15 }
 0xc1e   : > { %14022 = vst [vmem:[#allocation6_spill] sm:$0xff] %v12457_v4  ;;  %6220 = vmax.xlane.f32.xlu1 %v12457_v4 }
 0xc1f   : > { %14024 = vst [vmem:[#allocation32_spill] sm:$0xff] %v12463_v62 }
 0xc21   : > { %v12530_v49 = vpop.permute.xlu1 %556 }
 0xc22   : > { %14031 = vst [vmem:[#allocation105_spill] sm:$0xff] %v12530_v49  ;;  %v6036_v49 = vunpack.c.l.b16 %v5648_v39 }
 0xc23   : > { %v12460_v54 = vpop.f32.mrf.mxu1  ;;  %v12480_v24 = vpop.f32.mrf.mxu0 }
 0xc24   : > { %14023 = vst [vmem:[#allocation21_spill] sm:$0xff] %v12460_v54  ;;  %6162 = vmax.xlane.f32.xlu2 %v12460_v54  ;;  %6218 = vmax.xlane.f32.xlu0 %v12446_v44  ;;  %v6045_v55 = vpack.c.b16 %v6037_v21, %v6036_v49 }
 0xc25   : > { %v12471_v7 = vpop.f32.mrf.mxu3  ;;  %v12475_v17 = vpop.f32.mrf.mxu2 }
 0xc26   : > { %6132 = vmax.xlane.f32.xlu1 %v12466_v15  ;;  %14027 = vst [vmem:[#allocation99_spill] sm:$0xff] %v12471_v7  ;;  %7460 = vmatmul.msk.bf16.gmra.mxu3 %vm1052_vm15, %v6045_v55 }
 0xc2b   : > { %v12469_v29 = vpop.f32.mrf.mxu1  ;;  %v12493_v58 = vpop.f32.mrf.mxu0 }
 0xc2c   : > { %14026 = vst [vmem:[#allocation63_spill] sm:$0xff] %v12469_v29  ;;  %6188 = vmax.xlane.f32.xlu2 %v12463_v62  ;;  %6130 = vmax.xlane.f32.xlu0 %v12454_v32 }
 0xc2d   : > { %v12484_v33 = vpop.f32.mrf.mxu3  ;;  %v12487_v27 = vpop.f32.mrf.mxu2 }
 0xc2e   : > { %6190 = vmax.xlane.f32.xlu1 %v12475_v17  ;;  %14029 = vst [vmem:[#allocation34_spill] sm:$0xff] %v12487_v27 }
 0xc33   : > { %v12478_v48 = vpop.f32.mrf.mxu1  ;;  %v12512_v5 = vpop.f32.mrf.mxu0 }
 0xc34   : > { %14028 = vst [vmem:[#allocation104_spill] sm:$0xff] %v12478_v48  ;;  %6166 = vmax.xlane.f32.xlu2 %v12478_v48  ;;  %6164 = vmax.xlane.f32.xlu0 %v12469_v29 }
 0xc35   : > { %v12496_v25 = vpop.f32.mrf.mxu3  ;;  %v12498_v11 = vpop.f32.mrf.mxu2 }
 0xc36   : > { %6224 = vmax.xlane.f32.xlu1 %v12484_v33 }
 0xc3b   : > { %v12489_v23 = vpop.f32.mrf.mxu1  ;;  %v12525_v45 = vpop.f32.mrf.mxu0 }
 0xc3c   : > { %14030 = vst [vmem:[#allocation48_spill] sm:$0xff] %v12489_v23  ;;  %6192 = vmax.xlane.f32.xlu2 %v12487_v27  ;;  %6222 = vmax.xlane.f32.xlu0 %v12471_v7 }
 0xc3d   : > { %v12505_v57 = vpop.f32.mrf.mxu3  ;;  %v12518_v12 = vpop.f32.mrf.mxu2 }
 0xc3e   : > { %6136 = vmax.xlane.f32.xlu1 %v12493_v58 }
 0xc43   : > { %v12500_v43 = vpop.f32.mrf.mxu1  ;;  %v12550_v8 = vpop.f32.mrf.mxu0 }
 0xc44   : > { %6194 = vmax.xlane.f32.xlu2 %v12498_v11  ;;  %6134 = vmax.xlane.f32.xlu0 %v12480_v24 }
 0xc45   : > { %v12520_v26 = vpop.f32.mrf.mxu3  ;;  %v12523_v42 = vpop.f32.mrf.mxu2 }
 0xc46   : > { %6226 = vmax.xlane.f32.xlu1 %v12496_v25 }
 0xc4b   : > { %v12509_v63 = vpop.f32.mrf.mxu1 }
 0xc4c   : > { %6228 = vmax.xlane.f32.xlu2 %v12505_v57  ;;  %6168 = vmax.xlane.f32.xlu0 %v12489_v23 }
 0xc4d   : > { %v12528_v16 = vpop.f32.mrf.mxu3  ;;  %v12534_v2 = vpop.f32.mrf.mxu2 }
 0xc4e   : > { %6172 = vmax.xlane.f32.xlu1 %v12509_v63 }
 0xc53   : > { %v12567_v30 = vpop.f32.mrf.mxu1 }
 0xc54   : > { %6138 = vmax.xlane.f32.xlu0 %v12512_v5 }
 0xc55   : > { %v12537_v56 = vpop.f32.mrf.mxu3  ;;  %v12544_v0 = vpop.f32.mrf.mxu2 }
 0xc5b   : > { %v12613_v13 = vpop.f32.mrf.mxu1 }
 0xc5c   : > { %6170 = vmax.xlane.f32.xlu0 %v12500_v43 }
 0xc5d   : > { %v12546_v28 = vpop.f32.mrf.mxu3  ;;  %v12555_v51 = vpop.f32.mrf.mxu2 }
 0xc64   : > { %6196 = vmax.xlane.f32.xlu0 %v12518_v12 }
 0xc65   : > { %v12557_v59 = vpop.f32.mrf.mxu3  ;;  %v12570_v46 = vpop.f32.mrf.mxu2 }
 0xc67   : > { %v12532_v10 = vpop.xlane.xlu0 %6122 }
 0xc68   : > { %14032 = vst [vmem:[#allocation95_spill] sm:$0xff] %v12532_v10 }
 0xc6c   : > { %6140 = vmax.xlane.f32.xlu0 %v12525_v45 }
 0xc6d   : > { %v12572_v47 = vpop.f32.mrf.mxu3  ;;  %v12581_v60 = vpop.f32.mrf.mxu2 }
 0xc6f   : > { %v12541_v22 = vpop.xlane.xlu0 %6124 }
 0xc70   : > { %14034 = vst [vmem:[#allocation47_spill] sm:$0xff] %v12541_v22 }
 0xc74   : > { %6198 = vmax.xlane.f32.xlu0 %v12523_v42 }
 0xc75   : > { %v12583_v18 = vpop.f32.mrf.mxu3 }
 0xc77   : > { %v12539_v31 = vpop.xlane.xlu1 %6154  ;;  %v12559_v61 = vpop.xlane.xlu0 %6126 }
 0xc78   : > { %14033 = vst [vmem:[#allocation31_spill] sm:$0xff] %v12539_v31 }
 0xc79   : > { %14037 = vst [vmem:[#allocation117_spill] sm:$0xff] %v12559_v61 }
 0xc7c   : > { %6230 = vmax.xlane.f32.xlu0 %v12520_v26 }
 0xc7d   : > { %v12596_v21 = vpop.f32.mrf.mxu3 }
 0xc7e   : > { %6244 = vmax.xlane.f32.xlu1 %v12596_v21 }
 0xc7f   : > { %v12548_v35 = vpop.xlane.xlu1 %6128  ;;  %v12552_v34 = vpop.xlane.xlu2 %6156 }
 0xc80   : > { %14035 = vst [vmem:[#allocation103_spill] sm:$0xff] %v12548_v35 }
 0xc81   : > { %14036 = vst [vmem:[#allocation127_spill] sm:$0xff] %v12552_v34  ;;  %v5921_v34 = vunpack.c.l.b16 %v5633_v37 }
 0xc83   : > { %v5929_v50 = vpack.c.b16 %v5921_v34, %v5920_v3  ;;  %v12594_v34 = vpop.f32.mrf.mxu2  ;;  %v12606_v3 = vpop.f32.mrf.mxu0 }
 0xc84   : > { %6142 = vmax.xlane.f32.xlu0 %v12550_v8  ;;  %6210 = vmax.xlane.f32.xlu2 %v12594_v34 }
 0xc85   : > { %7452 = vmatmul.msk.bf16.gmra.mxu2 %vm1052_vm15, %v5929_v50 }
 0xc87   : > { %v12574_v19 = vpop.xlane.xlu2 %6158 }
 0xc88   : > { %14039 = vst [vmem:[#allocation43_spill] sm:$0xff] %v12574_v19 }
 0xc89   : > { %v12565_v6 = vpop.xlane.xlu1 %6186 }
 0xc8a   : > { %14038 = vst [vmem:[#allocation85_spill] sm:$0xff] %v12565_v6 }
 0xc8b   : > { %v12636_v40 = vpop.f32.mrf.mxu0 }
 0xc8c   : > { %6174 = vmax.xlane.f32.xlu0 %v12567_v30 }
 0xc8f   : > { %v12576_v41 = vpop.xlane.xlu0 %6160 }
 0xc90   : > { %14040 = vst [vmem:[#allocation16_spill] sm:$0xff] %v12576_v41 }
 0xc91   : > { %v12578_v1 = vpop.xlane.xlu1 %6220 }
 0xc92   : > { %14041 = vst [vmem:[#allocation12_spill] sm:$0xff] %v12578_v1 }
 0xc94   : > { %6200 = vmax.xlane.f32.xlu0 %v12534_v2 }
 0xc97   : > { %v12587_v10 = vpop.xlane.xlu2 %6162  ;;  %v12589_v39 = vpop.xlane.xlu0 %6218 }
 0xc98   : > { %14042 = vst [vmem:[#allocation13_spill] sm:$0xff] %v12587_v10 }
 0xc99   : > { %14043 = vst [vmem:[#allocation14_spill] sm:$0xff] %v12589_v39  ;;  %v12591_v9 = vpop.xlane.xlu1 %6132 }
 0xc9a   : > { %14044 = vst [vmem:[#allocation15_spill] sm:$0xff] %v12591_v9 }
 0xc9c   : > { %6232 = vmax.xlane.f32.xlu0 %v12528_v16 }
 0xc9f   : > { %v12600_v49 = vpop.xlane.xlu2 %6188  ;;  %v12602_v38 = vpop.xlane.xlu0 %6130 }
 0xca0   : > { %14045 = vst [vmem:[#allocation55_spill] sm:$0xff] %v12600_v49 }
 0xca1   : > { %14046 = vst [vmem:[#allocation41_spill] sm:$0xff] %v12602_v38  ;;  %v12604_v37 = vpop.xlane.xlu1 %6190 }
 0xca4   : > { %6144 = vmax.xlane.f32.xlu0 %v12606_v3 }
 0xca7   : > { %v12609_v50 = vpop.xlane.xlu2 %6166  ;;  %v12611_v55 = vpop.xlane.xlu0 %6164 }
 0xca8   : > { %14047 = vst [vmem:[#allocation57_spill] sm:$0xff] %v12609_v50 }
 0xca9   : > { %14048 = vst [vmem:[#allocation26_spill] sm:$0xff] %v12611_v55  ;;  %v12615_v22 = vpop.xlane.xlu1 %6224 }
 0xcac   : > { %6176 = vmax.xlane.f32.xlu0 %v12613_v13 }
 0xcaf   : > { %v12618_v14 = vpop.xlane.xlu2 %6192  ;;  %v12620_v35 = vpop.xlane.xlu0 %6222 }
 0xcb0   : > { %14049 = vst [vmem:[#allocation93_spill] sm:$0xff] %v12618_v14 }
 0xcb1   : > { %14050 = vst [vmem:[#allocation114_spill] sm:$0xff] %v12620_v35  ;;  %v12623_v20 = vpop.xlane.xlu1 %6136 }
 0xcb4   : > { %6202 = vmax.xlane.f32.xlu0 %v12544_v0 }
 0xcb7   : > { %v6195_v19 = vpop.xlane.xlu2 %6194  ;;  %v12626_v31 = vpop.xlane.xlu0 %6134 }
 0xcb8   : > { %v6286_v53 = vsub.f32 %v12498_v11, %v6195_v19 }
 0xcb9   : > { %v12629_v39 = vpop.xlane.xlu1 %6226 }
 0xcba   : > { %v6386_v44 = vmul.f32 1.442695, %v6286_v53 }
 0xcbc   : > { %8975 = vpow2.f32 %v6386_v44  ;;  %6234 = vmax.xlane.f32.xlu0 %v12537_v56  ;;  %v12640_v44 = vpop.f32.mrf.mxu1 }
 0xcbf   : > { %v12631_v4 = vpop.xlane.xlu0 %6168  ;;  %v12724_v9 = vpop.xlane.xlu2 %6228 }
 0xcc1   : > { %v6173_v11 = vpop.xlane.xlu1 %6172 }
 0xcc2   : > { %v12633_v1 = vpop.eup %8975  ;;  %v6275_v29 = vsub.f32 %v12509_v63, %v6173_v11 }
 0xcc3   : > { %14051 = vst [vmem:[#allocation74_spill] sm:$0xff] %v12633_v1  ;;  %6514 = vadd.xlane.f32.xlu2 %v12633_v1 }
 0xcc4   : > { %6146 = vmax.xlane.f32.xlu0 %v12636_v40  ;;  %v6364_v36 = vmul.f32 1.442695, %v6275_v29  ;;  %v12657_v29 = vpop.f32.mrf.mxu0  ;;  %v12664_v6 = vpop.f32.mrf.mxu1 }
 0xcc7   : > { %v6139_v41 = vpop.xlane.xlu0 %6138 }
 0xcc8   : > { %v6258_v19 = vsub.f32 %v12512_v5, %v6139_v41 }
 0xcca   : > { %v6330_v53 = vmul.f32 1.442695, %v6258_v19 }
 0xccc   : > { %8977 = vpow2.f32 %v6330_v53  ;;  %6178 = vmax.xlane.f32.xlu0 %v12640_v44 }
 0xccd   : > { %8979 = vpow2.f32 %v6364_v36 }
 0xccf   : > { %v12644_v55 = vpop.xlane.xlu0 %6170 }
 0xcd2   : > { %v12646_v1 = vpop.eup %8977 }
 0xcd3   : > { %6458 = vadd.xlane.f32.xlu1 %v12646_v1  ;;  %v12652_v41 = vpop.eup %8979 }
 0xcd4   : > { %6204 = vmax.xlane.f32.xlu0 %v12555_v51 }
 0xcd7   : > { %v12650_v5 = vpop.xlane.xlu0 %6196 }
 0xcdb   : > { %6492 = vadd.xlane.f32.xlu1 %v12652_v41 }
 0xcdc   : > { %6236 = vmax.xlane.f32.xlu0 %v12546_v28 }
 0xcdf   : > { %v6141_v63 = vpop.xlane.xlu0 %6140 }
 0xce0   : > { %v6259_v19 = vsub.f32 %v12525_v45, %v6141_v63 }
 0xce2   : > { %v6332_v11 = vmul.f32 1.442695, %v6259_v19 }
 0xce4   : > { %8981 = vpow2.f32 %v6332_v11  ;;  %6148 = vmax.xlane.f32.xlu0 %v12657_v29 }
 0xce7   : > { %v12660_v36 = vpop.xlane.xlu0 %6198 }
 0xcea   : > { %v12662_v53 = vpop.eup %8981 }
 0xceb   : > { %6460 = vadd.xlane.f32.xlu2 %v12662_v53 }
 0xcec   : > { %6180 = vmax.xlane.f32.xlu0 %v12664_v6 }
 0xcef   : > { %v6231_v52 = vpop.xlane.xlu0 %6230 }
 0xcf0   : > { %v6304_v61 = vsub.f32 %v12520_v26, %v6231_v52  ;;  %v12678_v26 = vpop.f32.mrf.mxu0 }
 0xcf2   : > { %v6422_v45 = vmul.f32 1.442695, %v6304_v61 }
 0xcf4   : > { %8983 = vpow2.f32 %v6422_v45  ;;  %6206 = vmax.xlane.f32.xlu0 %v12570_v46 }
 0xcf7   : > { %v6143_v63 = vpop.xlane.xlu0 %6142 }
 0xcf8   : > { %v6260_v19 = vsub.f32 %v12550_v8, %v6143_v63  ;;  %v12685_v63 = vpop.f32.mrf.mxu1 }
 0xcfa   : > { %v12671_v11 = vpop.eup %8983  ;;  %v6334_v32 = vmul.f32 1.442695, %v6260_v19 }
 0xcfb   : > { %14052 = vst [vmem:[#allocation35_spill] sm:$0xff] %v12671_v11  ;;  %6550 = vadd.xlane.f32.xlu2 %v12671_v11 }
 0xcfc   : > { %8985 = vpow2.f32 %v6334_v32  ;;  %6238 = vmax.xlane.f32.xlu0 %v12557_v59 }
 0xcff   : > { %v6175_v38 = vpop.xlane.xlu0 %6174 }
 0xd00   : > { %v6276_v62 = vsub.f32 %v12567_v30, %v6175_v38  ;;  %v12705_v15 = vpop.f32.mrf.mxu1 }
 0xd02   : > { %v12676_v49 = vpop.eup %8985  ;;  %v6366_v52 = vmul.f32 1.442695, %v6276_v62 }
 0xd03   : > { %14053 = vst [vmem:[#allocation61_spill] sm:$0xff] %v12676_v49  ;;  %6462 = vadd.xlane.f32.xlu2 %v12676_v49 }
 0xd04   : > { %8987 = vpow2.f32 %v6366_v52  ;;  %6150 = vmax.xlane.f32.xlu0 %v12678_v26 }
 0xd07   : > { %v6201_v8 = vpop.xlane.xlu0 %6200 }
 0xd08   : > { %v6289_v61 = vsub.f32 %v12534_v2, %v6201_v8  ;;  %v12699_v8 = vpop.f32.mrf.mxu0 }
 0xd0a   : > { %v12683_v45 = vpop.eup %8987  ;;  %v6392_v32 = vmul.f32 1.442695, %v6289_v61 }
 0xd0b   : > { %6494 = vadd.xlane.f32.xlu1 %v12683_v45 }
 0xd0c   : > { %8989 = vpow2.f32 %v6392_v32  ;;  %6182 = vmax.xlane.f32.xlu0 %v12685_v63 }
 0xd0f   : > { %v12689_v30 = vpop.xlane.xlu0 %6232 }
 0xd12   : > { %v12691_v62 = vpop.eup %8989 }
 0xd13   : > { %14054 = vst [vmem:[#allocation121_spill] sm:$0xff] %v12691_v62  ;;  %6520 = vadd.xlane.f32.xlu1 %v12691_v62  ;;  %v12729_v62 = vpop.f32.mrf.mxu3 }
 0xd14   : > { %6208 = vmax.xlane.f32.xlu0 %v12581_v60 }
 0xd17   : > { %v12695_v38 = vpop.xlane.xlu0 %6144 }
 0xd1b   : > { %v12751_v50 = vpop.f32.mrf.mxu3 }
 0xd1c   : > { %6240 = vmax.xlane.f32.xlu0 %v12572_v47 }
 0xd1f   : > { %v6177_v2 = vpop.xlane.xlu0 %6176 }
 0xd20   : > { %v6277_v19 = vsub.f32 %v12613_v13, %v6177_v2 }
 0xd22   : > { %v6368_v52 = vmul.f32 1.442695, %v6277_v19 }
 0xd24   : > { %8991 = vpow2.f32 %v6368_v52  ;;  %6152 = vmax.xlane.f32.xlu0 %v12699_v8 }
 0xd27   : > { %v6203_v61 = vpop.xlane.xlu0 %6202 }
 0xd28   : > { %v6290_v32 = vsub.f32 %v12544_v0, %v6203_v61  ;;  %v12717_v0 = vpop.f32.mrf.mxu2 }
 0xd2a   : > { %v12703_v49 = vpop.eup %8991  ;;  %v6394_v11 = vmul.f32 1.442695, %v6290_v32 }
 0xd2b   : > { %6496 = vadd.xlane.f32.xlu2 %v12703_v49 }
 0xd2c   : > { %8993 = vpow2.f32 %v6394_v11  ;;  %6184 = vmax.xlane.f32.xlu0 %v12705_v15 }
 0xd2f   : > { %v12709_v13 = vpop.xlane.xlu0 %6234 }
 0xd30   : > { %v12721_v32 = vpop.f32.mrf.mxu2 }
 0xd32   : > { %v12711_v2 = vpop.eup %8993 }
 0xd33   : > { %6522 = vadd.xlane.f32.xlu1 %v12711_v2 }
 0xd34   : > { %6242 = vmax.xlane.f32.xlu0 %v12583_v18 }
 0xd37   : > { %v12715_v19 = vpop.xlane.xlu0 %6146 }
 0xd3c   : > { %6212 = vmax.xlane.f32.xlu0 %v12717_v0 }
 0xd3f   : > { %v6179_v52 = vpop.xlane.xlu0 %6178 }
 0xd40   : > { %v6278_v61 = vsub.f32 %v12640_v44, %v6179_v52  ;;  %v12733_v44 = vpop.xlane.xlu2 %6210  ;;  %v12735_v52 = vpop.xlane.xlu1 %6244 }
 0xd42   : > { %v6370_v11 = vmul.f32 1.442695, %v6278_v61 }
 0xd44   : > { %8995 = vpow2.f32 %v6370_v11  ;;  %6214 = vmax.xlane.f32.xlu0 %v12721_v32 }
 0xd47   : > { %v6205_v27 = vpop.xlane.xlu0 %6204 }
 0xd48   : > { %v6291_v14 = vsub.f32 %v12555_v51, %v6205_v27  ;;  %v12740_v51 = vpop.f32.mrf.mxu2 }
 0xd4a   : > { %v12727_v7 = vpop.eup %8995  ;;  %v6396_v35 = vmul.f32 1.442695, %v6291_v14  ;;  %v6274_v14 = vsub.f32 %v12500_v43, %v12644_v55  ;;  %v6288_v43 = vsub.f32 %v12523_v42, %v12660_v36  ;;  %v6305_v42 = vsub.f32 %v12528_v16, %v12689_v30 }
 0xd4b   : > { %14055 = vst [vmem:[#allocation70_spill] sm:$0xff] %v12727_v7  ;;  %6498 = vadd.xlane.f32.xlu2 %v12727_v7  ;;  %v6459_v7 = vpop.xlane.xlu1 %6458 }
 0xd4c   : > { %8997 = vpow2.f32 %v6396_v35  ;;  %6246 = vmax.xlane.f32.xlu0 %v12729_v62  ;;  %v12746_v35 = vpop.xlane.xlu2 %6514 }
 0xd4d   : > { %14056 = vst [vmem:[#allocation79_spill] sm:$0xff] %v12746_v35 }
 0xd4f   : > { %v6237_v61 = vpop.xlane.xlu0 %6236 }
 0xd50   : > { %v6307_v11 = vsub.f32 %v12546_v28, %v6237_v61  ;;  %v6362_v28 = vmul.f32 1.442695, %v6274_v14 }
 0xd52   : > { %v12738_v54 = vpop.eup %8997  ;;  %v6428_v27 = vmul.f32 1.442695, %v6307_v11 }
 0xd53   : > { %6524 = vadd.xlane.f32.xlu2 %v12738_v54 }
 0xd54   : > { %8999 = vpow2.f32 %v6428_v27  ;;  %6216 = vmax.xlane.f32.xlu0 %v12740_v51 }
 0xd55   : > { %9001 = vrcp.f32 %v6459_v7 }
 0xd57   : > { %v6149_v10 = vpop.xlane.xlu0 %6148 }
 0xd58   : > { %v6263_v48 = vsub.f32 %v12657_v29, %v6149_v10  ;;  %v6390_v29 = vmul.f32 1.442695, %v6288_v43 }
 0xd5a   : > { %v12749_v61 = vpop.eup %8999  ;;  %v6340_v11 = vmul.f32 1.442695, %v6263_v48 }
 0xd5b   : > { %14057 = vst [vmem:[#allocation89_spill] sm:$0xff] %v12749_v61  ;;  %6556 = vadd.xlane.f32.xlu1 %v12749_v61  ;;  %v9002_v27 = vpop.eup %9001  ;;  %v6424_v61 = vmul.f32 1.442695, %v6305_v42 }
 0xd5c   : > { %9003 = vpow2.f32 %v6340_v11  ;;  %6248 = vmax.xlane.f32.xlu0 %v12751_v50  ;;  %v6642_v48 = vmul.f32 %v9002_v27, %v12646_v1 }
 0xd5d   : > { %9005 = vpow2.f32 %v6362_v28 }
 0xd5e   : > { %v6461_v55 = vpop.xlane.xlu2 %6460  ;;  %v6706_v28 = vpack.c.bf16 %v6642_v48, %v6642_v48 }
 0xd5f   : > { %9007 = vrcp.f32 %v6461_v55  ;;  %v6181_v10 = vpop.xlane.xlu0 %6180 }
 0xd60   : > { %9009 = vpow2.f32 %v6390_v29  ;;  %v12768_v27 = vunpack.c.l.b16 %v6706_v28 }
 0xd62   : > { %v12757_v7 = vpop.eup %9003 }
 0xd63   : > { %14058 = vst [vmem:[#allocation110_spill] sm:$0xff] %v12757_v7  ;;  %v12760_v14 = vpop.eup %9005  ;;  %6468 = vadd.xlane.f32.xlu1 %v12757_v7 }
 0xd64   : > { %6490 = vadd.xlane.f32.xlu0 %v12760_v14 }
 0xd65   : > { %v9008_v11 = vpop.eup %9007 }
 0xd66   : > { %v6643_v36 = vmul.f32 %v9008_v11, %v12662_v53  ;;  %v12772_v7 = vpop.eup %9009  ;;  %v6261_v53 = vsub.f32 %v12606_v3, %v12695_v38 }
 0xd67   : > { %v6207_v55 = vpop.xlane.xlu0 %6206 }
 0xd68   : > { %v6292_v43 = vsub.f32 %v12570_v46, %v6207_v55  ;;  %v6707_v35 = vpack.c.bf16 %v6643_v36, %v6643_v36  ;;  %v6336_v29 = vmul.f32 1.442695, %v6261_v53  ;;  %v6262_v55 = vsub.f32 %v12636_v40, %v12715_v19  ;;  %v12810_v19 = vpop.xlane.xlu1 %6492 }
 0xd6a   : > { %v6398_v1 = vmul.f32 1.442695, %v6292_v43  ;;  %v12770_v23 = vunpack.c.l.b16 %v6707_v35 }
 0xd6c   : > { %9011 = vpow2.f32 %v6398_v1  ;;  %6518 = vadd.xlane.f32.xlu0 %v12772_v7  ;;  %v6279_v1 = vsub.f32 %v12664_v6, %v6181_v10 }
 0xd6d   : > { %9013 = vpow2.f32 %v6424_v61  ;;  %v6306_v61 = vsub.f32 %v12537_v56, %v12709_v13  ;;  %v6338_v56 = vmul.f32 1.442695, %v6262_v55 }
 0xd6f   : > { %v6239_v46 = vpop.xlane.xlu0 %6238  ;;  %v6426_v38 = vmul.f32 1.442695, %v6306_v61 }
 0xd70   : > { %v6308_v30 = vsub.f32 %v12557_v59, %v6239_v46  ;;  %v6372_v46 = vmul.f32 1.442695, %v6279_v1 }
 0xd72   : > { %v12780_v48 = vpop.eup %9011  ;;  %v6430_v35 = vmul.f32 1.442695, %v6308_v30 }
 0xd73   : > { %v12782_v11 = vpop.eup %9013  ;;  %6526 = vadd.xlane.f32.xlu2 %v12780_v48 }
 0xd74   : > { %9015 = vpow2.f32 %v6430_v35  ;;  %6552 = vadd.xlane.f32.xlu0 %v12782_v11 }
 0xd75   : > { %9017 = vpow2.f32 %v6336_v29  ;;  %v12806_v29 = vpop.xlane.xlu2 %6550 }
 0xd77   : > { %v6151_v42 = vpop.xlane.xlu0 %6150 }
 0xd78   : > { %v6264_v3 = vsub.f32 %v12678_v26, %v6151_v42 }
 0xd7a   : > { %v12789_v59 = vpop.eup %9015  ;;  %v6342_v36 = vmul.f32 1.442695, %v6264_v3 }
 0xd7b   : > { %v12791_v28 = vpop.eup %9017  ;;  %6558 = vadd.xlane.f32.xlu1 %v12789_v59 }
 0xd7c   : > { %9019 = vpow2.f32 %v6342_v36  ;;  %6464 = vadd.xlane.f32.xlu0 %v12791_v28 }
 0xd7d   : > { %9021 = vpow2.f32 %v6426_v38  ;;  %v12817_v10 = vpop.xlane.xlu2 %6462 }
 0xd7e   : > { %9023 = vpow2.f32 %v6338_v56  ;;  %v6495_v36 = vpop.xlane.xlu1 %6494 }
 0xd7f   : > { %v6183_v43 = vpop.xlane.xlu0 %6182  ;;  %9025 = vpow2.f32 %v6372_v46  ;;  %v6294_v46 = vsub.f32 %v12594_v34, %v12733_v44  ;;  %v6311_v34 = vsub.f32 %v12596_v21, %v12735_v52 }
 0xd80   : > { %v6280_v40 = vsub.f32 %v12685_v63, %v6183_v43 }
 0xd82   : > { %v12797_v13 = vpop.eup %9019  ;;  %v6374_v42 = vmul.f32 1.442695, %v6280_v40  ;;  %v6402_v40 = vmul.f32 1.442695, %v6294_v46 }
 0xd83   : > { %v12799_v26 = vpop.eup %9021  ;;  %6470 = vadd.xlane.f32.xlu1 %v12797_v13 }
 0xd84   : > { %6554 = vadd.xlane.f32.xlu0 %v12799_v26  ;;  %v12804_v30 = vpop.eup %9023 }
 0xd85   : > { %v12813_v38 = vpop.eup %9025 }
 0xd87   : > { %v6209_v53 = vpop.xlane.xlu0 %6208 }
 0xd88   : > { %v6293_v6 = vsub.f32 %v12581_v60, %v6209_v53 }
 0xd8a   : > { %v6400_v43 = vmul.f32 1.442695, %v6293_v6 }
 0xd8c   : > { %6466 = vadd.xlane.f32.xlu0 %v12804_v30 }
 0xd8f   : > { %v6241_v35 = vpop.xlane.xlu0 %6240 }
 0xd90   : > { %v6309_v61 = vsub.f32 %v12572_v47, %v6241_v35 }
 0xd92   : > { %v6432_v3 = vmul.f32 1.442695, %v6309_v61 }
 0xd94   : > { %9027 = vpow2.f32 %v6432_v3  ;;  %6500 = vadd.xlane.f32.xlu0 %v12813_v38 }
 0xd95   : > { %9029 = vpow2.f32 %v6374_v42 }
 0xd96   : > { %9031 = vrcp.f32 %v6495_v36 }
 0xd97   : > { %v6153_v55 = vpop.xlane.xlu0 %6152 }
 0xd98   : > { %v6265_v63 = vsub.f32 %v12699_v8, %v6153_v55  ;;  %v6436_v55 = vmul.f32 1.442695, %v6311_v34 }
 0xd9a   : > { %v12820_v56 = vpop.eup %9027  ;;  %v6344_v47 = vmul.f32 1.442695, %v6265_v63 }
 0xd9b   : > { %v12822_v1 = vpop.eup %9029  ;;  %6560 = vadd.xlane.f32.xlu2 %v12820_v56 }
 0xd9c   : > { %9033 = vpow2.f32 %v6344_v47  ;;  %6502 = vadd.xlane.f32.xlu0 %v12822_v1  ;;  %v9032_v53 = vpop.eup %9031 }
 0xd9d   : > { %9035 = vpow2.f32 %v6400_v43  ;;  %v6660_v3 = vmul.f32 %v9032_v53, %v12683_v45 }
 0xd9e   : > { %v6497_v60 = vpop.xlane.xlu2 %6496 }
 0xd9f   : > { %9037 = vrcp.f32 %v6497_v60  ;;  %v6185_v8 = vpop.xlane.xlu0 %6184 }
 0xda0   : > { %v6281_v35 = vsub.f32 %v12705_v15, %v6185_v8  ;;  %9039 = vpow2.f32 %v6402_v40  ;;  %v6724_v15 = vpack.c.bf16 %v6660_v3, %v6660_v3 }
 0xda2   : > { %v12829_v61 = vpop.eup %9033  ;;  %v6376_v42 = vmul.f32 1.442695, %v6281_v35  ;;  %v12844_v21 = vunpack.c.l.b16 %v6724_v15 }
 0xda3   : > { %v12832_v6 = vpop.eup %9035  ;;  %6472 = vadd.xlane.f32.xlu2 %v12829_v61 }
 0xda4   : > { %9041 = vpow2.f32 %v6376_v42  ;;  %6528 = vadd.xlane.f32.xlu0 %v12832_v6  ;;  %v6521_v42 = vpop.xlane.xlu1 %6520 }
 0xda5   : > { %v9038_v44 = vpop.eup %9037  ;;  %9043 = vpow2.f32 %v6436_v55 }
 0xda6   : > { %v6661_v36 = vmul.f32 %v9038_v44, %v12703_v49  ;;  %v12840_v47 = vpop.eup %9039 }
 0xda7   : > { %v6243_v63 = vpop.xlane.xlu0 %6242 }
 0xda8   : > { %v6310_v43 = vsub.f32 %v12583_v18, %v6243_v63  ;;  %v6725_v45 = vpack.c.bf16 %v6661_v36, %v6661_v36 }
 0xdaa   : > { %v12842_v46 = vpop.eup %9041  ;;  %v6434_v60 = vmul.f32 1.442695, %v6310_v43  ;;  %v12846_v52 = vunpack.c.l.b16 %v6725_v45 }
 0xdab   : > { %6530 = vadd.xlane.f32.xlu2 %v12840_v47  ;;  %6504 = vadd.xlane.f32.xlu1 %v12842_v46  ;;  %v12853_v40 = vpop.eup %9043 }
 0xdac   : > { %9045 = vpow2.f32 %v6434_v60  ;;  %v6302_v60 = vsub.f32 %v12496_v25, %v12629_v39  ;;  %v6287_v25 = vsub.f32 %v12518_v12, %v12650_v5 }
 0xdaf   : > { %v6213_v18 = vpop.xlane.xlu0 %6212 }
 0xdb0   : > { %v6295_v53 = vsub.f32 %v12717_v0, %v6213_v18  ;;  %v6523_v0 = vpop.xlane.xlu1 %6522 }
 0xdb2   : > { %v12855_v8 = vpop.eup %9045  ;;  %v6404_v35 = vmul.f32 1.442695, %v6295_v53  ;;  %v6418_v53 = vmul.f32 1.442695, %v6302_v60 }
 0xdb3   : > { %6564 = vadd.xlane.f32.xlu2 %v12853_v40  ;;  %6562 = vadd.xlane.f32.xlu1 %v12855_v8 }
 0xdb4   : > { %9047 = vpow2.f32 %v6404_v35 }
 0xdb7   : > { %v6215_v3 = vpop.xlane.xlu0 %6214 }
 0xdb8   : > { %v6296_v34 = vsub.f32 %v12721_v32, %v6215_v3 }
 0xdba   : > { %v12860_v44 = vpop.eup %9047  ;;  %v6406_v36 = vmul.f32 1.442695, %v6296_v34 }
 0xdbb   : > { %6532 = vadd.xlane.f32.xlu0 %v12860_v44 }
 0xdbc   : > { %9049 = vpow2.f32 %v6406_v36 }
 0xdbd   : > { %9051 = vrcp.f32 %v6523_v0 }
 0xdbe   : > { %v12863_v15 = vpop.xlane.xlu2 %6498 }
 0xdbf   : > { %v6247_v55 = vpop.xlane.xlu0 %6246 }
 0xdc0   : > { %v6312_v63 = vsub.f32 %v12729_v62, %v6247_v55  ;;  %v6257_v62 = vsub.f32 %v12493_v58, %v12623_v20 }
 0xdc2   : > { %v12866_v43 = vpop.eup %9049  ;;  %v6438_v45 = vmul.f32 1.442695, %v6312_v63  ;;  %v6328_v55 = vmul.f32 1.442695, %v6257_v62 }
 0xdc3   : > { %6534 = vadd.xlane.f32.xlu2 %v12866_v43  ;;  %v9052_v18 = vpop.eup %9051 }
 0xdc4   : > { %9053 = vpow2.f32 %v6438_v45  ;;  %v6674_v0 = vmul.f32 %v9052_v18, %v12711_v2  ;;  %v6388_v45 = vmul.f32 1.442695, %v6287_v25 }
 0xdc6   : > { %v6525_v32 = vpop.xlane.xlu2 %6524 }
 0xdc7   : > { %9055 = vrcp.f32 %v6525_v32  ;;  %v6217_v35 = vpop.xlane.xlu0 %6216 }
 0xdc8   : > { %v6297_v3 = vsub.f32 %v12740_v51, %v6217_v35  ;;  %9057 = vpow2.f32 %v6418_v53  ;;  %v6738_v51 = vpack.c.bf16 %v6674_v0, %v6674_v0  ;;  %v6303_v53 = vsub.f32 %v12505_v57, %v12724_v9 }
 0xdca   : > { %v12874_v34 = vpop.eup %9053  ;;  %v6408_v36 = vmul.f32 1.442695, %v6297_v3  ;;  %v12887_v5 = vunpack.c.l.b16 %v6738_v51  ;;  %v6420_v0 = vmul.f32 1.442695, %v6303_v53 }
 0xdcb   : > { %6566 = vadd.xlane.f32.xlu1 %v12874_v34 }
 0xdcc   : > { %9059 = vpow2.f32 %v6408_v36 }
 0xdcd   : > { %v9056_v39 = vpop.eup %9055  ;;  %9061 = vpow2.f32 %v6328_v55  ;;  %v14062_v55 = vld [vmem:[#allocation104_spill] sm:$0xff] }
 0xdce   : > { %v6675_v63 = vmul.f32 %v9056_v39, %v12738_v54  ;;  %v12882_v32 = vpop.eup %9057  ;;  %9063 = vrcp.f32 %v12810_v19  ;;  %v6284_v54 = vsub.f32 %v12475_v17, %v12604_v37  ;;  %v14061_v39 = vld [vmem:[#allocation57_spill] sm:$0xff] }
 0xdcf   : > { %v6249_v60 = vpop.xlane.xlu0 %6248  ;;  %14059 = vst [vmem:[#allocation90_spill] sm:$0xff] %v12882_v32  ;;  %9065 = vpow2.f32 %v6388_v45 }
 0xdd0   : > { %v6313_v20 = vsub.f32 %v12751_v50, %v6249_v60  ;;  %v6739_v58 = vpack.c.bf16 %v6675_v63, %v6675_v63  ;;  %v6256_v50 = vsub.f32 %v12480_v24, %v12626_v31  ;;  %v6382_v3 = vmul.f32 1.442695, %v6284_v54  ;;  %v14060_v31 = vld [vmem:[#allocation48_spill] sm:$0xff]  ;;  %v14063_v54 = vld [vmem:[#allocation13_spill] sm:$0xff] }
 0xdd1   : > { %v6301_v24 = vsub.f32 %v12484_v33, %v12615_v22  ;;  %v6273_v9 = vsub.f32 %v14060_v31, %v12631_v4  ;;  %v6272_v63 = vsub.f32 %v14062_v55, %v14061_v39  ;;  %v14069_v31 = vld [vmem:[#allocation34_spill] sm:$0xff] }
 0xdd2   : > { %v12884_v2 = vpop.eup %9059  ;;  %v6440_v12 = vmul.f32 1.442695, %v6313_v20  ;;  %v12889_v18 = vunpack.c.l.b16 %v6739_v58  ;;  %v6326_v37 = vmul.f32 1.442695, %v6256_v50  ;;  %v14064_v50 = vld [vmem:[#allocation21_spill] sm:$0xff] }
 0xdd3   : > { %6546 = vadd.xlane.f32.xlu1 %v12882_v32  ;;  %6536 = vadd.xlane.f32.xlu0 %v12884_v2  ;;  %v12901_v35 = vpop.eup %9061  ;;  %v6416_v51 = vmul.f32 1.442695, %v6301_v24  ;;  %v6360_v20 = vmul.f32 1.442695, %v6273_v9  ;;  %v6358_v58 = vmul.f32 1.442695, %v6272_v63  ;;  %v6270_v53 = vsub.f32 %v14064_v50, %v14063_v54 }
 0xdd4   : > { %9067 = vpow2.f32 %v6440_v12  ;;  %v9064_v17 = vpop.eup %9063  ;;  %v14067_v24 = vld [vmem:[#allocation99_spill] sm:$0xff]  ;;  %v14072_v50 = vld [vmem:[#allocation64_spill] sm:$0xff]  ;;  %v14100_v32 = vld [vmem:[#allocation118_spill] sm:$0xff] }
 0xdd5   : > { %v12903_v36 = vpop.eup %9065  ;;  %v6659_v57 = vmul.f32 %v9064_v17, %v12652_v41  ;;  %v14065_v17 = vld [vmem:[#allocation121_spill] sm:$0xff]  ;;  %v6354_v63 = vmul.f32 1.442695, %v6270_v53  ;;  %v14071_v54 = vld [vmem:[#allocation15_spill] sm:$0xff] }
 0xdd7   : > { %v6491_v62 = vpop.xlane.xlu0 %6490  ;;  %v6723_v22 = vpack.c.bf16 %v6659_v57, %v6659_v57 }
 0xdd8   : > { %9069 = vrcp.f32 %v6491_v62 }
 0xdd9   : > { %9071 = vrcp.f32 %v6521_v42  ;;  %v12931_v62 = vunpack.c.l.b16 %v6723_v22 }
 0xdda   : > { %v12905_v25 = vpop.eup %9067  ;;  %9073 = vpow2.f32 %v6382_v3 }
 0xddb   : > { %6456 = vadd.xlane.f32.xlu1 %v12901_v35  ;;  %6516 = vadd.xlane.f32.xlu0 %v12903_v36  ;;  %9075 = vpow2.f32 %v6326_v37 }
 0xddc   : > { %6568 = vadd.xlane.f32.xlu2 %v12905_v25  ;;  %9077 = vpow2.f32 %v6420_v0  ;;  %v14066_v0 = vld [vmem:[#allocation114_spill] sm:$0xff] }
 0xddd   : > { %v6300_v57 = vsub.f32 %v14067_v24, %v14066_v0 }
 0xdde   : > { %v9070_v42 = vpop.eup %9069 }
 0xddf   : > { %v6519_v45 = vpop.xlane.xlu0 %6518  ;;  %v6658_v33 = vmul.f32 %v9070_v42, %v12760_v14  ;;  %v9072_v60 = vpop.eup %9071  ;;  %v6414_v22 = vmul.f32 1.442695, %v6300_v57  ;;  %v14074_v57 = vld [vmem:[#allocation55_spill] sm:$0xff] }
 0xde0   : > { %9079 = vrcp.f32 %v6519_v45  ;;  %v12918_v41 = vpop.eup %9073  ;;  %v6673_v37 = vmul.f32 %v9072_v60, %v14065_v17  ;;  %v6255_v17 = vsub.f32 %v14072_v50, %v14071_v54  ;;  %v6557_v54 = vpop.xlane.xlu1 %6556 }
 0xde1   : > { %v6722_v12 = vpack.c.bf16 %v6658_v33, %v6658_v33  ;;  %v12920_v4 = vpop.eup %9075  ;;  %9081 = vrcp.f32 %v12806_v29  ;;  %v14068_v29 = vld [vmem:[#allocation93_spill] sm:$0xff] }
 0xde2   : > { %v12925_v3 = vpop.eup %9077  ;;  %9083 = vpow2.f32 %v6416_v51  ;;  %v6285_v9 = vsub.f32 %v14069_v31, %v14068_v29  ;;  %v6737_v45 = vpack.c.bf16 %v6673_v37, %v6673_v37  ;;  %v14073_v37 = vld [vmem:[#allocation35_spill] sm:$0xff]  ;;  %v14075_v29 = vld [vmem:[#allocation32_spill] sm:$0xff] }
 0xde3   : > { %6510 = vadd.xlane.f32.xlu1 %v12918_v41  ;;  %6454 = vadd.xlane.f32.xlu0 %v12920_v4  ;;  %v12929_v14 = vunpack.c.l.b16 %v6722_v12  ;;  %9085 = vpow2.f32 %v6360_v20  ;;  %v6283_v31 = vsub.f32 %v14075_v29, %v14074_v57 }
 0xde4   : > { %6548 = vadd.xlane.f32.xlu2 %v12925_v3  ;;  %9087 = vpow2.f32 %v6358_v58  ;;  %v6384_v20 = vmul.f32 1.442695, %v6285_v9  ;;  %v12954_v53 = vunpack.c.l.b16 %v6737_v45  ;;  %v14076_v9 = vld [vmem:[#allocation41_spill] sm:$0xff] }
 0xde6   : > { %v9080_v55 = vpop.eup %9079 }
 0xde7   : > { %v6553_v42 = vpop.xlane.xlu0 %6552  ;;  %v6672_v51 = vmul.f32 %v9080_v55, %v12772_v7  ;;  %v9082_v33 = vpop.eup %9081  ;;  %v14077_v55 = vld [vmem:[#allocation126_spill] sm:$0xff] }
 0xde8   : > { %9089 = vrcp.f32 %v6553_v42  ;;  %v12942_v60 = vpop.eup %9083  ;;  %v6688_v24 = vmul.f32 %v9082_v33, %v14073_v37  ;;  %v6254_v42 = vsub.f32 %v14077_v55, %v14076_v9  ;;  %v6380_v37 = vmul.f32 1.442695, %v6283_v31  ;;  %v14080_v9 = vld [vmem:[#allocation117_spill] sm:$0xff]  ;;  %v14081_v55 = vld [vmem:[#allocation119_spill] sm:$0xff]  ;;  %v14085_v31 = vld [vmem:[#allocation98_spill] sm:$0xff] }
 0xde9   : > { %14070 = vst [vmem:[#allocation86_spill] sm:$0xff] %v12942_v60  ;;  %v6736_v12 = vpack.c.bf16 %v6672_v51, %v6672_v51  ;;  %v12944_v58 = vpop.eup %9085  ;;  %9091 = vpow2.f32 %v6354_v63  ;;  %v6252_v63 = vsub.f32 %v14081_v55, %v14080_v9 }
 0xdea   : > { %v12948_v0 = vpop.eup %9087  ;;  %9093 = vpow2.f32 %v6414_v22  ;;  %v6752_v50 = vpack.c.bf16 %v6688_v24, %v6688_v24  ;;  %v6322_v22 = vmul.f32 1.442695, %v6254_v42  ;;  %v14084_v24 = vld [vmem:[#allocation85_spill] sm:$0xff] }
 0xdeb   : > { %6544 = vadd.xlane.f32.xlu1 %v12942_v60  ;;  %6488 = vadd.xlane.f32.xlu0 %v12944_v58  ;;  %v12952_v7 = vunpack.c.l.b16 %v6736_v12  ;;  %9095 = vpow2.f32 %v6384_v20  ;;  %v6324_v12 = vmul.f32 1.442695, %v6255_v17  ;;  %v6282_v42 = vsub.f32 %v14085_v31, %v14084_v24  ;;  %v14090_v24 = vld [vmem:[#allocation76_spill] sm:$0xff] }
 0xdec   : > { %6486 = vadd.xlane.f32.xlu2 %v12948_v0  ;;  %9097 = vrcp.f32 %v6557_v54  ;;  %v14087_v54 = vld [vmem:[#allocation63_spill] sm:$0xff]  ;;  %v6318_v9 = vmul.f32 1.442695, %v6252_v63  ;;  %v14091_v63 = vld [vmem:[#allocation89_spill] sm:$0xff]  ;;  %v14095_v60 = vld [vmem:[#allocation124_spill] sm:$0xff] }
 0xded   : > { %9099 = vpow2.f32 %v6324_v12  ;;  %v13001_v12 = vpop.xlane.xlu1 %6468 }
 0xdee   : > { %v9090_v51 = vpop.eup %9089  ;;  %9101 = vpow2.f32 %v6380_v37 }
 0xdef   : > { %v12964_v45 = vpop.xlane.xlu0 %6464  ;;  %v6689_v33 = vmul.f32 %v9090_v51, %v12782_v11  ;;  %v12967_v57 = vpop.eup %9091  ;;  %v12977_v11 = vunpack.c.l.b16 %v6752_v50  ;;  %9103 = vpow2.f32 %v6322_v22  ;;  %v14086_v51 = vld [vmem:[#allocation26_spill] sm:$0xff]  ;;  %v6378_v50 = vmul.f32 1.442695, %v6282_v42  ;;  %v14089_v22 = vld [vmem:[#allocation16_spill] sm:$0xff] }
 0xdf0   : > { %14078 = vst [vmem:[#allocation10_spill] sm:$0xff] %v12967_v57  ;;  %v12969_v19 = vpop.eup %9093  ;;  %v6269_v31 = vsub.f32 %v14090_v24, %v14089_v22  ;;  %v14092_v42 = vld [vmem:[#allocation12_spill] sm:$0xff] }
 0xdf1   : > { %v6753_v29 = vpack.c.bf16 %v6689_v33, %v6689_v33  ;;  %14079 = vst [vmem:[#allocation72_spill] sm:$0xff] %v12969_v19  ;;  %v12971_v20 = vpop.eup %9095  ;;  %v6271_v33 = vsub.f32 %v14087_v54, %v14086_v51  ;;  %v14093_v54 = vld [vmem:[#allocation6_spill] sm:$0xff] }
 0xdf2   : > { %14082 = vst [vmem:[#allocation18_spill] sm:$0xff] %v12977_v11  ;;  %v9098_v39 = vpop.eup %9097  ;;  %v6352_v22 = vmul.f32 1.442695, %v6269_v31  ;;  %v14102_v31 = vld [vmem:[#allocation83_spill] sm:$0xff] }
 0xdf3   : > { %6482 = vadd.xlane.f32.xlu1 %v12967_v57  ;;  %6542 = vadd.xlane.f32.xlu0 %v12969_v19  ;;  %v12979_v17 = vunpack.c.l.b16 %v6753_v29  ;;  %v12988_v29 = vpop.eup %9099  ;;  %v6356_v49 = vmul.f32 1.442695, %v6271_v33  ;;  %v6691_v51 = vmul.f32 %v9098_v39, %v14091_v63  ;;  %v14094_v33 = vld [vmem:[#allocation14_spill] sm:$0xff] }
 0xdf4   : > { %6512 = vadd.xlane.f32.xlu2 %v12971_v20  ;;  %v12990_v16 = vpop.eup %9101 }
 0xdf5   : > { %14083 = vst [vmem:[#allocation17_spill] sm:$0xff] %v12979_v17  ;;  %v12992_v37 = vpop.eup %9103 }
 0xdf6   : > { %14088 = vst [vmem:[#allocation115_spill] sm:$0xff] %v12990_v16 }
 0xdf7   : > { %v6555_v55 = vpop.xlane.xlu0 %6554 }
 0xdf8   : > { %9105 = vrcp.f32 %v6555_v55  ;;  %v6299_v55 = vsub.f32 %v14093_v54, %v14092_v42  ;;  %v14099_v54 = vld [vmem:[#allocation31_spill] sm:$0xff] }
 0xdf9   : > { %9107 = vpow2.f32 %v6318_v9  ;;  %v6298_v9 = vsub.f32 %v14095_v60, %v14094_v33  ;;  %v6266_v57 = vsub.f32 %v14100_v32, %v14099_v54  ;;  %v14103_v33 = vld [vmem:[#allocation103_spill] sm:$0xff] }
 0xdfa   : > { %9109 = vpow2.f32 %v6378_v50  ;;  %v6412_v11 = vmul.f32 1.442695, %v6299_v55  ;;  %v6559_v55 = vpop.xlane.xlu1 %6558 }
 0xdfb   : > { %6508 = vadd.xlane.f32.xlu1 %v12990_v16  ;;  %6452 = vadd.xlane.f32.xlu0 %v12988_v29  ;;  %9111 = vpow2.f32 %v6356_v49  ;;  %v6755_v16 = vpack.c.bf16 %v6691_v51, %v6691_v51  ;;  %v6410_v39 = vmul.f32 1.442695, %v6298_v9  ;;  %v14104_v9 = vld [vmem:[#allocation78_spill] sm:$0xff] }
 0xdfc   : > { %6450 = vadd.xlane.f32.xlu2 %v12992_v37  ;;  %9113 = vpow2.f32 %v6352_v22  ;;  %v6253_v32 = vsub.f32 %v14104_v9, %v14103_v33 }
 0xdfd   : > { %v13019_v49 = vunpack.c.l.b16 %v6755_v16  ;;  %9115 = vpow2.f32 %v6412_v11 }
 0xdfe   : > { %v9106_v19 = vpop.eup %9105  ;;  %9117 = vpow2.f32 %v6410_v39  ;;  %v14107_v39 = vld [vmem:[#allocation47_spill] sm:$0xff] }
 0xdff   : > { %v6690_v24 = vmul.f32 %v9106_v19, %v12799_v26  ;;  %v13007_v17 = vpop.eup %9107  ;;  %v6467_v60 = vpop.xlane.xlu0 %6466  ;;  %v14101_v19 = vld [vmem:[#allocation43_spill] sm:$0xff]  ;;  %9119 = vrcp.f32 %v6559_v55 }
 0xe00   : > { %14096 = vst [vmem:[#allocation20_spill] sm:$0xff] %v13007_v17  ;;  %v13009_v63 = vpop.eup %9109  ;;  %v6268_v51 = vsub.f32 %v14102_v31, %v14101_v19  ;;  %v14108_v31 = vld [vmem:[#allocation65_spill] sm:$0xff] }
 0xe01   : > { %v6754_v50 = vpack.c.bf16 %v6690_v24, %v6690_v24  ;;  %14097 = vst [vmem:[#allocation96_spill] sm:$0xff] %v13009_v63  ;;  %v13011_v42 = vpop.eup %9111  ;;  %v13028_v24 = vpop.xlane.xlu2 %6526  ;;  %v6251_v33 = vsub.f32 %v14108_v31, %v14107_v39  ;;  %v14114_v31 = vld [vmem:[#allocation112_spill] sm:$0xff] }
 0xe02   : > { %14098 = vst [vmem:[#allocation91_spill] sm:$0xff] %v13011_v42  ;;  %v6350_v54 = vmul.f32 1.442695, %v6268_v51  ;;  %v13030_v16 = vpop.eup %9113  ;;  %v14110_v51 = vld [vmem:[#allocation122_spill] sm:$0xff] }
 0xe03   : > { %6446 = vadd.xlane.f32.xlu1 %v13007_v17  ;;  %6506 = vadd.xlane.f32.xlu0 %v13009_v63  ;;  %v13017_v26 = vunpack.c.l.b16 %v6754_v50  ;;  %v6346_v50 = vmul.f32 1.442695, %v6266_v57  ;;  %14105 = vst [vmem:[#allocation116_spill] sm:$0xff] %v13030_v16  ;;  %v6320_v17 = vmul.f32 1.442695, %v6253_v32  ;;  %v13032_v19 = vpop.eup %9115  ;;  %v14109_v57 = vld [vmem:[#allocation95_spill] sm:$0xff]  ;;  %v6471_v32 = vpop.xlane.xlu1 %6470 }
 0xe04   : > { %6484 = vadd.xlane.f32.xlu2 %v13011_v42  ;;  %14106 = vst [vmem:[#allocation58_spill] sm:$0xff] %v13032_v19  ;;  %v13034_v11 = vpop.eup %9117  ;;  %v6250_v9 = vsub.f32 %v14110_v51, %v14109_v57 }
 0xe05   : > { %9121 = vpow2.f32 %v6346_v50  ;;  %v9120_v63 = vpop.eup %9119  ;;  %v6316_v50 = vmul.f32 1.442695, %v6251_v33 }
 0xe06   : > { %9123 = vpow2.f32 %v6350_v54  ;;  %v6692_v54 = vmul.f32 %v9120_v63, %v12789_v59 }
 0xe07   : > { %9125 = vpow2.f32 %v6320_v17  ;;  %v6501_v55 = vpop.xlane.xlu0 %6500 }
 0xe0b   : > { %6480 = vadd.xlane.f32.xlu1 %v13030_v16  ;;  %6540 = vadd.xlane.f32.xlu0 %v13032_v19  ;;  %v13043_v42 = vpop.eup %9121  ;;  %v6314_v16 = vmul.f32 1.442695, %v6250_v9  ;;  %v6756_v9 = vpack.c.bf16 %v6692_v54, %v6692_v54  ;;  %v14118_v54 = vld [vmem:[#allocation70_spill] sm:$0xff] }
 0xe0c   : > { %6538 = vadd.xlane.f32.xlu2 %v13034_v11  ;;  %14111 = vst [vmem:[#allocation60_spill] sm:$0xff] %v13043_v42  ;;  %v13045_v19 = vpop.eup %9123 }
 0xe0d   : > { %14112 = vst [vmem:[#allocation81_spill] sm:$0xff] %v13045_v19  ;;  %v13048_v39 = vpop.eup %9125 }
 0xe0e   : > { %v6561_v22 = vpop.xlane.xlu2 %6560 }
 0xe0f   : > { %9127 = vrcp.f32 %v6561_v22  ;;  %v14113_v22 = vld [vmem:[#allocation127_spill] sm:$0xff]  ;;  %v6503_v63 = vpop.xlane.xlu0 %6502 }
 0xe10   : > { %9129 = vrcp.f32 %v6471_v32  ;;  %v6267_v33 = vsub.f32 %v14114_v31, %v14113_v22 }
 0xe11   : > { %9131 = vpow2.f32 %v6316_v50 }
 0xe12   : > { %9133 = vpow2.f32 %v6314_v16  ;;  %v13060_v16 = vunpack.c.l.b16 %v6756_v9 }
 0xe13   : > { %6474 = vadd.xlane.f32.xlu1 %v13043_v42  ;;  %6478 = vadd.xlane.f32.xlu0 %v13045_v19  ;;  %9135 = vrcp.f32 %v6467_v60  ;;  %v6348_v42 = vmul.f32 1.442695, %v6267_v33 }
 0xe14   : > { %6448 = vadd.xlane.f32.xlu2 %v13048_v39 }
 0xe15   : > { %v9128_v17 = vpop.eup %9127 }
 0xe16   : > { %v6473_v57 = vpop.xlane.xlu2 %6472  ;;  %v6693_v51 = vmul.f32 %v9128_v17, %v12820_v56  ;;  %v9130_v59 = vpop.eup %9129 }
 0xe17   : > { %9137 = vrcp.f32 %v6473_v57  ;;  %v13057_v50 = vpop.eup %9131  ;;  %v6648_v19 = vmul.f32 %v9130_v59, %v12797_v13 }
 0xe18   : > { %v6757_v32 = vpack.c.bf16 %v6693_v51, %v6693_v51  ;;  %9139 = vrcp.f32 %v13001_v12  ;;  %v13064_v60 = vpop.eup %9133 }
 0xe19   : > { %9141 = vrcp.f32 %v6503_v63  ;;  %v9136_v56 = vpop.eup %9135  ;;  %v6712_v13 = vpack.c.bf16 %v6648_v19, %v6648_v19 }
 0xe1a   : > { %v13062_v22 = vunpack.c.l.b16 %v6757_v32  ;;  %9143 = vpow2.f32 %v6348_v42  ;;  %v6646_v9 = vmul.f32 %v9136_v56, %v12804_v30  ;;  %v14115_v42 = vld [vmem:[#allocation110_spill] sm:$0xff] }
 0xe1b   : > { %6444 = vadd.xlane.f32.xlu0 %v13057_v50  ;;  %9145 = vrcp.f32 %v12964_v45  ;;  %v6792_v59 = vunpack.c.l.b16 %v6712_v13 }
 0xe1c   : > { %6442 = vadd.xlane.f32.xlu2 %v13064_v60  ;;  %9147 = vrcp.f32 %v6501_v55 }
 0xe1d   : > { %v9138_v12 = vpop.eup %9137 }
 0xe1e   : > { %v6649_v17 = vmul.f32 %v9138_v12, %v12829_v61  ;;  %v6505_v31 = vpop.xlane.xlu1 %6504  ;;  %v9140_v33 = vpop.eup %9139  ;;  %v6710_v12 = vpack.c.bf16 %v6646_v9, %v6646_v9 }
 0xe1f   : > { %v9142_v57 = vpop.eup %9141  ;;  %9149 = vrcp.f32 %v6505_v31  ;;  %v6647_v32 = vmul.f32 %v9140_v33, %v14115_v42 }
 0xe20   : > { %v6713_v51 = vpack.c.bf16 %v6649_v17, %v6649_v17  ;;  %9151 = vrcp.f32 %v12817_v10  ;;  %v13076_v45 = vpop.eup %9143  ;;  %v6664_v61 = vmul.f32 %v9142_v57, %v12822_v1  ;;  %v229_v1 = vld [vmem:[%s13269_s2 + $0xa8] sm:$0xff] }
 0xe21   : > { %9153 = vrcp.f32 %v12863_v15  ;;  %14116 = vst [vmem:[#allocation8_spill] sm:$0xff] %v13076_v45  ;;  %v9146_v19 = vpop.eup %9145  ;;  %v6711_v30 = vpack.c.bf16 %v6647_v32, %v6647_v32 }
 0xe22   : > { %v6793_v63 = vunpack.c.l.b16 %v6713_v51  ;;  %v9148_v17 = vpop.eup %9147  ;;  %v6728_v56 = vpack.c.bf16 %v6664_v61, %v6664_v61  ;;  %v6790_v51 = vunpack.c.l.b16 %v6710_v12  ;;  %v6645_v33 = vmul.f32 %v9146_v19, %v12791_v28  ;;  %v228_v28 = vld [vmem:[%s13269_s2 + $0xa0] sm:$0xff]  ;;  %v6531_v12 = vpop.xlane.xlu2 %6530 }
 0xe23   : > { %v6663_v57 = vmul.f32 %v9148_v17, %v12813_v38  ;;  %v6791_v9 = vunpack.c.l.b16 %v6711_v30 }
 0xe24   : > { %6476 = vadd.xlane.f32.xlu2 %v13076_v45  ;;  %v6801_v55 = vpack.c.b16 %v6793_v63, %v6792_v59  ;;  %v14117_v59 = vld [vmem:[#allocation61_spill] sm:$0xff]  ;;  %v6709_v19 = vpack.c.bf16 %v6645_v33, %v6645_v33 }
 0xe25   : > { %v9150_v31 = vpop.eup %9149 }
 0xe26   : > { %6810 = vmatpush.bf16.xpose.msra.mxu0 %v6801_v55  ;;  %v9152_v10 = vpop.eup %9151  ;;  %v6665_v15 = vmul.f32 %v9150_v31, %v12842_v46  ;;  %v6853_v55 = vunpack.c.l.b16 %v6728_v56  ;;  %v6800_v46 = vpack.c.b16 %v6791_v9, %v6790_v51  ;;  %v6789_v17 = vunpack.c.l.b16 %v6709_v19  ;;  %v6563_v33 = vpop.xlane.xlu1 %6562 }
 0xe27   : > { %v9154_v13 = vpop.eup %9153  ;;  %v6644_v63 = vmul.f32 %v9152_v10, %v14117_v59  ;;  %v14119_v59 = vpack.c.b16 %v12770_v23, %v12768_v27 }
 0xe28   : > { %v6729_v42 = vpack.c.bf16 %v6665_v15, %v6665_v15  ;;  %v6662_v61 = vmul.f32 %v9154_v13, %v14118_v54  ;;  %v6727_v15 = vpack.c.bf16 %v6663_v57, %v6663_v57  ;;  %v231_v13 = vld [vmem:[%s13269_s2 + $0xb8] sm:$0xff]  ;;  %v230_v57 = vld [vmem:[%s13269_s2 + $0xb0] sm:$0xff] }
 0xe29   : > { %v6708_v45 = vpack.c.bf16 %v6644_v63, %v6644_v63 }
 0xe2a   : > { %v6854_v32 = vunpack.c.l.b16 %v6729_v42  ;;  %v6726_v38 = vpack.c.bf16 %v6662_v61, %v6662_v61  ;;  %v6852_v30 = vunpack.c.l.b16 %v6727_v15  ;;  %v6529_v42 = vpop.xlane.xlu0 %6528 }
 0xe2b   : > { %v6788_v10 = vunpack.c.l.b16 %v6708_v45 }
 0xe2c   : > { %7029 = vperm.xlu1 %7539, %v229_v1   ;;  %v6862_v31 = vpack.c.b16 %v6854_v32, %v6853_v55  ;;  %v6851_v56 = vunpack.c.l.b16 %v6726_v38  ;;  %v6565_v1 = vpop.xlane.xlu2 %6564  ;;  %v14120_v55 = vpack.c.b16 %v12846_v52, %v12844_v21 }
 0xe2d   : > { %v6799_v54 = vpack.c.b16 %v6789_v17, %v6788_v10 }
 0xe2e   : > { %6811 = vmatpush.bf16.xpose.msra.mxu0 %v6800_v46  ;;  %6871 = vmatpush.bf16.xpose.msra.mxu1 %v6862_v31  ;;  %v6861_v51 = vpack.c.b16 %v6852_v30, %v6851_v56  ;;  %v14121_v46 = vpack.c.b16 %v12931_v62, %v12929_v14 }
 0xe2f   : > { %7024 = vperm.xlu0 %7538, %v228_v28  }
 0xe32   : > { %v6533_v9 = vpop.xlane.xlu0 %6532 }
 0xe36   : > { %6812 = vmatpush.bf16.xpose.msra.mxu0 %v6799_v54  ;;  %6872 = vmatpush.bf16.xpose.msra.mxu1 %v6861_v51  ;;  %v6535_v63 = vpop.xlane.xlu2 %6534 }
 0xe37   : > { %7039 = vperm.xlu0 %7538, %v231_v13   ;;  %9155 = vrcp.f32 %v6535_v63 }
 0xe38   : > { %9157 = vrcp.f32 %v6533_v9 }
 0xe3c   : > { %7034 = vperm.xlu2 %7540, %v230_v57  }
 0xe3d   : > { %v9156_v28 = vpop.eup %9155 }
 0xe3e   : > { %v6567_v45 = vpop.xlane.xlu1 %6566  ;;  %6813 = vmatpush.bf16.xpose.msra.mxu0 %v14119_v59  ;;  %6873 = vmatpush.bf16.xpose.msra.mxu1 %v14120_v55  ;;  %v6680_v23 = vmul.f32 %v9156_v28, %v12866_v43  ;;  %v9158_v27 = vpop.eup %9157 }
 0xe40   : > { %v6744_v15 = vpack.c.bf16 %v6680_v23, %v6680_v23 }
 0xe42   : > { %v6914_v10 = vunpack.c.l.b16 %v6744_v15 }
 0xe46   : > { %v13103_v32 = vpop.xlane.xlu1 %6546  ;;  %v6537_v61 = vpop.xlane.xlu0 %6536  ;;  %6874 = vmatpush.bf16.xpose.msra.mxu1 %v14121_v46 }
 0xe47   : > { %9159 = vrcp.f32 %v6537_v61 }
 0xe48   : > { %9161 = vrcp.f32 %v6531_v12  ;;  %v6679_v12 = vmul.f32 %v9158_v27, %v12860_v44 }
 0xe49   : > { %9163 = vrcp.f32 %v6567_v45 }
 0xe4a   : > { %9165 = vrcp.f32 %v6529_v42 }
 0xe4b   : > { %9167 = vrcp.f32 %v6565_v1 }
 0xe4c   : > { %9169 = vrcp.f32 %v6563_v33 }
 0xe4d   : > { %v9160_v19 = vpop.eup %9159 }
 0xe4e   : > { %v6457_v21 = vpop.xlane.xlu1 %6456  ;;  %v13109_v52 = vpop.xlane.xlu0 %6516  ;;  %v6681_v38 = vmul.f32 %v9160_v19, %v12884_v2  ;;  %v6743_v2 = vpack.c.bf16 %v6679_v12, %v6679_v12 }
 0xe4f   : > { %v9162_v31 = vpop.eup %9161  ;;  %v6569_v14 = vpop.xlane.xlu2 %6568 }
 0xe50   : > { %v9164_v62 = vpop.eup %9163  ;;  %9171 = vrcp.f32 %v6569_v14  ;;  %v6745_v17 = vpack.c.bf16 %v6681_v38, %v6681_v38  ;;  %v6678_v43 = vmul.f32 %v9162_v31, %v12840_v47  ;;  %v6913_v61 = vunpack.c.l.b16 %v6743_v2 }
 0xe51   : > { %9173 = vrcp.f32 %v13028_v24  ;;  %v9166_v30 = vpop.eup %9165  ;;  %v6696_v56 = vmul.f32 %v9164_v62, %v12874_v34 }
 0xe52   : > { %v6915_v54 = vunpack.c.l.b16 %v6745_v17  ;;  %9175 = vrcp.f32 %v6457_v21  ;;  %v9168_v13 = vpop.eup %9167  ;;  %v6742_v24 = vpack.c.bf16 %v6678_v43, %v6678_v43  ;;  %v6677_v34 = vmul.f32 %v9166_v30, %v12832_v6 }
 0xe53   : > { %v9170_v51 = vpop.eup %9169  ;;  %v6760_v9 = vpack.c.bf16 %v6696_v56, %v6696_v56  ;;  %v6695_v59 = vmul.f32 %v9168_v13, %v12853_v40 }
 0xe54   : > { %v6923_v42 = vpack.c.b16 %v6915_v54, %v6914_v10  ;;  %v6694_v46 = vmul.f32 %v9170_v51, %v12855_v8  ;;  %v6912_v27 = vunpack.c.l.b16 %v6742_v24  ;;  %v6741_v21 = vpack.c.bf16 %v6677_v34, %v6677_v34  ;;  %v14122_v34 = vld [vmem:[#allocation79_spill] sm:$0xff] }
 0xe55   : > { %v6975_v28 = vunpack.c.l.b16 %v6760_v9  ;;  %v6759_v40 = vpack.c.bf16 %v6695_v59, %v6695_v59 }
 0xe56   : > { %v9172_v33 = vpop.eup %9171  ;;  %v6511_v1 = vpop.xlane.xlu1 %6510  ;;  %6932 = vmatpush.bf16.xpose.msra.mxu2 %v6923_v42  ;;  %v6922_v15 = vpack.c.b16 %v6913_v61, %v6912_v27  ;;  %v6758_v38 = vpack.c.bf16 %v6694_v46, %v6694_v46  ;;  %v6911_v30 = vunpack.c.l.b16 %v6741_v21 }
 0xe57   : > { %v6455_v57 = vpop.xlane.xlu0 %6454  ;;  %v6697_v44 = vmul.f32 %v9172_v33, %v12905_v25  ;;  %v6549_v45 = vpop.xlane.xlu2 %6548 }
 0xe58   : > { %v9174_v47 = vpop.eup %9173  ;;  %9177 = vrcp.f32 %v6455_v57 }
 0xe59   : > { %v9176_v63 = vpop.eup %9175  ;;  %v6761_v55 = vpack.c.bf16 %v6697_v44, %v6697_v44  ;;  %v6676_v19 = vmul.f32 %v9174_v47, %v12780_v48  ;;  %v6973_v48 = vunpack.c.l.b16 %v6758_v38 }
 0xe5a   : > { %v6641_v25 = vmul.f32 %v9176_v63, %v12901_v35  ;;  %v6974_v35 = vunpack.c.l.b16 %v6759_v40 }
 0xe5b   : > { %v6976_v23 = vunpack.c.l.b16 %v6761_v55  ;;  %v6740_v8 = vpack.c.bf16 %v6676_v19, %v6676_v19 }
 0xe5c   : > { %v6705_v43 = vpack.c.bf16 %v6641_v25, %v6641_v25  ;;  %v6983_v51 = vpack.c.b16 %v6974_v35, %v6973_v48  ;;  %v14125_v25 = vld [vmem:[#allocation74_spill] sm:$0xff] }
 0xe5d   : > { %v6984_v31 = vpack.c.b16 %v6976_v23, %v6975_v28  ;;  %v6910_v56 = vunpack.c.l.b16 %v6740_v8 }
 0xe5e   : > { %v13122_v14 = vpop.xlane.xlu1 %6544  ;;  %v9178_v62 = vpop.eup %9177  ;;  %6933 = vmatpush.bf16.xpose.msra.mxu2 %v6922_v15  ;;  %v6785_v13 = vunpack.c.l.b16 %v6705_v43 }
 0xe5f   : > { %v6489_v6 = vpop.xlane.xlu0 %6488  ;;  %6993 = vmatpush.bf16.xpose.msra.mxu3 %v6984_v31  ;;  %v6487_v17 = vpop.xlane.xlu2 %6486  ;;  %v6640_v12 = vmul.f32 %v9178_v62, %v12920_v4  ;;  %v6921_v42 = vpack.c.b16 %v6911_v30, %v6910_v56  ;;  %v14128_v30 = vld [vmem:[#allocation10_spill] sm:$0xff] }
 0xe60   : > { %9179 = vrcp.f32 %v6487_v17 }
 0xe61   : > { %9181 = vrcp.f32 %v6489_v6  ;;  %v6704_v10 = vpack.c.bf16 %v6640_v12, %v6640_v12  ;;  %v14126_v6 = vpack.c.b16 %v12954_v53, %v12952_v7 }
 0xe62   : > { %9183 = vrcp.f32 %v13109_v52 }
 0xe63   : > { %v6784_v54 = vunpack.c.l.b16 %v6704_v10  ;;  %9185 = vrcp.f32 %v14122_v34 }
 0xe64   : > { %9187 = vrcp.f32 %v6511_v1 }
 0xe65   : > { %v6797_v57 = vpack.c.b16 %v6785_v13, %v6784_v54  ;;  %9189 = vrcp.f32 %v6549_v45 }
 0xe66   : > { %v9180_v2 = vpop.eup %9179  ;;  %v6483_v33 = vpop.xlane.xlu1 %6482  ;;  %6934 = vmatpush.bf16.xpose.msra.mxu2 %v6921_v42 }
 0xe67   : > { %v6543_v9 = vpop.xlane.xlu0 %6542  ;;  %v9182_v44 = vpop.eup %9181  ;;  %6994 = vmatpush.bf16.xpose.msra.mxu3 %v6983_v51  ;;  %v6656_v4 = vmul.f32 %v9180_v2, %v12948_v0  ;;  %6814 = vmatpush.bf16.xpose.msra.mxu0 %v6797_v57  ;;  %v14123_v0 = vpack.c.b16 %v13062_v22, %v13060_v16 }
 0xe68   : > { %v6513_v24 = vpop.xlane.xlu2 %6512  ;;  %v6657_v47 = vmul.f32 %v9182_v44, %v12944_v58  ;;  %v9184_v46 = vpop.eup %9183  ;;  %v14124_v58 = vpack.c.b16 %v12889_v18, %v12887_v5 }
 0xe69   : > { %v6720_v59 = vpack.c.bf16 %v6656_v4, %v6656_v4  ;;  %9191 = vrcp.f32 %v6513_v24  ;;  %v9186_v19 = vpop.eup %9185  ;;  %v6671_v1 = vmul.f32 %v9184_v46, %v12903_v36  ;;  %v14127_v36 = vpack.c.b16 %v13019_v49, %v13017_v26  ;;  %v14133_v4 = vld [vmem:[#allocation91_spill] sm:$0xff] }
 0xe6a   : > { %v6721_v63 = vpack.c.bf16 %v6657_v47, %v6657_v47  ;;  %v9188_v45 = vpop.eup %9187  ;;  %v6670_v21 = vmul.f32 %v9186_v19, %v14125_v25  ;;  %v14136_v25 = vld [vmem:[#allocation115_spill] sm:$0xff] }
 0xe6b   : > { %v6845_v55 = vunpack.c.l.b16 %v6720_v59  ;;  %v9190_v31 = vpop.eup %9189  ;;  %v6735_v22 = vpack.c.bf16 %v6671_v1, %v6671_v1  ;;  %v6668_v53 = vmul.f32 %v9188_v45, %v12918_v41 }
 0xe6c   : > { %v6846_v61 = vunpack.c.l.b16 %v6721_v63  ;;  %v6734_v62 = vpack.c.bf16 %v6670_v21, %v6670_v21  ;;  %v6687_v26 = vmul.f32 %v9190_v31, %v12925_v3  ;;  %v14130_v3 = vld [vmem:[#allocation17_spill] sm:$0xff] }
 0xe6d   : > { %v6905_v48 = vunpack.c.l.b16 %v6735_v22  ;;  %v6732_v57 = vpack.c.bf16 %v6668_v53, %v6668_v53  ;;  %v14138_v53 = vld [vmem:[#allocation58_spill] sm:$0xff] }
 0xe6e   : > { %v6509_v28 = vpop.xlane.xlu1 %6508  ;;  %v6858_v23 = vpack.c.b16 %v6846_v61, %v6845_v55  ;;  %6935 = vmatpush.bf16.xpose.msra.mxu2 %v14124_v58  ;;  %v6904_v49 = vunpack.c.l.b16 %v6734_v62  ;;  %v14135_v58 = vld [vmem:[#allocation72_spill] sm:$0xff] }
 0xe6f   : > { %v6453_v27 = vpop.xlane.xlu0 %6452  ;;  %6995 = vmatpush.bf16.xpose.msra.mxu3 %v14123_v0  ;;  %v9192_v16 = vpop.eup %9191  ;;  %v6902_v0 = vunpack.c.l.b16 %v6732_v57 }
 0xe70   : > { %v6451_v52 = vpop.xlane.xlu2 %6450  ;;  %6875 = vmatpush.bf16.xpose.msra.mxu1 %v6858_v23  ;;  %v6669_v35 = vmul.f32 %v9192_v16, %v12971_v20  ;;  %v6918_v51 = vpack.c.b16 %v6905_v48, %v6904_v49  ;;  %v14134_v23 = vld [vmem:[#allocation96_spill] sm:$0xff]  ;;  %v14137_v16 = vld [vmem:[#allocation86_spill] sm:$0xff] }
 0xe71   : > { %9193 = vrcp.f32 %v6451_v52  ;;  %v14139_v49 = vld [vmem:[#allocation20_spill] sm:$0xff] }
 0xe72   : > { %9195 = vrcp.f32 %v6453_v27  ;;  %v6733_v42 = vpack.c.bf16 %v6669_v35, %v6669_v35 }
 0xe73   : > { %9197 = vrcp.f32 %v6483_v33 }
 0xe74   : > { %9199 = vrcp.f32 %v13103_v32 }
 0xe75   : > { %9201 = vrcp.f32 %v6543_v9  ;;  %v6751_v9 = vpack.c.bf16 %v6687_v26, %v6687_v26 }
 0xe76   : > { %v6447_v38 = vpop.xlane.xlu1 %6446  ;;  %6936 = vmatpush.bf16.xpose.msra.mxu2 %v14126_v6 }
 0xe77   : > { %v9194_v15 = vpop.eup %9193  ;;  %v6507_v40 = vpop.xlane.xlu0 %6506  ;;  %6996 = vmatpush.bf16.xpose.msra.mxu3 %v14127_v36  ;;  %v6966_v52 = vunpack.c.l.b16 %v6751_v9 }
 0xe78   : > { %v9196_v5 = vpop.eup %9195  ;;  %v6485_v18 = vpop.xlane.xlu2 %6484  ;;  %v6638_v32 = vmul.f32 %v9194_v15, %v12992_v37 }
 0xe79   : > { %v9198_v17 = vpop.eup %9197  ;;  %9203 = vrcp.f32 %v6485_v18  ;;  %v6639_v8 = vmul.f32 %v9196_v5, %v12988_v29  ;;  %v14129_v29 = vld [vmem:[#allocation90_spill] sm:$0xff] }
 0xe7a   : > { %v9200_v12 = vpop.eup %9199  ;;  %9205 = vrcp.f32 %v6507_v40  ;;  %v6702_v43 = vpack.c.bf16 %v6638_v32, %v6638_v32  ;;  %v6654_v10 = vmul.f32 %v9198_v17, %v14128_v30 }
 0xe7b   : > { %9207 = vrcp.f32 %v6509_v28  ;;  %v6703_v7 = vpack.c.bf16 %v6639_v8, %v6639_v8  ;;  %v6686_v54 = vmul.f32 %v9200_v12, %v14129_v29  ;;  %v9202_v13 = vpop.eup %9201  ;;  %v6903_v28 = vunpack.c.l.b16 %v6733_v42 }
 0xe7c   : > { %9209 = vrcp.f32 %v13122_v14  ;;  %v6782_v37 = vunpack.c.l.b16 %v6702_v43  ;;  %v14131_v14 = vld [vmem:[#allocation18_spill] sm:$0xff]  ;;  %v6718_v59 = vpack.c.bf16 %v6654_v10, %v6654_v10  ;;  %v6684_v19 = vmul.f32 %v9202_v13, %v14135_v58 }
 0xe7d   : > { %v6783_v56 = vunpack.c.l.b16 %v6703_v7  ;;  %v14132_v24 = vpack.c.b16 %v14130_v3, %v14131_v14  ;;  %v6750_v55 = vpack.c.bf16 %v6686_v54, %v6686_v54  ;;  %v6917_v40 = vpack.c.b16 %v6903_v28, %v6902_v0  ;;  %v14142_v3 = vld [vmem:[#allocation54_spill] sm:$0xff] }
 0xe7e   : > { %6937 = vmatpush.bf16.xpose.msra.mxu2 %v6918_v51  ;;  %v6481_v63 = vpop.xlane.xlu1 %6480  ;;  %v6843_v1 = vunpack.c.l.b16 %v6718_v59  ;;  %v6748_v32 = vpack.c.bf16 %v6684_v19, %v6684_v19 }
 0xe7f   : > { %v9204_v2 = vpop.eup %9203  ;;  %v6796_v20 = vpack.c.b16 %v6783_v56, %v6782_v37  ;;  %v6541_v33 = vpop.xlane.xlu0 %6540  ;;  %6997 = vmatpush.bf16.xpose.msra.mxu3 %v14132_v24  ;;  %v6965_v31 = vunpack.c.l.b16 %v6750_v55  ;;  %v14140_v56 = vld [vmem:[#allocation116_spill] sm:$0xff]  ;;  %v14143_v24 = vld [vmem:[#allocation81_spill] sm:$0xff] }
 0xe80   : > { %v9206_v41 = vpop.eup %9205  ;;  %v6539_v44 = vpop.xlane.xlu2 %6538  ;;  %v6655_v47 = vmul.f32 %v9204_v2, %v14133_v4  ;;  %v6963_v35 = vunpack.c.l.b16 %v6748_v32 }
 0xe81   : > { %v9208_v34 = vpop.eup %9207  ;;  %9211 = vrcp.f32 %v6539_v44  ;;  %6815 = vmatpush.bf16.xpose.msra.mxu0 %v6796_v20  ;;  %v6666_v27 = vmul.f32 %v9206_v41, %v14134_v23  ;;  %v6979_v6 = vpack.c.b16 %v6966_v52, %v6965_v31  ;;  %v14141_v44 = vld [vmem:[#allocation105_spill] sm:$0xff] }
 0xe82   : > { %v9210_v61 = vpop.eup %9209  ;;  %9213 = vrcp.f32 %v6541_v33  ;;  %v6719_v46 = vpack.c.bf16 %v6655_v47, %v6655_v47  ;;  %v6667_v21 = vmul.f32 %v9208_v34, %v14136_v25  ;;  %v759_v14 = vadd.f32 %v14142_v3, %v14141_v44  ;;  %v14152_v3 = vld [vmem:[#allocation68_spill] sm:$0xff] }
 0xe83   : > { %9215 = vrcp.f32 %v6447_v38  ;;  %v6685_v22 = vmul.f32 %v9210_v61, %v14137_v16  ;;  %v6730_v5 = vpack.c.bf16 %v6666_v27, %v6666_v27  ;;  %v14144_v16 = vld [vmem:[#allocation53_spill] sm:$0xff] }
 0xe84   : > { %9217 = vrcp.f32 %v6481_v63  ;;  %v6844_v45 = vunpack.c.l.b16 %v6719_v46  ;;  %v6731_v17 = vpack.c.bf16 %v6667_v21, %v6667_v21  ;;  %v5656_v28 = vpack.c.bf16 %v759_v14, %v759_v14  ;;  %v14153_v14 = vld [vmem:[#allocation71_spill] sm:$0xff] }
 0xe85   : > { %v6749_v12 = vpack.c.bf16 %v6685_v22, %v6685_v22  ;;  %v6900_v48 = vunpack.c.l.b16 %v6730_v5  ;;  %v810_v22 = vadd.f32 %v14144_v16, %v14141_v44 }
 0xe86   : > { %v6857_v15 = vpack.c.b16 %v6844_v45, %v6843_v1  ;;  %6938 = vmatpush.bf16.xpose.msra.mxu2 %v6917_v40  ;;  %v6901_v37 = vunpack.c.l.b16 %v6731_v17  ;;  %v6475_v57 = vpop.xlane.xlu1 %6474  ;;  %v14147_v17 = vld [vmem:[#allocation45_spill] sm:$0xff] }
 0xe87   : > { %v9212_v18 = vpop.eup %9211  ;;  %v6479_v36 = vpop.xlane.xlu0 %6478  ;;  %6998 = vmatpush.bf16.xpose.msra.mxu3 %v6979_v6  ;;  %v6964_v10 = vunpack.c.l.b16 %v6749_v12 }
 0xe88   : > { %v9214_v38 = vpop.eup %9213  ;;  %v6449_v62 = vpop.xlane.xlu2 %6448  ;;  %6876 = vmatpush.bf16.xpose.msra.mxu1 %v6857_v15  ;;  %v6682_v7 = vmul.f32 %v9212_v18, %v13034_v11  ;;  %v6916_v54 = vpack.c.b16 %v6901_v37, %v6900_v48  ;;  %v14145_v18 = vld [vmem:[#allocation60_spill] sm:$0xff] }
 0xe89   : > { %v9216_v8 = vpop.eup %9215  ;;  %9219 = vrcp.f32 %v6449_v62  ;;  %v6683_v26 = vmul.f32 %v9214_v38, %v14138_v53  ;;  %v6978_v51 = vpack.c.b16 %v6964_v10, %v6963_v35  ;;  %v14146_v38 = vld [vmem:[#allocation8_spill] sm:$0xff] }
 0xe8a   : > { %v9218_v43 = vpop.eup %9217  ;;  %9221 = vrcp.f32 %v6479_v36  ;;  %v6636_v30 = vmul.f32 %v9216_v8, %v14139_v49  ;;  %v6746_v2 = vpack.c.bf16 %v6682_v7, %v6682_v7  ;;  %v5657_v36 = vpack.c.bf16 %v810_v22, %v810_v22  ;;  %v14148_v53 = vld [vmem:[#allocation44_spill] sm:$0xff]  ;;  %v14149_v49 = vld [vmem:[#allocation7_spill] sm:$0xff] }
 0xe8b   : > { %v6653_v29 = vmul.f32 %v9218_v43, %v14140_v56  ;;  %v6747_v20 = vpack.c.bf16 %v6683_v26, %v6683_v26  ;;  %v657_v8 = vadd.f32 %v14147_v17, %v14141_v44  ;;  %v708_v26 = vadd.f32 %v14148_v53, %v14141_v44  ;;  %v7491_v22 = vld [vmem:[%s13268_s1 + $0x38] sm:$0xff] }
 0xe8c   : > { %v6700_v41 = vpack.c.bf16 %v6636_v30, %v6636_v30  ;;  %v6961_v63 = vunpack.c.l.b16 %v6746_v2  ;;  %v7016_v30 = vpack.c.bf16 %v14149_v49, %v14149_v49 }
 0xe8d   : > { %v6717_v47 = vpack.c.bf16 %v6653_v29, %v6653_v29  ;;  %v6962_v55 = vunpack.c.l.b16 %v6747_v20  ;;  %v5654_v35 = vpack.c.bf16 %v657_v8, %v657_v8  ;;  %v5655_v37 = vpack.c.bf16 %v708_v26, %v708_v26  ;;  %v14151_v20 = vld [vmem:[#allocation108_spill] sm:$0xff] }
 0xe8e   : > { %6939 = vmatpush.bf16.xpose.msra.mxu2 %v6916_v54  ;;  %v6780_v61 = vunpack.c.l.b16 %v6700_v41  ;;  %v7126_v29 = vunpack.c.l.b16 %v7016_v30  ;;  %v7490_v41 = vld [vmem:[%s13268_s1 + $0x30] sm:$0xff] }
 0xe8f   : > { %v9220_v13 = vpop.eup %9219  ;;  %v6445_v42 = vpop.xlane.xlu0 %6444  ;;  %6999 = vmatpush.bf16.xpose.msra.mxu3 %v6978_v51  ;;  %v6842_v27 = vunpack.c.l.b16 %v6717_v47  ;;  %v6977_v19 = vpack.c.b16 %v6962_v55, %v6961_v63  ;;  %v14150_v51 = vld [vmem:[#allocation5_spill] sm:$0xff] }
 0xe90   : > { %v9222_v33 = vpop.eup %9221  ;;  %v6443_v9 = vpop.xlane.xlu2 %6442  ;;  %9223 = vrcp.f32 %v6445_v42  ;;  %v6637_v11 = vmul.f32 %v9220_v13, %v13048_v39  ;;  %v7020_v42 = vpack.c.bf16 %v14150_v51, %v14150_v51 }
 0xe91   : > { %9225 = vrcp.f32 %v6443_v9  ;;  %v6652_v4 = vmul.f32 %v9222_v33, %v14143_v24  ;;  %v7008_v33 = vpack.c.bf16 %v14151_v20, %v14151_v20  ;;  %v14154_v24 = vpack.c.b16 %v14152_v3, %v14153_v14 }
 0xe92   : > { %v6701_v59 = vpack.c.bf16 %v6637_v11, %v6637_v11  ;;  %9227 = vrcp.f32 %v6475_v57 }
 0xe93   : > { %v6716_v34 = vpack.c.bf16 %v6652_v4, %v6652_v4  ;;  %v7157_v4 = vunpack.c.l.b16 %v7020_v42 }
 0xe94   : > { %v6781_v46 = vunpack.c.l.b16 %v6701_v59  ;;  %v7058_v59 = vunpack.c.l.b16 %v7008_v33 }
 0xe95   : > { %v6841_v23 = vunpack.c.l.b16 %v6716_v34  ;;  %6940 = vmatmul.bf16.vlgmr.msra.gmra.mxu2 %v5656_v28 }
 0xe96   : > { %v9224_v39 = vpop.eup %9223  ;;  %v6795_v0 = vpack.c.b16 %v6781_v46, %v6780_v61  ;;  %v14155_v61 = vld [vmem:[#allocation109_spill] sm:$0xff] }
 0xe97   : > { %v9226_v52 = vpop.eup %9225  ;;  %v6856_v58 = vpack.c.b16 %v6842_v27, %v6841_v23  ;;  %v6635_v1 = vmul.f32 %v9224_v39, %v13057_v50  ;;  %7000 = vmatpush.bf16.xpose.msra.mxu3 %v6977_v19  ;;  %v7012_v46 = vpack.c.bf16 %v14155_v61, %v14155_v61 }
 0xe98   : > { %v6477_v45 = vpop.xlane.xlu2 %6476  ;;  %6816 = vmatpush.bf16.xpose.msra.mxu0 %v6795_v0  ;;  %v6634_v25 = vmul.f32 %v9226_v52, %v13064_v60  ;;  %v9228_v21 = vpop.eup %9227  ;;  %v14156_v0 = vld [vmem:[#allocation37_spill] sm:$0xff] }
 0xe99   : > { %9229 = vrcp.f32 %v6477_v45  ;;  %6877 = vmatpush.bf16.xpose.msra.mxu1 %v6856_v58  ;;  %v6699_v31 = vpack.c.bf16 %v6635_v1, %v6635_v1  ;;  %v6650_v6 = vmul.f32 %v9228_v21, %v14145_v18  ;;  %v14157_v52 = vld [vmem:[#allocation33_spill] sm:$0xff]  ;;  %v7095_v19 = vunpack.c.l.b16 %v7012_v46  ;;  %v14159_v45 = vld [vmem:[#allocation66_spill] sm:$0xff] }
 0xe9a   : > { %v6698_v15 = vpack.c.bf16 %v6634_v25, %v6634_v25  ;;  %v14158_v58 = vpack.c.b16 %v14156_v0, %v14157_v52  ;;  %v14160_v25 = vld [vmem:[#allocation101_spill] sm:$0xff] }
 0xe9b   : > { %v6779_v40 = vunpack.c.l.b16 %v6699_v31  ;;  %v6714_v62 = vpack.c.bf16 %v6650_v6, %v6650_v6  ;;  %v14161_v21 = vpack.c.b16 %v14159_v45, %v14160_v25 }
 0xe9c   : > { %v6778_v5 = vunpack.c.l.b16 %v6698_v15  ;;  %v14162_v15 = vld [vmem:[#allocation19_spill] sm:$0xff] }
 0xe9d   : > { %v6839_v43 = vunpack.c.l.b16 %v6714_v62 }
 0xe9e   : > { %v6794_v32 = vpack.c.b16 %v6779_v40, %v6778_v5  ;;  %7001 = vmatmul.bf16.vlgmr.msra.gmra.mxu3 %v5657_v36  ;;  %v14163_v40 = vld [vmem:[#allocation75_spill] sm:$0xff] }
 0xe9f   : > { %v9230_v50 = vpop.eup %9229  ;;  %v14164_v5 = vpack.c.b16 %v14162_v15, %v14163_v40 }
 0xea0   : > { %6817 = vmatpush.bf16.xpose.msra.mxu0 %v6794_v32  ;;  %v6651_v60 = vmul.f32 %v9230_v50, %v14146_v38  ;;  %v7030_v38 = vpop.permute.xlu1 %7029 }
 0xea1   : > { %v7025_v18 = vpop.permute.xlu0 %7024 }
 0xea2   : > { %v6715_v12 = vpack.c.bf16 %v6651_v60, %v6651_v60 }
 0xea4   : > { %v6840_v48 = vunpack.c.l.b16 %v6715_v12 }
 0xea6   : > { %v6855_v7 = vpack.c.b16 %v6840_v48, %v6839_v43 }
 0xea7   : > { %6818 = vmatmul.bf16.vlgmr.msra.gmra.mxu0 %v5654_v35 }
 0xea8   : > { %6878 = vmatpush.bf16.xpose.msra.mxu1 %v6855_v7  ;;  %v7035_v7 = vpop.permute.xlu2 %7034 }
 0xeaf   : > { %6879 = vmatmul.bf16.vlgmr.msra.gmra.mxu1 %v5655_v37 }
 0xf18   : > { %v6941_v10 = vpop.f32.mrf.mxu2 }
 0xf19   : > { %v7017_v56 = vpack.c.bf16 %v6941_v10, %v6941_v10 }
 0xf1b   : > { %v7127_v54 = vunpack.c.l.b16 %v7017_v56 }
 0xf1d   : > { %v7129_v13 = vpack.c.b16 %v7127_v54, %v7126_v29  ;;  %v7040_v54 = vpop.permute.xlu0 %7039 }
 0xf1f   : > { %7138 = vmatpush.bf16.msrb.mxu2 %v7129_v13 }
 0xf20   : > { %v6943_v2 = vpop.f32.mrf.mxu2 }
 0xf21   : > { %v7002_v57 = vpop.f32.mrf.mxu3 }
 0xf22   : > { %v7021_v9 = vpack.c.bf16 %v7002_v57, %v7002_v57 }
 0xf23   : > { %7139 = vmatpush.bf16.msrb.mxu2 %v14154_v24 }
 0xf24   : > { %v6819_v11 = vpop.f32.mrf.mxu0  ;;  %v7158_v47 = vunpack.c.l.b16 %v7021_v9 }
 0xf25   : > { %v7009_v44 = vpack.c.bf16 %v6819_v11, %v6819_v11 }
 0xf26   : > { %v7160_v63 = vpack.c.b16 %v7158_v47, %v7157_v4  ;;  %7473 = vmatmul.msk.bf16.vlgmr.msrb.gmra.mxu2 %vm601_vm13, %v7490_v41 }
 0xf27   : > { %v7059_v34 = vunpack.c.l.b16 %v7009_v44 }
 0xf28   : > { %7169 = vmatpush.bf16.msrb.mxu3 %v7160_v63 }
 0xf29   : > { %v7061_v55 = vpack.c.b16 %v7059_v34, %v7058_v59  ;;  %v7004_v28 = vpop.f32.mrf.mxu3 }
 0xf2b   : > { %7076 = vmatpush.bf16.msrb.mxu0 %v7061_v55 }
 0xf2c   : > { %v6821_v23 = vpop.f32.mrf.mxu0  ;;  %v6880_v27 = vpop.f32.mrf.mxu1  ;;  %7170 = vmatpush.bf16.msrb.mxu3 %v14158_v58 }
 0xf2d   : > { %v7013_v39 = vpack.c.bf16 %v6880_v27, %v6880_v27 }
 0xf2f   : > { %v7096_v1 = vunpack.c.l.b16 %v7013_v39  ;;  %7077 = vmatpush.bf16.msrb.mxu0 %v14161_v21  ;;  %7475 = vmatmul.msk.bf16.vlgmr.msrb.gmra.mxu3 %vm601_vm13, %v7490_v41 }
 0xf31   : > { %v7098_v31 = vpack.c.b16 %v7096_v1, %v7095_v19 }
 0xf32   : > { %7469 = vmatmul.msk.bf16.vlgmr.msrb.gmra.mxu0 %vm601_vm13, %v7490_v41 }
 0xf33   : > { %7107 = vmatpush.bf16.msrb.mxu1 %v7098_v31 }
 0xf34   : > { %v6882_v16 = vpop.f32.mrf.mxu1 }
 0xf36   : > { %7474 = vmatmul.msk.bf16.gmra.mxu2 %vm601_vm13, %v7491_v22 }
 0xf37   : > { %7108 = vmatpush.bf16.msrb.mxu1 %v14164_v5 }
 0xf3a   : > { %7471 = vmatmul.msk.bf16.vlgmr.msrb.gmra.mxu1 %vm601_vm13, %v7490_v41 }
 0xf3f   : > { %7476 = vmatmul.msk.bf16.gmra.mxu3 %vm601_vm13, %v7491_v22 }
 0xf42   : > { %7470 = vmatmul.msk.bf16.gmra.mxu0 %vm601_vm13, %v7491_v22 }
 0xf4a   : > { %7472 = vmatmul.msk.bf16.gmra.mxu1 %vm601_vm13, %v7491_v22 }
 0xfa9   : > { %v7141_v6 = vpop.f32.mrf.mxu2 }
 0xfaa   : > { %v7142_v36 = vadd.f32 %v7141_v6, %v7025_v18 }
 0xfac   : > { %7190 = vst [vmem:[%s13215_s20 + $0x40] sm:$0xff] %v7142_v36 }
 0xfaf   : > { %v7079_v32 = vpop.f32.mrf.mxu0 }
 0xfb0   : > { %v7080_v50 = vadd.f32 %v7079_v32, %v7025_v18 }
 0xfb1   : > { %v7143_v60 = vpop.f32.mrf.mxu2 }
 0xfb2   : > { %7182 = vst [vmem:[%s13215_s20] sm:$0xff] %v7080_v50  ;;  %v7144_v62 = vadd.f32 %v7143_v60, %v7030_v38  ;;  %v7172_v17 = vpop.f32.mrf.mxu3 }
 0xfb3   : > { %v7173_v8 = vadd.f32 %v7172_v17, %v7025_v18 }
 0xfb4   : > { %7191 = vst [vmem:[%s13215_s20 + $0x48] sm:$0xff] %v7144_v62 }
 0xfb5   : > { %7194 = vst [vmem:[%s13215_s20 + $0x60] sm:$0xff] %v7173_v8 }
 0xfb7   : > { %v7081_v12 = vpop.f32.mrf.mxu0  ;;  %v7110_v43 = vpop.f32.mrf.mxu1 }
 0xfb8   : > { %v7082_v48 = vadd.f32 %v7081_v12, %v7030_v38  ;;  %v7111_v35 = vadd.f32 %v7110_v43, %v7025_v18 }
 0xfb9   : > { %v7146_v53 = vpop.f32.mrf.mxu2 }
 0xfba   : > { %7183 = vst [vmem:[%s13215_s20 + $0x8] sm:$0xff] %v7082_v48  ;;  %v7147_v26 = vadd.f32 %v7146_v53, %v7035_v7  ;;  %v7174_v37 = vpop.f32.mrf.mxu3 }
 0xfbb   : > { %7186 = vst [vmem:[%s13215_s20 + $0x20] sm:$0xff] %v7111_v35  ;;  %v7175_v49 = vadd.f32 %v7174_v37, %v7030_v38 }
 0xfbc   : > { %7192 = vst [vmem:[%s13215_s20 + $0x50] sm:$0xff] %v7147_v26 }
 0xfbd   : > { %7195 = vst [vmem:[%s13215_s20 + $0x68] sm:$0xff] %v7175_v49 }
 0xfbf   : > { %v7084_v30 = vpop.f32.mrf.mxu0  ;;  %v7112_v10 = vpop.f32.mrf.mxu1 }
 0xfc0   : > { %v7085_v56 = vadd.f32 %v7084_v30, %v7035_v7  ;;  %v7113_v29 = vadd.f32 %v7112_v10, %v7030_v38 }
 0xfc1   : > { %v7148_v13 = vpop.f32.mrf.mxu2 }
 0xfc2   : > { %7184 = vst [vmem:[%s13215_s20 + $0x10] sm:$0xff] %v7085_v56  ;;  %v7149_v51 = vadd.f32 %v7148_v13, %v7040_v54  ;;  %v7177_v42 = vpop.f32.mrf.mxu3 }
 0xfc3   : > { %7187 = vst [vmem:[%s13215_s20 + $0x28] sm:$0xff] %v7113_v29  ;;  %v7178_v2 = vadd.f32 %v7177_v42, %v7035_v7 }
 0xfc4   : > { %7193 = vst [vmem:[%s13215_s20 + $0x58] sm:$0xff] %v7149_v51 }
 0xfc5   : > { %7196 = vst [vmem:[%s13215_s20 + $0x70] sm:$0xff] %v7178_v2 }
 0xfc7   : > { %v7086_v20 = vpop.f32.mrf.mxu0  ;;  %v7115_v33 = vpop.f32.mrf.mxu1 }
 0xfc8   : > { %v7087_v57 = vadd.f32 %v7086_v20, %v7040_v54  ;;  %v7116_v9 = vadd.f32 %v7115_v33, %v7035_v7 }
 0xfca   : > { %7185 = vst [vmem:[%s13215_s20 + $0x18] sm:$0xff] %v7087_v57  ;;  %v7179_v11 = vpop.f32.mrf.mxu3 }
 0xfcb   : > { %7188 = vst [vmem:[%s13215_s20 + $0x30] sm:$0xff] %v7116_v9  ;;  %v7180_v41 = vadd.f32 %v7179_v11, %v7040_v54 }
 0xfcd   : > { %7197 = vst [vmem:[%s13215_s20 + $0x78] sm:$0xff] %v7180_v41 }
 0xfcf   : > { %v7117_v44 = vpop.f32.mrf.mxu1 }
 0xfd0   : > { %v7118_v3 = vadd.f32 %v7117_v44, %v7040_v54 }
 0xfd2   : > { %7189 = vst [vmem:[%s13215_s20 + $0x38] sm:$0xff] %v7118_v3 }
 0xfd3   : > { %9258 = shalt.err (!%p9255_p3)
}
 0xfd4   : > { %s9297_s10 = smov 128   ;;  %s9298_s11 = smov 8  }
 0xfd5   : > { %7494 = dma.vmem_to_hbm [thread:$0]  (%p9357_p5), %s7213_s28, 2048, %s7215_s29, %s7199_s16, %s9297_s10, %s9297_s10, %s9298_s11  }
 0xfd6 PF: > { %p7500_p4 = scmp.ge.s32.totalorder %s9293_s15, 2  ;;  %s7229_s17 = sand.u32 1, %s9281_s12  }
 0xfd7   : > { %s7230_s19 = scalar_lea.sflag [#allocation3], %s7229_s17 }
 0xfd8   : > { %p7497_p7 = pnand %p7500_p4, %p9361_p6 }
 0xfda   : > { %p7498_p8 = pneg %p7497_p7 }
 0xfdc   : > { %9276 = dma.done.wait (%p7498_p8), %s7230_s19, 2048  }
 0xfdd   : > { %9278 = vsyncadd (%p7498_p8), %s7230_s19, 4294965248  ;;  %p13_p9 = scmp.ge.s32.totalorder %s9344_s18, 4   ;;  %s14165_s12 = smov %s9285_s13 }
 0xfde   : > { %s14166_s13 = smov %s9289_s14  ;;  %s14167_s14 = smov %s9355_s21 }
 0xfdf   : > { %s14168_s15 = smov %s9344_s18  ;;  %15 = sbr.rel (!%p13_p9) target bundleno = 3 (0x3), region = 67 }
 0xfe4   :  { %7236 = vsyncpa [#allocation3], 1 }
 0xfe5   :  { %7238 = vsyncpa [#allocation3 + $0x1], 1 }

</bundles_post_ra>
